<compile_context>
chip_gen: v5e
topology: v5e:2x2
jax: 0.10.0
libtpu: 0.0.40
codegen_flags: <defaults>
</compile_context>

<pallas_src>
import functools

import jax
import jax.numpy as jnp
from jax.experimental import pallas as pl
from jax.experimental.pallas import tpu as pltpu


def ghostconv_kernel(H, W, x_ref, w1_ref, b1_ref, w2_ref, b2_ref,
                     y_ref, z_ref, yp_ref):
    """One image: cv1 (MXU matmul + SiLU) then cv2 (5x5 depthwise VPU stencil + SiLU).

    x_ref : (1, H*W, C1)   input pixels (flattened spatial, channels on lanes)
    w1_ref: (C1, Cp)       1x1 conv weights with BN scale folded in
    b1_ref: (1, Cp)        folded BN bias for cv1
    w2_ref: (25, Cp)       5x5 depthwise weights (tap-major: t = dy*5+dx), BN scale folded
    b2_ref: (1, Cp)        folded BN bias for cv2
    y_ref : (1, H*W, Cp)   output: cv1 branch
    z_ref : (1, H, W, Cp)  output: cv2 branch
    yp_ref: (H+4, W+4, Cp) VMEM scratch: zero-padded spatial copy of y
    """
    Cp = y_ref.shape[-1]

    # ---- cv1: 1x1 conv as one matmul, BN bias, SiLU ----
    y = jnp.dot(x_ref[0], w1_ref[...], preferred_element_type=jnp.float32)
    y = y + b1_ref[...]
    y = y * jax.lax.logistic(y)                     # SiLU
    y_ref[0] = y.astype(y_ref.dtype)

    # ---- zero-pad y spatially (pad=2) into VMEM scratch for the 5x5 stencil ----
    yp_ref[...] = jnp.zeros_like(yp_ref)
    for r in range(H):                              # static unroll (H is compile-time)
        yp_ref[2 + r, 2:2 + W, :] = y[r * W:(r + 1) * W, :]

    # ---- cv2: 5x5 depthwise conv (per-channel taps on lanes), BN bias, SiLU ----
    acc = jnp.zeros((H, W, Cp), jnp.float32)
    for dy in range(5):
        for dx in range(5):
            t = dy * 5 + dx
            acc = acc + yp_ref[dy:dy + H, dx:dx + W, :] * w2_ref[t:t + 1, :]
    z = acc + b2_ref[...]
    z = z * jax.lax.logistic(z)                     # SiLU
    z_ref[0] = z.astype(z_ref.dtype)


def ghostconv_forward(x_nchw,
                      w_cv1, g1, bt1, m1, v1,
                      w_cv2, g2, bt2, m2, v2,
                      eps=1e-5):
    """GhostConv.forward (default k=1, s=1, g=1, act=SiLU), inference-mode BN.

    x_nchw : (N, C1, H, W)
    w_cv1  : (C_, C1, 1, 1)   cv1.conv.weight        (C_ = c2 // 2)
    w_cv2  : (C_, 1, 5, 5)    cv2.conv.weight (depthwise, groups=C_)
    g*, bt*, m*, v* : (C_,)   BatchNorm2d gamma / beta / running_mean / running_var
    returns (N, 2*C_, H, W)
    """
    N, C1, H, W = x_nchw.shape
    Ch = w_cv1.shape[0]
    LANE = 128
    Cp = ((Ch + LANE - 1) // LANE) * LANE           # lane-dense / MXU-aligned channel dim

    # ---- fold BN (inference) into conv weights: BN(conv(x)) = conv(x; W*s) + (beta - mean*s) ----
    s1 = g1 / jnp.sqrt(v1 + eps)                                    # (Ch,)
    w1_mat = (w_cv1[:, :, 0, 0] * s1[:, None]).T                    # (C1, Ch)
    bias1 = bt1 - m1 * s1                                           # (Ch,)
    s2 = g2 / jnp.sqrt(v2 + eps)
    w2_mat = jnp.transpose(w_cv2[:, 0, :, :] * s2[:, None, None],
                           (1, 2, 0)).reshape(25, Ch)               # (25, Ch), tap-major
    bias2 = bt2 - m2 * s2

    # pad channel dim to Cp (padded channels yield SiLU(0)=0 and are sliced off)
    pad_c = Cp - Ch
    w1_mat = jnp.pad(w1_mat, ((0, 0), (0, pad_c)))
    w2_mat = jnp.pad(w2_mat, ((0, 0), (0, pad_c)))
    bias1 = jnp.pad(bias1, (0, pad_c)).reshape(1, Cp)
    bias2 = jnp.pad(bias2, (0, pad_c)).reshape(1, Cp)

    # NCHW -> (N, H*W, C1) tokens (channels on the lane dim)
    x_tok = jnp.transpose(x_nchw, (0, 2, 3, 1)).reshape(N, H * W, C1)

    kernel = functools.partial(ghostconv_kernel, H, W)
    y_tok, z_img = pl.pallas_call(
        kernel,
        out_shape=(jax.ShapeDtypeStruct((N, H * W, Cp), x_nchw.dtype),
                   jax.ShapeDtypeStruct((N, H, W, Cp), x_nchw.dtype)),
        grid_spec=pltpu.PrefetchScalarGridSpec(
            num_scalar_prefetch=0,
            grid=(N,),
            in_specs=[
                pl.BlockSpec((1, H * W, C1), lambda n: (n, 0, 0)),  # input tokens
                pl.BlockSpec((C1, Cp), lambda n: (0, 0)),           # cv1 weights (resident)
                pl.BlockSpec((1, Cp), lambda n: (0, 0)),            # cv1 bias
                pl.BlockSpec((25, Cp), lambda n: (0, 0)),           # cv2 depthwise weights
                pl.BlockSpec((1, Cp), lambda n: (0, 0)),            # cv2 bias
            ],
            out_specs=(
                pl.BlockSpec((1, H * W, Cp), lambda n: (n, 0, 0)),  # y branch
                pl.BlockSpec((1, H, W, Cp), lambda n: (n, 0, 0, 0)),  # z branch
            ),
            scratch_shapes=[pltpu.VMEM((H + 4, W + 4, Cp), jnp.float32)],
        ),
        compiler_params=pltpu.CompilerParams(dimension_semantics=("parallel",)),
    )(x_tok, w1_mat, bias1, w2_mat, bias2)

    y_nhwc = y_tok.reshape(N, H, W, Cp)[..., :Ch]
    z_nhwc = z_img[..., :Ch]
    out_nhwc = jnp.concatenate([y_nhwc, z_nhwc], axis=-1)           # (N, H, W, 2*Ch)
    return jnp.transpose(out_nhwc, (0, 3, 1, 2))                    # back to NCHW


def _reference(x, w_cv1, g1, bt1, m1, v1, w_cv2, g2, bt2, m2, v2, eps=1e-5):
    """Pure-JAX GhostConv reference (lax convs) for the correctness check."""
    dn = ("NCHW", "OIHW", "NCHW")
    prec = jax.lax.Precision.HIGHEST

    y = jax.lax.conv_general_dilated(x, w_cv1, (1, 1), ((0, 0), (0, 0)),
                                     dimension_numbers=dn, precision=prec)
    s1 = (g1 / jnp.sqrt(v1 + eps)).reshape(1, -1, 1, 1)
    y = y * s1 + (bt1 - m1 * g1 / jnp.sqrt(v1 + eps)).reshape(1, -1, 1, 1)
    y = y * jax.nn.sigmoid(y)

    z = jax.lax.conv_general_dilated(y, w_cv2, (1, 1), ((2, 2), (2, 2)),
                                     dimension_numbers=dn,
                                     feature_group_count=w_cv2.shape[0],
                                     precision=prec)
    s2 = (g2 / jnp.sqrt(v2 + eps)).reshape(1, -1, 1, 1)
    z = z * s2 + (bt2 - m2 * g2 / jnp.sqrt(v2 + eps)).reshape(1, -1, 1, 1)
    z = z * jax.nn.sigmoid(z)
    return jnp.concatenate([y, z], axis=1)


if __name__ == "__main__":
    N, C1, C2, H, W = 2, 4, 8, 16, 16
    Ch = C2 // 2

    key = jax.random.PRNGKey(0)
    keys = jax.random.split(key, 11)
    x = jax.random.normal(keys[0], (N, C1, H, W), dtype=jnp.float32)
    w_cv1 = jax.random.normal(keys[1], (Ch, C1, 1, 1), dtype=jnp.float32) * 0.3
    g1 = 1.0 + 0.1 * jax.random.normal(keys[2], (Ch,), dtype=jnp.float32)
    bt1 = 0.1 * jax.random.normal(keys[3], (Ch,), dtype=jnp.float32)
    m1 = 0.1 * jax.random.normal(keys[4], (Ch,), dtype=jnp.float32)
    v1 = jnp.abs(1.0 + 0.1 * jax.random.normal(keys[5], (Ch,), dtype=jnp.float32))
    w_cv2 = jax.random.normal(keys[6], (Ch, 1, 5, 5), dtype=jnp.float32) * 0.3
    g2 = 1.0 + 0.1 * jax.random.normal(keys[7], (Ch,), dtype=jnp.float32)
    bt2 = 0.1 * jax.random.normal(keys[8], (Ch,), dtype=jnp.float32)
    m2 = 0.1 * jax.random.normal(keys[9], (Ch,), dtype=jnp.float32)
    v2 = jnp.abs(1.0 + 0.1 * jax.random.normal(keys[10], (Ch,), dtype=jnp.float32))

    out = jax.jit(ghostconv_forward)(x, w_cv1, g1, bt1, m1, v1,
                                     w_cv2, g2, bt2, m2, v2)
    out = jax.block_until_ready(out)

    ref = _reference(x, w_cv1, g1, bt1, m1, v1, w_cv2, g2, bt2, m2, v2)
    assert out.shape == (N, C2, H, W), out.shape
    err = float(jnp.abs(out - ref).max())
    assert jnp.allclose(out, ref, atol=1e-4, rtol=1e-4), err

    print("KERNEL_OK")
</pallas_src>

<mosaic_0001>
module attributes {stable_mosaic.version = 11 : i64} {
  func.func @ghostconv_kernel(%arg0: i32, %arg1: memref<1x256x4xf32, #tpu.memory_space<vmem>>, %arg2: memref<4x128xf32, #tpu.memory_space<vmem>>, %arg3: memref<1x128xf32, #tpu.memory_space<vmem>>, %arg4: memref<25x128xf32, #tpu.memory_space<vmem>>, %arg5: memref<1x128xf32, #tpu.memory_space<vmem>>, %arg6: memref<1x256x128xf32, #tpu.memory_space<vmem>>, %arg7: memref<1x16x16x128xf32, #tpu.memory_space<vmem>>, %arg8: memref<20x20x128xf32, #tpu.memory_space<vmem>>) attributes {dimension_semantics = [#tpu.dimension_semantics<parallel>], iteration_bounds = array<i64: 2>, scalar_prefetch = 0 : i64, scratch_operands = 1 : i64, tpu.core_type = #tpu.core_type<tc>, window_params = [{transform_indices = @transform_0, window_bounds = array<i64: 1, 256, 4>}, {pipeline_mode = #tpu.pipeline_mode<synchronous>, transform_indices = @transform_1, window_bounds = array<i64: 4, 128>}, {pipeline_mode = #tpu.pipeline_mode<synchronous>, transform_indices = @transform_2, window_bounds = array<i64: 1, 128>}, {pipeline_mode = #tpu.pipeline_mode<synchronous>, transform_indices = @transform_3, window_bounds = array<i64: 25, 128>}, {pipeline_mode = #tpu.pipeline_mode<synchronous>, transform_indices = @transform_4, window_bounds = array<i64: 1, 128>}, {transform_indices = @transform_5, window_bounds = array<i64: 1, 256, 128>}, {transform_indices = @transform_6, window_bounds = array<i64: 1, 16, 16, 128>}]} {
    %c0 = arith.constant 0 : index
    %c0_0 = arith.constant 0 : index
    %c0_1 = arith.constant 0 : index
    %0 = vector.load %arg1[%c0, %c0_0, %c0_1] : memref<1x256x4xf32, #tpu.memory_space<vmem>>, vector<1x256x4xf32>
    %1 = vector.shape_cast %0 : vector<1x256x4xf32> to vector<256x4xf32>
    %c0_2 = arith.constant 0 : index
    %c0_3 = arith.constant 0 : index
    %2 = vector.load %arg2[%c0_2, %c0_3] : memref<4x128xf32, #tpu.memory_space<vmem>>, vector<4x128xf32>
    %cst = arith.constant dense<0.000000e+00> : vector<256x128xf32>
    %3 = tpu.matmul %1, %2, %cst {dimension_numbers = #tpu.dot_dimension_numbers<[1], [0], [0], [1], [0, 0, 1, 1], [], []>} : vector<256x4xf32>, vector<4x128xf32>, vector<256x128xf32> -> vector<256x128xf32>
    %c0_4 = arith.constant 0 : index
    %c0_5 = arith.constant 0 : index
    %4 = vector.load %arg3[%c0_4, %c0_5] : memref<1x128xf32, #tpu.memory_space<vmem>>, vector<1x128xf32>
    %5 = vector.broadcast %4 : vector<1x128xf32> to vector<256x128xf32>
    %6 = arith.addf %3, %5 : vector<256x128xf32>
    %7 = arith.negf %6 : vector<256x128xf32>
    %8 = math.exp %7 : vector<256x128xf32>
    %cst_6 = arith.constant 1.000000e+00 : f32
    %9 = vector.broadcast %cst_6 : f32 to vector<256x128xf32>
    %10 = arith.addf %9, %8 : vector<256x128xf32>
    %11 = arith.divf %9, %10 : vector<256x128xf32>
    %12 = arith.mulf %6, %11 : vector<256x128xf32>
    %c0_7 = arith.constant 0 : index
    %c0_8 = arith.constant 0 : index
    %c0_9 = arith.constant 0 : index
    %13 = vector.load %arg6[%c0_7, %c0_8, %c0_9] : memref<1x256x128xf32, #tpu.memory_space<vmem>>, vector<1x256x128xf32>
    %14 = vector.shape_cast %13 : vector<1x256x128xf32> to vector<256x128xf32>
    %15 = vector.shape_cast %12 : vector<256x128xf32> to vector<1x256x128xf32>
    tpu.vector_store %arg6[%c0_7, %c0_8, %c0_9], %15 {strides = array<i32>} : memref<1x256x128xf32, #tpu.memory_space<vmem>>, vector<1x256x128xf32>,
    %cst_10 = arith.constant 0.000000e+00 : f32
    %16 = vector.broadcast %cst_10 : f32 to vector<20x20x128xf32>
    %c0_11 = arith.constant 0 : index
    %c0_12 = arith.constant 0 : index
    %c0_13 = arith.constant 0 : index
    %17 = vector.load %arg8[%c0_11, %c0_12, %c0_13] : memref<20x20x128xf32, #tpu.memory_space<vmem>>, vector<20x20x128xf32>
    tpu.vector_store %arg8[%c0_11, %c0_12, %c0_13], %16 {strides = array<i32>} : memref<20x20x128xf32, #tpu.memory_space<vmem>>, vector<20x20x128xf32>,
    %18 = vector.extract_strided_slice %12 {offsets = [0, 0], sizes = [16, 128], strides = [1, 1]} : vector<256x128xf32> to vector<16x128xf32>
    %c2 = arith.constant 2 : index
    %c2_14 = arith.constant 2 : index
    %c0_15 = arith.constant 0 : index
    %19 = vector.load %arg8[%c2, %c2_14, %c0_15] : memref<20x20x128xf32, #tpu.memory_space<vmem>>, vector<1x16x128xf32>
    %20 = vector.shape_cast %19 : vector<1x16x128xf32> to vector<16x128xf32>
    %21 = vector.shape_cast %18 : vector<16x128xf32> to vector<1x16x128xf32>
    tpu.vector_store %arg8[%c2, %c2_14, %c0_15], %21 {strides = array<i32>} : memref<20x20x128xf32, #tpu.memory_space<vmem>>, vector<1x16x128xf32>,
    %22 = vector.extract_strided_slice %12 {offsets = [16, 0], sizes = [16, 128], strides = [1, 1]} : vector<256x128xf32> to vector<16x128xf32>
    %c3 = arith.constant 3 : index
    %c2_16 = arith.constant 2 : index
    %c0_17 = arith.constant 0 : index
    %23 = vector.load %arg8[%c3, %c2_16, %c0_17] : memref<20x20x128xf32, #tpu.memory_space<vmem>>, vector<1x16x128xf32>
    %24 = vector.shape_cast %23 : vector<1x16x128xf32> to vector<16x128xf32>
    %25 = vector.shape_cast %22 : vector<16x128xf32> to vector<1x16x128xf32>
    tpu.vector_store %arg8[%c3, %c2_16, %c0_17], %25 {strides = array<i32>} : memref<20x20x128xf32, #tpu.memory_space<vmem>>, vector<1x16x128xf32>,
    %26 = vector.extract_strided_slice %12 {offsets = [32, 0], sizes = [16, 128], strides = [1, 1]} : vector<256x128xf32> to vector<16x128xf32>
    %c4 = arith.constant 4 : index
    %c2_18 = arith.constant 2 : index
    %c0_19 = arith.constant 0 : index
    %27 = vector.load %arg8[%c4, %c2_18, %c0_19] : memref<20x20x128xf32, #tpu.memory_space<vmem>>, vector<1x16x128xf32>
    %28 = vector.shape_cast %27 : vector<1x16x128xf32> to vector<16x128xf32>
    %29 = vector.shape_cast %26 : vector<16x128xf32> to vector<1x16x128xf32>
    tpu.vector_store %arg8[%c4, %c2_18, %c0_19], %29 {strides = array<i32>} : memref<20x20x128xf32, #tpu.memory_space<vmem>>, vector<1x16x128xf32>,
    %30 = vector.extract_strided_slice %12 {offsets = [48, 0], sizes = [16, 128], strides = [1, 1]} : vector<256x128xf32> to vector<16x128xf32>
    %c5 = arith.constant 5 : index
    %c2_20 = arith.constant 2 : index
    %c0_21 = arith.constant 0 : index
    %31 = vector.load %arg8[%c5, %c2_20, %c0_21] : memref<20x20x128xf32, #tpu.memory_space<vmem>>, vector<1x16x128xf32>
    %32 = vector.shape_cast %31 : vector<1x16x128xf32> to vector<16x128xf32>
    %33 = vector.shape_cast %30 : vector<16x128xf32> to vector<1x16x128xf32>
    tpu.vector_store %arg8[%c5, %c2_20, %c0_21], %33 {strides = array<i32>} : memref<20x20x128xf32, #tpu.memory_space<vmem>>, vector<1x16x128xf32>,
    %34 = vector.extract_strided_slice %12 {offsets = [64, 0], sizes = [16, 128], strides = [1, 1]} : vector<256x128xf32> to vector<16x128xf32>
    %c6 = arith.constant 6 : index
    %c2_22 = arith.constant 2 : index
    %c0_23 = arith.constant 0 : index
    %35 = vector.load %arg8[%c6, %c2_22, %c0_23] : memref<20x20x128xf32, #tpu.memory_space<vmem>>, vector<1x16x128xf32>
    %36 = vector.shape_cast %35 : vector<1x16x128xf32> to vector<16x128xf32>
    %37 = vector.shape_cast %34 : vector<16x128xf32> to vector<1x16x128xf32>
    tpu.vector_store %arg8[%c6, %c2_22, %c0_23], %37 {strides = array<i32>} : memref<20x20x128xf32, #tpu.memory_space<vmem>>, vector<1x16x128xf32>,
    %38 = vector.extract_strided_slice %12 {offsets = [80, 0], sizes = [16, 128], strides = [1, 1]} : vector<256x128xf32> to vector<16x128xf32>
    %c7 = arith.constant 7 : index
    %c2_24 = arith.constant 2 : index
    %c0_25 = arith.constant 0 : index
    %39 = vector.load %arg8[%c7, %c2_24, %c0_25] : memref<20x20x128xf32, #tpu.memory_space<vmem>>, vector<1x16x128xf32>
    %40 = vector.shape_cast %39 : vector<1x16x128xf32> to vector<16x128xf32>
    %41 = vector.shape_cast %38 : vector<16x128xf32> to vector<1x16x128xf32>
    tpu.vector_store %arg8[%c7, %c2_24, %c0_25], %41 {strides = array<i32>} : memref<20x20x128xf32, #tpu.memory_space<vmem>>, vector<1x16x128xf32>,
    %42 = vector.extract_strided_slice %12 {offsets = [96, 0], sizes = [16, 128], strides = [1, 1]} : vector<256x128xf32> to vector<16x128xf32>
    %c8 = arith.constant 8 : index
    %c2_26 = arith.constant 2 : index
    %c0_27 = arith.constant 0 : index
    %43 = vector.load %arg8[%c8, %c2_26, %c0_27] : memref<20x20x128xf32, #tpu.memory_space<vmem>>, vector<1x16x128xf32>
    %44 = vector.shape_cast %43 : vector<1x16x128xf32> to vector<16x128xf32>
    %45 = vector.shape_cast %42 : vector<16x128xf32> to vector<1x16x128xf32>
    tpu.vector_store %arg8[%c8, %c2_26, %c0_27], %45 {strides = array<i32>} : memref<20x20x128xf32, #tpu.memory_space<vmem>>, vector<1x16x128xf32>,
    %46 = vector.extract_strided_slice %12 {offsets = [112, 0], sizes = [16, 128], strides = [1, 1]} : vector<256x128xf32> to vector<16x128xf32>
    %c9 = arith.constant 9 : index
    %c2_28 = arith.constant 2 : index
    %c0_29 = arith.constant 0 : index
    %47 = vector.load %arg8[%c9, %c2_28, %c0_29] : memref<20x20x128xf32, #tpu.memory_space<vmem>>, vector<1x16x128xf32>
    %48 = vector.shape_cast %47 : vector<1x16x128xf32> to vector<16x128xf32>
    %49 = vector.shape_cast %46 : vector<16x128xf32> to vector<1x16x128xf32>
    tpu.vector_store %arg8[%c9, %c2_28, %c0_29], %49 {strides = array<i32>} : memref<20x20x128xf32, #tpu.memory_space<vmem>>, vector<1x16x128xf32>,
    %50 = vector.extract_strided_slice %12 {offsets = [128, 0], sizes = [16, 128], strides = [1, 1]} : vector<256x128xf32> to vector<16x128xf32>
    %c10 = arith.constant 10 : index
    %c2_30 = arith.constant 2 : index
    %c0_31 = arith.constant 0 : index
    %51 = vector.load %arg8[%c10, %c2_30, %c0_31] : memref<20x20x128xf32, #tpu.memory_space<vmem>>, vector<1x16x128xf32>
    %52 = vector.shape_cast %51 : vector<1x16x128xf32> to vector<16x128xf32>
    %53 = vector.shape_cast %50 : vector<16x128xf32> to vector<1x16x128xf32>
    tpu.vector_store %arg8[%c10, %c2_30, %c0_31], %53 {strides = array<i32>} : memref<20x20x128xf32, #tpu.memory_space<vmem>>, vector<1x16x128xf32>,
    %54 = vector.extract_strided_slice %12 {offsets = [144, 0], sizes = [16, 128], strides = [1, 1]} : vector<256x128xf32> to vector<16x128xf32>
    %c11 = arith.constant 11 : index
    %c2_32 = arith.constant 2 : index
    %c0_33 = arith.constant 0 : index
    %55 = vector.load %arg8[%c11, %c2_32, %c0_33] : memref<20x20x128xf32, #tpu.memory_space<vmem>>, vector<1x16x128xf32>
    %56 = vector.shape_cast %55 : vector<1x16x128xf32> to vector<16x128xf32>
    %57 = vector.shape_cast %54 : vector<16x128xf32> to vector<1x16x128xf32>
    tpu.vector_store %arg8[%c11, %c2_32, %c0_33], %57 {strides = array<i32>} : memref<20x20x128xf32, #tpu.memory_space<vmem>>, vector<1x16x128xf32>,
    %58 = vector.extract_strided_slice %12 {offsets = [160, 0], sizes = [16, 128], strides = [1, 1]} : vector<256x128xf32> to vector<16x128xf32>
    %c12 = arith.constant 12 : index
    %c2_34 = arith.constant 2 : index
    %c0_35 = arith.constant 0 : index
    %59 = vector.load %arg8[%c12, %c2_34, %c0_35] : memref<20x20x128xf32, #tpu.memory_space<vmem>>, vector<1x16x128xf32>
    %60 = vector.shape_cast %59 : vector<1x16x128xf32> to vector<16x128xf32>
    %61 = vector.shape_cast %58 : vector<16x128xf32> to vector<1x16x128xf32>
    tpu.vector_store %arg8[%c12, %c2_34, %c0_35], %61 {strides = array<i32>} : memref<20x20x128xf32, #tpu.memory_space<vmem>>, vector<1x16x128xf32>,
    %62 = vector.extract_strided_slice %12 {offsets = [176, 0], sizes = [16, 128], strides = [1, 1]} : vector<256x128xf32> to vector<16x128xf32>
    %c13 = arith.constant 13 : index
    %c2_36 = arith.constant 2 : index
    %c0_37 = arith.constant 0 : index
    %63 = vector.load %arg8[%c13, %c2_36, %c0_37] : memref<20x20x128xf32, #tpu.memory_space<vmem>>, vector<1x16x128xf32>
    %64 = vector.shape_cast %63 : vector<1x16x128xf32> to vector<16x128xf32>
    %65 = vector.shape_cast %62 : vector<16x128xf32> to vector<1x16x128xf32>
    tpu.vector_store %arg8[%c13, %c2_36, %c0_37], %65 {strides = array<i32>} : memref<20x20x128xf32, #tpu.memory_space<vmem>>, vector<1x16x128xf32>,
    %66 = vector.extract_strided_slice %12 {offsets = [192, 0], sizes = [16, 128], strides = [1, 1]} : vector<256x128xf32> to vector<16x128xf32>
    %c14 = arith.constant 14 : index
    %c2_38 = arith.constant 2 : index
    %c0_39 = arith.constant 0 : index
    %67 = vector.load %arg8[%c14, %c2_38, %c0_39] : memref<20x20x128xf32, #tpu.memory_space<vmem>>, vector<1x16x128xf32>
    %68 = vector.shape_cast %67 : vector<1x16x128xf32> to vector<16x128xf32>
    %69 = vector.shape_cast %66 : vector<16x128xf32> to vector<1x16x128xf32>
    tpu.vector_store %arg8[%c14, %c2_38, %c0_39], %69 {strides = array<i32>} : memref<20x20x128xf32, #tpu.memory_space<vmem>>, vector<1x16x128xf32>,
    %70 = vector.extract_strided_slice %12 {offsets = [208, 0], sizes = [16, 128], strides = [1, 1]} : vector<256x128xf32> to vector<16x128xf32>
    %c15 = arith.constant 15 : index
    %c2_40 = arith.constant 2 : index
    %c0_41 = arith.constant 0 : index
    %71 = vector.load %arg8[%c15, %c2_40, %c0_41] : memref<20x20x128xf32, #tpu.memory_space<vmem>>, vector<1x16x128xf32>
    %72 = vector.shape_cast %71 : vector<1x16x128xf32> to vector<16x128xf32>
    %73 = vector.shape_cast %70 : vector<16x128xf32> to vector<1x16x128xf32>
    tpu.vector_store %arg8[%c15, %c2_40, %c0_41], %73 {strides = array<i32>} : memref<20x20x128xf32, #tpu.memory_space<vmem>>, vector<1x16x128xf32>,
    %74 = vector.extract_strided_slice %12 {offsets = [224, 0], sizes = [16, 128], strides = [1, 1]} : vector<256x128xf32> to vector<16x128xf32>
    %c16 = arith.constant 16 : index
    %c2_42 = arith.constant 2 : index
    %c0_43 = arith.constant 0 : index
    %75 = vector.load %arg8[%c16, %c2_42, %c0_43] : memref<20x20x128xf32, #tpu.memory_space<vmem>>, vector<1x16x128xf32>
    %76 = vector.shape_cast %75 : vector<1x16x128xf32> to vector<16x128xf32>
    %77 = vector.shape_cast %74 : vector<16x128xf32> to vector<1x16x128xf32>
    tpu.vector_store %arg8[%c16, %c2_42, %c0_43], %77 {strides = array<i32>} : memref<20x20x128xf32, #tpu.memory_space<vmem>>, vector<1x16x128xf32>,
    %78 = vector.extract_strided_slice %12 {offsets = [240, 0], sizes = [16, 128], strides = [1, 1]} : vector<256x128xf32> to vector<16x128xf32>
    %c17 = arith.constant 17 : index
    %c2_44 = arith.constant 2 : index
    %c0_45 = arith.constant 0 : index
    %79 = vector.load %arg8[%c17, %c2_44, %c0_45] : memref<20x20x128xf32, #tpu.memory_space<vmem>>, vector<1x16x128xf32>
    %80 = vector.shape_cast %79 : vector<1x16x128xf32> to vector<16x128xf32>
    %81 = vector.shape_cast %78 : vector<16x128xf32> to vector<1x16x128xf32>
    tpu.vector_store %arg8[%c17, %c2_44, %c0_45], %81 {strides = array<i32>} : memref<20x20x128xf32, #tpu.memory_space<vmem>>, vector<1x16x128xf32>,
    %cst_46 = arith.constant 0.000000e+00 : f32
    %82 = vector.broadcast %cst_46 : f32 to vector<16x16x128xf32>
    %c0_47 = arith.constant 0 : index
    %c0_48 = arith.constant 0 : index
    %c0_49 = arith.constant 0 : index
    %83 = vector.load %arg8[%c0_47, %c0_48, %c0_49] : memref<20x20x128xf32, #tpu.memory_space<vmem>>, vector<16x16x128xf32>
    %c0_50 = arith.constant 0 : index
    %c0_51 = arith.constant 0 : index
    %84 = vector.load %arg4[%c0_50, %c0_51] : memref<25x128xf32, #tpu.memory_space<vmem>>, vector<1x128xf32>
    %85 = vector.shape_cast %84 : vector<1x128xf32> to vector<1x1x128xf32>
    %86 = vector.broadcast %85 : vector<1x1x128xf32> to vector<16x16x128xf32>
    %87 = arith.mulf %83, %86 : vector<16x16x128xf32>
    %88 = arith.addf %82, %87 : vector<16x16x128xf32>
    %c0_52 = arith.constant 0 : index
    %c1 = arith.constant 1 : index
    %c0_53 = arith.constant 0 : index
    %89 = vector.load %arg8[%c0_52, %c1, %c0_53] : memref<20x20x128xf32, #tpu.memory_space<vmem>>, vector<16x16x128xf32>
    %c1_54 = arith.constant 1 : index
    %c0_55 = arith.constant 0 : index
    %90 = vector.load %arg4[%c1_54, %c0_55] : memref<25x128xf32, #tpu.memory_space<vmem>>, vector<1x128xf32>
    %91 = vector.shape_cast %90 : vector<1x128xf32> to vector<1x1x128xf32>
    %92 = vector.broadcast %91 : vector<1x1x128xf32> to vector<16x16x128xf32>
    %93 = arith.mulf %89, %92 : vector<16x16x128xf32>
    %94 = arith.addf %88, %93 : vector<16x16x128xf32>
    %c0_56 = arith.constant 0 : index
    %c2_57 = arith.constant 2 : index
    %c0_58 = arith.constant 0 : index
    %95 = vector.load %arg8[%c0_56, %c2_57, %c0_58] : memref<20x20x128xf32, #tpu.memory_space<vmem>>, vector<16x16x128xf32>
    %c2_59 = arith.constant 2 : index
    %c0_60 = arith.constant 0 : index
    %96 = vector.load %arg4[%c2_59, %c0_60] : memref<25x128xf32, #tpu.memory_space<vmem>>, vector<1x128xf32>
    %97 = vector.shape_cast %96 : vector<1x128xf32> to vector<1x1x128xf32>
    %98 = vector.broadcast %97 : vector<1x1x128xf32> to vector<16x16x128xf32>
    %99 = arith.mulf %95, %98 : vector<16x16x128xf32>
    %100 = arith.addf %94, %99 : vector<16x16x128xf32>
    %c0_61 = arith.constant 0 : index
    %c3_62 = arith.constant 3 : index
    %c0_63 = arith.constant 0 : index
    %101 = vector.load %arg8[%c0_61, %c3_62, %c0_63] : memref<20x20x128xf32, #tpu.memory_space<vmem>>, vector<16x16x128xf32>
    %c3_64 = arith.constant 3 : index
    %c0_65 = arith.constant 0 : index
    %102 = vector.load %arg4[%c3_64, %c0_65] : memref<25x128xf32, #tpu.memory_space<vmem>>, vector<1x128xf32>
    %103 = vector.shape_cast %102 : vector<1x128xf32> to vector<1x1x128xf32>
    %104 = vector.broadcast %103 : vector<1x1x128xf32> to vector<16x16x128xf32>
    %105 = arith.mulf %101, %104 : vector<16x16x128xf32>
    %106 = arith.addf %100, %105 : vector<16x16x128xf32>
    %c0_66 = arith.constant 0 : index
    %c4_67 = arith.constant 4 : index
    %c0_68 = arith.constant 0 : index
    %107 = vector.load %arg8[%c0_66, %c4_67, %c0_68] : memref<20x20x128xf32, #tpu.memory_space<vmem>>, vector<16x16x128xf32>
    %c4_69 = arith.constant 4 : index
    %c0_70 = arith.constant 0 : index
    %108 = vector.load %arg4[%c4_69, %c0_70] : memref<25x128xf32, #tpu.memory_space<vmem>>, vector<1x128xf32>
    %109 = vector.shape_cast %108 : vector<1x128xf32> to vector<1x1x128xf32>
    %110 = vector.broadcast %109 : vector<1x1x128xf32> to vector<16x16x128xf32>
    %111 = arith.mulf %107, %110 : vector<16x16x128xf32>
    %112 = arith.addf %106, %111 : vector<16x16x128xf32>
    %c1_71 = arith.constant 1 : index
    %c0_72 = arith.constant 0 : index
    %c0_73 = arith.constant 0 : index
    %113 = vector.load %arg8[%c1_71, %c0_72, %c0_73] : memref<20x20x128xf32, #tpu.memory_space<vmem>>, vector<16x16x128xf32>
    %c5_74 = arith.constant 5 : index
    %c0_75 = arith.constant 0 : index
    %114 = vector.load %arg4[%c5_74, %c0_75] : memref<25x128xf32, #tpu.memory_space<vmem>>, vector<1x128xf32>
    %115 = vector.shape_cast %114 : vector<1x128xf32> to vector<1x1x128xf32>
    %116 = vector.broadcast %115 : vector<1x1x128xf32> to vector<16x16x128xf32>
    %117 = arith.mulf %113, %116 : vector<16x16x128xf32>
    %118 = arith.addf %112, %117 : vector<16x16x128xf32>
    %c1_76 = arith.constant 1 : index
    %c1_77 = arith.constant 1 : index
    %c0_78 = arith.constant 0 : index
    %119 = vector.load %arg8[%c1_76, %c1_77, %c0_78] : memref<20x20x128xf32, #tpu.memory_space<vmem>>, vector<16x16x128xf32>
    %c6_79 = arith.constant 6 : index
    %c0_80 = arith.constant 0 : index
    %120 = vector.load %arg4[%c6_79, %c0_80] : memref<25x128xf32, #tpu.memory_space<vmem>>, vector<1x128xf32>
    %121 = vector.shape_cast %120 : vector<1x128xf32> to vector<1x1x128xf32>
    %122 = vector.broadcast %121 : vector<1x1x128xf32> to vector<16x16x128xf32>
    %123 = arith.mulf %119, %122 : vector<16x16x128xf32>
    %124 = arith.addf %118, %123 : vector<16x16x128xf32>
    %c1_81 = arith.constant 1 : index
    %c2_82 = arith.constant 2 : index
    %c0_83 = arith.constant 0 : index
    %125 = vector.load %arg8[%c1_81, %c2_82, %c0_83] : memref<20x20x128xf32, #tpu.memory_space<vmem>>, vector<16x16x128xf32>
    %c7_84 = arith.constant 7 : index
    %c0_85 = arith.constant 0 : index
    %126 = vector.load %arg4[%c7_84, %c0_85] : memref<25x128xf32, #tpu.memory_space<vmem>>, vector<1x128xf32>
    %127 = vector.shape_cast %126 : vector<1x128xf32> to vector<1x1x128xf32>
    %128 = vector.broadcast %127 : vector<1x1x128xf32> to vector<16x16x128xf32>
    %129 = arith.mulf %125, %128 : vector<16x16x128xf32>
    %130 = arith.addf %124, %129 : vector<16x16x128xf32>
    %c1_86 = arith.constant 1 : index
    %c3_87 = arith.constant 3 : index
    %c0_88 = arith.constant 0 : index
    %131 = vector.load %arg8[%c1_86, %c3_87, %c0_88] : memref<20x20x128xf32, #tpu.memory_space<vmem>>, vector<16x16x128xf32>
    %c8_89 = arith.constant 8 : index
    %c0_90 = arith.constant 0 : index
    %132 = vector.load %arg4[%c8_89, %c0_90] : memref<25x128xf32, #tpu.memory_space<vmem>>, vector<1x128xf32>
    %133 = vector.shape_cast %132 : vector<1x128xf32> to vector<1x1x128xf32>
    %134 = vector.broadcast %133 : vector<1x1x128xf32> to vector<16x16x128xf32>
    %135 = arith.mulf %131, %134 : vector<16x16x128xf32>
    %136 = arith.addf %130, %135 : vector<16x16x128xf32>
    %c1_91 = arith.constant 1 : index
    %c4_92 = arith.constant 4 : index
    %c0_93 = arith.constant 0 : index
    %137 = vector.load %arg8[%c1_91, %c4_92, %c0_93] : memref<20x20x128xf32, #tpu.memory_space<vmem>>, vector<16x16x128xf32>
    %c9_94 = arith.constant 9 : index
    %c0_95 = arith.constant 0 : index
    %138 = vector.load %arg4[%c9_94, %c0_95] : memref<25x128xf32, #tpu.memory_space<vmem>>, vector<1x128xf32>
    %139 = vector.shape_cast %138 : vector<1x128xf32> to vector<1x1x128xf32>
    %140 = vector.broadcast %139 : vector<1x1x128xf32> to vector<16x16x128xf32>
    %141 = arith.mulf %137, %140 : vector<16x16x128xf32>
    %142 = arith.addf %136, %141 : vector<16x16x128xf32>
    %c2_96 = arith.constant 2 : index
    %c0_97 = arith.constant 0 : index
    %c0_98 = arith.constant 0 : index
    %143 = vector.load %arg8[%c2_96, %c0_97, %c0_98] : memref<20x20x128xf32, #tpu.memory_space<vmem>>, vector<16x16x128xf32>
    %c10_99 = arith.constant 10 : index
    %c0_100 = arith.constant 0 : index
    %144 = vector.load %arg4[%c10_99, %c0_100] : memref<25x128xf32, #tpu.memory_space<vmem>>, vector<1x128xf32>
    %145 = vector.shape_cast %144 : vector<1x128xf32> to vector<1x1x128xf32>
    %146 = vector.broadcast %145 : vector<1x1x128xf32> to vector<16x16x128xf32>
    %147 = arith.mulf %143, %146 : vector<16x16x128xf32>
    %148 = arith.addf %142, %147 : vector<16x16x128xf32>
    %c2_101 = arith.constant 2 : index
    %c1_102 = arith.constant 1 : index
    %c0_103 = arith.constant 0 : index
    %149 = vector.load %arg8[%c2_101, %c1_102, %c0_103] : memref<20x20x128xf32, #tpu.memory_space<vmem>>, vector<16x16x128xf32>
    %c11_104 = arith.constant 11 : index
    %c0_105 = arith.constant 0 : index
    %150 = vector.load %arg4[%c11_104, %c0_105] : memref<25x128xf32, #tpu.memory_space<vmem>>, vector<1x128xf32>
    %151 = vector.shape_cast %150 : vector<1x128xf32> to vector<1x1x128xf32>
    %152 = vector.broadcast %151 : vector<1x1x128xf32> to vector<16x16x128xf32>
    %153 = arith.mulf %149, %152 : vector<16x16x128xf32>
    %154 = arith.addf %148, %153 : vector<16x16x128xf32>
    %c2_106 = arith.constant 2 : index
    %c2_107 = arith.constant 2 : index
    %c0_108 = arith.constant 0 : index
    %155 = vector.load %arg8[%c2_106, %c2_107, %c0_108] : memref<20x20x128xf32, #tpu.memory_space<vmem>>, vector<16x16x128xf32>
    %c12_109 = arith.constant 12 : index
    %c0_110 = arith.constant 0 : index
    %156 = vector.load %arg4[%c12_109, %c0_110] : memref<25x128xf32, #tpu.memory_space<vmem>>, vector<1x128xf32>
    %157 = vector.shape_cast %156 : vector<1x128xf32> to vector<1x1x128xf32>
    %158 = vector.broadcast %157 : vector<1x1x128xf32> to vector<16x16x128xf32>
    %159 = arith.mulf %155, %158 : vector<16x16x128xf32>
    %160 = arith.addf %154, %159 : vector<16x16x128xf32>
    %c2_111 = arith.constant 2 : index
    %c3_112 = arith.constant 3 : index
    %c0_113 = arith.constant 0 : index
    %161 = vector.load %arg8[%c2_111, %c3_112, %c0_113] : memref<20x20x128xf32, #tpu.memory_space<vmem>>, vector<16x16x128xf32>
    %c13_114 = arith.constant 13 : index
    %c0_115 = arith.constant 0 : index
    %162 = vector.load %arg4[%c13_114, %c0_115] : memref<25x128xf32, #tpu.memory_space<vmem>>, vector<1x128xf32>
    %163 = vector.shape_cast %162 : vector<1x128xf32> to vector<1x1x128xf32>
    %164 = vector.broadcast %163 : vector<1x1x128xf32> to vector<16x16x128xf32>
    %165 = arith.mulf %161, %164 : vector<16x16x128xf32>
    %166 = arith.addf %160, %165 : vector<16x16x128xf32>
    %c2_116 = arith.constant 2 : index
    %c4_117 = arith.constant 4 : index
    %c0_118 = arith.constant 0 : index
    %167 = vector.load %arg8[%c2_116, %c4_117, %c0_118] : memref<20x20x128xf32, #tpu.memory_space<vmem>>, vector<16x16x128xf32>
    %c14_119 = arith.constant 14 : index
    %c0_120 = arith.constant 0 : index
    %168 = vector.load %arg4[%c14_119, %c0_120] : memref<25x128xf32, #tpu.memory_space<vmem>>, vector<1x128xf32>
    %169 = vector.shape_cast %168 : vector<1x128xf32> to vector<1x1x128xf32>
    %170 = vector.broadcast %169 : vector<1x1x128xf32> to vector<16x16x128xf32>
    %171 = arith.mulf %167, %170 : vector<16x16x128xf32>
    %172 = arith.addf %166, %171 : vector<16x16x128xf32>
    %c3_121 = arith.constant 3 : index
    %c0_122 = arith.constant 0 : index
    %c0_123 = arith.constant 0 : index
    %173 = vector.load %arg8[%c3_121, %c0_122, %c0_123] : memref<20x20x128xf32, #tpu.memory_space<vmem>>, vector<16x16x128xf32>
    %c15_124 = arith.constant 15 : index
    %c0_125 = arith.constant 0 : index
    %174 = vector.load %arg4[%c15_124, %c0_125] : memref<25x128xf32, #tpu.memory_space<vmem>>, vector<1x128xf32>
    %175 = vector.shape_cast %174 : vector<1x128xf32> to vector<1x1x128xf32>
    %176 = vector.broadcast %175 : vector<1x1x128xf32> to vector<16x16x128xf32>
    %177 = arith.mulf %173, %176 : vector<16x16x128xf32>
    %178 = arith.addf %172, %177 : vector<16x16x128xf32>
    %c3_126 = arith.constant 3 : index
    %c1_127 = arith.constant 1 : index
    %c0_128 = arith.constant 0 : index
    %179 = vector.load %arg8[%c3_126, %c1_127, %c0_128] : memref<20x20x128xf32, #tpu.memory_space<vmem>>, vector<16x16x128xf32>
    %c16_129 = arith.constant 16 : index
    %c0_130 = arith.constant 0 : index
    %180 = vector.load %arg4[%c16_129, %c0_130] : memref<25x128xf32, #tpu.memory_space<vmem>>, vector<1x128xf32>
    %181 = vector.shape_cast %180 : vector<1x128xf32> to vector<1x1x128xf32>
    %182 = vector.broadcast %181 : vector<1x1x128xf32> to vector<16x16x128xf32>
    %183 = arith.mulf %179, %182 : vector<16x16x128xf32>
    %184 = arith.addf %178, %183 : vector<16x16x128xf32>
    %c3_131 = arith.constant 3 : index
    %c2_132 = arith.constant 2 : index
    %c0_133 = arith.constant 0 : index
    %185 = vector.load %arg8[%c3_131, %c2_132, %c0_133] : memref<20x20x128xf32, #tpu.memory_space<vmem>>, vector<16x16x128xf32>
    %c17_134 = arith.constant 17 : index
    %c0_135 = arith.constant 0 : index
    %186 = vector.load %arg4[%c17_134, %c0_135] : memref<25x128xf32, #tpu.memory_space<vmem>>, vector<1x128xf32>
    %187 = vector.shape_cast %186 : vector<1x128xf32> to vector<1x1x128xf32>
    %188 = vector.broadcast %187 : vector<1x1x128xf32> to vector<16x16x128xf32>
    %189 = arith.mulf %185, %188 : vector<16x16x128xf32>
    %190 = arith.addf %184, %189 : vector<16x16x128xf32>
    %c3_136 = arith.constant 3 : index
    %c3_137 = arith.constant 3 : index
    %c0_138 = arith.constant 0 : index
    %191 = vector.load %arg8[%c3_136, %c3_137, %c0_138] : memref<20x20x128xf32, #tpu.memory_space<vmem>>, vector<16x16x128xf32>
    %c18 = arith.constant 18 : index
    %c0_139 = arith.constant 0 : index
    %192 = vector.load %arg4[%c18, %c0_139] : memref<25x128xf32, #tpu.memory_space<vmem>>, vector<1x128xf32>
    %193 = vector.shape_cast %192 : vector<1x128xf32> to vector<1x1x128xf32>
    %194 = vector.broadcast %193 : vector<1x1x128xf32> to vector<16x16x128xf32>
    %195 = arith.mulf %191, %194 : vector<16x16x128xf32>
    %196 = arith.addf %190, %195 : vector<16x16x128xf32>
    %c3_140 = arith.constant 3 : index
    %c4_141 = arith.constant 4 : index
    %c0_142 = arith.constant 0 : index
    %197 = vector.load %arg8[%c3_140, %c4_141, %c0_142] : memref<20x20x128xf32, #tpu.memory_space<vmem>>, vector<16x16x128xf32>
    %c19 = arith.constant 19 : index
    %c0_143 = arith.constant 0 : index
    %198 = vector.load %arg4[%c19, %c0_143] : memref<25x128xf32, #tpu.memory_space<vmem>>, vector<1x128xf32>
    %199 = vector.shape_cast %198 : vector<1x128xf32> to vector<1x1x128xf32>
    %200 = vector.broadcast %199 : vector<1x1x128xf32> to vector<16x16x128xf32>
    %201 = arith.mulf %197, %200 : vector<16x16x128xf32>
    %202 = arith.addf %196, %201 : vector<16x16x128xf32>
    %c4_144 = arith.constant 4 : index
    %c0_145 = arith.constant 0 : index
    %c0_146 = arith.constant 0 : index
    %203 = vector.load %arg8[%c4_144, %c0_145, %c0_146] : memref<20x20x128xf32, #tpu.memory_space<vmem>>, vector<16x16x128xf32>
    %c20 = arith.constant 20 : index
    %c0_147 = arith.constant 0 : index
    %204 = vector.load %arg4[%c20, %c0_147] : memref<25x128xf32, #tpu.memory_space<vmem>>, vector<1x128xf32>
    %205 = vector.shape_cast %204 : vector<1x128xf32> to vector<1x1x128xf32>
    %206 = vector.broadcast %205 : vector<1x1x128xf32> to vector<16x16x128xf32>
    %207 = arith.mulf %203, %206 : vector<16x16x128xf32>
    %208 = arith.addf %202, %207 : vector<16x16x128xf32>
    %c4_148 = arith.constant 4 : index
    %c1_149 = arith.constant 1 : index
    %c0_150 = arith.constant 0 : index
    %209 = vector.load %arg8[%c4_148, %c1_149, %c0_150] : memref<20x20x128xf32, #tpu.memory_space<vmem>>, vector<16x16x128xf32>
    %c21 = arith.constant 21 : index
    %c0_151 = arith.constant 0 : index
    %210 = vector.load %arg4[%c21, %c0_151] : memref<25x128xf32, #tpu.memory_space<vmem>>, vector<1x128xf32>
    %211 = vector.shape_cast %210 : vector<1x128xf32> to vector<1x1x128xf32>
    %212 = vector.broadcast %211 : vector<1x1x128xf32> to vector<16x16x128xf32>
    %213 = arith.mulf %209, %212 : vector<16x16x128xf32>
    %214 = arith.addf %208, %213 : vector<16x16x128xf32>
    %c4_152 = arith.constant 4 : index
    %c2_153 = arith.constant 2 : index
    %c0_154 = arith.constant 0 : index
    %215 = vector.load %arg8[%c4_152, %c2_153, %c0_154] : memref<20x20x128xf32, #tpu.memory_space<vmem>>, vector<16x16x128xf32>
    %c22 = arith.constant 22 : index
    %c0_155 = arith.constant 0 : index
    %216 = vector.load %arg4[%c22, %c0_155] : memref<25x128xf32, #tpu.memory_space<vmem>>, vector<1x128xf32>
    %217 = vector.shape_cast %216 : vector<1x128xf32> to vector<1x1x128xf32>
    %218 = vector.broadcast %217 : vector<1x1x128xf32> to vector<16x16x128xf32>
    %219 = arith.mulf %215, %218 : vector<16x16x128xf32>
    %220 = arith.addf %214, %219 : vector<16x16x128xf32>
    %c4_156 = arith.constant 4 : index
    %c3_157 = arith.constant 3 : index
    %c0_158 = arith.constant 0 : index
    %221 = vector.load %arg8[%c4_156, %c3_157, %c0_158] : memref<20x20x128xf32, #tpu.memory_space<vmem>>, vector<16x16x128xf32>
    %c23 = arith.constant 23 : index
    %c0_159 = arith.constant 0 : index
    %222 = vector.load %arg4[%c23, %c0_159] : memref<25x128xf32, #tpu.memory_space<vmem>>, vector<1x128xf32>
    %223 = vector.shape_cast %222 : vector<1x128xf32> to vector<1x1x128xf32>
    %224 = vector.broadcast %223 : vector<1x1x128xf32> to vector<16x16x128xf32>
    %225 = arith.mulf %221, %224 : vector<16x16x128xf32>
    %226 = arith.addf %220, %225 : vector<16x16x128xf32>
    %c4_160 = arith.constant 4 : index
    %c4_161 = arith.constant 4 : index
    %c0_162 = arith.constant 0 : index
    %227 = vector.load %arg8[%c4_160, %c4_161, %c0_162] : memref<20x20x128xf32, #tpu.memory_space<vmem>>, vector<16x16x128xf32>
    %c24 = arith.constant 24 : index
    %c0_163 = arith.constant 0 : index
    %228 = vector.load %arg4[%c24, %c0_163] : memref<25x128xf32, #tpu.memory_space<vmem>>, vector<1x128xf32>
    %229 = vector.shape_cast %228 : vector<1x128xf32> to vector<1x1x128xf32>
    %230 = vector.broadcast %229 : vector<1x1x128xf32> to vector<16x16x128xf32>
    %231 = arith.mulf %227, %230 : vector<16x16x128xf32>
    %232 = arith.addf %226, %231 : vector<16x16x128xf32>
    %c0_164 = arith.constant 0 : index
    %c0_165 = arith.constant 0 : index
    %233 = vector.load %arg5[%c0_164, %c0_165] : memref<1x128xf32, #tpu.memory_space<vmem>>, vector<1x128xf32>
    %234 = vector.shape_cast %233 : vector<1x128xf32> to vector<1x1x128xf32>
    %235 = vector.broadcast %234 : vector<1x1x128xf32> to vector<16x16x128xf32>
    %236 = arith.addf %232, %235 : vector<16x16x128xf32>
    %237 = arith.negf %236 : vector<16x16x128xf32>
    %238 = math.exp %237 : vector<16x16x128xf32>
    %cst_166 = arith.constant 1.000000e+00 : f32
    %239 = vector.broadcast %cst_166 : f32 to vector<16x16x128xf32>
    %240 = arith.addf %239, %238 : vector<16x16x128xf32>
    %241 = arith.divf %239, %240 : vector<16x16x128xf32>
    %242 = arith.mulf %236, %241 : vector<16x16x128xf32>
    %c0_167 = arith.constant 0 : index
    %c0_168 = arith.constant 0 : index
    %c0_169 = arith.constant 0 : index
    %c0_170 = arith.constant 0 : index
    %243 = vector.load %arg7[%c0_167, %c0_168, %c0_169, %c0_170] : memref<1x16x16x128xf32, #tpu.memory_space<vmem>>, vector<1x16x16x128xf32>
    %244 = vector.shape_cast %243 : vector<1x16x16x128xf32> to vector<16x16x128xf32>
    %245 = vector.shape_cast %242 : vector<16x16x128xf32> to vector<1x16x16x128xf32>
    tpu.vector_store %arg7[%c0_167, %c0_168, %c0_169, %c0_170], %245 {strides = array<i32>} : memref<1x16x16x128xf32, #tpu.memory_space<vmem>>, vector<1x16x16x128xf32>,
    return
  }
  func.func @transform_0(%arg0: i32) -> (i32, i32, i32) {
    %c0_i32 = arith.constant 0 : i32
    %c0_i32_0 = arith.constant 0 : i32
    %c0_i32_1 = arith.constant 0 : i32
    return %arg0, %c0_i32, %c0_i32_0 : i32, i32, i32
  }
  func.func @transform_1(%arg0: i32) -> (i32, i32) {
    %c0_i32 = arith.constant 0 : i32
    %c0_i32_0 = arith.constant 0 : i32
    %c0_i32_1 = arith.constant 0 : i32
    return %c0_i32, %c0_i32_0 : i32, i32
  }
  func.func @transform_2(%arg0: i32) -> (i32, i32) {
    %c0_i32 = arith.constant 0 : i32
    %c0_i32_0 = arith.constant 0 : i32
    %c0_i32_1 = arith.constant 0 : i32
    return %c0_i32, %c0_i32_0 : i32, i32
  }
  func.func @transform_3(%arg0: i32) -> (i32, i32) {
    %c0_i32 = arith.constant 0 : i32
    %c0_i32_0 = arith.constant 0 : i32
    %c0_i32_1 = arith.constant 0 : i32
    return %c0_i32, %c0_i32_0 : i32, i32
  }
  func.func @transform_4(%arg0: i32) -> (i32, i32) {
    %c0_i32 = arith.constant 0 : i32
    %c0_i32_0 = arith.constant 0 : i32
    %c0_i32_1 = arith.constant 0 : i32
    return %c0_i32, %c0_i32_0 : i32, i32
  }
  func.func @transform_5(%arg0: i32) -> (i32, i32, i32) {
    %c0_i32 = arith.constant 0 : i32
    %c0_i32_0 = arith.constant 0 : i32
    %c0_i32_1 = arith.constant 0 : i32
    return %arg0, %c0_i32, %c0_i32_0 : i32, i32, i32
  }
  func.func @transform_6(%arg0: i32) -> (i32, i32, i32, i32) {
    %c0_i32 = arith.constant 0 : i32
    %c0_i32_0 = arith.constant 0 : i32
    %c0_i32_1 = arith.constant 0 : i32
    %c0_i32_2 = arith.constant 0 : i32
    return %arg0, %c0_i32, %c0_i32_0, %c0_i32_1 : i32, i32, i32, i32
  }
}

</mosaic_0001>

<bundles_post_ra>
// kernel: ghostconv_forward.1
= control target key start
LH: loop header
LB: loop body
LE: loop exit
PB: predicated region body
PF: predicated region fallthrough
CT: control target
= control target key end

     0   :  { %s5174_s21 = smov 0   ;;  %s10453_s0 = inlined_call_operand.vmem [shape: f32[2,256,4], index: 0, kind: input, shape index: {}]   ;;  %s10454_s1 = inlined_call_operand.vmem [shape: f32[4,128], index: 1, kind: input, shape index: {}]   ;;  %s10455_s2 = inlined_call_operand.vmem [shape: f32[1,128], index: 2, kind: input, shape index: {}]   ;;  %s10456_s3 = inlined_call_operand.vmem [shape: f32[25,128], index: 3, kind: input, shape index: {}]   ;;  %s10457_s4 = inlined_call_operand.vmem [shape: f32[1,128], index: 4, kind: input, shape index: {}]   ;;  %s10458_s5 = inlined_call_operand.vmem [shape: f32[2,256,128], index: 5, kind: output, shape index: {0}]   ;;  %s10459_s6 = inlined_call_operand.vmem [shape: f32[2,16,16,128], index: 6, kind: output, shape index: {1}]  }
   0x1 LB: > { %s4543_s22 = sadd.s32 4294967295, %s5136_s21   ;;  %p4547_p0 = scmp.ge.s32.totalorder %s5136_s21, 1  ;;  %s5136_s21 = sphi %s5174_s21, %s17_s21  }
   0x2   : > { %p215_p1 = scmp.lt.s32.totalorder %s5136_s21, 3 }
   0x4   : > { %p216_p2 = pnand %p4547_p0, %p215_p1 }
   0x6   : > { %219 = sbr.rel (%p216_p2) target bundleno = 1012 (0x3f4), region = 40 }
   0xb   : > { %v297_v0 = vld [vmem:[%s10454_s1] sm:$0xf]  ;;  %vm399_vm0 = vcmask 1043456   ;;  %p250_p3 = scmp.lt.s32.totalorder %s4543_s22, 1  ;;  %vm302_vm1 = vcmask 31744   ;;  %v5138_v33 = vmov 0.0  }
   0xc   : > { %4554 = vmatpush.msk.msra.mxu0 %vm399_vm0, %v297_v0  ;;  %4656 = vmatpush.msk.msra.mxu1 %vm399_vm0, %v297_v0  ;;  %1188 = vst [vmem:[#allocation2] sm:$0xff] %v5138_v33  ;;  %v5273_v34 = vld [vmem:[%s10455_s2] ss:$0 sm:$0xff]  ;;  %v5286_v37 = vld [vmem:[%s10456_s3 + $0x1] ss:$0 sm:$0xff] }
   0xd   : > { %4657 = vmatpush.msk.msra.mxu2 %vm399_vm0, %v297_v0  ;;  %4658 = vmatpush.msk.msra.mxu3 %vm399_vm0, %v297_v0  ;;  %s11518_s22 = smov (!%p250_p3, %s4543_s22), 1  ;;  %1189 = vst [vmem:[#allocation2 + $0x8] sm:$0xff] %v5138_v33  ;;  %v5279_v35 = vld [vmem:[%s10456_s3] ss:$0 sm:$0xff]  ;;  %v5306_v44 = vld [vmem:[%s10456_s3 + $0x2] ss:$0 sm:$0xff] }
   0xe   : > { %s5185_s25 = sshll.u32 %s11518_s22, 8  ;;  %1191 = vst [vmem:[#allocation2 + $0x18] sm:$0xff] %v5138_v33  ;;  %v5299_v42 = vmul.f32 0.0, %v5279_v35  ;;  %v5320_v50 = vld [vmem:[%s10456_s3 + $0x3] ss:$0 sm:$0xff] }
   0xf   : > { %s5191_s28 = scalar_lea.vmem %s10453_s0, %s5185_s25  ;;  %1192 = vst [vmem:[#allocation2 + $0x20] sm:$0xff] %v5138_v33  ;;  %v5331_v54 = vld [vmem:[%s10456_s3 + $0x4] ss:$0 sm:$0xff]  ;;  %s5408_s19 = scalar_lea.vmem %s10458_s5, %s5185_s25 }
  0x10   : > { %v265_v1 = vld [vmem:[%s5191_s28] sm:$0xff]  ;;  %v266_v5 = vld [vmem:[%s5191_s28 + $0x8] sm:$0xff]  ;;  %v267_v9 = vld [vmem:[%s5191_s28 + $0x10] sm:$0xff]  ;;  %1194 = vst [vmem:[#allocation2 + $0x30] sm:$0xff] %v5138_v33  ;;  %s7473_s22 = scalar_lea.vmem %s10459_s6, %s5185_s25 }
  0x11   : > { %v273_v2 = vld [vmem:[%s5191_s28 + $0x40] sm:$0xff]  ;;  %4555 = vmatmul.msk.f32.vlgmr.msra.gmra.mxu0 %vm302_vm1, %v265_v1  ;;  %v274_v6 = vld [vmem:[%s5191_s28 + $0x48] sm:$0xff]  ;;  %v275_v10 = vld [vmem:[%s5191_s28 + $0x50] sm:$0xff]  ;;  %1195 = vst [vmem:[#allocation2 + $0x38] sm:$0xff] %v5138_v33 }
  0x12   : > { %v281_v3 = vld [vmem:[%s5191_s28 + $0x80] sm:$0xff]  ;;  %4563 = vmatmul.msk.f32.vlgmr.msra.gmra.mxu1 %vm302_vm1, %v273_v2  ;;  %v282_v7 = vld [vmem:[%s5191_s28 + $0x88] sm:$0xff]  ;;  %v283_v11 = vld [vmem:[%s5191_s28 + $0x90] sm:$0xff]  ;;  %1190 = vst [vmem:[#allocation2 + $0x10] sm:$0xf] %v5138_v33 }
  0x13   : > { %v289_v4 = vld [vmem:[%s5191_s28 + $0xc0] sm:$0xff]  ;;  %4571 = vmatmul.msk.f32.vlgmr.msra.gmra.mxu2 %vm302_vm1, %v281_v3  ;;  %v290_v8 = vld [vmem:[%s5191_s28 + $0xc8] sm:$0xff]  ;;  %v291_v12 = vld [vmem:[%s5191_s28 + $0xd0] sm:$0xff]  ;;  %1193 = vst [vmem:[#allocation2 + $0x28] sm:$0xf] %v5138_v33 }
  0x14   : > { %4579 = vmatmul.msk.f32.vlgmr.msra.gmra.mxu3 %vm302_vm1, %v289_v4  ;;  %v268_v13 = vld [vmem:[%s5191_s28 + $0x18] sm:$0xff]  ;;  %v269_v17 = vld [vmem:[%s5191_s28 + $0x20] sm:$0xff]  ;;  %v270_v21 = vld [vmem:[%s5191_s28 + $0x28] sm:$0xff]  ;;  %1196 = vst [vmem:[#allocation2 + $0x40] sm:$0xf] %v5138_v33 }
  0x15   : > { %v276_v14 = vld [vmem:[%s5191_s28 + $0x58] sm:$0xff]  ;;  %v277_v18 = vld [vmem:[%s5191_s28 + $0x60] sm:$0xff]  ;;  %v278_v22 = vld [vmem:[%s5191_s28 + $0x68] sm:$0xff]  ;;  %1197 = vst [vmem:[#allocation2 + $0x48] sm:$0xff] %v5138_v33 }
  0x16   : > { %v284_v15 = vld [vmem:[%s5191_s28 + $0x98] sm:$0xff]  ;;  %v285_v19 = vld [vmem:[%s5191_s28 + $0xa0] sm:$0xff]  ;;  %v286_v23 = vld [vmem:[%s5191_s28 + $0xa8] sm:$0xff]  ;;  %1198 = vst [vmem:[#allocation2 + $0x50] sm:$0xff] %v5138_v33 }
  0x17   : > { %v292_v16 = vld [vmem:[%s5191_s28 + $0xd8] sm:$0xff]  ;;  %v293_v20 = vld [vmem:[%s5191_s28 + $0xe0] sm:$0xff]  ;;  %v294_v24 = vld [vmem:[%s5191_s28 + $0xe8] sm:$0xff]  ;;  %1199 = vst [vmem:[#allocation2 + $0x58] sm:$0xf] %v5138_v33 }
  0x18   : > { %v271_v25 = vld [vmem:[%s5191_s28 + $0x30] sm:$0xff]  ;;  %v272_v29 = vld [vmem:[%s5191_s28 + $0x38] sm:$0xff]  ;;  %1200 = vst [vmem:[#allocation2 + $0x60] sm:$0xff] %v5138_v33 }
  0x19   : > { %4556 = vmatmul.msk.f32.gmra.mxu0 %vm302_vm1, %v266_v5  ;;  %v279_v26 = vld [vmem:[%s5191_s28 + $0x70] sm:$0xff]  ;;  %v280_v30 = vld [vmem:[%s5191_s28 + $0x78] sm:$0xff]  ;;  %1201 = vst [vmem:[#allocation2 + $0x68] sm:$0xff] %v5138_v33 }
  0x1a   : > { %4564 = vmatmul.msk.f32.gmra.mxu1 %vm302_vm1, %v274_v6  ;;  %v287_v27 = vld [vmem:[%s5191_s28 + $0xb0] sm:$0xff]  ;;  %v288_v31 = vld [vmem:[%s5191_s28 + $0xb8] sm:$0xff]  ;;  %1202 = vst [vmem:[#allocation2 + $0x70] sm:$0xf] %v5138_v33 }
  0x1b   : > { %4572 = vmatmul.msk.f32.gmra.mxu2 %vm302_vm1, %v282_v7  ;;  %v295_v28 = vld [vmem:[%s5191_s28 + $0xf0] sm:$0xff]  ;;  %v296_v32 = vld [vmem:[%s5191_s28 + $0xf8] sm:$0xff]  ;;  %1203 = vst [vmem:[#allocation2 + $0x78] sm:$0xff] %v5138_v33 }
  0x1c   : > { %4580 = vmatmul.msk.f32.gmra.mxu3 %vm302_vm1, %v290_v8  ;;  %1204 = vst [vmem:[#allocation2 + $0x80] sm:$0xff] %v5138_v33  ;;  %v5292_v40 = vld [vmem:[#allocation2 + $0x19] sm:$0xff] }
  0x1d   : > { %1205 = vst [vmem:[#allocation2 + $0x88] sm:$0xf] %v5138_v33  ;;  %v1430_v43 = vmul.f32 %v5286_v37, %v5292_v40  ;;  %v5310_v46 = vld [vmem:[#allocation2 + $0x1a] sm:$0xff] }
  0x1e   : > { %1206 = vst [vmem:[#allocation2 + $0x90] sm:$0xff] %v5138_v33  ;;  %v1528_v49 = vmul.f32 %v5306_v44, %v5310_v46  ;;  %v5323_v51 = vld [vmem:[#allocation2 + $0x1b] sm:$0xff] }
  0x1f   : > { %1207 = vst [vmem:[#allocation2 + $0x98] sm:$0xff] %v5138_v33  ;;  %v1462_v48 = vadd.f32 %v1430_v43, %v5299_v42  ;;  %v1626_v53 = vmul.f32 %v5320_v50, %v5323_v51  ;;  %v5334_v55 = vld [vmem:[#allocation2 + $0x1c] sm:$0xff] }
  0x20   : > { %1208 = vst [vmem:[#allocation2 + $0xa0] sm:$0xf] %v5138_v33  ;;  %v1724_v59 = vmul.f32 %v5331_v54, %v5334_v55 }
  0x21   : > { %4557 = vmatmul.msk.f32.gmra.mxu0 %vm302_vm1, %v267_v9  ;;  %1209 = vst [vmem:[#allocation2 + $0xa8] sm:$0xff] %v5138_v33  ;;  %v1560_v52 = vadd.f32 %v1528_v49, %v1462_v48 }
  0x22   : > { %4565 = vmatmul.msk.f32.gmra.mxu1 %vm302_vm1, %v275_v10  ;;  %1210 = vst [vmem:[#allocation2 + $0xb0] sm:$0xff] %v5138_v33 }
  0x23   : > { %4573 = vmatmul.msk.f32.gmra.mxu2 %vm302_vm1, %v283_v11  ;;  %1211 = vst [vmem:[#allocation2 + $0xb8] sm:$0xf] %v5138_v33  ;;  %v1658_v58 = vadd.f32 %v1626_v53, %v1560_v52  ;;  %v5421_v52 = vld [vmem:[#allocation2 + $0x22] sm:$0xff] }
  0x24   : > { %4581 = vmatmul.msk.f32.gmra.mxu3 %vm302_vm1, %v291_v12  ;;  %1212 = vst [vmem:[#allocation2 + $0xc0] sm:$0xff] %v5138_v33 }
  0x25   : > { %1213 = vst [vmem:[#allocation2 + $0xc8] sm:$0xff] %v5138_v33  ;;  %v5350_v0 = vadd.f32 %v1724_v59, %v1658_v58 }
  0x26   : > { %1214 = vst [vmem:[#allocation2 + $0xd0] sm:$0xf] %v5138_v33 }
  0x27   : > { %1215 = vst [vmem:[#allocation2 + $0xd8] sm:$0xff] %v5138_v33 }
  0x28   : > { %1216 = vst [vmem:[#allocation2 + $0xe0] sm:$0xff] %v5138_v33 }
  0x29   : > { %4558 = vmatmul.msk.f32.gmra.mxu0 %vm302_vm1, %v268_v13  ;;  %1217 = vst [vmem:[#allocation2 + $0xe8] sm:$0xf] %v5138_v33 }
  0x2a   : > { %4566 = vmatmul.msk.f32.gmra.mxu1 %vm302_vm1, %v276_v14  ;;  %1218 = vst [vmem:[#allocation2 + $0xf0] sm:$0xff] %v5138_v33 }
  0x2b   : > { %4574 = vmatmul.msk.f32.gmra.mxu2 %vm302_vm1, %v284_v15  ;;  %1219 = vst [vmem:[#allocation2 + $0xf8] sm:$0xff] %v5138_v33 }
  0x2c   : > { %4582 = vmatmul.msk.f32.gmra.mxu3 %vm302_vm1, %v292_v16  ;;  %1220 = vst [vmem:[#allocation2 + $0x100] sm:$0xf] %v5138_v33 }
  0x2d   : > { %1221 = vst [vmem:[#allocation2 + $0x108] sm:$0xff] %v5138_v33 }
  0x2e   : > { %1222 = vst [vmem:[#allocation2 + $0x110] sm:$0xff] %v5138_v33 }
  0x2f   : > { %1223 = vst [vmem:[#allocation2 + $0x118] sm:$0xf] %v5138_v33 }
  0x30   : > { %1224 = vst [vmem:[#allocation2 + $0x120] sm:$0xff] %v5138_v33 }
  0x31   : > { %4559 = vmatmul.msk.f32.gmra.mxu0 %vm302_vm1, %v269_v17  ;;  %1225 = vst [vmem:[#allocation2 + $0x128] sm:$0xff] %v5138_v33 }
  0x32   : > { %4567 = vmatmul.msk.f32.gmra.mxu1 %vm302_vm1, %v277_v18  ;;  %1226 = vst [vmem:[#allocation2 + $0x130] sm:$0xf] %v5138_v33 }
  0x33   : > { %4575 = vmatmul.msk.f32.gmra.mxu2 %vm302_vm1, %v285_v19  ;;  %1227 = vst [vmem:[#allocation2 + $0x138] sm:$0xff] %v5138_v33 }
  0x34   : > { %4583 = vmatmul.msk.f32.gmra.mxu3 %vm302_vm1, %v293_v20  ;;  %1228 = vst [vmem:[#allocation2 + $0x140] sm:$0xff] %v5138_v33 }
  0x35   : > { %1229 = vst [vmem:[#allocation2 + $0x148] sm:$0xf] %v5138_v33 }
  0x36   : > { %1230 = vst [vmem:[#allocation2 + $0x150] sm:$0xff] %v5138_v33 }
  0x37   : > { %1231 = vst [vmem:[#allocation2 + $0x158] sm:$0xff] %v5138_v33 }
  0x38   : > { %1232 = vst [vmem:[#allocation2 + $0x160] sm:$0xf] %v5138_v33 }
  0x39   : > { %4560 = vmatmul.msk.f32.gmra.mxu0 %vm302_vm1, %v270_v21  ;;  %1233 = vst [vmem:[#allocation2 + $0x168] sm:$0xff] %v5138_v33 }
  0x3a   : > { %4568 = vmatmul.msk.f32.gmra.mxu1 %vm302_vm1, %v278_v22  ;;  %1234 = vst [vmem:[#allocation2 + $0x170] sm:$0xff] %v5138_v33 }
  0x3b   : > { %4576 = vmatmul.msk.f32.gmra.mxu2 %vm302_vm1, %v286_v23  ;;  %1235 = vst [vmem:[#allocation2 + $0x178] sm:$0xf] %v5138_v33 }
  0x3c   : > { %4584 = vmatmul.msk.f32.gmra.mxu3 %vm302_vm1, %v294_v24  ;;  %1236 = vst [vmem:[#allocation2 + $0x180] sm:$0xff] %v5138_v33 }
  0x3d   : > { %1237 = vst [vmem:[#allocation2 + $0x188] sm:$0xff] %v5138_v33 }
  0x3e   : > { %1238 = vst [vmem:[#allocation2 + $0x190] sm:$0xf] %v5138_v33 }
  0x3f   : > { %1239 = vst [vmem:[#allocation2 + $0x198] sm:$0xff] %v5138_v33 }
  0x40   : > { %1240 = vst [vmem:[#allocation2 + $0x1a0] sm:$0xff] %v5138_v33 }
  0x41   : > { %4561 = vmatmul.msk.f32.gmra.mxu0 %vm302_vm1, %v271_v25  ;;  %1241 = vst [vmem:[#allocation2 + $0x1a8] sm:$0xf] %v5138_v33 }
  0x42   : > { %4569 = vmatmul.msk.f32.gmra.mxu1 %vm302_vm1, %v279_v26  ;;  %1242 = vst [vmem:[#allocation2 + $0x1b0] sm:$0xff] %v5138_v33 }
  0x43   : > { %4577 = vmatmul.msk.f32.gmra.mxu2 %vm302_vm1, %v287_v27  ;;  %1243 = vst [vmem:[#allocation2 + $0x1b8] sm:$0xff] %v5138_v33 }
  0x44   : > { %4585 = vmatmul.msk.f32.gmra.mxu3 %vm302_vm1, %v295_v28  ;;  %1244 = vst [vmem:[#allocation2 + $0x1c0] sm:$0xf] %v5138_v33 }
  0x45   : > { %1245 = vst [vmem:[#allocation2 + $0x1c8] sm:$0xff] %v5138_v33 }
  0x46   : > { %1246 = vst [vmem:[#allocation2 + $0x1d0] sm:$0xff] %v5138_v33 }
  0x47   : > { %1247 = vst [vmem:[#allocation2 + $0x1d8] sm:$0xf] %v5138_v33 }
  0x49   : > { %4562 = vmatmul.msk.f32.gmra.mxu0 %vm302_vm1, %v272_v29 }
  0x4a   : > { %4570 = vmatmul.msk.f32.gmra.mxu1 %vm302_vm1, %v280_v30 }
  0x4b   : > { %4578 = vmatmul.msk.f32.gmra.mxu2 %vm302_vm1, %v288_v31 }
  0x4c   : > { %4586 = vmatmul.msk.f32.gmra.mxu3 %vm302_vm1, %v296_v32 }
  0x8e   : > { %v420_v36 = vpop.f32.mrf.mxu0 }
  0x8f   : > { %v444_v38 = vpop.f32.mrf.mxu1  ;;  %v5290_v39 = vadd.f32 %v5273_v34, %v420_v36  ;;  %v5402_v36 = vld [vmem:[#allocation2 + $0x21] sm:$0xff] }
  0x90   : > { %v5296_v41 = vadd.f32 %v5273_v34, %v444_v38 }
  0x91   : > { %v4587_v45 = vmul.f32 -1.442695, %v5290_v39 }
  0x92   : > { %v4595_v47 = vmul.f32 -1.442695, %v5296_v41 }
  0x93   : > { %4695 = vpow2.f32 %v4587_v45 }
  0x94   : > { %4697 = vpow2.f32 %v4595_v47 }
  0x96   : > { %v468_v56 = vpop.f32.mrf.mxu2  ;;  %v423_v61 = vpop.f32.mrf.mxu0 }
  0x97   : > { %v492_v57 = vpop.f32.mrf.mxu3  ;;  %v5341_v60 = vadd.f32 %v5273_v34, %v468_v56  ;;  %v5348_v63 = vadd.f32 %v5273_v34, %v423_v61  ;;  %v447_v26 = vpop.f32.mrf.mxu1  ;;  %v5436_v61 = vld [vmem:[#allocation2 + $0x23] sm:$0xff] }
  0x98   : > { %v5345_v62 = vadd.f32 %v5273_v34, %v492_v57  ;;  %v5413_v45 = vadd.f32 %v5273_v34, %v447_v26 }
  0x99   : > { %v4603_v1 = vmul.f32 -1.442695, %v5341_v60  ;;  %v4696_v2 = vpop.eup %4695  ;;  %v4588_v6 = vmul.f32 -1.442695, %v5348_v63 }
  0x9a   : > { %v4611_v3 = vmul.f32 -1.442695, %v5345_v62  ;;  %v4698_v4 = vpop.eup %4697  ;;  %v612_v5 = vadd.f32 1.0, %v4696_v2 }
  0x9b   : > { %4699 = vpow2.f32 %v4603_v1  ;;  %v5359_v7 = vadd.f32 1.0, %v4698_v4  ;;  %v1529_v4 = vmul.f32 %v5306_v44, %v5421_v52 }
  0x9c   : > { %4701 = vpow2.f32 %v4611_v3  ;;  %vm649_vm2 = vweird.f32 %v612_v5  ;;  %v655_v18 = vand.u32 2147483648, %v612_v5  ;;  %v653_v21 = vand.u32 2147483647, %v612_v5 }
  0x9d   : > { %4703 = vrcp.f32 %v612_v5  ;;  %v775_v29 = vand.u32 2147483648, %v5359_v7  ;;  %vm769_vm6 = vweird.f32 %v5359_v7  ;;  %v773_v53 = vand.u32 2147483647, %v5359_v7 }
  0x9e   : > { %4705 = vrcp.f32 %v5359_v7  ;;  %v656_v28 = vor.u32 1.1754944e-38, %v655_v18  ;;  %vm654_vm5 = vcmp.eq.f32.partialorder %v653_v21, 8.507059e+37 }
  0x9f   : > { %4707 = vpow2.f32 %v4588_v6  ;;  %v776_v56 = vor.u32 1.1754944e-38, %v775_v29  ;;  %vm774_vm14 = vcmp.eq.f32.partialorder %v773_v53, 8.507059e+37 }
  0xa1   : > { %v4700_v8 = vpop.eup %4699 }
  0xa2   : > { %v4702_v9 = vpop.eup %4701  ;;  %v5368_v10 = vadd.f32 1.0, %v4700_v8 }
  0xa3   : > { %v4704_v11 = vpop.eup %4703  ;;  %v5371_v12 = vadd.f32 1.0, %v4702_v9 }
  0xa4   : > { %v5373_v13 = vpop.eup %4705  ;;  %v645_v14 = vmul.f32 %v4704_v11, %v612_v5  ;;  %4709 = vrcp.f32 %v5368_v10  ;;  %vm650_vm3 = vweird.f32 %v4704_v11  ;;  %vm889_vm8 = vweird.f32 %v5368_v10 }
  0xa5   : > { %v4708_v15 = vpop.eup %4707  ;;  %v765_v16 = vmul.f32 %v5373_v13, %v5359_v7  ;;  %4711 = vrcp.f32 %v5371_v12  ;;  %vm651_vm4 = vmor %vm649_vm2, %vm650_vm3  ;;  %vm770_vm7 = vweird.f32 %v5373_v13  ;;  %vm1009_vm10 = vweird.f32 %v5371_v12 }
  0xa6   : > { %v646_v17 = vsub.f32 1.0, %v645_v14  ;;  %v5384_v22 = vadd.f32 1.0, %v4708_v15  ;;  %vm5443_vm11 = vmor %vm769_vm6, %vm770_vm7  ;;  %v893_v2 = vand.u32 2147483647, %v5368_v10  ;;  %v895_v3 = vand.u32 2147483648, %v5368_v10 }
  0xa7   : > { %v766_v19 = vsub.f32 1.0, %v765_v16  ;;  %v1015_v7 = vand.u32 2147483648, %v5371_v12  ;;  %v1627_v15 = vmul.f32 %v5320_v50, %v5436_v61 }
  0xa8   : > { %v647_v20 = vmul.f32 %v4704_v11, %v646_v17  ;;  %4713 = vrcp.f32 %v5384_v22  ;;  %vm894_vm0 = vcmp.eq.f32.partialorder %v893_v2, 8.507059e+37  ;;  %v896_v21 = vor.u32 1.1754944e-38, %v895_v3 }
  0xa9   : > { %v767_v25 = vmul.f32 %v5373_v13, %v766_v19  ;;  %vm664_vm2 = vweird.f32 %v5384_v22 }
  0xaa   : > { %v5387_v23 = vpop.eup %4709  ;;  %v648_v24 = vadd.f32 %v4704_v11, %v647_v20  ;;  %v4596_v20 = vmul.f32 -1.442695, %v5413_v45 }
  0xab   : > { %v5392_v27 = vpop.eup %4711  ;;  %v885_v30 = vmul.f32 %v5387_v23, %v5368_v10  ;;  %v768_v48 = vadd.f32 %v5373_v13, %v767_v25  ;;  %vm890_vm9 = vweird.f32 %v5387_v23  ;;  %v5494_v25 = vld [vmem:[%s10456_s3 + $0x5] ss:$0 sm:$0xff] }
  0xac   : > { %v652_v31 = vsel %vm651_vm4, %v4704_v11, %v648_v24  ;;  %v1005_v32 = vmul.f32 %v5392_v27, %v5371_v12  ;;  %vm1010_vm12 = vweird.f32 %v5392_v27  ;;  %vm5465_vm13 = vmor %vm889_vm8, %vm890_vm9  ;;  %v5489_v24 = vld [vmem:[#allocation2 + $0x24] sm:$0xff]  ;;  %4715 = vpow2.f32 %v4596_v20 }
  0xad   : > { %v657_v38 = vsel %vm654_vm5, %v656_v28, %v652_v31  ;;  %v886_v43 = vsub.f32 1.0, %v885_v30  ;;  %v772_v5 = vsel %vm5443_vm11, %v5373_v13, %v768_v48  ;;  %v1013_v13 = vand.u32 2147483647, %v5371_v12  ;;  %vm5479_vm15 = vmor %vm1009_vm10, %vm1010_vm12  ;;  %v5512_v31 = vld [vmem:[%s10456_s3 + $0x7] ss:$0 sm:$0xff] }
  0xae   : > { %v5416_v47 = vmul.f32 %v657_v38, %v5290_v39  ;;  %v1006_v49 = vsub.f32 1.0, %v1005_v32  ;;  %v1431_v39 = vmul.f32 %v5286_v37, %v5402_v36  ;;  %v5428_v58 = vpop.eup %4713  ;;  %v777_v17 = vsel %vm774_vm14, %v776_v56, %v772_v5  ;;  %v5529_v56 = vld [vmem:[%s10456_s3 + $0x6] ss:$0 sm:$0xff] }
  0xaf   : > { %v887_v57 = vmul.f32 %v5387_v23, %v886_v43  ;;  %v660_v8 = vmul.f32 %v5428_v58, %v5384_v22  ;;  %v1016_v12 = vor.u32 1.1754944e-38, %v1015_v7  ;;  %vm5500_vm1 = vcmp.eq.f32.partialorder %v1013_v13, 8.507059e+37 }
  0xb0   : > { %1156 = vst [vmem:[%s5408_s19] sm:$0xff] %v5416_v47  ;;  %v1007_v59 = vmul.f32 %v5392_v27, %v1006_v49  ;;  %v1463_v14 = vadd.f32 %v1431_v39, %v5299_v42  ;;  %v670_v43 = vand.u32 2147483648, %v5384_v22  ;;  %vm665_vm3 = vweird.f32 %v5428_v58 }
  0xb1   : > { %1249 = vst [vmem:[#allocation2 + $0x32] sm:$0xff] %v5416_v47  ;;  %v888_v6 = vadd.f32 %v5387_v23, %v887_v57  ;;  %v661_v16 = vsub.f32 1.0, %v660_v8  ;;  %v1530_v57 = vmul.f32 %v5306_v44, %v5416_v47  ;;  %v2019_v5 = vmul.f32 %v5512_v31, %v5416_v47  ;;  %vm666_vm4 = vmor %vm664_vm2, %vm665_vm3 }
  0xb2   : > { %v1008_v11 = vadd.f32 %v5392_v27, %v1007_v59  ;;  %v1561_v19 = vadd.f32 %v1529_v4, %v1463_v14  ;;  %v668_v59 = vand.u32 2147483647, %v5384_v22  ;;  %v671_v7 = vor.u32 1.1754944e-38, %v670_v43  ;;  %v495_v22 = vpop.f32.mrf.mxu3 }
  0xb3   : > { %v892_v18 = vsel %vm5465_vm13, %v5387_v23, %v888_v6  ;;  %v662_v38 = vmul.f32 %v5428_v58, %v661_v16  ;;  %v5575_v10 = vadd.f32 %v5273_v34, %v495_v22 }
  0xb4   : > { %v1012_v23 = vsel %vm5479_vm15, %v5392_v27, %v1008_v11  ;;  %v1659_v28 = vadd.f32 %v1627_v15, %v1561_v19  ;;  %v5516_v27 = vmul.f32 %v777_v17, %v5296_v41  ;;  %v897_v32 = vsel %vm894_vm0, %v896_v21, %v892_v18 }
  0xb5   : > { %v1725_v41 = vmul.f32 %v5331_v54, %v5489_v24  ;;  %v1017_v39 = vsel %vm5500_vm1, %v1016_v12, %v1012_v23  ;;  %v1140_v4 = vmul.f32 %v897_v32, %v5341_v60  ;;  %v663_v6 = vadd.f32 %v5428_v58, %v662_v38 }
  0xb6   : > { %1164 = vst [vmem:[%s5408_s19 + $0x40] sm:$0xff] %v5516_v27  ;;  %vm669_vm5 = vcmp.eq.f32.partialorder %v668_v59, 8.507059e+37  ;;  %v4612_v21 = vmul.f32 -1.442695, %v5575_v10 }
  0xb7   : > { %v1757_v60 = vadd.f32 %v1725_v41, %v1659_v28  ;;  %1261 = vst [vmem:[#allocation2 + $0x92] sm:$0xff] %v5516_v27  ;;  %v667_v33 = vsel %vm666_vm4, %v5428_v58, %v663_v6  ;;  %v4716_v58 = vpop.eup %4715  ;;  %v1546_v23 = vmul.f32 %v5306_v44, %v1140_v4 }
  0xb8   : > { %v5505_v29 = vld [vmem:[#allocation2 + $0x30] sm:$0xff]  ;;  %1172 = vst [vmem:[%s5408_s19 + $0x80] sm:$0xff] %v1140_v4  ;;  %v672_v13 = vsel %vm669_vm5, %v671_v7, %v667_v33  ;;  %v5578_v18 = vadd.f32 1.0, %v4716_v58 }
  0xb9   : > { %v5507_v30 = vld [vmem:[#allocation2 + $0x31] sm:$0xff]  ;;  %v1334_v48 = vmul.f32 %v5279_v35, %v5505_v29  ;;  %v1823_v53 = vmul.f32 %v5494_v25, %v5505_v29  ;;  %1273 = vst [vmem:[#allocation2 + $0xf2] sm:$0xff] %v1140_v4  ;;  %v5563_v14 = vmul.f32 %v672_v13, %v5348_v63 }
  0xba   : > { %v1432_v49 = vmul.f32 %v5286_v37, %v5507_v30  ;;  %v1921_v3 = vmul.f32 %v5529_v56, %v5507_v30  ;;  %4717 = vrcp.f32 %v5578_v18  ;;  %vm784_vm6 = vweird.f32 %v5578_v18 }
  0xbb   : > { %v1855_v2 = vadd.f32 %v1823_v53, %v5350_v0  ;;  %v5553_v0 = vmul.f32 %v1017_v39, %v5345_v62  ;;  %v471_v62 = vpop.f32.mrf.mxu2  ;;  %1157 = vst [vmem:[%s5408_s19 + $0x8] sm:$0xff] %v5563_v14  ;;  %v1531_v39 = vmul.f32 %v5306_v44, %v5563_v14 }
  0xbc   : > { %v1464_v1 = vadd.f32 %v1432_v49, %v1334_v48  ;;  %1250 = vst [vmem:[#allocation2 + $0x3a] sm:$0xff] %v5563_v14  ;;  %v5572_v15 = vadd.f32 %v5273_v34, %v471_v62  ;;  %v5600_v49 = vld [vmem:[%s10456_s3 + $0x8] ss:$0 sm:$0xff] }
  0xbd   : > { %v1953_v9 = vadd.f32 %v1921_v3, %v1855_v2  ;;  %1180 = vst [vmem:[%s5408_s19 + $0xc0] sm:$0xff] %v5553_v0 }
  0xbe   : > { %v1562_v8 = vadd.f32 %v1530_v57, %v1464_v1  ;;  %1285 = vst [vmem:[#allocation2 + $0x152] sm:$0xff] %v5553_v0  ;;  %v4604_v20 = vmul.f32 -1.442695, %v5572_v15  ;;  %v5615_v1 = vld [vmem:[%s10456_s3 + $0x9] ss:$0 sm:$0xff] }
  0xbf   : > { %v2051_v11 = vadd.f32 %v2019_v5, %v1953_v9 }
  0xc0   : > { %v1316_v16 = vld [vmem:[#allocation2 + $0xf0] sm:$0xff]  ;;  %4719 = vpow2.f32 %v4604_v20  ;;  %v4718_v6 = vpop.eup %4717 }
  0xc1   : > { %v1414_v63 = vld [vmem:[#allocation2 + $0xf1] sm:$0xff]  ;;  %v1350_v17 = vmul.f32 %v5279_v35, %v1316_v16  ;;  %4721 = vpow2.f32 %v4612_v21  ;;  %vm785_vm7 = vweird.f32 %v4718_v6 }
  0xc2   : > { %v1448_v19 = vmul.f32 %v5286_v37, %v1414_v63  ;;  %vm786_vm8 = vmor %vm784_vm6, %vm785_vm7 }
  0xc3   : > { %v5584_v26 = vld [vmem:[#allocation2 + $0x38] sm:$0xff] }
  0xc4   : > { %v1480_v12 = vadd.f32 %v1448_v19, %v1350_v17  ;;  %v5586_v28 = vld [vmem:[#allocation2 + $0x39] sm:$0xff]  ;;  %v1335_v43 = vmul.f32 %v5279_v35, %v5584_v26  ;;  %v1824_v59 = vmul.f32 %v5494_v25, %v5584_v26  ;;  %v2020_v19 = vmul.f32 %v5512_v31, %v5563_v14 }
  0xc5   : > { %v5588_v32 = vld [vmem:[#allocation2 + $0x33] sm:$0xff]  ;;  %v1433_v53 = vmul.f32 %v5286_v37, %v5586_v28  ;;  %v5604_v41 = vld [vmem:[#allocation2 + $0x3b] sm:$0xff]  ;;  %v1922_v13 = vmul.f32 %v5529_v56, %v5586_v28 }
  0xc6   : > { %v5591_v38 = vadd.f32 %v1546_v23, %v1480_v12  ;;  %v5595_v48 = vld [vmem:[#allocation2 + $0x34] sm:$0xff]  ;;  %v1628_v57 = vmul.f32 %v5320_v50, %v5588_v32  ;;  %v2117_v5 = vmul.f32 %v5600_v49, %v5588_v32  ;;  %v1629_v7 = vmul.f32 %v5320_v50, %v5604_v41  ;;  %v5623_v9 = vld [vmem:[#allocation2 + $0x3c] sm:$0xff]  ;;  %v4720_v62 = vpop.eup %4719 }
  0xc7   : > { %v1465_v2 = vadd.f32 %v1433_v53, %v1335_v43  ;;  %v1726_v4 = vmul.f32 %v5331_v54, %v5595_v48  ;;  %v1856_v33 = vadd.f32 %v1824_v59, %v1757_v60  ;;  %v2215_v16 = vmul.f32 %v5615_v1, %v5595_v48  ;;  %v4722_v63 = vpop.eup %4721 }
  0xc8   : > { %v1660_v3 = vadd.f32 %v1628_v57, %v1562_v8  ;;  %v2149_v8 = vadd.f32 %v2117_v5, %v2051_v11  ;;  %v1727_v60 = vmul.f32 %v5331_v54, %v5623_v9  ;;  %v2118_v23 = vmul.f32 %v5600_v49, %v5604_v41 }
  0xc9   : > { %v1563_v22 = vadd.f32 %v1531_v39, %v1465_v2  ;;  %v1954_v17 = vadd.f32 %v1922_v13, %v1856_v33  ;;  %v780_v11 = vmul.f32 %v4718_v6, %v5578_v18  ;;  %v5642_v53 = vadd.f32 1.0, %v4720_v62  ;;  %v426_v62 = vpop.f32.mrf.mxu0 }
  0xca   : > { %v5627_v58 = vadd.f32 %v1726_v4, %v1660_v3  ;;  %v5635_v21 = vadd.f32 %v2215_v16, %v2149_v8  ;;  %v637_v57 = vadd.f32 1.0, %v4722_v63  ;;  %v2216_v59 = vmul.f32 %v5615_v1, %v5623_v9 }
  0xcb   : > { %v1661_v20 = vadd.f32 %v1629_v7, %v1563_v22  ;;  %v2052_v12 = vadd.f32 %v2020_v19, %v1954_v17  ;;  %v781_v2 = vsub.f32 1.0, %v780_v11  ;;  %v788_v3 = vand.u32 2147483647, %v5578_v18  ;;  %v1394_v17 = vld [vmem:[#allocation2 + $0x1] sm:$0xff] }
  0xcc   : > { %v790_v4 = vand.u32 2147483648, %v5578_v18  ;;  %4723 = vrcp.f32 %v5642_v53  ;;  %v1492_v11 = vld [vmem:[#allocation2 + $0x2] sm:$0xff]  ;;  %vm1024_vm10 = vweird.f32 %v637_v57  ;;  %vm904_vm14 = vweird.f32 %v5642_v53 }
  0xcd   : > { %v5640_v43 = vadd.f32 %v1727_v60, %v1661_v20  ;;  %v2150_v39 = vadd.f32 %v2118_v23, %v2052_v12  ;;  %v782_v7 = vmul.f32 %v4718_v6, %v781_v2  ;;  %4725 = vrcp.f32 %v637_v57 }
  0xce   : > { %v791_v13 = vor.u32 1.1754944e-38, %v790_v4  ;;  %vm789_vm9 = vcmp.eq.f32.partialorder %v788_v3, 8.507059e+37  ;;  %v5657_v20 = vadd.f32 %v5273_v34, %v426_v62  ;;  %v1428_v12 = vmul.f32 %v5286_v37, %v1394_v17  ;;  %v1590_v4 = vld [vmem:[#allocation2 + $0x3] sm:$0xff] }
  0xcf   : > { %v5650_v5 = vadd.f32 %v2216_v59, %v2150_v39  ;;  %v783_v33 = vadd.f32 %v4718_v6, %v782_v7  ;;  %v1526_v3 = vmul.f32 %v5306_v44, %v1492_v11  ;;  %v450_v7 = vpop.f32.mrf.mxu1  ;;  %v1624_v17 = vmul.f32 %v5320_v50, %v1590_v4 }
  0xd0   : > { %v4589_v39 = vmul.f32 -1.442695, %v5657_v20  ;;  %v1460_v2 = vadd.f32 %v1428_v12, %v5299_v42  ;;  %v5673_v12 = vadd.f32 %v5273_v34, %v450_v7  ;;  %v474_v7 = vpop.f32.mrf.mxu2 }
  0xd1   : > { %10635 = vst [vmem:[#allocation3_spill] sm:$0xff] %v5650_v5  ;;  %v787_v22 = vsel %vm786_vm8, %v4718_v6, %v783_v33  ;;  %v1030_v33 = vand.u32 2147483648, %v637_v57 }
  0xd2   : > { %v4724_v8 = vpop.eup %4723  ;;  %v792_v16 = vsel %vm789_vm9, %v791_v13, %v787_v22  ;;  %4727 = vpow2.f32 %v4589_v39  ;;  %v1028_v22 = vand.u32 2147483647, %v637_v57  ;;  %v4597_v4 = vmul.f32 -1.442695, %v5673_v12 }
  0xd3   : > { %v4726_v63 = vpop.eup %4725  ;;  %v5653_v18 = vmul.f32 %v792_v16, %v5413_v45  ;;  %v900_v19 = vmul.f32 %v4724_v8, %v5642_v53  ;;  %vm905_vm12 = vweird.f32 %v4724_v8  ;;  %v1558_v16 = vadd.f32 %v1526_v3, %v1460_v2 }
  0xd4   : > { %v1020_v60 = vmul.f32 %v4726_v63, %v637_v57  ;;  %vm1025_vm11 = vweird.f32 %v4726_v63  ;;  %vm906_vm15 = vmor %vm904_vm14, %vm905_vm12  ;;  %v1031_v11 = vor.u32 1.1754944e-38, %v1030_v33  ;;  %vm1029_vm0 = vcmp.eq.f32.partialorder %v1028_v22, 8.507059e+37  ;;  %v1395_v22 = vld [vmem:[#allocation2 + $0x9] sm:$0xff] }
  0xd5   : > { %10636 = vst [vmem:[#allocation4_spill] sm:$0xff] %v5653_v18  ;;  %v901_v6 = vsub.f32 1.0, %v900_v19  ;;  %v910_v19 = vand.u32 2147483648, %v5642_v53  ;;  %vm5668_vm13 = vmor %vm1024_vm10, %vm1025_vm11  ;;  %4729 = vpow2.f32 %v4597_v4 }
  0xd6   : > { %1165 = vst [vmem:[%s5408_s19 + $0x48] sm:$0xff] %v5653_v18  ;;  %v1021_v23 = vsub.f32 1.0, %v1020_v60  ;;  %v1429_v60 = vmul.f32 %v5286_v37, %v1395_v22 }
  0xd7   : > { %1262 = vst [vmem:[#allocation2 + $0x9a] sm:$0xff] %v5653_v18  ;;  %v902_v59 = vmul.f32 %v4724_v8, %v901_v6  ;;  %v1688_v6 = vld [vmem:[#allocation2 + $0x4] sm:$0xff]  ;;  %v911_v3 = vor.u32 1.1754944e-38, %v910_v19 }
  0xd8   : > { %v1022_v45 = vmul.f32 %v4726_v63, %v1021_v23  ;;  %v908_v23 = vand.u32 2147483647, %v5642_v53  ;;  %v4728_v57 = vpop.eup %4727  ;;  %v1722_v2 = vmul.f32 %v5331_v54, %v1688_v6  ;;  %v2017_v6 = vmul.f32 %v5512_v31, %v5310_v46 }
  0xd9   : > { %v903_v13 = vadd.f32 %v4724_v8, %v902_v59  ;;  %v5681_v53 = vadd.f32 1.0, %v4728_v57  ;;  %v1591_v57 = vld [vmem:[#allocation2 + $0xb] sm:$0xff] }
  0xda   : > { %v1023_v62 = vadd.f32 %v4726_v63, %v1022_v45  ;;  %v1656_v45 = vadd.f32 %v1624_v17, %v1558_v16  ;;  %vm909_vm1 = vcmp.eq.f32.partialorder %v908_v23, 8.507059e+37  ;;  %v1919_v17 = vmul.f32 %v5529_v56, %v5292_v40 }
  0xdb   : > { %v907_v39 = vsel %vm906_vm15, %v4724_v8, %v903_v13  ;;  %v5684_v8 = vmul.f32 0.0, %v5494_v25  ;;  %4731 = vrcp.f32 %v5681_v53  ;;  %v1461_v40 = vadd.f32 %v1429_v60, %v5299_v42 }
  0xdc   : > { %v1027_v59 = vsel %vm5668_vm13, %v4726_v63, %v1023_v62  ;;  %v912_v18 = vsel %vm909_vm1, %v911_v3, %v907_v39  ;;  %v1754_v33 = vadd.f32 %v1722_v2, %v1656_v45  ;;  %v5687_v63 = vadd.f32 %v5273_v34, %v474_v7  ;;  %v498_v39 = vpop.f32.mrf.mxu3 }
  0xdd   : > { %v1032_v5 = vsel %vm1029_vm0, %v1031_v11, %v1027_v59  ;;  %v1141_v13 = vmul.f32 %v912_v18, %v5572_v15  ;;  %v4730_v15 = vpop.eup %4729  ;;  %v1493_v18 = vld [vmem:[#allocation2 + $0xa] sm:$0xff]  ;;  %v2115_v59 = vmul.f32 %v5600_v49, %v5323_v51  ;;  %v5721_v51 = vadd.f32 %v5273_v34, %v498_v39 }
  0xde   : > { %v5691_v62 = vmul.f32 %v1032_v5, %v5575_v10  ;;  %v1853_v16 = vadd.f32 %v5684_v8, %v1754_v33  ;;  %v4605_v19 = vmul.f32 -1.442695, %v5687_v63  ;;  %v1527_v23 = vmul.f32 %v5306_v44, %v1493_v18 }
  0xdf   : > { %1173 = vst [vmem:[%s5408_s19 + $0x88] sm:$0xff] %v1141_v13  ;;  %v5709_v11 = vadd.f32 1.0, %v4730_v15  ;;  %v1547_v15 = vmul.f32 %v5306_v44, %v1141_v13  ;;  %vm679_vm2 = vweird.f32 %v5681_v53 }
  0xe0   : > { %10639 = vst [vmem:[#allocation5_spill] sm:$0xff] %v5691_v62  ;;  %v1951_v5 = vadd.f32 %v1919_v17, %v1853_v16  ;;  %4733 = vpow2.f32 %v4605_v19  ;;  %v1559_v16 = vadd.f32 %v1527_v23, %v1461_v40  ;;  %v1625_v17 = vmul.f32 %v5320_v50, %v1591_v57 }
  0xe1   : > { %1274 = vst [vmem:[#allocation2 + $0xfa] sm:$0xff] %v1141_v13  ;;  %v5703_v10 = vpop.eup %4731  ;;  %4735 = vrcp.f32 %v5709_v11  ;;  %v2213_v57 = vmul.f32 %v5615_v1, %v5334_v55  ;;  %v5737_v13 = vld [vmem:[%s10456_s3 + $0xa] ss:$0 sm:$0xff]  ;;  %vm799_vm6 = vweird.f32 %v5709_v11 }
  0xe2   : > { %1181 = vst [vmem:[%s5408_s19 + $0xc8] sm:$0xff] %v5691_v62  ;;  %v675_v4 = vmul.f32 %v5703_v10, %v5681_v53  ;;  %v2049_v7 = vadd.f32 %v2017_v6, %v1951_v5  ;;  %v1689_v6 = vld [vmem:[#allocation2 + $0xc] sm:$0xff]  ;;  %v2311_v55 = vmul.f32 %v5737_v13, %v5505_v29  ;;  %vm680_vm3 = vweird.f32 %v5703_v10  ;;  %v5763_v29 = vld [vmem:[%s10456_s3 + $0xb] ss:$0 sm:$0xff] }
  0xe3   : > { %1286 = vst [vmem:[#allocation2 + $0x15a] sm:$0xff] %v5691_v62  ;;  %vm5777_vm4 = vmor %vm679_vm2, %vm680_vm3 }
  0xe4   : > { %v2147_v23 = vadd.f32 %v2115_v59, %v2049_v7  ;;  %v429_v59 = vpop.f32.mrf.mxu0 }
  0xe6   : > { %v4734_v19 = vpop.eup %4733  ;;  %v2245_v7 = vadd.f32 %v2213_v57, %v2147_v23  ;;  %v1920_v23 = vmul.f32 %v5529_v56, %v5402_v36  ;;  %v2409_v36 = vmul.f32 %v5763_v29, %v5507_v30  ;;  %v805_v30 = vand.u32 2147483648, %v5709_v11 }
  0xe7   : > { %v5732_v39 = vadd.f32 1.0, %v4734_v19  ;;  %v5758_v19 = vadd.f32 %v5273_v34, %v429_v59 }
  0xe8   : > { %v1317_v45 = vld [vmem:[#allocation2 + $0xf8] sm:$0xff] }
  0xe9   : > { %v1415_v2 = vld [vmem:[#allocation2 + $0xf9] sm:$0xff]  ;;  %v1351_v46 = vmul.f32 %v5279_v35, %v1317_v45  ;;  %v676_v45 = vsub.f32 1.0, %v675_v4  ;;  %v4613_v4 = vmul.f32 -1.442695, %v5721_v51  ;;  %4737 = vrcp.f32 %v5732_v39 }
  0xea   : > { %v1610_v3 = vld [vmem:[#allocation2 + $0xf3] sm:$0xff]  ;;  %v1449_v42 = vmul.f32 %v5286_v37, %v1415_v2  ;;  %vm919_vm11 = vweird.f32 %v5732_v39 }
  0xeb   : > { %v1644_v33 = vmul.f32 %v5320_v50, %v1610_v3  ;;  %v1708_v22 = vld [vmem:[#allocation2 + $0xf4] sm:$0xff]  ;;  %v1723_v3 = vmul.f32 %v5331_v54, %v1689_v6  ;;  %4739 = vpow2.f32 %v4613_v4  ;;  %v2343_v4 = vadd.f32 %v2311_v55, %v2245_v7 }
  0xec   : > { %v1481_v60 = vadd.f32 %v1449_v42, %v1351_v46  ;;  %v1742_v5 = vmul.f32 %v5331_v54, %v1708_v22  ;;  %v5741_v46 = vpop.eup %4735  ;;  %v677_v42 = vmul.f32 %v5703_v10, %v676_v45  ;;  %v1538_v45 = vmul.f32 %v5306_v44, %v5516_v27 }
  0xed   : > { %v1676_v18 = vadd.f32 %v1644_v33, %v5591_v38  ;;  %v1657_v38 = vadd.f32 %v1625_v17, %v1559_v16  ;;  %v5750_v33 = vld [vmem:[%s10456_s3 + $0xc] ss:$0 sm:$0xff]  ;;  %v795_v16 = vmul.f32 %v5741_v46, %v5709_v11  ;;  %vm800_vm7 = vweird.f32 %v5741_v46 }
  0xee   : > { %v5726_v2 = vadd.f32 %v1547_v15, %v1481_v60  ;;  %v678_v17 = vadd.f32 %v5703_v10, %v677_v42  ;;  %v685_v60 = vand.u32 2147483648, %v5681_v53  ;;  %v5766_v15 = vld [vmem:[#allocation2 + $0x90] sm:$0xff]  ;;  %v2507_v6 = vmul.f32 %v5750_v33, %v5416_v47  ;;  %vm801_vm8 = vmor %vm799_vm6, %vm800_vm7 }
  0xef   : > { %v5728_v40 = vadd.f32 %v1742_v5, %v1676_v18  ;;  %v1755_v22 = vadd.f32 %v1723_v3, %v1657_v38  ;;  %10640 = vst [vmem:[#allocation6_spill] sm:$0xff] %v5766_v15  ;;  %v5768_v18 = vld [vmem:[#allocation2 + $0x91] sm:$0xff]  ;;  %v683_v5 = vand.u32 2147483647, %v5681_v53  ;;  %v796_v38 = vsub.f32 1.0, %v795_v16  ;;  %v5781_v3 = vpop.eup %4737 }
  0xf0   : > { %10641 = vst [vmem:[#allocation7_spill] sm:$0xff] %v5768_v18  ;;  %v682_v47 = vsel %vm5777_vm4, %v5703_v10, %v678_v17  ;;  %v4590_v53 = vmul.f32 -1.442695, %v5758_v19  ;;  %v1342_v59 = vmul.f32 %v5279_v35, %v5766_v15  ;;  %v1440_v16 = vmul.f32 %v5286_v37, %v5768_v18 }
  0xf1   : > { %v1854_v42 = vadd.f32 %v5684_v8, %v1755_v22  ;;  %v4740_v27 = vpop.eup %4739  ;;  %v686_v62 = vor.u32 1.1754944e-38, %v685_v60  ;;  %v5797_v8 = vld [vmem:[%s10456_s3 + $0xd] ss:$0 sm:$0xff]  ;;  %vm684_vm5 = vcmp.eq.f32.partialorder %v683_v5, 8.507059e+37  ;;  %v803_v10 = vand.u32 2147483647, %v5709_v11 }
  0xf2   : > { %v797_v55 = vmul.f32 %v5741_v46, %v796_v38  ;;  %v915_v22 = vmul.f32 %v5781_v3, %v5732_v39  ;;  %v2441_v17 = vadd.f32 %v2409_v36, %v2343_v4  ;;  %v5809_v5 = vadd.f32 1.0, %v4740_v27  ;;  %v5820_v4 = vld [vmem:[#allocation2 + $0x93] sm:$0xff]  ;;  %v5830_v11 = vld [vmem:[%s10456_s3 + $0xe] ss:$0 sm:$0xff] }
  0xf3   : > { %v687_v7 = vsel %vm684_vm5, %v686_v62, %v682_v47  ;;  %4741 = vpow2.f32 %v4590_v53  ;;  %v1952_v57 = vadd.f32 %v1920_v23, %v1854_v42  ;;  %v2018_v18 = vmul.f32 %v5512_v31, %v5421_v52 }
  0xf4   : > { %v5807_v60 = vmul.f32 %v687_v7, %v5657_v20  ;;  %v798_v62 = vadd.f32 %v5741_v46, %v797_v55  ;;  %v916_v47 = vsub.f32 1.0, %v915_v22  ;;  %v1472_v38 = vadd.f32 %v1440_v16, %v1342_v59  ;;  %v453_v7 = vpop.f32.mrf.mxu1  ;;  %v5843_v22 = vld [vmem:[#allocation2 + $0x94] sm:$0xff] }
  0xf5   : > { %v2605_v15 = vmul.f32 %v5797_v8, %v5588_v32  ;;  %vm804_vm9 = vcmp.eq.f32.partialorder %v803_v10, 8.507059e+37  ;;  %v806_v20 = vor.u32 1.1754944e-38, %v805_v30  ;;  %v925_v42 = vand.u32 2147483648, %v5732_v39 }
  0xf6   : > { %1158 = vst [vmem:[%s5408_s19 + $0x10] sm:$0xff] %v5807_v60  ;;  %v802_v52 = vsel %vm801_vm8, %v5741_v46, %v798_v62  ;;  %v917_v23 = vmul.f32 %v5781_v3, %v916_v47  ;;  %4743 = vrcp.f32 %v5809_v5  ;;  %v2539_v32 = vadd.f32 %v2507_v6, %v2441_v17 }
  0xf7   : > { %1252 = vst [vmem:[#allocation2 + $0x4a] sm:$0xff] %v5807_v60  ;;  %v807_v53 = vsel %vm804_vm9, %v806_v20, %v802_v52  ;;  %vm920_vm10 = vweird.f32 %v5781_v3  ;;  %v923_v27 = vand.u32 2147483647, %v5732_v39  ;;  %v2050_v36 = vadd.f32 %v2018_v18, %v1952_v57 }
  0xf8   : > { %v2116_v46 = vmul.f32 %v5600_v49, %v5436_v61  ;;  %v5837_v59 = vmul.f32 %v807_v53, %v5673_v12  ;;  %v918_v6 = vadd.f32 %v5781_v3, %v917_v23  ;;  %v2637_v10 = vadd.f32 %v2605_v15, %v2539_v32  ;;  %vm921_vm12 = vmor %vm919_vm11, %vm920_vm10 }
  0xf9   : > { %v4742_v16 = vpop.eup %4741  ;;  %v1636_v30 = vmul.f32 %v5320_v50, %v5820_v4  ;;  %v1570_v55 = vadd.f32 %v1538_v45, %v1472_v38  ;;  %v926_v61 = vor.u32 1.1754944e-38, %v925_v42  ;;  %v2703_v12 = vmul.f32 %v5830_v11, %v5595_v48  ;;  %v5863_v48 = vld [vmem:[%s10456_s3 + $0xf] ss:$0 sm:$0xff]  ;;  %v5877_v42 = vld [vmem:[%s10456_s3 + $0x10] ss:$0 sm:$0xff] }
  0xfa   : > { %10644 = vst [vmem:[#allocation8_spill] sm:$0xff] %v5837_v59  ;;  %v922_v15 = vsel %vm921_vm12, %v5781_v3, %v918_v6  ;;  %vm924_vm13 = vcmp.eq.f32.partialorder %v923_v27, 8.507059e+37  ;;  %v5851_v18 = vadd.f32 1.0, %v4742_v16  ;;  %v2148_v39 = vadd.f32 %v2116_v46, %v2050_v36 }
  0xfb   : > { %1166 = vst [vmem:[%s5408_s19 + $0x50] sm:$0xff] %v5837_v59  ;;  %v2214_v45 = vmul.f32 %v5615_v1, %v5489_v24  ;;  %v927_v17 = vsel %vm924_vm13, %v926_v61, %v922_v15  ;;  %v5858_v57 = vadd.f32 %v5273_v34, %v453_v7  ;;  %v2735_v3 = vadd.f32 %v2703_v12, %v2637_v10 }
  0xfc   : > { %1264 = vst [vmem:[#allocation2 + $0xaa] sm:$0xff] %v5837_v59  ;;  %v5853_v50 = vpop.eup %4743  ;;  %v1668_v62 = vadd.f32 %v1636_v30, %v1570_v55  ;;  %v1734_v47 = vmul.f32 %v5331_v54, %v5843_v22  ;;  %v5868_v52 = vmul.f32 %v927_v17, %v5687_v63  ;;  %4745 = vrcp.f32 %v5851_v18 }
  0xfd   : > { %v1532_v54 = vmul.f32 %v5306_v44, %v5807_v60  ;;  %v4598_v36 = vmul.f32 -1.442695, %v5858_v57  ;;  %v5894_v44 = vld [vmem:[%s10456_s3 + $0x11] ss:$0 sm:$0xff]  ;;  %v2021_v7 = vmul.f32 %v5512_v31, %v5807_v60  ;;  %v2509_v55 = vmul.f32 %v5750_v33, %v5807_v60 }
  0xfe   : > { %v1302_v38 = vld [vmem:[#allocation2 + $0x48] sm:$0xff]  ;;  %10645 = vst [vmem:[#allocation9_spill] sm:$0xff] %v5868_v52  ;;  %vm1039_vm14 = vweird.f32 %v5809_v5  ;;  %vm1040_vm15 = vweird.f32 %v5853_v50  ;;  %vm694_vm2 = vweird.f32 %v5851_v18 }
  0xff   : > { %v1400_v20 = vld [vmem:[#allocation2 + $0x49] sm:$0xff]  ;;  %v1336_v24 = vmul.f32 %v5279_v35, %v1302_v38  ;;  %v1825_v23 = vmul.f32 %v5494_v25, %v1302_v38  ;;  %v2313_v32 = vmul.f32 %v5737_v13, %v1302_v38  ;;  %v2801_v63 = vmul.f32 %v5863_v48, %v1302_v38  ;;  %1174 = vst [vmem:[%s5408_s19 + $0x90] sm:$0xff] %v5868_v52  ;;  %vm5965_vm0 = vmor %vm1039_vm14, %vm1040_vm15 }
 0x100   : > { %v1434_v34 = vmul.f32 %v5286_v37, %v1400_v20  ;;  %v1035_v35 = vmul.f32 %v5853_v50, %v5809_v5  ;;  %v1923_v27 = vmul.f32 %v5529_v56, %v1400_v20  ;;  %1276 = vst [vmem:[#allocation2 + $0x10a] sm:$0xff] %v5868_v52  ;;  %v2411_v6 = vmul.f32 %v5763_v29, %v1400_v20 }
 0x101   : > { %v1857_v53 = vadd.f32 %v1825_v23, %v5627_v58  ;;  %v2345_v46 = vadd.f32 %v2313_v32, %v5635_v21  ;;  %v2833_v16 = vadd.f32 %v2801_v63, %v2735_v3  ;;  %v2899_v10 = vmul.f32 %v5877_v42, %v1400_v20 }
 0x102   : > { %v1466_v37 = vadd.f32 %v1434_v34, %v1336_v24  ;;  %v2997_v21 = vmul.f32 %v5894_v44, %v5807_v60  ;;  %v1036_v3 = vsub.f32 1.0, %v1035_v35  ;;  %v5911_v38 = vpop.eup %4745  ;;  %v2246_v20 = vadd.f32 %v2214_v45, %v2148_v39  ;;  %v5923_v60 = vld [vmem:[#allocation2 + $0x150] sm:$0xff] }
 0x103   : > { %v1955_v58 = vadd.f32 %v1923_v27, %v1857_v53  ;;  %v5905_v61 = vld [vmem:[#allocation2 + $0xa8] sm:$0xff]  ;;  %v2443_v12 = vadd.f32 %v2411_v6, %v2345_v46  ;;  %v2931_v15 = vadd.f32 %v2899_v10, %v2833_v16  ;;  %v1766_v24 = vadd.f32 %v1734_v47, %v1668_v62  ;;  %v5925_v35 = vld [vmem:[#allocation2 + $0x151] sm:$0xff]  ;;  %v5947_v16 = vld [vmem:[%s10456_s3] ss:$0 sm:$0xff] }
 0x104   : > { %v5899_v30 = vadd.f32 %v1532_v54, %v1466_v37  ;;  %v5909_v17 = vld [vmem:[#allocation2 + $0xa9] sm:$0xff]  ;;  %v1833_v23 = vmul.f32 %v5494_v25, %v5905_v61  ;;  %v2312_v54 = vmul.f32 %v5737_v13, %v5584_v26  ;;  %4747 = vpow2.f32 %v4598_v36 }
 0x105   : > { %10646 = vst [vmem:[#allocation10_spill] sm:$0xff] %v5909_v17  ;;  %v5913_v34 = vadd.f32 %v2021_v7, %v1955_v58  ;;  %v5919_v32 = vadd.f32 %v2509_v55, %v2443_v12  ;;  %v5921_v63 = vadd.f32 %v2997_v21, %v2931_v15  ;;  %v1931_v39 = vmul.f32 %v5529_v56, %v5909_v17  ;;  %v5954_v58 = vld [vmem:[%s10456_s3 + $0x1] ss:$0 sm:$0xff] }
 0x106   : > { %v1865_v37 = vadd.f32 %v1833_v23, %v1766_v24  ;;  %v1045_v45 = vand.u32 2147483648, %v5809_v5  ;;  %v1037_v47 = vmul.f32 %v5853_v50, %v1036_v3  ;;  %v1043_v53 = vand.u32 2147483647, %v5809_v5  ;;  %v10660_v17 = vld [vmem:[#allocation3_spill] sm:$0xff] }
 0x107   : > { %10647 = vst [vmem:[#allocation11_spill] sm:$0xff] %v5921_v63  ;;  %v5931_v62 = vld [vmem:[#allocation2 + $0x108] sm:$0xff]  ;;  %v690_v27 = vmul.f32 %v5911_v38, %v5851_v18  ;;  %v2029_v46 = vmul.f32 %v5512_v31, %v5837_v59  ;;  %v1358_v10 = vmul.f32 %v5947_v16, %v5923_v60  ;;  %v1456_v7 = vmul.f32 %v5954_v58, %v5925_v35 }
 0x108   : > { %10648 = vst [vmem:[#allocation12_spill] sm:$0xff] %v5931_v62  ;;  %v5933_v26 = vld [vmem:[#allocation2 + $0x109] sm:$0xff]  ;;  %v1963_v36 = vadd.f32 %v1931_v39, %v1865_v37  ;;  %v1841_v6 = vmul.f32 %v5494_v25, %v5931_v62  ;;  %v1046_v3 = vor.u32 1.1754944e-38, %v1045_v45  ;;  %v2344_v23 = vadd.f32 %v2312_v54, %v2246_v20 }
 0x109   : > { %10649 = vst [vmem:[#allocation13_spill] sm:$0xff] %v5933_v26  ;;  %v1939_v15 = vmul.f32 %v5529_v56, %v5933_v26  ;;  %v1038_v37 = vadd.f32 %v5853_v50, %v1037_v47  ;;  %vm1044_vm1 = vcmp.eq.f32.partialorder %v1043_v53, 8.507059e+37  ;;  %v691_v39 = vsub.f32 1.0, %v690_v27  ;;  %v477_v27 = vpop.f32.mrf.mxu2 }
 0x10a   : > { %v5958_v55 = vadd.f32 %v2029_v46, %v1963_v36  ;;  %v1873_v12 = vadd.f32 %v1841_v6, %v5728_v40  ;;  %v4748_v24 = vpop.eup %4747  ;;  %v2410_v36 = vmul.f32 %v5763_v29, %v5586_v28  ;;  %v2037_v46 = vmul.f32 %v5512_v31, %v5868_v52 }
 0x10b   : > { %v1042_v5 = vsel %vm5965_vm0, %v5853_v50, %v1038_v37  ;;  %v692_v20 = vmul.f32 %v5911_v38, %v691_v39  ;;  %vm695_vm3 = vweird.f32 %v5911_v38  ;;  %v700_v54 = vand.u32 2147483648, %v5851_v18 }
 0x10c   : > { %10650 = vst [vmem:[#allocation14_spill] sm:$0xff] %v5958_v55  ;;  %v1971_v40 = vadd.f32 %v1939_v15, %v1873_v12  ;;  %v1047_v28 = vsel %vm1044_vm1, %v1046_v3, %v1042_v5  ;;  %v698_v47 = vand.u32 2147483647, %v5851_v18  ;;  %v5984_v53 = vadd.f32 1.0, %v4748_v24  ;;  %v1618_v12 = vld [vmem:[#allocation2 + $0x153] sm:$0xff]  ;;  %vm696_vm4 = vmor %vm694_vm2, %vm695_vm3 }
 0x10d   : > { %v2442_v6 = vadd.f32 %v2410_v36, %v2344_v23  ;;  %v5987_v15 = vmul.f32 %v1047_v28, %v5721_v51  ;;  %v693_v50 = vadd.f32 %v5911_v38, %v692_v20  ;;  %v1488_v21 = vadd.f32 %v1456_v7, %v1358_v10  ;;  %v6002_v51 = vld [vmem:[%s10455_s2] ss:$0 sm:$0xff]  ;;  %v6017_v18 = vld [vmem:[%s10456_s3 + $0x3] ss:$0 sm:$0xff]  ;;  %v1716_v5 = vld [vmem:[#allocation2 + $0x154] sm:$0xff] }
 0x10e   : > { %v5981_v45 = vadd.f32 %v2037_v46, %v1971_v40  ;;  %4749 = vrcp.f32 %v5984_v53  ;;  %v2508_v37 = vmul.f32 %v5750_v33, %v5563_v14  ;;  %v701_v3 = vor.u32 1.1754944e-38, %v700_v54  ;;  %10654 = vst [vmem:[#allocation16_spill] sm:$0xff] %v6002_v51  ;;  %v6010_v14 = vld [vmem:[%s10456_s3 + $0x2] ss:$0 sm:$0xff]  ;;  %v501_v54 = vpop.f32.mrf.mxu3 }
 0x10f   : > { %10653 = vst [vmem:[#allocation15_spill] sm:$0xff] %v5987_v15  ;;  %v6005_v10 = vadd.f32 %v6002_v51, %v477_v27  ;;  %v1554_v7 = vmul.f32 %v6010_v14, %v5553_v0  ;;  %v1652_v24 = vmul.f32 %v6017_v18, %v1618_v12  ;;  %v697_v23 = vsel %vm696_vm4, %v5911_v38, %v693_v50 }
 0x110   : > { %1182 = vst [vmem:[%s5408_s19 + $0xd0] sm:$0xff] %v5987_v15  ;;  %vm699_vm5 = vcmp.eq.f32.partialorder %v698_v47, 8.507059e+37  ;;  %v2540_v39 = vadd.f32 %v2508_v37, %v2442_v6  ;;  %v2606_v0 = vmul.f32 %v5797_v8, %v5604_v41  ;;  %v6042_v6 = vadd.f32 %v6002_v51, %v501_v54  ;;  %v6050_v37 = vld [vmem:[#allocation2 + $0x98] sm:$0xff] }
 0x111   : > { %1288 = vst [vmem:[#allocation2 + $0x16a] sm:$0xff] %v5987_v15  ;;  %v702_v36 = vsel %vm699_vm5, %v701_v3, %v697_v23  ;;  %v1586_v40 = vadd.f32 %v1554_v7, %v1488_v21  ;;  %v4606_v20 = vmul.f32 -1.442695, %v6005_v10  ;;  %v2704_v12 = vmul.f32 %v5830_v11, %v5623_v9 }
 0x112   : > { %v6023_v46 = vmul.f32 %v702_v36, %v5758_v19  ;;  %v2638_v38 = vadd.f32 %v2606_v0, %v2540_v39  ;;  %v6036_v19 = vld [vmem:[%s10456_s3 + $0x4] ss:$0 sm:$0xff]  ;;  %v6059_v9 = vmul.f32 %v5947_v16, %v6050_v37  ;;  %v2045_v0 = vmul.f32 %v5512_v31, %v5987_v15 }
 0x113   : > { %v1684_v27 = vadd.f32 %v1652_v24, %v1586_v40  ;;  %v1750_v47 = vmul.f32 %v6036_v19, %v1716_v5  ;;  %4751 = vpow2.f32 %v4606_v20  ;;  %v4614_v40 = vmul.f32 -1.442695, %v6042_v6 }
 0x114   : > { %v6028_v28 = vpop.eup %4749  ;;  %1159 = vst [vmem:[%s5408_s19 + $0x18] sm:$0xff] %v6023_v46  ;;  %v2736_v24 = vadd.f32 %v2704_v12, %v2638_v38  ;;  %v2022_v12 = vmul.f32 %v5512_v31, %v6023_v46  ;;  %vm814_vm6 = vweird.f32 %v5984_v53 }
 0x115   : > { %1253 = vst [vmem:[#allocation2 + $0x52] sm:$0xff] %v6023_v46  ;;  %v810_v41 = vmul.f32 %v6028_v28, %v5984_v53  ;;  %v1782_v3 = vadd.f32 %v1750_v47, %v1684_v27  ;;  %v1533_v47 = vmul.f32 %v6010_v14, %v6023_v46  ;;  %4753 = vpow2.f32 %v4614_v40 }
 0x116   : > { %vm815_vm7 = vweird.f32 %v6028_v28 }
 0x117   : > { %v811_v36 = vsub.f32 1.0, %v810_v41  ;;  %vm816_vm8 = vmor %vm814_vm6, %vm815_vm7 }
 0x118   : > { %v6046_v50 = vld [vmem:[#allocation2 + $0x168] sm:$0xff] }
 0x119   : > { %10655 = vst [vmem:[#allocation17_spill] sm:$0xff] %v6046_v50  ;;  %v6048_v21 = vld [vmem:[#allocation2 + $0x169] sm:$0xff]  ;;  %v1849_v7 = vmul.f32 %v5494_v25, %v6046_v50  ;;  %v812_v50 = vmul.f32 %v6028_v28, %v811_v36 }
 0x11a   : > { %10656 = vst [vmem:[#allocation18_spill] sm:$0xff] %v6048_v21  ;;  %v1947_v39 = vmul.f32 %v5529_v56, %v6048_v21 }
 0x11b   : > { %v1881_v23 = vadd.f32 %v1849_v7, %v1782_v3  ;;  %v2510_v3 = vmul.f32 %v5750_v33, %v6023_v46  ;;  %v4752_v7 = vpop.eup %4751 }
 0x11c   : > { %v1303_v27 = vld [vmem:[#allocation2 + $0x50] sm:$0xff]  ;;  %v6099_v36 = vadd.f32 1.0, %v4752_v7 }
 0x11d   : > { %v1979_v54 = vadd.f32 %v1947_v39, %v1881_v23  ;;  %v1401_v38 = vld [vmem:[#allocation2 + $0x51] sm:$0xff]  ;;  %v1337_v63 = vmul.f32 %v5947_v16, %v1303_v27  ;;  %v1826_v52 = vmul.f32 %v5494_v25, %v1303_v27 }
 0x11e   : > { %v6067_v41 = vld [vmem:[#allocation2 + $0x4b] sm:$0xff]  ;;  %v1435_v5 = vmul.f32 %v5954_v58, %v1401_v38  ;;  %v6075_v20 = vld [vmem:[#allocation2 + $0x53] sm:$0xff]  ;;  %v1924_v59 = vmul.f32 %v5529_v56, %v1401_v38  ;;  %4755 = vrcp.f32 %v6099_v36  ;;  %vm934_vm13 = vweird.f32 %v6099_v36 }
 0x11f   : > { %10657 = vst [vmem:[#allocation19_spill] sm:$0xff] %v6075_v20  ;;  %v1630_v23 = vmul.f32 %v6017_v18, %v6067_v41  ;;  %v6079_v39 = vld [vmem:[#allocation2 + $0x4c] sm:$0xff]  ;;  %v6081_v15 = vld [vmem:[#allocation2 + $0x54] sm:$0xff]  ;;  %v6084_v31 = vadd.f32 %v2045_v0, %v1979_v54  ;;  %v1858_v55 = vadd.f32 %v1826_v52, %v5640_v43  ;;  %v1631_v25 = vmul.f32 %v6017_v18, %v6075_v20 }
 0x120   : > { %10658 = vst [vmem:[#allocation20_spill] sm:$0xff] %v6081_v15  ;;  %v1728_v21 = vmul.f32 %v6036_v19, %v6079_v39  ;;  %v1467_v26 = vadd.f32 %v1435_v5, %v1337_v63  ;;  %v1729_v0 = vmul.f32 %v6036_v19, %v6081_v15  ;;  %v2119_v54 = vmul.f32 %v5600_v49, %v6067_v41 }
 0x121   : > { %10659 = vst [vmem:[#allocation21_spill] sm:$0xff] %v6084_v31  ;;  %v1662_v62 = vadd.f32 %v1630_v23, %v5899_v30  ;;  %v1956_v63 = vadd.f32 %v1924_v59, %v1858_v55  ;;  %v2314_v30 = vmul.f32 %v5737_v13, %v1303_v27  ;;  %v2120_v56 = vmul.f32 %v5600_v49, %v6075_v20  ;;  %v4754_v59 = vpop.eup %4753  ;;  %v6113_v55 = vld [vmem:[#allocation2 + $0x99] sm:$0xff] }
 0x122   : > { %v1565_v31 = vadd.f32 %v1533_v47, %v1467_v26  ;;  %v2151_v43 = vadd.f32 %v2119_v54, %v5913_v34  ;;  %v2217_v52 = vmul.f32 %v5615_v1, %v6079_v39  ;;  %v2607_v5 = vmul.f32 %v5797_v8, %v6067_v41 }
 0x123   : > { %v6101_v40 = vadd.f32 %v1728_v21, %v1662_v62  ;;  %v2054_v7 = vadd.f32 %v2022_v12, %v1956_v63  ;;  %v2346_v26 = vadd.f32 %v2314_v30, %v10660_v17  ;;  %v2412_v62 = vmul.f32 %v5763_v29, %v1401_v38 }
 0x124   : > { %v1663_v23 = vadd.f32 %v1631_v25, %v1565_v31  ;;  %v6115_v21 = vadd.f32 %v2217_v52, %v2151_v43  ;;  %v2639_v49 = vadd.f32 %v2607_v5, %v5919_v32  ;;  %v2705_v34 = vmul.f32 %v5830_v11, %v6079_v39 }
 0x125   : > { %v2802_v47 = vmul.f32 %v5863_v48, %v1303_v27  ;;  %v2152_v31 = vadd.f32 %v2120_v56, %v2054_v7  ;;  %v2218_v17 = vmul.f32 %v5615_v1, %v6081_v15  ;;  %v2444_v12 = vadd.f32 %v2412_v62, %v2346_v26 }
 0x126   : > { %v6121_v54 = vadd.f32 %v1729_v0, %v1663_v23  ;;  %v6125_v25 = vadd.f32 %v2705_v34, %v2639_v49  ;;  %v2900_v30 = vmul.f32 %v5877_v42, %v1401_v38  ;;  %v1441_v32 = vmul.f32 %v5954_v58, %v6113_v55 }
 0x127   : > { %v2834_v63 = vadd.f32 %v2802_v47, %v2736_v24  ;;  %v6131_v43 = vadd.f32 %v2218_v17, %v2152_v31  ;;  %v2542_v27 = vadd.f32 %v2510_v3, %v2444_v12  ;;  %v2608_v0 = vmul.f32 %v5797_v8, %v6075_v20  ;;  %v10667_v47 = vld [vmem:[#allocation4_spill] sm:$0xff]  ;;  %v4756_v17 = vpop.eup %4755 }
 0x128   : > { %10661 = vst [vmem:[#allocation3_spill] sm:$0xff] %v6121_v54  ;;  %v2998_v1 = vmul.f32 %v5894_v44, %v6023_v46  ;;  %v813_v52 = vadd.f32 %v6028_v28, %v812_v50  ;;  %v2706_v38 = vmul.f32 %v5830_v11, %v6081_v15  ;;  %v10663_v3 = vand.u32 2147483648, %v5984_v53  ;;  %v4964_v54 = vld [vmem:[#allocation2 + $0xf1] sm:$0xff] }
 0x129   : > { %10662 = vst [vmem:[#allocation22_spill] sm:$0xff] %v6131_v43  ;;  %v2932_v56 = vadd.f32 %v2900_v30, %v2834_v63  ;;  %v2640_v24 = vadd.f32 %v2608_v0, %v2542_v27  ;;  %v639_v23 = vadd.f32 1.0, %v4754_v59  ;;  %v10665_v50 = vand.u32 2147483647, %v5984_v53  ;;  %v6156_v59 = vld [vmem:[#allocation2 + $0x9b] sm:$0xff]  ;;  %v4963_v43 = vld [vmem:[#allocation2 + $0xf0] sm:$0xff] }
 0x12a   : > { %v821_v5 = vor.u32 1.1754944e-38, %v10663_v3  ;;  %v817_v46 = vsel %vm816_vm8, %v6028_v28, %v813_v52  ;;  %v1473_v26 = vadd.f32 %v1441_v32, %v6059_v9  ;;  %v1539_v31 = vmul.f32 %v6010_v14, %v10667_v47  ;;  %v6162_v9 = vld [vmem:[#allocation2 + $0x9c] sm:$0xff]  ;;  %v6173_v52 = vld [vmem:[%s10456_s3 + $0x5] ss:$0 sm:$0xff]  ;;  %v6180_v3 = vld [vmem:[%s10456_s3 + $0x6] ss:$0 sm:$0xff] }
 0x12b   : > { %v6145_v7 = vadd.f32 %v2998_v1, %v2932_v56  ;;  %vm819_vm9 = vcmp.eq.f32.partialorder %v10665_v50, 8.507059e+37  ;;  %v6151_v62 = vadd.f32 %v2706_v38, %v2640_v24  ;;  %4757 = vrcp.f32 %v639_v23  ;;  %v432_v50 = vpop.f32.mrf.mxu0  ;;  %v6187_v47 = vld [vmem:[%s10456_s3 + $0x7] ss:$0 sm:$0xff]  ;;  %v10703_v15 = vld [vmem:[#allocation5_spill] sm:$0xff] }
 0x12c   : > { %v822_v49 = vsel %vm819_vm9, %v821_v5, %v817_v46  ;;  %v1571_v12 = vadd.f32 %v1539_v31, %v1473_v26  ;;  %v1637_v53 = vmul.f32 %v6017_v18, %v6156_v59  ;;  %v930_v28 = vmul.f32 %v4756_v17, %v6099_v36 }
 0x12d   : > { %10664 = vst [vmem:[#allocation23_spill] sm:$0xff] %v6145_v7  ;;  %v1135_v34 = vmul.f32 %v822_v49, %v5858_v57  ;;  %v1735_v57 = vmul.f32 %v6036_v19, %v6162_v9  ;;  %vm935_vm10 = vweird.f32 %v4756_v17  ;;  %vm1054_vm11 = vweird.f32 %v639_v23  ;;  %v6368_v7 = vld [vmem:[%s10456_s3 + $0x9] ss:$0 sm:$0xff] }
 0x12e   : > { %10666 = vst [vmem:[#allocation24_spill] sm:$0xff] %v6151_v62  ;;  %v1669_v30 = vadd.f32 %v1637_v53, %v1571_v12  ;;  %v931_v32 = vsub.f32 1.0, %v930_v28  ;;  %v940_v12 = vand.u32 2147483648, %v6099_v36  ;;  %v6192_v53 = vadd.f32 %v6002_v51, %v432_v50  ;;  %vm936_vm14 = vmor %vm934_vm13, %vm935_vm10 }
 0x12f   : > { %1167 = vst [vmem:[%s5408_s19 + $0x58] sm:$0xff] %v1135_v34  ;;  %v2030_v31 = vmul.f32 %v6187_v47, %v1135_v34 }
 0x130   : > { %1265 = vst [vmem:[#allocation2 + $0xb2] sm:$0xff] %v1135_v34  ;;  %v1767_v1 = vadd.f32 %v1735_v57, %v1669_v30  ;;  %v932_v46 = vmul.f32 %v4756_v17, %v931_v32  ;;  %v938_v57 = vand.u32 2147483647, %v6099_v36  ;;  %v941_v34 = vor.u32 1.1754944e-38, %v940_v12  ;;  %v6209_v36 = vld [vmem:[%s10456_s3 + $0x16] ss:$0 sm:$0xff] }
 0x131   : > { %v4758_v63 = vpop.eup %4757  ;;  %v6216_v12 = vld [vmem:[#allocation2 + $0xfb] sm:$0xff] }
 0x132   : > { %v1050_v56 = vmul.f32 %v4758_v63, %v639_v23  ;;  %v933_v30 = vadd.f32 %v4756_v17, %v932_v46  ;;  %vm1055_vm12 = vweird.f32 %v4758_v63  ;;  %vm939_vm15 = vcmp.eq.f32.partialorder %v938_v57, 8.507059e+37  ;;  %v456_v46 = vpop.f32.mrf.mxu1 }
 0x133   : > { %vm6199_vm0 = vmor %vm1054_vm11, %vm1055_vm12 }
 0x134   : > { %v1051_v26 = vsub.f32 1.0, %v1050_v56  ;;  %v1060_v56 = vand.u32 2147483648, %v639_v23 }
 0x136   : > { %v1052_v32 = vmul.f32 %v4758_v63, %v1051_v26 }
 0x137   : > { %v6166_v27 = vld [vmem:[#allocation2 + $0xb0] sm:$0xff] }
 0x138   : > { %10668 = vst [vmem:[#allocation4_spill] sm:$0xff] %v6166_v27  ;;  %v6168_v0 = vld [vmem:[#allocation2 + $0xb1] sm:$0xff]  ;;  %v1834_v24 = vmul.f32 %v6173_v52, %v6166_v27  ;;  %v1053_v26 = vadd.f32 %v4758_v63, %v1052_v32  ;;  %v4960_v32 = vld [vmem:[%s5408_s19 + $0x40] sm:$0xff] }
 0x139   : > { %10669 = vst [vmem:[#allocation25_spill] sm:$0xff] %v6168_v0  ;;  %v1932_v5 = vmul.f32 %v6180_v3, %v6168_v0  ;;  %v6356_v0 = vld [vmem:[#allocation2 + $0x15b] sm:$0xff] }
 0x13a   : > { %v1866_v38 = vadd.f32 %v1834_v24, %v1767_v1  ;;  %v1058_v1 = vand.u32 2147483647, %v639_v23  ;;  %v4591_v24 = vmul.f32 -1.442695, %v6192_v53  ;;  %v1057_v23 = vsel %vm6199_vm0, %v4758_v63, %v1053_v26  ;;  %10706 = vst [vmem:[#allocation54_spill] sm:$0xff] %v6356_v0 }
 0x13b   : > { %v6227_v63 = vmul.f32 %v4960_v32, %v6187_v47 }
 0x13c   : > { %v1964_v49 = vadd.f32 %v1932_v5, %v1866_v38  ;;  %v937_v38 = vsel %vm936_vm14, %v4756_v17, %v933_v30  ;;  %vm1059_vm1 = vcmp.eq.f32.partialorder %v1058_v1, 8.507059e+37  ;;  %4759 = vpow2.f32 %v4591_v24  ;;  %v6222_v30 = vld [vmem:[#allocation2 + $0x159] sm:$0xff] }
 0x13d   : > { %v942_v50 = vsel %vm939_vm15, %v941_v34, %v937_v38  ;;  %v6214_v17 = vadd.f32 %v6002_v51, %v456_v46  ;;  %10674 = vst [vmem:[#allocation28_spill] sm:$0xff] %v6222_v30  ;;  %v6236_v34 = vmul.f32 %v4960_v32, %v5894_v44  ;;  %v6239_v24 = vmul.f32 %v4960_v32, %v6209_v36  ;;  %v4961_v46 = vld [vmem:[%s5408_s19 + $0x80] sm:$0xff] }
 0x13e   : > { %v6194_v28 = vadd.f32 %v2030_v31, %v1964_v49  ;;  %v1061_v49 = vor.u32 1.1754944e-38, %v1060_v56  ;;  %v6204_v31 = vmul.f32 %v942_v50, %v6005_v10  ;;  %v6220_v10 = vld [vmem:[#allocation2 + $0x158] sm:$0xff]  ;;  %10675 = vst [vmem:[#allocation29_spill] sm:$0xff] %v6227_v63  ;;  %v6230_v56 = vmul.f32 %v4960_v32, %v5750_v33  ;;  %v6262_v32 = vld [vmem:[%s10456_s3 + $0x14] ss:$0 sm:$0xff] }
 0x13f   : > { %10673 = vst [vmem:[#allocation27_spill] sm:$0xff] %v6220_v10  ;;  %v1645_v38 = vmul.f32 %v6017_v18, %v6216_v12  ;;  %v4599_v5 = vmul.f32 -1.442695, %v6214_v17  ;;  %v6246_v50 = vmul.f32 %v4961_v46, %v6187_v47  ;;  %v6249_v26 = vmul.f32 %v4961_v46, %v5750_v33  ;;  %v10686_v63 = vld [vmem:[#allocation6_spill] sm:$0xff] }
 0x140   : > { %10670 = vst [vmem:[#allocation26_spill] sm:$0xff] %v6194_v28  ;;  %v1062_v57 = vsel %vm1059_vm1, %v1061_v49, %v1057_v23  ;;  %v1359_v49 = vmul.f32 %v5947_v16, %v6220_v10  ;;  %v1457_v23 = vmul.f32 %v5954_v58, %v6222_v30  ;;  %v6278_v28 = vmul.f32 %v6173_v52, %v10686_v63  ;;  %v6283_v30 = vld [vmem:[%s10456_s3 + $0x15] ss:$0 sm:$0xff] }
 0x141   : > { %1175 = vst [vmem:[%s5408_s19 + $0x98] sm:$0xff] %v6204_v31  ;;  %v6233_v1 = vmul.f32 %v1062_v57, %v6042_v6  ;;  %v6251_v6 = vld [vmem:[#allocation2 + $0xfc] sm:$0xff]  ;;  %4761 = vpow2.f32 %v4599_v5  ;;  %v6324_v5 = vmul.f32 %v6262_v32, %v10686_v63 }
 0x142   : > { %1277 = vst [vmem:[#allocation2 + $0x112] sm:$0xff] %v6204_v31  ;;  %v4760_v57 = vpop.eup %4759 }
 0x143   : > { %10676 = vst [vmem:[#allocation30_spill] sm:$0xff] %v6230_v56  ;;  %v1677_v56 = vadd.f32 %v1645_v38, %v5726_v2  ;;  %v10692_v2 = vld [vmem:[#allocation7_spill] sm:$0xff]  ;;  %v6316_v62 = vadd.f32 1.0, %v4760_v57  ;;  %v6333_v57 = vmul.f32 %v4963_v43, %v6173_v52 }
 0x144   : > { %10677 = vst [vmem:[#allocation31_spill] sm:$0xff] %v6236_v34  ;;  %v6296_v38 = vmul.f32 %v6180_v3, %v10692_v2 }
 0x145   : > { %10678 = vst [vmem:[#allocation32_spill] sm:$0xff] %v6239_v24  ;;  %v4962_v24 = vld [vmem:[%s5408_s19 + $0xc0] sm:$0xff]  ;;  %4763 = vrcp.f32 %v6316_v62  ;;  %vm709_vm2 = vweird.f32 %v6316_v62 }
 0x146   : > { %10679 = vst [vmem:[#allocation33_spill] sm:$0xff] %v6246_v50  ;;  %v6265_v50 = vmul.f32 %v4961_v46, %v5894_v44  ;;  %v6272_v34 = vmul.f32 %v4962_v24, %v6187_v47 }
 0x147   : > { %10680 = vst [vmem:[#allocation34_spill] sm:$0xff] %v6249_v26  ;;  %v6268_v26 = vmul.f32 %v4961_v46, %v6209_v36  ;;  %v6286_v46 = vmul.f32 %v4962_v24, %v5750_v33 }
 0x148   : > { %10681 = vst [vmem:[#allocation35_spill] sm:$0xff] %v6251_v6 }
 0x149   : > { %1183 = vst [vmem:[%s5408_s19 + $0xd8] sm:$0xff] %v6233_v1  ;;  %v6314_v10 = vld [vmem:[#allocation2 + $0x10b] sm:$0xff] }
 0x14a   : > { %10682 = vst [vmem:[#allocation36_spill] sm:$0xff] %v6262_v32 }
 0x14b   : > { %10683 = vst [vmem:[#allocation37_spill] sm:$0xff] %v6265_v50  ;;  %v6300_v50 = vmul.f32 %v5737_v13, %v10686_v63 }
 0x14c   : > { %10684 = vst [vmem:[#allocation38_spill] sm:$0xff] %v6268_v26  ;;  %v6289_v26 = vmul.f32 %v4962_v24, %v5894_v44 }
 0x14d   : > { %10685 = vst [vmem:[#allocation39_spill] sm:$0xff] %v6272_v34  ;;  %v6292_v34 = vmul.f32 %v4962_v24, %v6209_v36  ;;  %v6310_v24 = vmul.f32 %v5863_v48, %v10686_v63  ;;  %v1555_v63 = vmul.f32 %v6010_v14, %v10703_v15 }
 0x14e   : > { %1289 = vst [vmem:[#allocation2 + $0x172] sm:$0xff] %v6233_v1 }
 0x14f   : > { %10687 = vst [vmem:[#allocation6_spill] sm:$0xff] %v6278_v28  ;;  %v1743_v28 = vmul.f32 %v6036_v19, %v6251_v6 }
 0x150   : > { %10688 = vst [vmem:[#allocation40_spill] sm:$0xff] %v6283_v30 }
 0x151   : > { %10689 = vst [vmem:[#allocation41_spill] sm:$0xff] %v6286_v46  ;;  %v6306_v46 = vmul.f32 %v5763_v29, %v10692_v2 }
 0x152   : > { %10690 = vst [vmem:[#allocation42_spill] sm:$0xff] %v6289_v26  ;;  %v6312_v26 = vld [vmem:[#allocation2 + $0x110] sm:$0xff] }
 0x153   : > { %10691 = vst [vmem:[#allocation43_spill] sm:$0xff] %v6292_v34  ;;  %v1489_v34 = vadd.f32 %v1457_v23, %v1359_v49  ;;  %v480_v49 = vpop.f32.mrf.mxu2  ;;  %v6330_v23 = vmul.f32 %v6283_v30, %v10692_v2 }
 0x154   : > { %10693 = vst [vmem:[#allocation7_spill] sm:$0xff] %v6296_v38  ;;  %v1417_v38 = vld [vmem:[#allocation2 + $0x111] sm:$0xff] }
 0x155   : > { %10694 = vst [vmem:[#allocation44_spill] sm:$0xff] %v6300_v50  ;;  %v6320_v50 = vmul.f32 %v5877_v42, %v10692_v2  ;;  %v1940_v2 = vmul.f32 %v6180_v3, %v1417_v38  ;;  %v1587_v15 = vadd.f32 %v1555_v63, %v1489_v34  ;;  %v4762_v38 = vpop.eup %4761  ;;  %v6373_v63 = vmul.f32 %v4963_v43, %v5863_v48 }
 0x156   : > { %10695 = vst [vmem:[#allocation45_spill] sm:$0xff] %v6306_v46  ;;  %v1775_v46 = vadd.f32 %v1743_v28, %v1677_v56  ;;  %v6340_v28 = vld [vmem:[#allocation2 + $0x10c] sm:$0xff]  ;;  %v6343_v56 = vmul.f32 %v4963_v43, %v5737_v13 }
 0x157   : > { %10696 = vst [vmem:[#allocation46_spill] sm:$0xff] %v6310_v24  ;;  %v1842_v24 = vmul.f32 %v6173_v52, %v6312_v26  ;;  %v2233_v34 = vmul.f32 %v6368_v7, %v6340_v28 }
 0x158   : > { %10697 = vst [vmem:[#allocation47_spill] sm:$0xff] %v6312_v26  ;;  %v6354_v26 = vmul.f32 %v4964_v54, %v5763_v29 }
 0x159   : > { %10698 = vst [vmem:[#allocation48_spill] sm:$0xff] %v6320_v50  ;;  %v6336_v50 = vmul.f32 %v4964_v54, %v6180_v3 }
 0x15a   : > { %10699 = vst [vmem:[#allocation49_spill] sm:$0xff] %v6324_v5  ;;  %v1874_v5 = vadd.f32 %v1842_v24, %v1775_v46  ;;  %v6360_v46 = vadd.f32 %v6002_v51, %v480_v49  ;;  %v6376_v49 = vmul.f32 %v4964_v54, %v5877_v42 }
 0x15b   : > { %10700 = vst [vmem:[#allocation50_spill] sm:$0xff] %v6330_v23  ;;  %v6349_v23 = vld [vmem:[%s10456_s3 + $0x8] ss:$0 sm:$0xff] }
 0x15c   : > { %10701 = vst [vmem:[#allocation51_spill] sm:$0xff] %v6333_v57  ;;  %v2135_v57 = vmul.f32 %v6349_v23, %v6314_v10  ;;  %v1972_v24 = vadd.f32 %v1940_v2, %v1874_v5  ;;  %v6379_v5 = vmul.f32 %v4963_v43, %v6262_v32  ;;  %v6399_v43 = vmul.f32 %v6180_v3, %v5925_v35 }
 0x15d   : > { %10702 = vst [vmem:[#allocation52_spill] sm:$0xff] %v6336_v50  ;;  %v504_v50 = vpop.f32.mrf.mxu3 }
 0x15e   : > { %10704 = vst [vmem:[#allocation5_spill] sm:$0xff] %v6343_v56  ;;  %v2038_v56 = vmul.f32 %v6187_v47, %v6204_v31  ;;  %v2167_v27 = vadd.f32 %v2135_v57, %v5981_v45  ;;  %v6382_v31 = vadd.f32 %v6002_v51, %v504_v50  ;;  %v6385_v45 = vmul.f32 %v4964_v54, %v6283_v30  ;;  %v6405_v50 = vld [vmem:[#allocation2 + $0x15c] sm:$0xff] }
 0x15f   : > { %10705 = vst [vmem:[#allocation53_spill] sm:$0xff] %v6354_v26  ;;  %v1653_v57 = vmul.f32 %v6017_v18, %v6356_v0  ;;  %v6403_v54 = vmul.f32 %v5737_v13, %v5923_v60 }
 0x160   : > { %10707 = vst [vmem:[#allocation55_spill] sm:$0xff] %v6373_v63  ;;  %v6389_v2 = vadd.f32 %v2038_v56, %v1972_v24  ;;  %v6391_v26 = vadd.f32 %v2233_v34, %v2167_v27  ;;  %v6411_v27 = vmul.f32 %v5763_v29, %v5925_v35  ;;  %v6415_v56 = vmul.f32 %v5863_v48, %v5923_v60  ;;  %v1425_v63 = vld [vmem:[#allocation2 + $0x171] sm:$0xff] }
 0x161   : > { %10708 = vst [vmem:[#allocation56_spill] sm:$0xff] %v6376_v49  ;;  %v6395_v49 = vmul.f32 %v6173_v52, %v5923_v60  ;;  %v1685_v24 = vadd.f32 %v1653_v57, %v1587_v15  ;;  %v4607_v34 = vmul.f32 -1.442695, %v6360_v46  ;;  %v4967_v15 = vld [vmem:[%s5408_s19 + $0x48] sm:$0xff] }
 0x162   : > { %10709 = vst [vmem:[#allocation57_spill] sm:$0xff] %v6379_v5  ;;  %v6435_v57 = vmul.f32 %v4967_v15, %v6187_v47  ;;  %v6438_v5 = vmul.f32 %v4967_v15, %v5750_v33  ;;  %v6459_v33 = vmul.f32 %v6349_v23, %v5820_v4 }
 0x163   : > { %10710 = vst [vmem:[#allocation58_spill] sm:$0xff] %v6385_v45  ;;  %v6407_v45 = vadd.f32 1.0, %v4762_v38  ;;  %v6426_v38 = vmul.f32 %v6262_v32, %v5923_v60  ;;  %v1751_v60 = vmul.f32 %v6036_v19, %v6405_v50 }
 0x164   : > { %10711 = vst [vmem:[#allocation59_spill] sm:$0xff] %v6389_v2  ;;  %v10767_v2 = vld [vmem:[#allocation18_spill] sm:$0xff] }
 0x165   : > { %10712 = vst [vmem:[#allocation60_spill] sm:$0xff] %v6391_v26  ;;  %4765 = vrcp.f32 %v6407_v45  ;;  %vm829_vm6 = vweird.f32 %v6407_v45 }
 0x166   : > { %10713 = vst [vmem:[#allocation61_spill] sm:$0xff] %v6395_v49  ;;  %v1327_v49 = vld [vmem:[#allocation2 + $0x170] sm:$0xff]  ;;  %4767 = vpow2.f32 %v4607_v34 }
 0x167   : > { %10714 = vst [vmem:[#allocation62_spill] sm:$0xff] %v6399_v43  ;;  %v6418_v43 = vpop.eup %4763 }
 0x168   : > { %10715 = vst [vmem:[#allocation63_spill] sm:$0xff] %v6403_v54  ;;  %v6422_v54 = vmul.f32 %v5877_v42, %v5925_v35  ;;  %vm710_vm3 = vweird.f32 %v6418_v43 }
 0x169   : > { %10716 = vst [vmem:[#allocation64_spill] sm:$0xff] %v6405_v50  ;;  %vm711_vm4 = vmor %vm709_vm2, %vm710_vm3  ;;  %v6677_v50 = vmul.f32 %v5954_v58, %v10767_v2 }
 0x16a   : > { %10717 = vst [vmem:[#allocation65_spill] sm:$0xff] %v6411_v27  ;;  %v6430_v27 = vmul.f32 %v6283_v30, %v5925_v35  ;;  %v6447_v35 = vmul.f32 %v6173_v52, %v6050_v37 }
 0x16b   : > { %10718 = vst [vmem:[#allocation66_spill] sm:$0xff] %v6415_v56  ;;  %v4615_v56 = vmul.f32 -1.442695, %v6382_v31 }
 0x16c   : > { %10719 = vst [vmem:[#allocation67_spill] sm:$0xff] %v6422_v54  ;;  %v6441_v54 = vmul.f32 %v4967_v15, %v5894_v44 }
 0x16d   : > { %10720 = vst [vmem:[#allocation68_spill] sm:$0xff] %v6426_v38  ;;  %v6454_v38 = vmul.f32 %v4967_v15, %v6209_v36  ;;  %v6473_v15 = vld [vmem:[%s10456_s3 + $0x12] ss:$0 sm:$0xff]  ;;  %4769 = vpow2.f32 %v4615_v56  ;;  %v6496_v56 = vmul.f32 %v5797_v8, %v6156_v59 }
 0x16e   : > { %10721 = vst [vmem:[#allocation69_spill] sm:$0xff] %v6430_v27  ;;  %v6451_v27 = vmul.f32 %v6180_v3, %v6113_v55 }
 0x16f   : > { %10722 = vst [vmem:[#allocation70_spill] sm:$0xff] %v6435_v57  ;;  %v6464_v57 = vmul.f32 %v6349_v23, %v6156_v59 }
 0x170   : > { %10723 = vst [vmem:[#allocation71_spill] sm:$0xff] %v6438_v5  ;;  %v1850_v5 = vmul.f32 %v6173_v52, %v1327_v49  ;;  %v6479_v49 = vmul.f32 %v6368_v7, %v6162_v9 }
 0x171   : > { %10724 = vst [vmem:[#allocation72_spill] sm:$0xff] %v6441_v54  ;;  %v1783_v54 = vadd.f32 %v1751_v60, %v1685_v24  ;;  %v6483_v24 = vmul.f32 %v5737_v13, %v6050_v37  ;;  %v1948_v60 = vmul.f32 %v6180_v3, %v1425_v63  ;;  %v6505_v13 = vld [vmem:[%s10456_s3 + $0x13] ss:$0 sm:$0xff]  ;;  %v435_v63 = vpop.f32.mrf.mxu0 }
 0x172   : > { %10725 = vst [vmem:[#allocation73_spill] sm:$0xff] %v6447_v35 }
 0x173   : > { %10726 = vst [vmem:[#allocation74_spill] sm:$0xff] %v6451_v27  ;;  %v6468_v27 = vmul.f32 %v6368_v7, %v5843_v22  ;;  %v1882_v34 = vadd.f32 %v1850_v5, %v1783_v54  ;;  %v6513_v5 = vmul.f32 %v5863_v48, %v6050_v37 }
 0x174   : > { %10727 = vst [vmem:[#allocation75_spill] sm:$0xff] %v6454_v38  ;;  %v705_v38 = vmul.f32 %v6418_v43, %v6316_v62 }
 0x175   : > { %10728 = vst [vmem:[#allocation76_spill] sm:$0xff] %v6459_v33  ;;  %v1980_v54 = vadd.f32 %v1948_v60, %v1882_v34  ;;  %v1344_v34 = vmul.f32 %v5947_v16, %v5905_v61  ;;  %v6555_v61 = vmul.f32 %v6262_v32, %v6050_v37 }
 0x176   : > { %10729 = vst [vmem:[#allocation77_spill] sm:$0xff] %v6464_v57  ;;  %v6488_v57 = vmul.f32 %v5763_v29, %v6113_v55  ;;  %v6509_v29 = vmul.f32 %v5830_v11, %v6162_v9 }
 0x177   : > { %10730 = vst [vmem:[#allocation78_spill] sm:$0xff] %v6468_v27  ;;  %v6492_v27 = vmul.f32 %v5797_v8, %v5820_v4  ;;  %v6518_v8 = vld [vmem:[%s10456_s3 + $0x17] ss:$0 sm:$0xff] }
 0x178   : > { %10731 = vst [vmem:[#allocation79_spill] sm:$0xff] %v6479_v49  ;;  %v6500_v49 = vmul.f32 %v5830_v11, %v5843_v22  ;;  %v6530_v11 = vmul.f32 %v6473_v15, %v5820_v4 }
 0x179   : > { %10732 = vst [vmem:[#allocation80_spill] sm:$0xff] %v6483_v24 }
 0x17a   : > { %10733 = vst [vmem:[#allocation81_spill] sm:$0xff] %v6488_v57 }
 0x17b   : > { %10734 = vst [vmem:[#allocation82_spill] sm:$0xff] %v6492_v27  ;;  %v6526_v27 = vmul.f32 %v5877_v42, %v6113_v55 }
 0x17c   : > { %10735 = vst [vmem:[#allocation83_spill] sm:$0xff] %v6496_v56  ;;  %v2046_v56 = vmul.f32 %v6187_v47, %v6233_v1  ;;  %v10743_v1 = vld [vmem:[#allocation10_spill] sm:$0xff] }
 0x17d   : > { %10736 = vst [vmem:[#allocation84_spill] sm:$0xff] %v6500_v49  ;;  %v6522_v49 = vpop.eup %4765  ;;  %v1442_v60 = vmul.f32 %v5954_v58, %v10743_v1 }
 0x17e   : > { %10737 = vst [vmem:[#allocation85_spill] sm:$0xff] %v6509_v29  ;;  %v6534_v29 = vmul.f32 %v6473_v15, %v6156_v59  ;;  %v4768_v57 = vpop.eup %4767  ;;  %v6540_v24 = vadd.f32 %v2046_v56, %v1980_v54  ;;  %v6559_v56 = vmul.f32 %v6283_v30, %v6113_v55  ;;  %v10751_v54 = vld [vmem:[#allocation8_spill] sm:$0xff]  ;;  %v825_v37 = vmul.f32 %v6522_v49, %v6407_v45 }
 0x17f   : > { %10738 = vst [vmem:[#allocation86_spill] sm:$0xff] %v6513_v5  ;;  %v706_v5 = vsub.f32 1.0, %v705_v38  ;;  %v4770_v33 = vpop.eup %4769  ;;  %v6551_v38 = vmul.f32 %v6505_v13, %v6162_v9  ;;  %v1540_v1 = vmul.f32 %v6010_v14, %v10751_v54  ;;  %v1474_v55 = vadd.f32 %v1442_v60, %v1344_v34  ;;  %v6715_v30 = vld [vmem:[%s10456_s3 + $0xa] ss:$0 sm:$0xff] }
 0x180   : > { %10739 = vst [vmem:[#allocation87_spill] sm:$0xff] %v6518_v8  ;;  %v835_v60 = vand.u32 2147483648, %v6407_v45  ;;  %vm830_vm7 = vweird.f32 %v6522_v49 }
 0x181   : > { %10740 = vst [vmem:[#allocation88_spill] sm:$0xff] %v6526_v27  ;;  %v6543_v27 = vadd.f32 %v6002_v51, %v435_v63  ;;  %v6563_v63 = vmul.f32 %v6518_v8, %v5820_v4  ;;  %v707_v35 = vmul.f32 %v6418_v43, %v706_v5  ;;  %v6574_v4 = vadd.f32 1.0, %v4768_v57  ;;  %vm831_vm8 = vmor %vm829_vm6, %vm830_vm7 }
 0x182   : > { %10741 = vst [vmem:[#allocation89_spill] sm:$0xff] %v6530_v11  ;;  %v6547_v11 = vmul.f32 %v6505_v13, %v5843_v22 }
 0x183   : > { %10742 = vst [vmem:[#allocation90_spill] sm:$0xff] %v6534_v29  ;;  %v1604_v29 = vld [vmem:[#allocation2 + $0xab] sm:$0xff]  ;;  %v4592_v54 = vmul.f32 -1.442695, %v6543_v27  ;;  %4771 = vrcp.f32 %v6574_v4  ;;  %vm949_vm10 = vweird.f32 %v6574_v4 }
 0x184   : > { %10744 = vst [vmem:[#allocation10_spill] sm:$0xff] %v6540_v24  ;;  %v1638_v5 = vmul.f32 %v6017_v18, %v1604_v29  ;;  %v826_v24 = vsub.f32 1.0, %v825_v37  ;;  %v4968_v37 = vld [vmem:[%s5408_s19 + $0x88] sm:$0xff] }
 0x185   : > { %10745 = vst [vmem:[#allocation91_spill] sm:$0xff] %v6543_v27 }
 0x186   : > { %10746 = vst [vmem:[#allocation92_spill] sm:$0xff] %v6547_v11  ;;  %v713_v11 = vand.u32 2147483647, %v6316_v62  ;;  %v827_v34 = vmul.f32 %v6522_v49, %v826_v24 }
 0x187   : > { %10747 = vst [vmem:[#allocation93_spill] sm:$0xff] %v6551_v38  ;;  %v715_v38 = vand.u32 2147483648, %v6316_v62  ;;  %v2127_v62 = vmul.f32 %v6349_v23, %v1604_v29 }
 0x188   : > { %10748 = vst [vmem:[#allocation94_spill] sm:$0xff] %v6555_v61  ;;  %v708_v61 = vadd.f32 %v6418_v43, %v707_v35  ;;  %vm714_vm5 = vcmp.eq.f32.partialorder %v713_v11, 8.507059e+37  ;;  %v833_v35 = vand.u32 2147483647, %v6407_v45  ;;  %v6597_v11 = vmul.f32 %v6518_v8, %v6156_v59  ;;  %v6618_v59 = vld [vmem:[%s10456_s3 + $0xc] ss:$0 sm:$0xff] }
 0x189   : > { %10749 = vst [vmem:[#allocation95_spill] sm:$0xff] %v6559_v56  ;;  %v6582_v56 = vld [vmem:[%s10456_s3 + $0x18] ss:$0 sm:$0xff]  ;;  %v716_v57 = vor.u32 1.1754944e-38, %v715_v38  ;;  %v828_v38 = vadd.f32 %v6522_v49, %v827_v34  ;;  %v6630_v34 = vld [vmem:[%s5408_s19 + $0xc8] sm:$0xff] }
 0x18a   : > { %10750 = vst [vmem:[#allocation96_spill] sm:$0xff] %v6563_v63  ;;  %v6576_v63 = vadd.f32 1.0, %v4770_v33  ;;  %v712_v33 = vsel %vm711_vm4, %v6418_v43, %v708_v61  ;;  %v6601_v43 = vmul.f32 %v6582_v56, %v5843_v22  ;;  %v6609_v61 = vmul.f32 %v6582_v56, %v6162_v9 }
 0x18b   : > { %10752 = vst [vmem:[#allocation8_spill] sm:$0xff] %v6582_v56  ;;  %v717_v29 = vsel %vm714_vm5, %v716_v57, %v712_v33  ;;  %v6621_v22 = vmul.f32 %v6618_v59, %v4968_v37  ;;  %v1702_v57 = vld [vmem:[#allocation2 + $0xac] sm:$0xff]  ;;  %v6624_v33 = vmul.f32 %v4968_v37, %v5894_v44  ;;  %v6627_v9 = vmul.f32 %v4968_v37, %v6209_v36 }
 0x18c   : > { %4773 = vrcp.f32 %v6576_v63  ;;  %10753 = vst [vmem:[#allocation97_spill] sm:$0xff] %v6597_v11  ;;  %v6604_v24 = vmul.f32 %v717_v29, %v6192_v53  ;;  %v1572_v53 = vadd.f32 %v1540_v1, %v1474_v55  ;;  %v6634_v29 = vmul.f32 %v6630_v34, %v6187_v47  ;;  %v6642_v55 = vpop.eup %4771 }
 0x18d   : > { %4775 = vpow2.f32 %v4592_v54  ;;  %10754 = vst [vmem:[#allocation98_spill] sm:$0xff] %v6601_v43  ;;  %v6613_v54 = vmul.f32 %v4968_v37, %v6187_v47  ;;  %v836_v1 = vor.u32 1.1754944e-38, %v835_v60  ;;  %vm834_vm9 = vcmp.eq.f32.partialorder %v833_v35, 8.507059e+37 }
 0x18e   : > { %10755 = vst [vmem:[#allocation99_spill] sm:$0xff] %v6609_v61  ;;  %v1736_v61 = vmul.f32 %v6036_v19, %v1702_v57  ;;  %v2225_v43 = vmul.f32 %v6368_v7, %v1702_v57  ;;  %v945_v60 = vmul.f32 %v6642_v55, %v6574_v4  ;;  %v10764_v57 = vld [vmem:[#allocation13_spill] sm:$0xff]  ;;  %vm1069_vm11 = vweird.f32 %v6576_v63 }
 0x18f   : > { %10756 = vst [vmem:[#allocation100_spill] sm:$0xff] %v6613_v54  ;;  %v459_v54 = vpop.f32.mrf.mxu1  ;;  %vm950_vm13 = vweird.f32 %v6642_v55 }
 0x190   : > { %10757 = vst [vmem:[#allocation101_spill] sm:$0xff] %v6618_v59  ;;  %v6669_v11 = vadd.f32 %v6002_v51, %v459_v54  ;;  %v6732_v51 = vld [vmem:[%s10456_s3 + $0xb] ss:$0 sm:$0xff]  ;;  %vm6743_vm14 = vmor %vm949_vm10, %vm950_vm13 }
 0x191   : > { %10758 = vst [vmem:[#allocation102_spill] sm:$0xff] %v6621_v22  ;;  %v10762_v22 = vld [vmem:[#allocation14_spill] sm:$0xff] }
 0x192   : > { %10759 = vst [vmem:[#allocation103_spill] sm:$0xff] %v6624_v33  ;;  %v1670_v33 = vadd.f32 %v1638_v5, %v1572_v53  ;;  %v2159_v37 = vadd.f32 %v2127_v62, %v10762_v22  ;;  %v953_v22 = vand.u32 2147483647, %v6574_v4 }
 0x193   : > { %10760 = vst [vmem:[#allocation104_spill] sm:$0xff] %v6627_v9  ;;  %v832_v9 = vsel %vm831_vm8, %v6522_v49, %v828_v38  ;;  %v955_v49 = vand.u32 2147483648, %v6574_v4  ;;  %v10763_v38 = vld [vmem:[#allocation12_spill] sm:$0xff] }
 0x194   : > { %10761 = vst [vmem:[#allocation105_spill] sm:$0xff] %v6634_v29  ;;  %v6647_v29 = vpop.eup %4773  ;;  %v837_v45 = vsel %vm834_vm9, %v836_v1, %v832_v9  ;;  %v6662_v53 = vmul.f32 %v5947_v16, %v10763_v38  ;;  %v6666_v9 = vmul.f32 %v5954_v58, %v10764_v57  ;;  %v946_v1 = vsub.f32 1.0, %v945_v60 }
 0x195   : > { %1160 = vst [vmem:[%s5408_s19 + $0x20] sm:$0xff] %v6604_v24  ;;  %v4776_v5 = vpop.eup %4775  ;;  %v6654_v62 = vmul.f32 %v837_v45, %v6214_v17  ;;  %v1065_v35 = vmul.f32 %v6647_v29, %v6576_v63  ;;  %v10766_v17 = vld [vmem:[#allocation17_spill] sm:$0xff]  ;;  %v1768_v0 = vadd.f32 %v1736_v61, %v1670_v33  ;;  %v6679_v56 = vadd.f32 %v2225_v43, %v2159_v37 }
 0x196   : > { %1255 = vst [vmem:[#allocation2 + $0x62] sm:$0xff] %v6604_v24  ;;  %v6673_v45 = vmul.f32 %v5947_v16, %v10766_v17  ;;  %v947_v60 = vmul.f32 %v6642_v55, %v946_v1  ;;  %v6687_v54 = vadd.f32 1.0, %v4776_v5  ;;  %vm6689_vm12 = vcmp.eq.f32.partialorder %v953_v22, 8.507059e+37 }
 0x197   : > { %10765 = vst [vmem:[#allocation14_spill] sm:$0xff] %v6669_v11  ;;  %v956_v2 = vor.u32 1.1754944e-38, %v955_v49  ;;  %v1066_v61 = vsub.f32 1.0, %v1065_v35  ;;  %v1073_v43 = vand.u32 2147483647, %v6576_v63  ;;  %v1075_v33 = vand.u32 2147483648, %v6576_v63 }
 0x198   : > { %1168 = vst [vmem:[%s5408_s19 + $0x60] sm:$0xff] %v6654_v62  ;;  %v1534_v1 = vmul.f32 %v6010_v14, %v6604_v24  ;;  %v2023_v5 = vmul.f32 %v6187_v47, %v6604_v24  ;;  %v4600_v22 = vmul.f32 -1.442695, %v6669_v11  ;;  %v948_v8 = vadd.f32 %v6642_v55, %v947_v60 }
 0x199   : > { %1267 = vst [vmem:[#allocation2 + $0xc2] sm:$0xff] %v6654_v62  ;;  %v2511_v11 = vmul.f32 %v6618_v59, %v6604_v24  ;;  %4777 = vrcp.f32 %v6687_v54  ;;  %v1067_v27 = vmul.f32 %v6647_v29, %v1066_v61  ;;  %vm1070_vm15 = vweird.f32 %v6647_v29  ;;  %v10776_v61 = vld [vmem:[#allocation15_spill] sm:$0xff] }
 0x19a   : > { %4779 = vpow2.f32 %v4600_v22  ;;  %vm6772_vm0 = vmor %vm1069_vm11, %vm1070_vm15  ;;  %vm1074_vm1 = vcmp.eq.f32.partialorder %v1073_v43, 8.507059e+37  ;;  %v1490_v38 = vadd.f32 %v6677_v50, %v6673_v45  ;;  %v1620_v22 = vld [vmem:[#allocation2 + $0x16b] sm:$0xff]  ;;  %v2519_v50 = vmul.f32 %v6618_v59, %v6654_v62 }
 0x19b   : > { %vm724_vm2 = vweird.f32 %v6687_v54 }
 0x19d   : > { %v6695_v37 = vld [vmem:[#allocation2 + $0x60] sm:$0xff] }
 0x19e   : > { %v6697_v57 = vld [vmem:[#allocation2 + $0x61] sm:$0xff]  ;;  %v1338_v49 = vmul.f32 %v5947_v16, %v6695_v37  ;;  %v1827_v17 = vmul.f32 %v6173_v52, %v6695_v37  ;;  %v2315_v20 = vmul.f32 %v6715_v30, %v6695_v37  ;;  %v2803_v16 = vmul.f32 %v5863_v48, %v6695_v37 }
 0x19f   : > { %10770 = vst [vmem:[#allocation12_spill] sm:$0xff] %v6697_v57  ;;  %v1436_v35 = vmul.f32 %v5954_v58, %v6697_v57  ;;  %v1925_v60 = vmul.f32 %v6180_v3, %v6697_v57  ;;  %v2413_v48 = vmul.f32 %v6732_v51, %v6697_v57 }
 0x1a0   : > { %v1859_v6 = vadd.f32 %v1827_v17, %v6101_v40  ;;  %v2347_v26 = vadd.f32 %v2315_v20, %v6115_v21  ;;  %v2835_v32 = vadd.f32 %v2803_v16, %v6125_v25  ;;  %v2901_v40 = vmul.f32 %v5877_v42, %v6697_v57  ;;  %v1410_v4 = vld [vmem:[#allocation2 + $0xc1] sm:$0xff] }
 0x1a1   : > { %v1468_v58 = vadd.f32 %v1436_v35, %v1338_v49  ;;  %v1312_v49 = vld [vmem:[#allocation2 + $0xc0] sm:$0xff]  ;;  %v952_v35 = vsel %vm6743_vm14, %v6642_v55, %v948_v8  ;;  %v2999_v17 = vmul.f32 %v5894_v44, %v6604_v24  ;;  %v1076_v16 = vor.u32 1.1754944e-38, %v1075_v33 }
 0x1a2   : > { %v1957_v21 = vadd.f32 %v1925_v60, %v1859_v6  ;;  %v2445_v25 = vadd.f32 %v2413_v48, %v2347_v26  ;;  %v2933_v42 = vadd.f32 %v2901_v40, %v2835_v32  ;;  %v1068_v6 = vadd.f32 %v6647_v29, %v1067_v27  ;;  %v10775_v27 = vld [vmem:[#allocation9_spill] sm:$0xff]  ;;  %v10785_v32 = vld [vmem:[#allocation11_spill] sm:$0xff] }
 0x1a3   : > { %v6747_v20 = vadd.f32 %v1534_v1, %v1468_v58  ;;  %v1835_v1 = vmul.f32 %v6173_v52, %v1312_v49  ;;  %v6759_v58 = vpop.eup %4777  ;;  %v2323_v26 = vmul.f32 %v6715_v30, %v1312_v49  ;;  %v957_v44 = vsel %vm6689_vm12, %v956_v2, %v952_v35 }
 0x1a4   : > { %v6755_v57 = vadd.f32 %v2023_v5, %v1957_v21  ;;  %v6761_v60 = vadd.f32 %v2511_v11, %v2445_v25  ;;  %v6763_v8 = vadd.f32 %v2999_v17, %v2933_v42  ;;  %v1548_v55 = vmul.f32 %v6010_v14, %v10775_v27  ;;  %v4780_v43 = vpop.eup %4779 }
 0x1a5   : > { %v1867_v11 = vadd.f32 %v1835_v1, %v1768_v0  ;;  %v1933_v33 = vmul.f32 %v6180_v3, %v1410_v4  ;;  %v1482_v5 = vadd.f32 %v6666_v9, %v6662_v53  ;;  %v2355_v2 = vadd.f32 %v2323_v26, %v6679_v56 }
 0x1a6   : > { %v2421_v63 = vmul.f32 %v6732_v51, %v1410_v4  ;;  %v2031_v40 = vmul.f32 %v6187_v47, %v6654_v62  ;;  %v6788_v0 = vmul.f32 %v957_v44, %v6360_v46  ;;  %v1072_v53 = vsel %vm6772_vm0, %v6647_v29, %v1068_v6  ;;  %v6828_v4 = vld [vmem:[#allocation2 + $0xf8] sm:$0xff]  ;;  %v1718_v44 = vld [vmem:[#allocation2 + $0x16c] sm:$0xff] }
 0x1a7   : > { %v1965_v48 = vadd.f32 %v1933_v33, %v1867_v11  ;;  %v1077_v56 = vsel %vm1074_vm1, %v1076_v16, %v1072_v53  ;;  %v720_v45 = vmul.f32 %v6759_v58, %v6687_v54  ;;  %v1556_v21 = vmul.f32 %v6010_v14, %v10776_v61  ;;  %v6834_v16 = vld [vmem:[#allocation2 + $0xf9] sm:$0xff] }
 0x1a8   : > { %v2453_v9 = vadd.f32 %v2421_v63, %v2355_v2  ;;  %v3095_v46 = vmul.f32 %v6473_v15, %v6067_v41  ;;  %v1646_v49 = vmul.f32 %v6017_v18, %v6314_v10  ;;  %1176 = vst [vmem:[%s5408_s19 + $0xa0] sm:$0xff] %v6788_v0  ;;  %v1654_v29 = vmul.f32 %v6017_v18, %v1620_v22  ;;  %v6822_v10 = vld [vmem:[%s10456_s3 + $0x11] ss:$0 sm:$0xff] }
 0x1a9   : > { %v6803_v35 = vadd.f32 %v2031_v40, %v1965_v48  ;;  %v2143_v62 = vmul.f32 %v6349_v23, %v1620_v22  ;;  %1279 = vst [vmem:[#allocation2 + $0x122] sm:$0xff] %v6788_v0  ;;  %v6813_v14 = vmul.f32 %v1077_v56, %v6382_v31  ;;  %v6817_v41 = vmul.f32 %v6630_v34, %v6618_v59 }
 0x1aa   : > { %v6809_v25 = vadd.f32 %v2519_v50, %v2453_v9  ;;  %10780 = vst [vmem:[#allocation9_spill] sm:$0xff] %v6822_v10  ;;  %v6826_v18 = vmul.f32 %v6822_v10, %v6630_v34  ;;  %v1580_v42 = vadd.f32 %v1548_v55, %v1482_v5  ;;  %v721_v17 = vsub.f32 1.0, %v720_v45  ;;  %v6851_v5 = vld [vmem:[#allocation2 + $0xf3] sm:$0xff] }
 0x1ab   : > { %10777 = vst [vmem:[#allocation13_spill] sm:$0xff] %v6803_v35  ;;  %v6832_v31 = vmul.f32 %v6828_v4, %v6173_v52  ;;  %v6838_v1 = vmul.f32 %v6834_v16, %v6180_v3  ;;  %v6842_v6 = vmul.f32 %v6630_v34, %v6209_v36  ;;  %v1588_v26 = vadd.f32 %v1556_v21, %v1490_v38  ;;  %v10787_v38 = vld [vmem:[#allocation21_spill] sm:$0xff] }
 0x1ac   : > { %10778 = vst [vmem:[#allocation17_spill] sm:$0xff] %v6809_v25  ;;  %v3127_v27 = vadd.f32 %v3095_v46, %v10785_v32  ;;  %v1678_v55 = vadd.f32 %v1646_v49, %v1580_v42  ;;  %v722_v11 = vmul.f32 %v6759_v58, %v721_v17  ;;  %v6849_v33 = vadd.f32 1.0, %v4780_v43 }
 0x1ad   : > { %10779 = vst [vmem:[#allocation18_spill] sm:$0xff] %v6817_v41  ;;  %v6855_v2 = vmul.f32 %v6851_v5, %v6349_v23  ;;  %v1686_v34 = vadd.f32 %v1654_v29, %v1588_v26  ;;  %v2175_v63 = vadd.f32 %v2143_v62, %v10787_v38  ;;  %v728_v22 = vand.u32 2147483647, %v6687_v54  ;;  %v10793_v62 = vld [vmem:[#allocation36_spill] sm:$0xff] }
 0x1ae   : > { %10781 = vst [vmem:[#allocation15_spill] sm:$0xff] %v6826_v18  ;;  %v3193_v48 = vmul.f32 %v6505_v13, %v6079_v39  ;;  %v1744_v40 = vmul.f32 %v6036_v19, %v6340_v28  ;;  %v1752_v53 = vmul.f32 %v6036_v19, %v1718_v44  ;;  %v730_v9 = vand.u32 2147483648, %v6687_v54  ;;  %v483_v19 = vpop.f32.mrf.mxu2  ;;  %v10796_v38 = vld [vmem:[#allocation16_spill] sm:$0xff] }
 0x1af   : > { %10782 = vst [vmem:[#allocation106_spill] sm:$0xff] %v6832_v31  ;;  %v2241_v50 = vmul.f32 %v6368_v7, %v1718_v44  ;;  %v723_v56 = vadd.f32 %v6759_v58, %v722_v11  ;;  %vm725_vm3 = vweird.f32 %v6759_v58  ;;  %v6871_v45 = vmul.f32 %v6349_v23, %v6216_v12  ;;  %v10823_v41 = vld [vmem:[#allocation20_spill] sm:$0xff] }
 0x1b0   : > { %10783 = vst [vmem:[#allocation107_spill] sm:$0xff] %v6838_v1  ;;  %v3225_v39 = vadd.f32 %v3193_v48, %v3127_v27  ;;  %v1776_v43 = vadd.f32 %v1744_v40, %v1678_v55  ;;  %v6873_v61 = vld [vmem:[#allocation2 + $0x120] sm:$0xff]  ;;  %4781 = vrcp.f32 %v6849_v33  ;;  %v1784_v21 = vadd.f32 %v1752_v53, %v1686_v34  ;;  %vm6894_vm5 = vmor %vm724_vm2, %vm725_vm3 }
 0x1b1   : > { %10784 = vst [vmem:[#allocation108_spill] sm:$0xff] %v6842_v6  ;;  %v6875_v28 = vld [vmem:[#allocation2 + $0x121] sm:$0xff]  ;;  %v2273_v46 = vadd.f32 %v2241_v50, %v2175_v63  ;;  %v1843_v49 = vmul.f32 %v6173_v52, %v6873_v61  ;;  %vm6880_vm4 = vcmp.eq.f32.partialorder %v728_v22, 8.507059e+37  ;;  %v3291_v42 = vmul.f32 %v10793_v62, %v6695_v37 }
 0x1b2   : > { %1184 = vst [vmem:[%s5408_s19 + $0xe0] sm:$0xff] %v6813_v14  ;;  %v2039_v17 = vmul.f32 %v6187_v47, %v6788_v0  ;;  %v2331_v26 = vmul.f32 %v6715_v30, %v6873_v61  ;;  %v731_v32 = vor.u32 1.1754944e-38, %v730_v9  ;;  %v1941_v55 = vmul.f32 %v6180_v3, %v6875_v28  ;;  %v10798_v22 = vld [vmem:[#allocation60_spill] sm:$0xff] }
 0x1b3   : > { %1291 = vst [vmem:[#allocation2 + $0x182] sm:$0xff] %v6813_v14  ;;  %v1875_v27 = vadd.f32 %v1843_v49, %v1776_v43  ;;  %v727_v34 = vsel %vm6894_vm5, %v6759_v58, %v723_v56  ;;  %v6904_v63 = vadd.f32 %v10796_v38, %v483_v19  ;;  %v2429_v48 = vmul.f32 %v6732_v51, %v6875_v28 }
 0x1b4   : > { %10786 = vst [vmem:[#allocation11_spill] sm:$0xff] %v6855_v2  ;;  %v2363_v54 = vadd.f32 %v2331_v26, %v10798_v22  ;;  %v2527_v50 = vmul.f32 %v6618_v59, %v6788_v0  ;;  %v2047_v58 = vmul.f32 %v6187_v47, %v6813_v14  ;;  %v732_v0 = vsel %vm6880_vm4, %v731_v32, %v727_v34 }
 0x1b5   : > { %10788 = vst [vmem:[#allocation21_spill] sm:$0xff] %v6871_v45  ;;  %v1973_v9 = vadd.f32 %v1941_v55, %v1875_v27  ;;  %v2535_v27 = vmul.f32 %v6618_v59, %v6813_v14  ;;  %v4608_v55 = vmul.f32 -1.442695, %v6904_v63  ;;  %v10803_v14 = vld [vmem:[#allocation35_spill] sm:$0xff]  ;;  %v3323_v32 = vadd.f32 %v3291_v42, %v3225_v39  ;;  %v10810_v39 = vld [vmem:[#allocation12_spill] sm:$0xff] }
 0x1b6   : > { %10789 = vst [vmem:[#allocation109_spill] sm:$0xff] %v6873_v61  ;;  %v6916_v56 = vpop.eup %4781  ;;  %v2461_v19 = vadd.f32 %v2429_v48, %v2363_v54  ;;  %v10801_v54 = vld [vmem:[#allocation91_spill] sm:$0xff]  ;;  %v6939_v29 = vmul.f32 %v6368_v7, %v10803_v14  ;;  %v6945_v34 = vmul.f32 %v6828_v4, %v6715_v30  ;;  %v10811_v42 = vld [vmem:[#allocation40_spill] sm:$0xff]  ;;  %vm844_vm6 = vweird.f32 %v6849_v33 }
 0x1b7   : > { %10790 = vst [vmem:[#allocation110_spill] sm:$0xff] %v6875_v28  ;;  %v6919_v38 = vadd.f32 %v2039_v17, %v1973_v9  ;;  %v10806_v48 = vld [vmem:[#allocation19_spill] sm:$0xff]  ;;  %4783 = vpow2.f32 %v4608_v55  ;;  %vm845_vm7 = vweird.f32 %v6916_v56 }
 0x1b8   : > { %10797 = vst [vmem:[#allocation36_spill] sm:$0xff] %v6904_v63  ;;  %vm7051_vm8 = vmor %vm844_vm6, %vm845_vm7 }
 0x1b9   : > { %10799 = vst [vmem:[#allocation16_spill] sm:$0xff] %v6919_v38 }
 0x1ba   : > { %v1817_v37 = vld [vmem:[#allocation2 + $0x180] sm:$0xff]  ;;  %10804 = vst [vmem:[#allocation35_spill] sm:$0xff] %v6939_v29  ;;  %v7031_v29 = vmul.f32 %v6851_v5, %v6473_v15 }
 0x1bb   : > { %v1915_v11 = vld [vmem:[#allocation2 + $0x181] sm:$0xff]  ;;  %v1851_v40 = vmul.f32 %v6173_v52, %v1817_v37  ;;  %v2339_v53 = vmul.f32 %v6715_v30, %v1817_v37  ;;  %v6926_v37 = vadd.f32 %v2527_v50, %v2461_v19  ;;  %10805 = vst [vmem:[#allocation111_spill] sm:$0xff] %v6945_v34  ;;  %v6957_v50 = vmul.f32 %v6834_v16, %v6732_v51 }
 0x1bc   : > { %v1949_v43 = vmul.f32 %v6180_v3, %v1915_v11  ;;  %v2437_v44 = vmul.f32 %v6732_v51, %v1915_v11  ;;  %v840_v11 = vmul.f32 %v6916_v56, %v6849_v33  ;;  %10824 = vst [vmem:[#allocation20_spill] sm:$0xff] %v7031_v29  ;;  %v7078_v34 = vld [vmem:[%s10456_s3 + $0x3] ss:$0 sm:$0xff] }
 0x1bd   : > { %v1883_v49 = vadd.f32 %v1851_v40, %v1784_v21  ;;  %v2371_v26 = vadd.f32 %v2339_v53, %v2273_v46  ;;  %10800 = vst [vmem:[#allocation60_spill] sm:$0xff] %v6926_v37  ;;  %v6929_v21 = vmul.f32 %v732_v0, %v10801_v54  ;;  %v6931_v46 = vld [vmem:[#allocation2 + $0xf4] sm:$0xff]  ;;  %v3096_v40 = vmul.f32 %v6473_v15, %v10806_v48  ;;  %v10816_v0 = vld [vmem:[#allocation4_spill] sm:$0xff]  ;;  %v10830_v37 = vld [vmem:[#allocation3_spill] sm:$0xff] }
 0x1be   : > { %v6935_v17 = vmul.f32 %v6931_v46, %v6368_v7  ;;  %10809 = vst [vmem:[#allocation113_spill] sm:$0xff] %v6957_v50  ;;  %v841_v19 = vsub.f32 1.0, %v840_v11  ;;  %v10818_v54 = vld [vmem:[#allocation25_spill] sm:$0xff] }
 0x1bf   : > { %v1981_v22 = vadd.f32 %v1949_v43, %v1883_v49  ;;  %v2469_v6 = vadd.f32 %v2437_v44, %v2371_v26  ;;  %1161 = vst [vmem:[%s5408_s19 + $0x28] sm:$0xff] %v6929_v21  ;;  %v3389_v43 = vmul.f32 %v10811_v42, %v10810_v39  ;;  %v10814_v26 = vld [vmem:[#allocation23_spill] sm:$0xff] }
 0x1c0   : > { %10802 = vst [vmem:[#allocation91_spill] sm:$0xff] %v6935_v17  ;;  %v3128_v44 = vadd.f32 %v3096_v40, %v10814_v26  ;;  %v842_v39 = vmul.f32 %v6916_v56, %v841_v19  ;;  %v850_v40 = vand.u32 2147483648, %v6849_v33  ;;  %v6995_v26 = vld [vmem:[%s10456_s3 + $0xe] ss:$0 sm:$0xff]  ;;  %v7019_v19 = vld [vmem:[%s10456_s3 + $0x10] ss:$0 sm:$0xff] }
 0x1c1   : > { %v6949_v53 = vadd.f32 %v2047_v58, %v1981_v22  ;;  %v6951_v9 = vadd.f32 %v2535_v27, %v2469_v6  ;;  %1256 = vst [vmem:[#allocation2 + $0x6a] sm:$0xff] %v6929_v21  ;;  %v6965_v58 = vld [vmem:[%s10456_s3 + $0xd] ss:$0 sm:$0xff]  ;;  %v6979_v27 = vld [vmem:[%s10456_s3] ss:$0 sm:$0xff]  ;;  %v3421_v48 = vadd.f32 %v3389_v43, %v3323_v32  ;;  %v7003_v18 = vmul.f32 %v6995_v26, %v10803_v14 }
 0x1c2   : > { %v6969_v6 = vmul.f32 %v6965_v58, %v6851_v5  ;;  %v6973_v49 = vmul.f32 %v6965_v58, %v6216_v12  ;;  %10815 = vst [vmem:[#allocation23_spill] sm:$0xff] %v6979_v27  ;;  %v1345_v55 = vmul.f32 %v6979_v27, %v10816_v0  ;;  %v6986_v22 = vld [vmem:[%s10456_s3 + $0x1] ss:$0 sm:$0xff]  ;;  %v6999_v0 = vmul.f32 %v6995_v26, %v6931_v46  ;;  %v7010_v32 = vld [vmem:[%s10456_s3 + $0xf] ss:$0 sm:$0xff] }
 0x1c3   : > { %10807 = vst [vmem:[#allocation19_spill] sm:$0xff] %v6949_v53  ;;  %v1443_v11 = vmul.f32 %v6986_v22, %v10818_v54  ;;  %v7014_v43 = vmul.f32 %v7010_v32, %v6828_v4  ;;  %v7023_v54 = vmul.f32 %v7019_v19, %v6834_v16  ;;  %v7038_v45 = vadd.f32 %v6916_v56, %v842_v39 }
 0x1c4   : > { %10808 = vst [vmem:[#allocation112_spill] sm:$0xff] %v6951_v9  ;;  %v7087_v9 = vld [vmem:[%s10456_s3 + $0x4] ss:$0 sm:$0xff] }
 0x1c5   : > { %10812 = vst [vmem:[#allocation12_spill] sm:$0xff] %v6969_v6  ;;  %v847_v25 = vsel %vm7051_vm8, %v6916_v56, %v7038_v45 }
 0x1c6   : > { %10813 = vst [vmem:[#allocation40_spill] sm:$0xff] %v6973_v49  ;;  %v3487_v49 = vmul.f32 %v6209_v36, %v6604_v24 }
 0x1c7   : > { %10817 = vst [vmem:[#allocation4_spill] sm:$0xff] %v6986_v22 }
 0x1c8   : > { %10819 = vst [vmem:[#allocation25_spill] sm:$0xff] %v6999_v0  ;;  %v7035_v0 = vmul.f32 %v6473_v15, %v6216_v12  ;;  %v7045_v50 = vadd.f32 %v3487_v49, %v3421_v48  ;;  %v1305_v39 = vld [vmem:[#allocation2 + $0x68] sm:$0xff] }
 0x1c9   : > { %10820 = vst [vmem:[#allocation114_spill] sm:$0xff] %v7003_v18  ;;  %v3194_v18 = vmul.f32 %v6505_v13, %v10823_v41  ;;  %v7043_v41 = vadd.f32 %v1443_v11, %v1345_v55  ;;  %v7055_v29 = vld [vmem:[#allocation2 + $0x69] sm:$0xff]  ;;  %v2512_v55 = vmul.f32 %v6618_v59, %v6929_v21  ;;  %v3000_v11 = vmul.f32 %v6822_v10, %v6929_v21 }
 0x1ca   : > { %10821 = vst [vmem:[#allocation115_spill] sm:$0xff] %v7014_v43  ;;  %v848_v43 = vand.u32 2147483647, %v6849_v33  ;;  %v2024_v33 = vmul.f32 %v6187_v47, %v6929_v21  ;;  %v1339_v48 = vmul.f32 %v6979_v27, %v1305_v39  ;;  %v7073_v17 = vld [vmem:[#allocation2 + $0x6b] sm:$0xff]  ;;  %v1828_v31 = vmul.f32 %v6173_v52, %v1305_v39 }
 0x1cb   : > { %10822 = vst [vmem:[#allocation116_spill] sm:$0xff] %v7023_v54  ;;  %v4784_v54 = vpop.eup %4783  ;;  %v7041_v6 = vadd.f32 %v3194_v18, %v3128_v44  ;;  %v7060_v18 = vld [vmem:[%s10456_s3 + $0x2] ss:$0 sm:$0xff]  ;;  %v1598_v44 = vld [vmem:[#allocation2 + $0x63] sm:$0xff]  ;;  %v7081_v1 = vld [vmem:[#allocation2 + $0x6c] sm:$0xff]  ;;  %v1926_v38 = vmul.f32 %v6180_v3, %v7055_v29  ;;  %v1633_v3 = vmul.f32 %v7078_v34, %v7073_v17  ;;  %v2316_v56 = vmul.f32 %v6715_v30, %v1305_v39 }
 0x1cc   : > { %10825 = vst [vmem:[#allocation117_spill] sm:$0xff] %v7035_v0  ;;  %v851_v0 = vor.u32 1.1754944e-38, %v850_v40  ;;  %v1535_v49 = vmul.f32 %v7060_v18, %v6929_v21  ;;  %v1437_v40 = vmul.f32 %v6986_v22, %v7055_v29  ;;  %v1632_v47 = vmul.f32 %v7078_v34, %v1598_v44  ;;  %v1696_v2 = vld [vmem:[#allocation2 + $0x64] sm:$0xff] }
 0x1cd   : > { %v1730_v53 = vmul.f32 %v7087_v9, %v1696_v2  ;;  %vm7096_vm9 = vcmp.eq.f32.partialorder %v848_v43, 8.507059e+37  ;;  %v7100_v52 = vadd.f32 1.0, %v4784_v54  ;;  %v1860_v63 = vadd.f32 %v1828_v31, %v10830_v37  ;;  %v10832_v37 = vld [vmem:[#allocation22_spill] sm:$0xff] }
 0x1ce   : > { %v1469_v28 = vadd.f32 %v1437_v40, %v1339_v48  ;;  %v1664_v61 = vadd.f32 %v1632_v47, %v6747_v20  ;;  %v2121_v10 = vmul.f32 %v6349_v23, %v1598_v44  ;;  %v1731_v24 = vmul.f32 %v7087_v9, %v7081_v1 }
 0x1cf   : > { %v2219_v45 = vmul.f32 %v6368_v7, %v1696_v2  ;;  %v1958_v48 = vadd.f32 %v1926_v38, %v1860_v63  ;;  %v2122_v31 = vmul.f32 %v6349_v23, %v7073_v17  ;;  %v2348_v40 = vadd.f32 %v2316_v56, %v10832_v37 }
 0x1d0   : > { %v1567_v43 = vadd.f32 %v1535_v49, %v1469_v28  ;;  %v7111_v54 = vadd.f32 %v1730_v53, %v1664_v61  ;;  %v2153_v20 = vadd.f32 %v2121_v10, %v6755_v57  ;;  %v2414_v47 = vmul.f32 %v6732_v51, %v7055_v29 }
 0x1d1   : > { %v2609_v59 = vmul.f32 %v6965_v58, %v1598_v44  ;;  %v2056_v27 = vadd.f32 %v2024_v33, %v1958_v48  ;;  %v2220_v28 = vmul.f32 %v6368_v7, %v7081_v1  ;;  %v2707_v10 = vmul.f32 %v6995_v26, %v1696_v2 }
 0x1d2   : > { %10831 = vst [vmem:[#allocation3_spill] sm:$0xff] %v7111_v54  ;;  %v1665_v22 = vadd.f32 %v1633_v3, %v1567_v43  ;;  %v7122_v61 = vadd.f32 %v2219_v45, %v2153_v20  ;;  %v2446_v63 = vadd.f32 %v2414_v47, %v2348_v40  ;;  %v2804_v38 = vmul.f32 %v7010_v32, %v1305_v39  ;;  %v10834_v45 = vld [vmem:[#allocation24_spill] sm:$0xff] }
 0x1d3   : > { %v2641_v57 = vadd.f32 %v2609_v59, %v6761_v60  ;;  %v2154_v49 = vadd.f32 %v2122_v31, %v2056_v27  ;;  %v2610_v56 = vmul.f32 %v6965_v58, %v7073_v17  ;;  %v3097_v33 = vmul.f32 %v6473_v15, %v1598_v44  ;;  %v507_v60 = vpop.f32.mrf.mxu3 }
 0x1d4   : > { %v7127_v53 = vadd.f32 %v1731_v24, %v1665_v22  ;;  %v2544_v3 = vadd.f32 %v2512_v55, %v2446_v63  ;;  %v2836_v48 = vadd.f32 %v2804_v38, %v10834_v45  ;;  %v2902_v59 = vmul.f32 %v7019_v19, %v7055_v29  ;;  %v10838_v38 = vld [vmem:[#allocation8_spill] sm:$0xff] }
 0x1d5   : > { %v7132_v43 = vadd.f32 %v2707_v10, %v2641_v57  ;;  %v7137_v20 = vadd.f32 %v2220_v28, %v2154_v49  ;;  %v3129_v22 = vadd.f32 %v3097_v33, %v6763_v8  ;;  %v3195_v27 = vmul.f32 %v6505_v13, %v1696_v2  ;;  %v10836_v28 = vld [vmem:[#allocation87_spill] sm:$0xff]  ;;  %v10839_v33 = vld [vmem:[#allocation14_spill] sm:$0xff] }
 0x1d6   : > { %10833 = vst [vmem:[#allocation22_spill] sm:$0xff] %v7127_v53  ;;  %v852_v24 = vsel %vm7096_vm9, %v851_v0, %v847_v25  ;;  %v2642_v31 = vadd.f32 %v2610_v56, %v2544_v3  ;;  %v2708_v55 = vmul.f32 %v6995_v26, %v7081_v1  ;;  %v2934_v37 = vadd.f32 %v2902_v59, %v2836_v48  ;;  %v7154_v8 = vld [vmem:[%s10455_s2] ss:$0 sm:$0xff] }
 0x1d7   : > { %10835 = vst [vmem:[#allocation24_spill] sm:$0xff] %v7137_v20  ;;  %v3292_v40 = vmul.f32 %v10793_v62, %v1305_v39  ;;  %v3098_v47 = vmul.f32 %v6473_v15, %v7073_v17  ;;  %v7148_v63 = vadd.f32 %v3195_v27, %v3129_v22  ;;  %v3585_v57 = vmul.f32 %v10836_v28, %v1598_v44  ;;  %v4694_v56 = vld [vmem:[%s10457_s4] ss:$0 sm:$0xff]  ;;  %v7193_v27 = vld [vmem:[#allocation2 + $0xb3] sm:$0xff] }
 0x1d8   : > { %v7157_v35 = vadd.f32 %v7154_v8, %v507_v60  ;;  %v7159_v25 = vadd.f32 %v2708_v55, %v2642_v31  ;;  %v3032_v0 = vadd.f32 %v3000_v11, %v2934_v37  ;;  %v3390_v10 = vmul.f32 %v10811_v42, %v7055_v29 }
 0x1d9   : > { %v3324_v39 = vadd.f32 %v3292_v40, %v7041_v6  ;;  %v3617_v44 = vadd.f32 %v3585_v57, %v7045_v50  ;;  %v3683_v49 = vmul.f32 %v10838_v38, %v1696_v2  ;;  %v7170_v3 = vmul.f32 %v852_v24, %v10839_v33  ;;  %v7182_v50 = vld [vmem:[%s5408_s19 + $0x58] sm:$0xff] }
 0x1da   : > { %10837 = vst [vmem:[#allocation87_spill] sm:$0xff] %v7159_v25  ;;  %4785 = vrcp.f32 %v7100_v52  ;;  %v3130_v11 = vadd.f32 %v3098_v47, %v3032_v0  ;;  %v3196_v6 = vmul.f32 %v6505_v13, %v7081_v1  ;;  %v3488_v29 = vmul.f32 %v6209_v36, %v6929_v21 }
 0x1db   : > { %v3422_v45 = vadd.f32 %v3390_v10, %v3324_v39  ;;  %v7179_v2 = vmul.f32 %v6931_v46, %v6505_v13  ;;  %v1541_v48 = vmul.f32 %v7182_v50, %v7060_v18  ;;  %v3715_v59 = vadd.f32 %v3683_v49, %v3617_v44  ;;  %1169 = vst [vmem:[%s5408_s19 + $0x68] sm:$0xff] %v7170_v3  ;;  %v10851_v39 = vld [vmem:[#allocation28_spill] sm:$0xff]  ;;  %v4991_v49 = vld [vmem:[#allocation2 + $0x153] sm:$0xff] }
 0x1dc   : > { %v4616_v60 = vmul.f32 -1.442695, %v7157_v35  ;;  %v7191_v22 = vmul.f32 %v6505_v13, %v10803_v14  ;;  %v7195_v36 = vadd.f32 %v3196_v6, %v3130_v11  ;;  %v3586_v24 = vmul.f32 %v10836_v28, %v7073_v17  ;;  %1268 = vst [vmem:[#allocation2 + $0xca] sm:$0xff] %v7170_v3  ;;  %v10854_v11 = vld [vmem:[#allocation54_spill] sm:$0xff] }
 0x1dd   : > { %10840 = vst [vmem:[#allocation8_spill] sm:$0xff] %v7179_v2  ;;  %v3520_v21 = vadd.f32 %v3488_v29, %v3422_v45  ;;  %v7202_v31 = vmul.f32 %v6828_v4, %v10793_v62  ;;  %v7206_v55 = vmul.f32 %v6834_v16, %v10811_v42  ;;  %v1573_v37 = vadd.f32 %v1541_v48, %v7043_v41  ;;  %v10849_v41 = vld [vmem:[#allocation27_spill] sm:$0xff]  ;;  %v4992_v29 = vld [vmem:[#allocation2 + $0x154] sm:$0xff] }
 0x1de   : > { %10841 = vst [vmem:[#allocation14_spill] sm:$0xff] %v7191_v22  ;;  %v7209_v40 = vadd.f32 %v4694_v56, %v3715_v59  ;;  %v7213_v47 = vmul.f32 %v6851_v5, %v10836_v28  ;;  %v7217_v17 = vmul.f32 %v10836_v28, %v6216_v12  ;;  %v3684_v4 = vmul.f32 %v10838_v38, %v7081_v1  ;;  %v7237_v1 = vld [vmem:[%s10456_s3 + $0x5] ss:$0 sm:$0xff]  ;;  %v10857_v59 = vld [vmem:[#allocation64_spill] sm:$0xff] }
 0x1df   : > { %10842 = vst [vmem:[#allocation118_spill] sm:$0xff] %v7195_v36  ;;  %v3618_v57 = vadd.f32 %v3586_v24, %v3520_v21  ;;  %v7225_v16 = vmul.f32 %v6931_v46, %v10838_v38  ;;  %v1639_v42 = vmul.f32 %v7078_v34, %v7193_v27  ;;  %4787 = vpow2.f32 %v4616_v60  ;;  %v7246_v46 = vld [vmem:[%s10456_s3 + $0x6] ss:$0 sm:$0xff] }
 0x1e0   : > { %10843 = vst [vmem:[#allocation119_spill] sm:$0xff] %v7202_v31  ;;  %v7221_v62 = vpop.eup %4785  ;;  %v4619_v5 = vmul.f32 -1.442695, %v7209_v40  ;;  %v7232_v12 = vmul.f32 %v10838_v38, %v10803_v14  ;;  %v7241_v0 = vmul.f32 %v7237_v1, %v10849_v41  ;;  %v7250_v10 = vmul.f32 %v7246_v46, %v10851_v39  ;;  %v7252_v14 = vld [vmem:[#allocation2 + $0xb4] sm:$0xff] }
 0x1e1   : > { %10844 = vst [vmem:[#allocation120_spill] sm:$0xff] %v7206_v55  ;;  %v3716_v44 = vadd.f32 %v3684_v4, %v3618_v57  ;;  %v7255_v33 = vmul.f32 %v4991_v49, %v6349_v23  ;;  %v7259_v6 = vmul.f32 %v6349_v23, %v10854_v11  ;;  %v1671_v45 = vadd.f32 %v1639_v42, %v1573_v37  ;;  %v4993_v57 = vld [vmem:[#allocation2 + $0x158] sm:$0xff] }
 0x1e2   : > { %10845 = vst [vmem:[#allocation121_spill] sm:$0xff] %v7213_v47  ;;  %4789 = vpow2.f32 %v4619_v5  ;;  %v7262_v48 = vmul.f32 %v4992_v29, %v6368_v7  ;;  %v7266_v60 = vmul.f32 %v6368_v7, %v10857_v59  ;;  %v960_v24 = vmul.f32 %v7221_v62, %v7100_v52  ;;  %v4994_v41 = vld [vmem:[#allocation2 + $0x159] sm:$0xff] }
 0x1e3   : > { %10846 = vst [vmem:[#allocation122_spill] sm:$0xff] %v7217_v17  ;;  %v7268_v21 = vadd.f32 %v4694_v56, %v3716_v44  ;;  %v7273_v4 = vmul.f32 %v4993_v57, %v6715_v30  ;;  %v7276_v37 = vmul.f32 %v4994_v41, %v6732_v51  ;;  %v1737_v42 = vmul.f32 %v7087_v9, %v7252_v14  ;;  %v7282_v39 = vld [vmem:[#allocation2 + $0xc8] sm:$0xff] }
 0x1e4   : > { %10847 = vst [vmem:[#allocation123_spill] sm:$0xff] %v7225_v16  ;;  %v2128_v5 = vmul.f32 %v6349_v23, %v7193_v27  ;;  %v7285_v56 = vmul.f32 %v4991_v49, %v6965_v58  ;;  %v7289_v44 = vmul.f32 %v6965_v58, %v10854_v11  ;;  %v7299_v23 = vmul.f32 %v6995_v26, %v10857_v59 }
 0x1e5   : > { %10848 = vst [vmem:[#allocation124_spill] sm:$0xff] %v7232_v12  ;;  %v7311_v16 = vmul.f32 %v4991_v49, %v6473_v15  ;;  %v7384_v47 = vmul.f32 %v10838_v38, %v10857_v59  ;;  %vm965_vm10 = vweird.f32 %v7221_v62  ;;  %vm964_vm11 = vweird.f32 %v7100_v52 }
 0x1e6   : > { %10850 = vst [vmem:[#allocation27_spill] sm:$0xff] %v7241_v0  ;;  %v961_v0 = vsub.f32 1.0, %v960_v24  ;;  %vm7425_vm12 = vmor %vm964_vm11, %vm965_vm10 }
 0x1e7   : > { %10852 = vst [vmem:[#allocation28_spill] sm:$0xff] %v7250_v10 }
 0x1e8   : > { %10853 = vst [vmem:[#allocation125_spill] sm:$0xff] %v7255_v33  ;;  %v10867_v33 = vld [vmem:[#allocation26_spill] sm:$0xff] }
 0x1e9   : > { %10855 = vst [vmem:[#allocation54_spill] sm:$0xff] %v7259_v6  ;;  %v4620_v6 = vmul.f32 -1.442695, %v7268_v21  ;;  %v2160_v10 = vadd.f32 %v2128_v5, %v10867_v33  ;;  %v7319_v5 = vmul.f32 %v6473_v15, %v10854_v11  ;;  %v2324_v15 = vmul.f32 %v6715_v30, %v7282_v39 }
 0x1ea   : > { %10856 = vst [vmem:[#allocation126_spill] sm:$0xff] %v7262_v48  ;;  %v4788_v48 = vpop.eup %4787 }
 0x1eb   : > { %10858 = vst [vmem:[#allocation64_spill] sm:$0xff] %v7266_v60  ;;  %v7292_v60 = vmul.f32 %v4992_v29, %v6995_v26  ;;  %4791 = vpow2.f32 %v4620_v6  ;;  %v4790_v12 = vpop.eup %4789  ;;  %v7326_v24 = vadd.f32 1.0, %v4788_v48  ;;  %v10875_v48 = vld [vmem:[#allocation23_spill] sm:$0xff] }
 0x1ec   : > { %10859 = vst [vmem:[#allocation127_spill] sm:$0xff] %v7273_v4  ;;  %v1769_v4 = vadd.f32 %v1737_v42, %v1671_v45  ;;  %v2226_v45 = vmul.f32 %v6368_v7, %v7252_v14  ;;  %v7324_v6 = vadd.f32 1.0, %v4790_v12  ;;  %v7331_v7 = vld [vmem:[%s10456_s3 + $0x7] ss:$0 sm:$0xff] }
 0x1ed   : > { %10860 = vst [vmem:[#allocation128_spill] sm:$0xff] %v7276_v37  ;;  %v7295_v37 = vld [vmem:[#allocation2 + $0xc9] sm:$0xff]  ;;  %v10874_v12 = vld [vmem:[#allocation47_spill] sm:$0xff]  ;;  %vm1084_vm15 = vweird.f32 %v7326_v24 }
 0x1ee   : > { %10861 = vst [vmem:[#allocation129_spill] sm:$0xff] %v7282_v39  ;;  %v1934_v33 = vmul.f32 %v7246_v46, %v7295_v37  ;;  %4793 = vrcp.f32 %v7324_v6  ;;  %v2422_v17 = vmul.f32 %v6732_v51, %v7295_v37  ;;  %v3922_v36 = vand.u32 2147483648, %v7324_v6 }
 0x1ef   : > { %10862 = vst [vmem:[#allocation130_spill] sm:$0xff] %v7285_v56  ;;  %v1836_v56 = vmul.f32 %v7237_v1, %v7282_v39  ;;  %4795 = vrcp.f32 %v7326_v24  ;;  %vm3916_vm0 = vweird.f32 %v7324_v6 }
 0x1f0   : > { %10863 = vst [vmem:[#allocation131_spill] sm:$0xff] %v7289_v44  ;;  %v7305_v44 = vmul.f32 %v4993_v57, %v7010_v32 }
 0x1f1   : > { %10864 = vst [vmem:[#allocation132_spill] sm:$0xff] %v7292_v60  ;;  %v7308_v60 = vmul.f32 %v4994_v41, %v7019_v19  ;;  %v1868_v42 = vadd.f32 %v1836_v56, %v1769_v4  ;;  %v2032_v4 = vmul.f32 %v7331_v7, %v7170_v3  ;;  %v7339_v56 = vmul.f32 %v6505_v13, %v10857_v59  ;;  %v10886_v59 = vld [vmem:[#allocation9_spill] sm:$0xff] }
 0x1f2   : > { %10865 = vst [vmem:[#allocation133_spill] sm:$0xff] %v7295_v37 }
 0x1f3   : > { %10866 = vst [vmem:[#allocation134_spill] sm:$0xff] %v7299_v23  ;;  %v7322_v23 = vmul.f32 %v4992_v29, %v6505_v13  ;;  %v4792_v13 = vpop.eup %4791 }
 0x1f4   : > { %10868 = vst [vmem:[#allocation26_spill] sm:$0xff] %v7305_v44 }
 0x1f5   : > { %10869 = vst [vmem:[#allocation135_spill] sm:$0xff] %v7308_v60  ;;  %v2258_v60 = vadd.f32 %v2226_v45, %v2160_v10  ;;  %v962_v10 = vmul.f32 %v7221_v62, %v961_v0  ;;  %v7345_v45 = vld [vmem:[#allocation2 + $0x111] sm:$0xff] }
 0x1f6   : > { %10870 = vst [vmem:[#allocation136_spill] sm:$0xff] %v7311_v16  ;;  %v1966_v16 = vadd.f32 %v1934_v33, %v1868_v42  ;;  %v10876_v42 = vld [vmem:[#allocation4_spill] sm:$0xff] }
 0x1f7   : > { %10871 = vst [vmem:[#allocation137_spill] sm:$0xff] %v7319_v5  ;;  %v1451_v33 = vmul.f32 %v7345_v45, %v10876_v42  ;;  %v2356_v44 = vadd.f32 %v2324_v15, %v2258_v60  ;;  %v7370_v60 = vmul.f32 %v4991_v49, %v10836_v28  ;;  %v7380_v15 = vadd.f32 1.0, %v4792_v13 }
 0x1f8   : > { %10872 = vst [vmem:[#allocation138_spill] sm:$0xff] %v7322_v23  ;;  %v1353_v23 = vmul.f32 %v10875_v48, %v10874_v12  ;;  %v7349_v5 = vadd.f32 %v2032_v4, %v1966_v16  ;;  %v7356_v12 = vld [vmem:[%s10456_s3 + $0x14] ss:$0 sm:$0xff]  ;;  %v7375_v4 = vmul.f32 %v10836_v28, %v10854_v11 }
 0x1f9   : > { %10873 = vst [vmem:[#allocation139_spill] sm:$0xff] %v7339_v56  ;;  %v7359_v0 = vmul.f32 %v7356_v12, %v4993_v57  ;;  %v7364_v56 = vld [vmem:[%s10456_s3 + $0x15] ss:$0 sm:$0xff]  ;;  %v7378_v57 = vmul.f32 %v4992_v29, %v10838_v38  ;;  %4797 = vrcp.f32 %v7380_v15  ;;  %v4794_v38 = vpop.eup %4793  ;;  %vm3931_vm7 = vweird.f32 %v7380_v15 }
 0x1fa   : > { %10877 = vst [vmem:[#allocation47_spill] sm:$0xff] %v7349_v5  ;;  %v7367_v16 = vmul.f32 %v7364_v56, %v4994_v41  ;;  %v10884_v41 = vld [vmem:[#allocation101_spill] sm:$0xff]  ;;  %v1483_v29 = vadd.f32 %v1451_v33, %v1353_v23  ;;  %vm3917_vm14 = vweird.f32 %v4794_v38 }
 0x1fb   : > { %10878 = vst [vmem:[#allocation23_spill] sm:$0xff] %v7359_v0  ;;  %v2454_v0 = vadd.f32 %v2422_v17, %v2356_v44  ;;  %v2520_v49 = vmul.f32 %v10884_v41, %v7170_v3  ;;  %v4999_v28 = vld [vmem:[%s5408_s19 + $0x50] sm:$0xff]  ;;  %v970_v17 = vand.u32 2147483648, %v7100_v52  ;;  %vm3918_vm2 = vmor %vm3916_vm0, %vm3917_vm14 }
 0x1fc   : > { %10879 = vst [vmem:[#allocation4_spill] sm:$0xff] %v7367_v16  ;;  %v7392_v11 = vmul.f32 %v4999_v28, %v10884_v41  ;;  %v7397_v44 = vmul.f32 %v4999_v28, %v10886_v59  ;;  %v7399_v3 = vld [vmem:[#allocation2 + $0x113] sm:$0xff]  ;;  %v7429_v16 = vpop.eup %4795 }
 0x1fd   : > { %10880 = vst [vmem:[#allocation140_spill] sm:$0xff] %v7370_v60  ;;  %v963_v60 = vadd.f32 %v7221_v62, %v962_v10  ;;  %v7401_v13 = vadd.f32 %v2520_v49, %v2454_v0  ;;  %v968_v10 = vand.u32 2147483647, %v7100_v52  ;;  %v7408_v23 = vld [vmem:[%s10456_s3 + $0x16] ss:$0 sm:$0xff]  ;;  %v3912_v49 = vmul.f32 %v4794_v38, %v7324_v6 }
 0x1fe   : > { %10881 = vst [vmem:[#allocation141_spill] sm:$0xff] %v7375_v4  ;;  %v7411_v33 = vmul.f32 %v7408_v23, %v4999_v28  ;;  %v7418_v4 = vld [vmem:[%s5408_s19 + $0x98] sm:$0xff]  ;;  %v7431_v28 = vld [vmem:[#allocation2 + $0xa8] sm:$0xff]  ;;  %v971_v5 = vor.u32 1.1754944e-38, %v970_v17  ;;  %vm1085_vm1 = vweird.f32 %v7429_v16 }
 0x1ff   : > { %10882 = vst [vmem:[#allocation142_spill] sm:$0xff] %v7378_v57  ;;  %v1549_v0 = vmul.f32 %v7418_v4, %v7060_v18  ;;  %v967_v22 = vsel %vm7425_vm12, %v7221_v62, %v963_v60  ;;  %vm969_vm13 = vcmp.eq.f32.partialorder %v968_v10, 8.507059e+37  ;;  %v1080_v62 = vmul.f32 %v7429_v16, %v7326_v24  ;;  %v438_v60 = vpop.f32.mrf.mxu0  ;;  %vm7480_vm5 = vmor %vm1084_vm15, %vm1085_vm1 }
 0x200   : > { %10883 = vst [vmem:[#allocation143_spill] sm:$0xff] %v7384_v47  ;;  %v5001_v47 = vld [vmem:[%s5408_s19 + $0x90] sm:$0xff]  ;;  %v1088_v10 = vand.u32 2147483647, %v7326_v24 }
 0x201   : > { %10885 = vst [vmem:[#allocation101_spill] sm:$0xff] %v7392_v11  ;;  %v7415_v57 = vmul.f32 %v5001_v47, %v10884_v41  ;;  %v7435_v41 = vmul.f32 %v7431_v28, %v6715_v30  ;;  %v7438_v55 = vmul.f32 %v5001_v47, %v10886_v59  ;;  %v7441_v31 = vmul.f32 %v5001_v47, %v7408_v23 }
 0x202   : > { %10887 = vst [vmem:[#allocation9_spill] sm:$0xff] %v7397_v44  ;;  %v1581_v2 = vadd.f32 %v1549_v0, %v1483_v29  ;;  %v4798_v44 = vpop.eup %4797  ;;  %v10897_v0 = vld [vmem:[#allocation36_spill] sm:$0xff]  ;;  %v3937_v11 = vand.u32 2147483648, %v7380_v15  ;;  %vm7489_vm6 = vcmp.eq.f32.partialorder %v1088_v10, 8.507059e+37 }
 0x203   : > { %10888 = vst [vmem:[#allocation144_spill] sm:$0xff] %v7399_v3  ;;  %v3927_v29 = vmul.f32 %v4798_v44, %v7380_v15  ;;  %vm3932_vm4 = vweird.f32 %v4798_v44 }
 0x204   : > { %10889 = vst [vmem:[#allocation145_spill] sm:$0xff] %v7401_v13  ;;  %v3913_v13 = vsub.f32 1.0, %v3912_v49  ;;  %vm3933_vm8 = vmor %vm3931_vm7, %vm3932_vm4 }
 0x205   : > { %10890 = vst [vmem:[#allocation146_spill] sm:$0xff] %v7411_v33  ;;  %v3920_v33 = vand.u32 2147483647, %v7324_v6 }
 0x206   : > { %10891 = vst [vmem:[#allocation147_spill] sm:$0xff] %v7415_v57  ;;  %v1647_v57 = vmul.f32 %v7078_v34, %v7399_v3  ;;  %v3914_v47 = vmul.f32 %v4794_v38, %v3913_v13  ;;  %v1081_v13 = vsub.f32 1.0, %v1080_v62 }
 0x207   : > { %10894 = vst [vmem:[#allocation148_spill] sm:$0xff] %v7435_v41  ;;  %vm3921_vm3 = vcmp.eq.f32.partialorder %v3920_v33, 8.507059e+37  ;;  %v5004_v33 = vld [vmem:[#allocation2 + $0xa9] sm:$0xff] }
 0x208   : > { %10895 = vst [vmem:[#allocation149_spill] sm:$0xff] %v7438_v55  ;;  %v1090_v55 = vand.u32 2147483648, %v7326_v24  ;;  %v3915_v49 = vadd.f32 %v4794_v38, %v3914_v47  ;;  %v1082_v6 = vmul.f32 %v7429_v16, %v1081_v13  ;;  %v7485_v62 = vmul.f32 %v5004_v33, %v6732_v51 }
 0x209   : > { %10896 = vst [vmem:[#allocation150_spill] sm:$0xff] %v7441_v31  ;;  %v972_v31 = vsel %vm969_vm13, %v971_v5, %v967_v22  ;;  %v3923_v22 = vor.u32 1.1754944e-38, %v3922_v36  ;;  %v3928_v5 = vsub.f32 1.0, %v3927_v29  ;;  %v1679_v13 = vadd.f32 %v1647_v57, %v1581_v2 }
 0x20a   : > { %v7455_v17 = vmul.f32 %v972_v31, %v10897_v0  ;;  %v1091_v52 = vor.u32 1.1754944e-38, %v1090_v55  ;;  %v7464_v31 = vadd.f32 %v7154_v8, %v438_v60  ;;  %v3919_v0 = vsel %vm3918_vm2, %v4794_v38, %v3915_v49  ;;  %10900 = vst [vmem:[#allocation36_spill] sm:$0xff] %v7485_v62 }
 0x20b   : > { %v3924_v36 = vsel %vm3921_vm3, %v3923_v22, %v3919_v0  ;;  %v3929_v47 = vmul.f32 %v4798_v44, %v3928_v5  ;;  %v3935_v55 = vand.u32 2147483647, %v7380_v15  ;;  %v1083_v29 = vadd.f32 %v7429_v16, %v1082_v6  ;;  %v7493_v22 = vld [vmem:[#allocation2 + $0x114] sm:$0xff]  ;;  %v7513_v15 = vld [vmem:[%s10456_s3 + $0x8] ss:$0 sm:$0xff] }
 0x20c   : > { %1177 = vst [vmem:[%s5408_s19 + $0xa8] sm:$0xff] %v7455_v17  ;;  %v4391_v60 = vmul.f32 %v3924_v36, %v7209_v40  ;;  %v4593_v5 = vmul.f32 -1.442695, %v7464_v31  ;;  %v7497_v0 = vld [vmem:[#allocation2 + $0x170] sm:$0xff]  ;;  %v3938_v2 = vor.u32 1.1754944e-38, %v3937_v11  ;;  %v2136_v6 = vmul.f32 %v7513_v15, %v7399_v3 }
 0x20d   : > { %1280 = vst [vmem:[#allocation2 + $0x12a] sm:$0xff] %v7455_v17  ;;  %v3930_v24 = vadd.f32 %v4798_v44, %v3929_v47  ;;  %v1361_v62 = vmul.f32 %v7497_v0, %v10875_v48  ;;  %v7501_v40 = vld [vmem:[#allocation2 + $0x171] sm:$0xff]  ;;  %v1087_v57 = vsel %vm7480_vm5, %v7429_v16, %v1083_v29  ;;  %vm3936_vm9 = vcmp.eq.f32.partialorder %v3935_v55, 8.507059e+37 }
 0x20e   : > { %10903 = vst [vmem:[#allocation151_spill] sm:$0xff] %v7497_v0  ;;  %v1459_v10 = vmul.f32 %v7501_v40, %v10876_v42  ;;  %v1092_v47 = vsel %vm7489_vm6, %v1091_v52, %v1087_v57  ;;  %v7521_v11 = vmul.f32 %v7431_v28, %v7010_v32  ;;  %v1745_v16 = vmul.f32 %v7087_v9, %v7493_v22 }
 0x20f   : > { %10904 = vst [vmem:[#allocation152_spill] sm:$0xff] %v7501_v40  ;;  %v3934_v36 = vsel %vm3933_vm8, %v4798_v44, %v3930_v24  ;;  %v7529_v29 = vmul.f32 %v5004_v33, %v7019_v19  ;;  %v10908_v44 = vld [vmem:[#allocation59_spill] sm:$0xff]  ;;  %4799 = vpow2.f32 %v4593_v5  ;;  %v7535_v57 = vmul.f32 %v7431_v28, %v7356_v12  ;;  %v7552_v28 = vld [vmem:[%s10456_s3 + $0x9] ss:$0 sm:$0xff] }
 0x210   : > { %4423 = vst [vmem:[%s7473_s22] sm:$0xff] %v4391_v60  ;;  %v3939_v38 = vsel %vm3936_vm9, %v3938_v2, %v3934_v36  ;;  %v7526_v60 = vmul.f32 %v1092_v47, %v7157_v35  ;;  %v2168_v55 = vadd.f32 %v2136_v6, %v10908_v44  ;;  %v1777_v2 = vadd.f32 %v1745_v16, %v1679_v13  ;;  %v5008_v6 = vld [vmem:[#allocation2 + $0x108] sm:$0xff]  ;;  %v7561_v13 = vld [vmem:[%s5408_s19 + $0xd8] sm:$0xff] }
 0x211   : > { %10905 = vst [vmem:[#allocation153_spill] sm:$0xff] %v7513_v15  ;;  %v4392_v49 = vmul.f32 %v3939_v38, %v7268_v21  ;;  %v1491_v36 = vadd.f32 %v1459_v10, %v1361_v62  ;;  %v7541_v47 = vmul.f32 %v5004_v33, %v7364_v56  ;;  %v7544_v21 = vmul.f32 %v5008_v6, %v6715_v30  ;;  %v5009_v38 = vld [vmem:[#allocation2 + $0x109] sm:$0xff] }
 0x212   : > { %10906 = vst [vmem:[#allocation154_spill] sm:$0xff] %v7521_v11  ;;  %v7547_v5 = vmul.f32 %v5009_v38, %v6732_v51  ;;  %v2234_v62 = vmul.f32 %v7552_v28, %v7493_v22  ;;  %v7558_v33 = vmul.f32 %v5008_v6, %v7010_v32  ;;  %v1557_v10 = vmul.f32 %v7561_v13, %v7060_v18  ;;  %v486_v11 = vpop.f32.mrf.mxu2  ;;  %v5014_v40 = vld [vmem:[#allocation2 + $0x168] sm:$0xff] }
 0x213   : > { %10907 = vst [vmem:[#allocation155_spill] sm:$0xff] %v7529_v29  ;;  %v7579_v41 = vmul.f32 %v5009_v38, %v7364_v56  ;;  %v2040_v20 = vmul.f32 %v7331_v7, %v7455_v17  ;;  %v7628_v0 = vmul.f32 %v5014_v40, %v6715_v30 }
 0x214   : > { %v1321_v52 = vld [vmem:[#allocation2 + $0x128] sm:$0xff]  ;;  %10909 = vst [vmem:[#allocation59_spill] sm:$0xff] %v7535_v57  ;;  %v7575_v57 = vld [vmem:[#allocation2 + $0x173] sm:$0xff] }
 0x215   : > { %v1419_v24 = vld [vmem:[#allocation2 + $0x129] sm:$0xff]  ;;  %v1844_v35 = vmul.f32 %v7237_v1, %v1321_v52  ;;  %1185 = vst [vmem:[%s5408_s19 + $0xe8] sm:$0xff] %v7526_v60  ;;  %v2332_v29 = vmul.f32 %v6715_v30, %v1321_v52 }
 0x216   : > { %10910 = vst [vmem:[#allocation156_spill] sm:$0xff] %v7541_v47  ;;  %v7565_v16 = vld [vmem:[#allocation2 + $0x123] sm:$0xff]  ;;  %v7570_v47 = vmul.f32 %v5009_v38, %v7019_v19  ;;  %v2144_v38 = vmul.f32 %v7513_v15, %v7575_v57 }
 0x217   : > { %10911 = vst [vmem:[#allocation157_spill] sm:$0xff] %v7544_v21  ;;  %v1876_v44 = vadd.f32 %v1844_v35, %v1777_v2  ;;  %v462_v21 = vpop.f32.mrf.mxu1  ;;  %v1589_v2 = vadd.f32 %v1557_v10, %v1491_v36  ;;  %v7581_v35 = vld [vmem:[#allocation2 + $0x124] sm:$0xff]  ;;  %v1655_v36 = vmul.f32 %v7078_v34, %v7575_v57  ;;  %v7598_v10 = vadd.f32 %v7154_v8, %v486_v11 }
 0x218   : > { %10912 = vst [vmem:[#allocation158_spill] sm:$0xff] %v7547_v5  ;;  %v1942_v5 = vmul.f32 %v7246_v46, %v1419_v24  ;;  %v7589_v52 = vadd.f32 %v7154_v8, %v462_v21 }
 0x219   : > { %4424 = vst [vmem:[%s7473_s22 + $0x8] sm:$0xff] %v4392_v49  ;;  %v7573_v49 = vmul.f32 %v5008_v6, %v7356_v12 }
 0x21a   : > { %10913 = vst [vmem:[#allocation159_spill] sm:$0xff] %v7558_v33  ;;  %v2266_v33 = vadd.f32 %v2234_v62, %v2168_v55  ;;  %v1974_v25 = vadd.f32 %v1942_v5, %v1876_v44  ;;  %v2430_v55 = vmul.f32 %v6732_v51, %v1419_v24  ;;  %v2625_v62 = vmul.f32 %v6965_v58, %v7565_v16  ;;  %v10920_v44 = vld [vmem:[#allocation60_spill] sm:$0xff] }
 0x21b   : > { %1292 = vst [vmem:[#allocation2 + $0x18a] sm:$0xff] %v7526_v60 }
 0x21c   : > { %10914 = vst [vmem:[#allocation160_spill] sm:$0xff] %v7570_v47  ;;  %v4800_v47 = vpop.eup %4799  ;;  %v2364_v6 = vadd.f32 %v2332_v29, %v2266_v33  ;;  %v7595_v5 = vadd.f32 %v2040_v20, %v1974_v25  ;;  %v7600_v29 = vld [vmem:[#allocation2 + $0x174] sm:$0xff]  ;;  %v7605_v33 = vld [vmem:[%s10456_s3 + $0xc] ss:$0 sm:$0xff]  ;;  %v2723_v20 = vmul.f32 %v6995_v26, %v7581_v35 }
 0x21d   : > { %10915 = vst [vmem:[#allocation161_spill] sm:$0xff] %v7573_v49  ;;  %v2528_v21 = vmul.f32 %v7605_v33, %v7455_v17  ;;  %v5013_v25 = vld [vmem:[%s5408_s19 + $0xd0] sm:$0xff]  ;;  %v10923_v49 = vld [vmem:[#allocation10_spill] sm:$0xff] }
 0x21e   : > { %10916 = vst [vmem:[#allocation162_spill] sm:$0xff] %v7575_v57  ;;  %v2462_v24 = vadd.f32 %v2430_v55, %v2364_v6  ;;  %v7614_v11 = vmul.f32 %v5013_v25, %v7605_v33  ;;  %v1687_v6 = vadd.f32 %v1655_v36, %v1589_v2  ;;  %v7619_v55 = vadd.f32 1.0, %v4800_v47 }
 0x21f   : > { %10917 = vst [vmem:[#allocation163_spill] sm:$0xff] %v7579_v41  ;;  %v2657_v41 = vadd.f32 %v2625_v62, %v10920_v44  ;;  %v2176_v53 = vadd.f32 %v2144_v38, %v10923_v49  ;;  %v4601_v44 = vmul.f32 -1.442695, %v7589_v52  ;;  %v1753_v47 = vmul.f32 %v7087_v9, %v7600_v29  ;;  %v5015_v49 = vld [vmem:[#allocation2 + $0x169] sm:$0xff] }
 0x220   : > { %10918 = vst [vmem:[#allocation164_spill] sm:$0xff] %v7595_v5  ;;  %v7617_v5 = vmul.f32 %v5013_v25, %v10886_v59  ;;  %v7622_v57 = vadd.f32 %v2528_v21, %v2462_v24  ;;  %v4609_v2 = vmul.f32 -1.442695, %v7598_v10  ;;  %v7637_v36 = vmul.f32 %v5015_v49, %v6732_v51 }
 0x221   : > { %10919 = vst [vmem:[#allocation165_spill] sm:$0xff] %v7600_v29  ;;  %v7624_v17 = vadd.f32 %v2723_v20, %v2657_v41  ;;  %v7640_v41 = vmul.f32 %v5014_v40, %v7010_v32  ;;  %v7643_v38 = vmul.f32 %v5015_v49, %v7019_v19  ;;  %v2242_v24 = vmul.f32 %v7552_v28, %v7600_v29  ;;  %v7855_v29 = vld [vmem:[#allocation2 + $0x10b] sm:$0xff] }
 0x222   : > { %10921 = vst [vmem:[#allocation60_spill] sm:$0xff] %v7614_v11  ;;  %v1818_v62 = vld [vmem:[#allocation2 + $0x188] sm:$0xff]  ;;  %v7631_v11 = vmul.f32 %v5013_v25, %v7408_v23  ;;  %v7648_v20 = vmul.f32 %v5014_v40, %v7356_v12  ;;  %v1785_v25 = vadd.f32 %v1753_v47, %v1687_v6  ;;  %4801 = vrcp.f32 %v7619_v55  ;;  %v5016_v6 = vld [vmem:[#allocation2 + $0xb0] sm:$0xff] }
 0x223   : > { %10922 = vst [vmem:[#allocation166_spill] sm:$0xff] %v7617_v5  ;;  %v1916_v21 = vld [vmem:[#allocation2 + $0x189] sm:$0xff]  ;;  %v510_v5 = vpop.f32.mrf.mxu3  ;;  %4803 = vpow2.f32 %v4601_v44  ;;  %v2340_v40 = vmul.f32 %v6715_v30, %v1818_v62  ;;  %v7662_v47 = vmul.f32 %v5016_v6, %v6715_v30  ;;  %v5017_v30 = vld [vmem:[#allocation2 + $0xb1] sm:$0xff]  ;;  %vm739_vm10 = vweird.f32 %v7619_v55 }
 0x224   : > { %10924 = vst [vmem:[#allocation10_spill] sm:$0xff] %v7622_v57  ;;  %v1950_v57 = vmul.f32 %v7246_v46, %v1916_v21  ;;  %4805 = vpow2.f32 %v4609_v2  ;;  %v2438_v2 = vmul.f32 %v6732_v51, %v1916_v21 }
 0x225   : > { %10925 = vst [vmem:[#allocation167_spill] sm:$0xff] %v7628_v0 }
 0x226   : > { %10926 = vst [vmem:[#allocation168_spill] sm:$0xff] %v7631_v11  ;;  %v1852_v11 = vmul.f32 %v7237_v1, %v1818_v62  ;;  %v2048_v62 = vmul.f32 %v7331_v7, %v7526_v60 }
 0x227   : > { %10927 = vst [vmem:[#allocation169_spill] sm:$0xff] %v7637_v36  ;;  %v7653_v36 = vmul.f32 %v5015_v49, %v7364_v56  ;;  %v7666_v49 = vmul.f32 %v7182_v50, %v10886_v59 }
 0x228   : > { %10928 = vst [vmem:[#allocation170_spill] sm:$0xff] %v7640_v41  ;;  %v7657_v41 = vmul.f32 %v7605_v33, %v7182_v50  ;;  %v1884_v0 = vadd.f32 %v1852_v11, %v1785_v25  ;;  %v5018_v25 = vld [vmem:[#allocation2 + $0xab] sm:$0xff] }
 0x229   : > { %10929 = vst [vmem:[#allocation171_spill] sm:$0xff] %v7643_v38  ;;  %v2274_v38 = vadd.f32 %v2242_v24, %v2176_v53  ;;  %v7673_v53 = vadd.f32 %v7154_v8, %v510_v5  ;;  %v7679_v24 = vmul.f32 %v5017_v30, %v6732_v51  ;;  %v5019_v5 = vld [vmem:[#allocation2 + $0xac] sm:$0xff] }
 0x22a   : > { %10930 = vst [vmem:[#allocation172_spill] sm:$0xff] %v7648_v20  ;;  %v1982_v11 = vadd.f32 %v1950_v57, %v1884_v0  ;;  %v7682_v20 = vmul.f32 %v5018_v25, %v6965_v58  ;;  %v7689_v0 = vmul.f32 %v5019_v5, %v6995_v26  ;;  %v7691_v57 = vpop.eup %4801 }
 0x22b   : > { %10931 = vst [vmem:[#allocation173_spill] sm:$0xff] %v7653_v36  ;;  %v7670_v36 = vmul.f32 %v7408_v23, %v7182_v50  ;;  %v2372_v44 = vadd.f32 %v2340_v40, %v2274_v38  ;;  %v7686_v50 = vmul.f32 %v6965_v58, %v7193_v27  ;;  %v7695_v38 = vmul.f32 %v6995_v26, %v7252_v14 }
 0x22c   : > { %10932 = vst [vmem:[#allocation174_spill] sm:$0xff] %v7657_v41  ;;  %v7697_v51 = vadd.f32 %v2048_v62, %v1982_v11  ;;  %v2536_v40 = vmul.f32 %v7605_v33, %v7526_v60  ;;  %v4804_v41 = vpop.eup %4803  ;;  %v4617_v11 = vmul.f32 -1.442695, %v7673_v53  ;;  %vm740_vm11 = vweird.f32 %v7691_v57 }
 0x22d   : > { %10933 = vst [vmem:[#allocation175_spill] sm:$0xff] %v7662_v47  ;;  %v2470_v21 = vadd.f32 %v2438_v2, %v2372_v44  ;;  %v4806_v62 = vpop.eup %4805  ;;  %v7723_v44 = vld [vmem:[%s10456_s3 + $0x13] ss:$0 sm:$0xff]  ;;  %v7833_v47 = vld [vmem:[%s10456_s3 + $0xb] ss:$0 sm:$0xff]  ;;  %vm741_vm12 = vmor %vm739_vm10, %vm740_vm11 }
 0x22e   : > { %10934 = vst [vmem:[#allocation176_spill] sm:$0xff] %v7666_v49  ;;  %v7726_v2 = vmul.f32 %v7723_v44, %v5019_v5  ;;  %4807 = vpow2.f32 %v4617_v11  ;;  %v745_v11 = vand.u32 2147483648, %v7619_v55 }
 0x22f   : > { %10935 = vst [vmem:[#allocation177_spill] sm:$0xff] %v7670_v36  ;;  %v7702_v36 = vmul.f32 %v5016_v6, %v7010_v32  ;;  %v7732_v49 = vadd.f32 %v2536_v40, %v2470_v21  ;;  %v7772_v40 = vmul.f32 %v7418_v4, %v10886_v59 }
 0x230   : > { %10936 = vst [vmem:[#allocation178_spill] sm:$0xff] %v7679_v24  ;;  %v7817_v24 = vld [vmem:[%s10456_s3 + $0xa] ss:$0 sm:$0xff] }
 0x231   : > { %10937 = vst [vmem:[#allocation179_spill] sm:$0xff] %v7682_v20 }
 0x232   : > { %10938 = vst [vmem:[#allocation180_spill] sm:$0xff] %v7686_v50  ;;  %v7705_v50 = vmul.f32 %v5017_v30, %v7019_v19 }
 0x233   : > { %10939 = vst [vmem:[#allocation181_spill] sm:$0xff] %v7689_v0  ;;  %v7710_v0 = vld [vmem:[%s10456_s3 + $0x12] ss:$0 sm:$0xff] }
 0x234   : > { %10940 = vst [vmem:[#allocation182_spill] sm:$0xff] %v7695_v38  ;;  %v7713_v38 = vmul.f32 %v7710_v0, %v5018_v25  ;;  %v7718_v60 = vmul.f32 %v7710_v0, %v7193_v27 }
 0x235   : > { %10941 = vst [vmem:[#allocation183_spill] sm:$0xff] %v7697_v51  ;;  %v7730_v51 = vmul.f32 %v7723_v44, %v7252_v14 }
 0x236   : > { %10942 = vst [vmem:[#allocation184_spill] sm:$0xff] %v7702_v36 }
 0x237   : > { %10943 = vst [vmem:[#allocation185_spill] sm:$0xff] %v7705_v50  ;;  %v7738_v50 = vmul.f32 %v5017_v30, %v7364_v56 }
 0x238   : > { %10944 = vst [vmem:[#allocation186_spill] sm:$0xff] %v7710_v0 }
 0x239   : > { %10945 = vst [vmem:[#allocation187_spill] sm:$0xff] %v7713_v38  ;;  %v7735_v38 = vmul.f32 %v5016_v6, %v7356_v12  ;;  %v7755_v6 = vld [vmem:[%s10456_s3 + $0x18] ss:$0 sm:$0xff] }
 0x23a   : > { %10946 = vst [vmem:[#allocation188_spill] sm:$0xff] %v7718_v60  ;;  %v7743_v60 = vld [vmem:[%s10456_s3 + $0x17] ss:$0 sm:$0xff]  ;;  %v7758_v30 = vmul.f32 %v7755_v6, %v5019_v5  ;;  %v7762_v21 = vmul.f32 %v7755_v6, %v7252_v14  ;;  %v7778_v5 = vld [vmem:[#allocation2 + $0xc0] sm:$0xff] }
 0x23b   : > { %10947 = vst [vmem:[#allocation189_spill] sm:$0xff] %v7723_v44  ;;  %v7746_v36 = vmul.f32 %v7743_v60, %v5018_v25  ;;  %v7766_v25 = vmul.f32 %v7605_v33, %v7418_v4  ;;  %v1346_v14 = vmul.f32 %v7778_v5, %v10875_v48 }
 0x23c   : > { %10948 = vst [vmem:[#allocation190_spill] sm:$0xff] %v7726_v2  ;;  %v7750_v2 = vmul.f32 %v7743_v60, %v7193_v27  ;;  %v735_v27 = vmul.f32 %v7691_v57, %v7619_v55 }
 0x23d   : > { %10949 = vst [vmem:[#allocation191_spill] sm:$0xff] %v7730_v51 }
 0x23e   : > { %10950 = vst [vmem:[#allocation192_spill] sm:$0xff] %v7732_v49  ;;  %v7774_v49 = vadd.f32 1.0, %v4804_v41  ;;  %v10964_v41 = vld [vmem:[#allocation110_spill] sm:$0xff] }
 0x23f   : > { %10951 = vst [vmem:[#allocation193_spill] sm:$0xff] %v7735_v38  ;;  %v743_v38 = vand.u32 2147483647, %v7619_v55 }
 0x240   : > { %10952 = vst [vmem:[#allocation194_spill] sm:$0xff] %v7738_v50  ;;  %4809 = vrcp.f32 %v7774_v49  ;;  %vm859_vm14 = vweird.f32 %v7774_v49 }
 0x241   : > { %10953 = vst [vmem:[#allocation195_spill] sm:$0xff] %v7743_v60  ;;  %vm744_vm13 = vcmp.eq.f32.partialorder %v743_v38, 8.507059e+37 }
 0x242   : > { %10954 = vst [vmem:[#allocation196_spill] sm:$0xff] %v7746_v36  ;;  %v736_v36 = vsub.f32 1.0, %v735_v27  ;;  %v7803_v27 = vmul.f32 %v7605_v33, %v7561_v13 }
 0x243   : > { %10955 = vst [vmem:[#allocation197_spill] sm:$0xff] %v7750_v2  ;;  %v7776_v2 = vadd.f32 1.0, %v4806_v62  ;;  %v1452_v62 = vmul.f32 %v10876_v42, %v10964_v41  ;;  %v7807_v41 = vmul.f32 %v7561_v13, %v10886_v59  ;;  %v7827_v59 = vmul.f32 %v7561_v13, %v7408_v23 }
 0x244   : > { %10956 = vst [vmem:[#allocation198_spill] sm:$0xff] %v7755_v6  ;;  %v737_v50 = vmul.f32 %v7691_v57, %v736_v36  ;;  %v7809_v36 = vld [vmem:[#allocation2 + $0xc3] sm:$0xff] }
 0x245   : > { %10957 = vst [vmem:[#allocation199_spill] sm:$0xff] %v7758_v30  ;;  %v10963_v30 = vld [vmem:[#allocation109_spill] sm:$0xff]  ;;  %4811 = vrcp.f32 %v7776_v2  ;;  %vm979_vm2 = vweird.f32 %v7776_v2 }
 0x246   : > { %10958 = vst [vmem:[#allocation200_spill] sm:$0xff] %v7762_v21  ;;  %v7782_v21 = vld [vmem:[#allocation2 + $0xc1] sm:$0xff]  ;;  %v1354_v51 = vmul.f32 %v10875_v48, %v10963_v30  ;;  %v7799_v30 = vmul.f32 %v7418_v4, %v7408_v23  ;;  %v7819_v4 = vld [vmem:[#allocation2 + $0x110] sm:$0xff] }
 0x247   : > { %10959 = vst [vmem:[#allocation201_spill] sm:$0xff] %v7766_v25  ;;  %v1444_v25 = vmul.f32 %v7782_v21, %v10876_v42 }
 0x248   : > { %10960 = vst [vmem:[#allocation202_spill] sm:$0xff] %v7772_v40  ;;  %v441_v40 = vpop.f32.mrf.mxu0 }
 0x249   : > { %10961 = vst [vmem:[#allocation203_spill] sm:$0xff] %v7778_v5  ;;  %v7812_v20 = vadd.f32 %v7154_v8, %v441_v40  ;;  %v4808_v40 = vpop.eup %4807  ;;  %v7840_v5 = vld [vmem:[%s5408_s19 + $0x60] sm:$0xff] }
 0x24a   : > { %10962 = vst [vmem:[#allocation204_spill] sm:$0xff] %v7782_v21  ;;  %v7837_v21 = vmul.f32 %v7833_v47, %v7345_v45  ;;  %v1542_v13 = vmul.f32 %v7840_v5, %v7060_v18 }
 0x24b   : > { %10965 = vst [vmem:[#allocation109_spill] sm:$0xff] %v7799_v30  ;;  %v7823_v30 = vmul.f32 %v7819_v4, %v7817_v24 }
 0x24c   : > { %10966 = vst [vmem:[#allocation110_spill] sm:$0xff] %v7803_v27  ;;  %v1476_v27 = vadd.f32 %v1444_v25, %v1346_v14  ;;  %v1640_v25 = vmul.f32 %v7078_v34, %v7809_v36 }
 0x24d   : > { %10967 = vst [vmem:[#allocation205_spill] sm:$0xff] %v7807_v41  ;;  %v738_v41 = vadd.f32 %v7691_v57, %v737_v50  ;;  %v746_v50 = vor.u32 1.1754944e-38, %v745_v11  ;;  %v7866_v11 = vld [vmem:[#allocation2 + $0xc4] sm:$0xff] }
 0x24e   : > { %10968 = vst [vmem:[#allocation206_spill] sm:$0xff] %v7809_v36 }
 0x24f   : > { %10969 = vst [vmem:[#allocation207_spill] sm:$0xff] %v7812_v20  ;;  %v742_v14 = vsel %vm741_vm12, %v7691_v57, %v738_v41  ;;  %v4594_v57 = vmul.f32 -1.442695, %v7812_v20  ;;  %v1574_v41 = vadd.f32 %v1542_v13, %v1476_v27  ;;  %v7892_v27 = vmul.f32 %v7087_v9, %v7866_v11 }
 0x250   : > { %10970 = vst [vmem:[#allocation208_spill] sm:$0xff] %v7823_v30  ;;  %v7851_v30 = vadd.f32 1.0, %v4808_v40  ;;  %v7896_v13 = vmul.f32 %v7513_v15, %v7809_v36 }
 0x251   : > { %10971 = vst [vmem:[#allocation209_spill] sm:$0xff] %v7827_v59  ;;  %v1484_v59 = vadd.f32 %v1452_v62, %v1354_v51  ;;  %v7859_v51 = vmul.f32 %v7855_v29, %v6965_v58  ;;  %v7862_v62 = vld [vmem:[%s5408_s19 + $0xa0] sm:$0xff] }
 0x252   : > { %10972 = vst [vmem:[#allocation210_spill] sm:$0xff] %v7837_v21  ;;  %v7853_v21 = vpop.eup %4809  ;;  %v1550_v55 = vmul.f32 %v7862_v62, %v7060_v18  ;;  %4813 = vrcp.f32 %v7851_v30  ;;  %vm1099_vm6 = vweird.f32 %v7851_v30 }
 0x253   : > { %10973 = vst [vmem:[#allocation211_spill] sm:$0xff] %v7840_v5  ;;  %v747_v5 = vsel %vm744_vm13, %v746_v50, %v742_v14  ;;  %v4812_v38 = vpop.eup %4811  ;;  %v855_v6 = vmul.f32 %v7853_v21, %v7774_v49  ;;  %4815 = vpow2.f32 %v4594_v57  ;;  %vm860_vm15 = vweird.f32 %v7853_v21 }
 0x254   : > { %10974 = vst [vmem:[#allocation212_spill] sm:$0xff] %v7855_v29  ;;  %v7870_v40 = vmul.f32 %v747_v5, %v7464_v31  ;;  %v7885_v14 = vadd.f32 %v1550_v55, %v1484_v59  ;;  %v975_v31 = vmul.f32 %v4812_v38, %v7776_v2  ;;  %v7888_v5 = vadd.f32 %v1640_v25, %v1574_v41  ;;  %vm7929_vm1 = vmor %vm859_vm14, %vm860_vm15 }
 0x255   : > { %10975 = vst [vmem:[#allocation213_spill] sm:$0xff] %v7859_v51  ;;  %v7877_v51 = vmul.f32 %v6965_v58, %v7399_v3  ;;  %v856_v59 = vsub.f32 1.0, %v855_v6  ;;  %v863_v55 = vand.u32 2147483647, %v7774_v49  ;;  %v865_v41 = vand.u32 2147483648, %v7774_v49 }
 0x256   : > { %10976 = vst [vmem:[#allocation214_spill] sm:$0xff] %v7862_v62  ;;  %v7879_v62 = vld [vmem:[#allocation2 + $0x10c] sm:$0xff]  ;;  %v976_v25 = vsub.f32 1.0, %v975_v31  ;;  %vm980_vm0 = vweird.f32 %v4812_v38  ;;  %v2617_v6 = vmul.f32 %v6965_v58, %v7809_v36  ;;  %v1648_v57 = vmul.f32 %v7078_v34, %v7565_v16 }
 0x257   : > { %10977 = vst [vmem:[#allocation215_spill] sm:$0xff] %v7877_v51  ;;  %v7883_v50 = vmul.f32 %v7879_v62, %v6995_v26  ;;  %v7900_v51 = vmul.f32 %v7552_v28, %v7866_v11  ;;  %v2111_v26 = vld [vmem:[#allocation2 + $0x183] sm:$0xff]  ;;  %v857_v60 = vmul.f32 %v7853_v21, %v856_v59  ;;  %v2137_v31 = vmul.f32 %v7513_v15, %v7565_v16  ;;  %vm7938_vm4 = vmor %vm979_vm2, %vm980_vm0 }
 0x258   : > { %10978 = vst [vmem:[#allocation216_spill] sm:$0xff] %v7879_v62  ;;  %v977_v54 = vmul.f32 %v4812_v38, %v976_v25  ;;  %v985_v62 = vand.u32 2147483648, %v7776_v2  ;;  %v7912_v44 = vpop.eup %4813  ;;  %v2145_v3 = vmul.f32 %v7513_v15, %v2111_v26  ;;  %v7922_v29 = vmul.f32 %v6965_v58, %v2111_v26 }
 0x259   : > { %10979 = vst [vmem:[#allocation217_spill] sm:$0xff] %v7883_v50  ;;  %v983_v50 = vand.u32 2147483647, %v7776_v2  ;;  %v858_v59 = vadd.f32 %v7853_v21, %v857_v60  ;;  %vm7934_vm3 = vcmp.eq.f32.partialorder %v863_v55, 8.507059e+37  ;;  %v866_v16 = vor.u32 1.1754944e-38, %v865_v41  ;;  %v4816_v26 = vpop.eup %4815 }
 0x25a   : > { %1162 = vst [vmem:[%s5408_s19 + $0x30] sm:$0xff] %v7870_v40  ;;  %v978_v36 = vadd.f32 %v4812_v38, %v977_v54  ;;  %v1095_v49 = vmul.f32 %v7912_v44, %v7851_v30  ;;  %v986_v55 = vor.u32 1.1754944e-38, %v985_v62  ;;  %v1536_v15 = vmul.f32 %v7060_v18, %v7870_v40 }
 0x25b   : > { %1258 = vst [vmem:[#allocation2 + $0x7a] sm:$0xff] %v7870_v40  ;;  %vm7942_vm5 = vcmp.eq.f32.partialorder %v983_v50, 8.507059e+37  ;;  %v862_v54 = vsel %vm7929_vm1, %v7853_v21, %v858_v59  ;;  %v2513_v0 = vmul.f32 %v7605_v33, %v7870_v40  ;;  %v7965_v21 = vld [vmem:[%s10456_s3 + $0x11] ss:$0 sm:$0xff]  ;;  %v1103_v62 = vand.u32 2147483647, %v7851_v30 }
 0x25c   : > { %v982_v2 = vsel %vm7938_vm4, %v4812_v38, %v978_v36  ;;  %v3001_v36 = vmul.f32 %v7965_v21, %v7870_v40  ;;  %v867_v18 = vsel %vm7934_vm3, %v866_v16, %v862_v54  ;;  %v1096_v37 = vsub.f32 1.0, %v1095_v49 }
 0x25d   : > { %v987_v25 = vsel %vm7942_vm5, %v986_v55, %v982_v2  ;;  %v7982_v39 = vadd.f32 1.0, %v4816_v26  ;;  %v1105_v55 = vand.u32 2147483648, %v7851_v30  ;;  %vm1100_vm7 = vweird.f32 %v7912_v44 }
 0x25e   : > { %v7996_v49 = vmul.f32 %v987_v25, %v7598_v10  ;;  %v2209_v25 = vld [vmem:[#allocation2 + $0x184] sm:$0xff]  ;;  %vm8031_vm8 = vmor %vm1099_vm6, %vm1100_vm7  ;;  %vm1104_vm9 = vcmp.eq.f32.partialorder %v1103_v62, 8.507059e+37  ;;  %v1770_v30 = vadd.f32 %v7892_v27, %v7888_v5 }
 0x25f   : > { %4817 = vrcp.f32 %v7982_v39  ;;  %vm754_vm10 = vweird.f32 %v7982_v39 }
 0x260   : > { %1178 = vst [vmem:[%s5408_s19 + $0xb0] sm:$0xff] %v7996_v49 }
 0x261   : > { %1282 = vst [vmem:[#allocation2 + $0x13a] sm:$0xff] %v7996_v49 }
 0x262   : > { %v7954_v41 = vld [vmem:[#allocation2 + $0x78] sm:$0xff] }
 0x263   : > { %v7956_v50 = vld [vmem:[#allocation2 + $0x79] sm:$0xff]  ;;  %v1340_v38 = vmul.f32 %v10875_v48, %v7954_v41  ;;  %v2317_v58 = vmul.f32 %v7817_v24, %v7954_v41  ;;  %v2805_v20 = vmul.f32 %v7010_v32, %v7954_v41  ;;  %v3293_v16 = vmul.f32 %v7356_v12, %v7954_v41 }
 0x264   : > { %v1438_v59 = vmul.f32 %v10876_v42, %v7956_v50  ;;  %v2415_v42 = vmul.f32 %v7833_v47, %v7956_v50  ;;  %v2903_v34 = vmul.f32 %v7019_v19, %v7956_v50  ;;  %v7993_v32 = vmul.f32 %v867_v18, %v7589_v52  ;;  %v10988_v52 = vld [vmem:[#allocation13_spill] sm:$0xff] }
 0x265   : > { %v2349_v60 = vadd.f32 %v2317_v58, %v7122_v61  ;;  %v2837_v54 = vadd.f32 %v2805_v20, %v7132_v43  ;;  %v3325_v2 = vadd.f32 %v3293_v16, %v7148_v63  ;;  %v3391_v19 = vmul.f32 %v7364_v56, %v7956_v50  ;;  %v10989_v20 = vld [vmem:[#allocation17_spill] sm:$0xff]  ;;  %v8057_v62 = vpop.eup %4817 }
 0x266   : > { %v1470_v48 = vadd.f32 %v1438_v59, %v1340_v38  ;;  %1170 = vst [vmem:[%s5408_s19 + $0x70] sm:$0xff] %v7993_v32  ;;  %v1097_v43 = vmul.f32 %v7912_v44, %v1096_v37  ;;  %v3489_v63 = vmul.f32 %v7408_v23, %v7870_v40  ;;  %v2649_v59 = vadd.f32 %v2617_v6, %v10989_v20  ;;  %v8038_v6 = vld [vmem:[%s10456_s3 + $0xe] ss:$0 sm:$0xff] }
 0x267   : > { %v2447_v38 = vadd.f32 %v2415_v42, %v2349_v60  ;;  %v2935_v61 = vadd.f32 %v2903_v34, %v2837_v54  ;;  %v3423_v10 = vadd.f32 %v3391_v19, %v3325_v2  ;;  %1270 = vst [vmem:[#allocation2 + $0xda] sm:$0xff] %v7993_v32  ;;  %v1680_v18 = vadd.f32 %v1648_v57, %v7885_v14  ;;  %v10991_v42 = vld [vmem:[#allocation19_spill] sm:$0xff]  ;;  %v10995_v57 = vld [vmem:[#allocation112_spill] sm:$0xff] }
 0x268   : > { %v7998_v26 = vadd.f32 %v1536_v15, %v1470_v48  ;;  %v2161_v15 = vadd.f32 %v7896_v13, %v10988_v52  ;;  %v10990_v13 = vld [vmem:[#allocation16_spill] sm:$0xff]  ;;  %v2177_v34 = vadd.f32 %v2145_v3, %v10991_v42  ;;  %v2715_v3 = vmul.f32 %v8038_v6, %v7866_v11  ;;  %v1322_v14 = vld [vmem:[#allocation2 + $0x138] sm:$0xff] }
 0x269   : > { %v8016_v58 = vadd.f32 %v2513_v0, %v2447_v38  ;;  %v8018_v37 = vadd.f32 %v3001_v36, %v2935_v61  ;;  %v2169_v48 = vadd.f32 %v2137_v31, %v10990_v13  ;;  %v8024_v16 = vadd.f32 %v3489_v63, %v3423_v10  ;;  %v8079_v63 = vld [vmem:[%s10456_s3] ss:$0 sm:$0xff]  ;;  %v8100_v42 = vld [vmem:[%s10456_s3 + $0xf] ss:$0 sm:$0xff] }
 0x26a   : > { %v1106_v0 = vor.u32 1.1754944e-38, %v1105_v55  ;;  %v2665_v31 = vadd.f32 %v7922_v29, %v10995_v57  ;;  %v1098_v36 = vadd.f32 %v7912_v44, %v1097_v43  ;;  %v1746_v60 = vmul.f32 %v7087_v9, %v7581_v35 }
 0x26b   : > { %10992 = vst [vmem:[#allocation13_spill] sm:$0xff] %v8024_v16  ;;  %v2235_v54 = vmul.f32 %v7552_v28, %v7581_v35  ;;  %v2243_v2 = vmul.f32 %v7552_v28, %v2209_v25  ;;  %v2259_v19 = vadd.f32 %v7900_v51, %v2161_v15  ;;  %v2747_v55 = vadd.f32 %v2715_v3, %v2649_v59  ;;  %v8068_v51 = vld [vmem:[%s10456_s3 + $0x2] ss:$0 sm:$0xff]  ;;  %v8086_v59 = vld [vmem:[%s10456_s3 + $0x1] ss:$0 sm:$0xff]  ;;  %v465_v3 = vpop.f32.mrf.mxu1 }
 0x26c   : > { %v2731_v38 = vmul.f32 %v8038_v6, %v2209_v25  ;;  %v1102_v29 = vsel %vm8031_vm8, %v7912_v44, %v1098_v36  ;;  %v1778_v5 = vadd.f32 %v1746_v60, %v1680_v18  ;;  %v1544_v44 = vmul.f32 %v8068_v51, %v7993_v32 }
 0x26d   : > { %v2267_v27 = vadd.f32 %v2235_v54, %v2169_v48  ;;  %v8059_v61 = vadd.f32 %v2243_v2, %v2177_v34  ;;  %v1107_v9 = vsel %vm1104_vm9, %v1106_v0, %v1102_v29  ;;  %v2033_v25 = vmul.f32 %v7331_v7, %v7993_v32  ;;  %v8116_v29 = vld [vmem:[%s10456_s3 + $0x10] ss:$0 sm:$0xff] }
 0x26e   : > { %v8061_v43 = vadd.f32 %v2731_v38, %v2665_v31  ;;  %v8063_v35 = vld [vmem:[#allocation2 + $0xd8] sm:$0xff]  ;;  %v8073_v15 = vmul.f32 %v1107_v9, %v7673_v53  ;;  %v2521_v48 = vmul.f32 %v7605_v33, %v7993_v32  ;;  %v750_v0 = vmul.f32 %v8057_v62, %v7982_v39 }
 0x26f   : > { %10996 = vst [vmem:[#allocation17_spill] sm:$0xff] %v8063_v35  ;;  %v1412_v52 = vld [vmem:[#allocation2 + $0xd9] sm:$0xff]  ;;  %v1348_v20 = vmul.f32 %v8079_v63, %v8063_v35  ;;  %v1837_v53 = vmul.f32 %v7237_v1, %v8063_v35  ;;  %v2325_v13 = vmul.f32 %v7817_v24, %v8063_v35  ;;  %v2813_v34 = vmul.f32 %v8100_v42, %v8063_v35 }
 0x270   : > { %v1446_v18 = vmul.f32 %v8086_v59, %v1412_v52  ;;  %1186 = vst [vmem:[%s5408_s19 + $0xf0] sm:$0xff] %v8073_v15  ;;  %v1935_v36 = vmul.f32 %v7246_v46, %v1412_v52  ;;  %v3009_v60 = vmul.f32 %v7965_v21, %v7993_v32  ;;  %v2423_v2 = vmul.f32 %v7833_v47, %v1412_v52 }
 0x271   : > { %v1869_v31 = vadd.f32 %v1837_v53, %v1770_v30  ;;  %1294 = vst [vmem:[#allocation2 + $0x19a] sm:$0xff] %v8073_v15  ;;  %v2357_v54 = vadd.f32 %v2325_v13, %v2259_v19  ;;  %v2845_v38 = vadd.f32 %v2813_v34, %v2747_v55  ;;  %v2911_v9 = vmul.f32 %v8116_v29, %v1412_v52 }
 0x272   : > { %v1478_v57 = vadd.f32 %v1446_v18, %v1348_v20  ;;  %v1420_v20 = vld [vmem:[#allocation2 + $0x139] sm:$0xff]  ;;  %v1845_v32 = vmul.f32 %v7237_v1, %v1322_v14  ;;  %v8124_v19 = vadd.f32 %v7154_v8, %v465_v3  ;;  %v2333_v13 = vmul.f32 %v7817_v24, %v1322_v14 }
 0x273   : > { %v1967_v18 = vadd.f32 %v1935_v36, %v1869_v31  ;;  %v2455_v53 = vadd.f32 %v2423_v2, %v2357_v54  ;;  %v2943_v55 = vadd.f32 %v2911_v9, %v2845_v38  ;;  %v751_v34 = vsub.f32 1.0, %v750_v0 }
 0x274   : > { %v8120_v30 = vadd.f32 %v1544_v44, %v1478_v57  ;;  %10998 = vst [vmem:[#allocation19_spill] sm:$0xff] %v8124_v19  ;;  %v1877_v35 = vadd.f32 %v1845_v32, %v1778_v5  ;;  %v1943_v52 = vmul.f32 %v7246_v46, %v1420_v20  ;;  %v2821_v16 = vmul.f32 %v8100_v42, %v1322_v14 }
 0x275   : > { %v8127_v10 = vadd.f32 %v2033_v25, %v1967_v18  ;;  %v8131_v44 = vadd.f32 %v2521_v48, %v2455_v53  ;;  %v8133_v57 = vadd.f32 %v3009_v60, %v2943_v55  ;;  %v2365_v31 = vadd.f32 %v2333_v13, %v2267_v27 }
 0x276   : > { %10997 = vst [vmem:[#allocation16_spill] sm:$0xff] %v8120_v30  ;;  %v2431_v8 = vmul.f32 %v7833_v47, %v1420_v20  ;;  %v1975_v3 = vadd.f32 %v1943_v52, %v1877_v35  ;;  %v2041_v36 = vmul.f32 %v7331_v7, %v7996_v49  ;;  %v2853_v0 = vadd.f32 %v2821_v16, %v7624_v17 }
 0x277   : > { %10999 = vst [vmem:[#allocation112_spill] sm:$0xff] %v8127_v10  ;;  %v2919_v25 = vmul.f32 %v8116_v29, %v1420_v20  ;;  %v2529_v46 = vmul.f32 %v7605_v33, %v7996_v49  ;;  %v3017_v48 = vmul.f32 %v7965_v21, %v7996_v49  ;;  %v752_v27 = vmul.f32 %v8057_v62, %v751_v34 }
 0x278   : > { %11000 = vst [vmem:[#allocation218_spill] sm:$0xff] %v8131_v44  ;;  %v2463_v5 = vadd.f32 %v2431_v8, %v2365_v31  ;;  %v2307_v14 = vld [vmem:[#allocation2 + $0x198] sm:$0xff]  ;;  %v8145_v54 = vadd.f32 %v2041_v36, %v1975_v3  ;;  %v4602_v17 = vmul.f32 -1.442695, %v8124_v19  ;;  %vm755_vm11 = vweird.f32 %v8057_v62  ;;  %v11055_v44 = vld [vmem:[#allocation153_spill] sm:$0xff] }
 0x279   : > { %11001 = vst [vmem:[#allocation219_spill] sm:$0xff] %v8133_v57  ;;  %v2405_v60 = vld [vmem:[#allocation2 + $0x199] sm:$0xff]  ;;  %v2951_v35 = vadd.f32 %v2919_v25, %v2853_v0  ;;  %v2341_v2 = vmul.f32 %v7817_v24, %v2307_v14  ;;  %v2829_v38 = vmul.f32 %v8100_v42, %v2307_v14  ;;  %v758_v9 = vand.u32 2147483647, %v7982_v39  ;;  %vm756_vm12 = vmor %vm754_vm10, %vm755_vm11  ;;  %v11010_v25 = vld [vmem:[#allocation129_spill] sm:$0xff] }
 0x27a   : > { %11002 = vst [vmem:[#allocation220_spill] sm:$0xff] %v8145_v54  ;;  %v8149_v16 = vadd.f32 %v2529_v46, %v2463_v5  ;;  %v8156_v49 = vmul.f32 %v8038_v6, %v7493_v22  ;;  %v2439_v32 = vmul.f32 %v7833_v47, %v2405_v60  ;;  %v2927_v55 = vmul.f32 %v8116_v29, %v2405_v60  ;;  %v11011_v46 = vld [vmem:[#allocation133_spill] sm:$0xff]  ;;  %v11014_v60 = vld [vmem:[#allocation186_spill] sm:$0xff] }
 0x27b   : > { %v8158_v20 = vadd.f32 %v3017_v48, %v2951_v35  ;;  %v2373_v18 = vadd.f32 %v2341_v2, %v8059_v61  ;;  %v2861_v53 = vadd.f32 %v2829_v38, %v8061_v43  ;;  %v753_v13 = vadd.f32 %v8057_v62, %v752_v27  ;;  %v11013_v48 = vld [vmem:[#allocation207_spill] sm:$0xff]  ;;  %v11015_v27 = vld [vmem:[#allocation212_spill] sm:$0xff]  ;;  %v11019_v38 = vld [vmem:[#allocation189_spill] sm:$0xff] }
 0x27c   : > { %11003 = vst [vmem:[#allocation221_spill] sm:$0xff] %v8149_v16  ;;  %v11006_v34 = vand.u32 2147483648, %v7982_v39  ;;  %v1829_v31 = vmul.f32 %v7237_v1, %v7954_v41  ;;  %v2537_v3 = vmul.f32 %v7605_v33, %v8073_v15  ;;  %4819 = vpow2.f32 %v4602_v17  ;;  %v11017_v2 = vld [vmem:[#allocation144_spill] sm:$0xff]  ;;  %v11051_v54 = vld [vmem:[#allocation206_spill] sm:$0xff] }
 0x27d   : > { %11004 = vst [vmem:[#allocation222_spill] sm:$0xff] %v8156_v49  ;;  %v2471_v8 = vadd.f32 %v2439_v32, %v2373_v18  ;;  %v2959_v61 = vadd.f32 %v2927_v55, %v2861_v53  ;;  %v3025_v43 = vmul.f32 %v7965_v21, %v8073_v15  ;;  %v757_v36 = vsel %vm756_vm12, %v8057_v62, %v753_v13  ;;  %v11022_v32 = vld [vmem:[#allocation3_spill] sm:$0xff] }
 0x27e   : > { %11005 = vst [vmem:[#allocation223_spill] sm:$0xff] %v8158_v20  ;;  %v761_v52 = vor.u32 1.1754944e-38, %v11006_v34  ;;  %vm759_vm13 = vcmp.eq.f32.partialorder %v758_v9, 8.507059e+37  ;;  %v8178_v0 = vmul.f32 %v8100_v42, %v7819_v4  ;;  %v8182_v1 = vmul.f32 %v8116_v29, %v7345_v45  ;;  %v11020_v9 = vld [vmem:[#allocation216_spill] sm:$0xff] }
 0x27f   : > { %v8184_v41 = vadd.f32 %v2537_v3, %v2471_v8  ;;  %v1347_v5 = vmul.f32 %v8079_v63, %v11010_v25  ;;  %v1445_v15 = vmul.f32 %v8086_v59, %v11011_v46  ;;  %v8190_v62 = vadd.f32 %v3025_v43, %v2959_v61  ;;  %v11029_v61 = vld [vmem:[#allocation198_spill] sm:$0xff]  ;;  %v11035_v46 = vld [vmem:[#allocation152_spill] sm:$0xff] }
 0x280   : > { %11007 = vst [vmem:[#allocation224_spill] sm:$0xff] %v8178_v0  ;;  %v762_v39 = vsel %vm759_vm13, %v761_v52, %v757_v36  ;;  %v8195_v35 = vmul.f32 %v11015_v27, %v11014_v60  ;;  %v8199_v17 = vmul.f32 %v11014_v60, %v11017_v2  ;;  %v8203_v18 = vmul.f32 %v11020_v9, %v11019_v38  ;;  %v11026_v52 = vld [vmem:[#allocation195_spill] sm:$0xff]  ;;  %v11054_v0 = vld [vmem:[#allocation22_spill] sm:$0xff] }
 0x281   : > { %11008 = vst [vmem:[#allocation225_spill] sm:$0xff] %v8182_v1  ;;  %v1131_v14 = vmul.f32 %v762_v39, %v11013_v48  ;;  %v1861_v53 = vadd.f32 %v1829_v31, %v11022_v32  ;;  %v8208_v55 = vmul.f32 %v11019_v38, %v7493_v22  ;;  %v8212_v13 = vmul.f32 %v7819_v4, %v7356_v12  ;;  %v11033_v39 = vld [vmem:[#allocation151_spill] sm:$0xff] }
 0x282   : > { %11009 = vst [vmem:[#allocation226_spill] sm:$0xff] %v8184_v41  ;;  %v8216_v34 = vmul.f32 %v7364_v56, %v7345_v45  ;;  %v8220_v8 = vmul.f32 %v11015_v27, %v11026_v52  ;;  %v4820_v3 = vpop.eup %4819  ;;  %v8225_v31 = vmul.f32 %v11026_v52, %v11017_v2  ;;  %v8229_v43 = vmul.f32 %v11020_v9, %v11029_v61  ;;  %v8238_v45 = vld [vmem:[%s10456_s3 + $0x6] ss:$0 sm:$0xff]  ;;  %v5042_v27 = vld [vmem:[#allocation2 + $0x16b] sm:$0xff] }
 0x283   : > { %11012 = vst [vmem:[#allocation129_spill] sm:$0xff] %v8190_v62  ;;  %v8233_v4 = vmul.f32 %v11029_v61, %v7493_v22  ;;  %v1927_v36 = vmul.f32 %v8238_v45, %v7956_v50  ;;  %v8244_v25 = vmul.f32 %v7817_v24, %v11033_v39  ;;  %v8248_v48 = vmul.f32 %v7833_v47, %v11035_v46  ;;  %v8253_v22 = vld [vmem:[%s10456_s3 + $0xd] ss:$0 sm:$0xff]  ;;  %v11039_v50 = vld [vmem:[#allocation162_spill] sm:$0xff]  ;;  %v11042_v46 = vld [vmem:[#allocation165_spill] sm:$0xff] }
 0x284   : > { %11016 = vst [vmem:[#allocation133_spill] sm:$0xff] %v8195_v35  ;;  %v8256_v2 = vmul.f32 %v5042_v27, %v8253_v22  ;;  %v1477_v9 = vadd.f32 %v1445_v15, %v1347_v5  ;;  %v8260_v32 = vmul.f32 %v8253_v22, %v11039_v50  ;;  %v5043_v62 = vld [vmem:[#allocation2 + $0x16c] sm:$0xff]  ;;  %v8271_v20 = vmul.f32 %v8100_v42, %v11033_v39  ;;  %v11045_v27 = vld [vmem:[#allocation211_spill] sm:$0xff] }
 0x285   : > { %11018 = vst [vmem:[#allocation207_spill] sm:$0xff] %v8199_v17  ;;  %v8263_v41 = vmul.f32 %v5043_v62, %v8038_v6  ;;  %v8275_v5 = vmul.f32 %v11045_v27, %v7408_v23  ;;  %v8278_v15 = vld [vmem:[%s5408_s19 + $0x68] sm:$0xff]  ;;  %v8282_v62 = vadd.f32 1.0, %v4820_v3  ;;  %v8314_v49 = vmul.f32 %v11026_v52, %v11051_v54  ;;  %v8365_v17 = vld [vmem:[%s10456_s3 + $0x4] ss:$0 sm:$0xff] }
 0x286   : > { %11021 = vst [vmem:[#allocation186_spill] sm:$0xff] %v8203_v18  ;;  %v1543_v50 = vmul.f32 %v8278_v15, %v8068_v51  ;;  %v8294_v39 = vmul.f32 %v8278_v15, %v7408_v23 }
 0x287   : > { %11023 = vst [vmem:[#allocation212_spill] sm:$0xff] %v8208_v55  ;;  %v8333_v55 = vmul.f32 %v7408_v23, %v1131_v14  ;;  %4821 = vrcp.f32 %v8282_v62  ;;  %vm874_vm14 = vweird.f32 %v8282_v62 }
 0x288   : > { %11024 = vst [vmem:[#allocation144_spill] sm:$0xff] %v8212_v13 }
 0x289   : > { %11025 = vst [vmem:[#allocation189_spill] sm:$0xff] %v8216_v34 }
 0x28a   : > { %11027 = vst [vmem:[#allocation216_spill] sm:$0xff] %v8220_v8  ;;  %v8330_v8 = vmul.f32 %v7965_v21, %v1131_v14 }
 0x28b   : > { %1163 = vst [vmem:[%s5408_s19 + $0x38] sm:$0xff] %v1131_v14 }
 0x28c   : > { %11028 = vst [vmem:[#allocation3_spill] sm:$0xff] %v8225_v31 }
 0x28d   : > { %11030 = vst [vmem:[#allocation195_spill] sm:$0xff] %v8229_v43 }
 0x28e   : > { %11031 = vst [vmem:[#allocation198_spill] sm:$0xff] %v8233_v4 }
 0x28f   : > { %11032 = vst [vmem:[#allocation227_spill] sm:$0xff] %v8238_v45 }
 0x290   : > { %1259 = vst [vmem:[#allocation2 + $0x82] sm:$0xff] %v1131_v14 }
 0x291   : > { %11034 = vst [vmem:[#allocation151_spill] sm:$0xff] %v8244_v25  ;;  %v1959_v25 = vadd.f32 %v1927_v36, %v1861_v53  ;;  %v11048_v53 = vld [vmem:[#allocation204_spill] sm:$0xff] }
 0x292   : > { %11036 = vst [vmem:[#allocation152_spill] sm:$0xff] %v8248_v48  ;;  %v8267_v48 = vmul.f32 %v8038_v6, %v11042_v46  ;;  %v8290_v36 = vmul.f32 %v11048_v53, %v7364_v56 }
 0x293   : > { %11037 = vst [vmem:[#allocation228_spill] sm:$0xff] %v8253_v22 }
 0x294   : > { %11038 = vst [vmem:[#allocation229_spill] sm:$0xff] %v8256_v2  ;;  %v8300_v2 = vld [vmem:[#allocation2 + $0xc8] sm:$0xff] }
 0x295   : > { %11040 = vst [vmem:[#allocation162_spill] sm:$0xff] %v8260_v32  ;;  %v11047_v32 = vld [vmem:[#allocation203_spill] sm:$0xff]  ;;  %v8304_v3 = vmul.f32 %v8300_v2, %v7356_v12 }
 0x296   : > { %11041 = vst [vmem:[#allocation230_spill] sm:$0xff] %v8263_v41  ;;  %v8286_v46 = vmul.f32 %v11047_v32, %v7356_v12  ;;  %v8298_v41 = vadd.f32 %v1543_v50, %v1477_v9  ;;  %v1537_v50 = vmul.f32 %v8068_v51, %v1131_v14  ;;  %v2026_v12 = vmul.f32 %v7331_v7, %v1131_v14 }
 0x297   : > { %11043 = vst [vmem:[#allocation165_spill] sm:$0xff] %v8267_v48  ;;  %v2025_v48 = vmul.f32 %v7331_v7, %v7870_v40  ;;  %v8318_v40 = vmul.f32 %v11029_v61, %v7866_v11  ;;  %v8322_v4 = vld [vmem:[#allocation2 + $0x80] sm:$0xff] }
 0x298   : > { %11044 = vst [vmem:[#allocation231_spill] sm:$0xff] %v8271_v20  ;;  %v8306_v20 = vld [vmem:[#allocation2 + $0xc9] sm:$0xff]  ;;  %v8324_v43 = vld [vmem:[#allocation2 + $0x81] sm:$0xff]  ;;  %v1341_v11 = vmul.f32 %v8079_v63, %v8322_v4 }
 0x299   : > { %11046 = vst [vmem:[#allocation211_spill] sm:$0xff] %v8278_v15  ;;  %v8310_v16 = vmul.f32 %v8306_v20, %v7364_v56  ;;  %v2057_v9 = vadd.f32 %v2025_v48, %v1959_v25  ;;  %v8326_v31 = vld [vmem:[#allocation2 + $0x7b] sm:$0xff]  ;;  %v2514_v56 = vmul.f32 %v7605_v33, %v1131_v14  ;;  %v1439_v7 = vmul.f32 %v8086_v59, %v8324_v43  ;;  %v8340_v51 = vld [vmem:[#allocation2 + $0x83] sm:$0xff] }
 0x29a   : > { %11049 = vst [vmem:[#allocation203_spill] sm:$0xff] %v8300_v2  ;;  %v8345_v33 = vld [vmem:[%s10456_s3 + $0x3] ss:$0 sm:$0xff]  ;;  %v8351_v14 = vld [vmem:[#allocation2 + $0x84] sm:$0xff]  ;;  %v1928_v13 = vmul.f32 %v8238_v45, %v8324_v43  ;;  %v2123_v10 = vmul.f32 %v11055_v44, %v8326_v31  ;;  %v2124_v30 = vmul.f32 %v11055_v44, %v8340_v51  ;;  %v2318_v45 = vmul.f32 %v7817_v24, %v8322_v4  ;;  %v11057_v15 = vld [vmem:[#allocation6_spill] sm:$0xff] }
 0x29b   : > { %11050 = vst [vmem:[#allocation204_spill] sm:$0xff] %v8306_v20  ;;  %v1634_v25 = vmul.f32 %v8345_v33, %v8326_v31  ;;  %v8349_v23 = vld [vmem:[#allocation2 + $0x7c] sm:$0xff]  ;;  %v8356_v63 = vld [vmem:[%s10456_s3 + $0x5] ss:$0 sm:$0xff]  ;;  %v1635_v48 = vmul.f32 %v8345_v33, %v8340_v51  ;;  %v1733_v18 = vmul.f32 %v8365_v17, %v8351_v14  ;;  %v1471_v35 = vadd.f32 %v1439_v7, %v1341_v11 }
 0x29c   : > { %11052 = vst [vmem:[#allocation232_spill] sm:$0xff] %v8356_v63  ;;  %v1830_v59 = vmul.f32 %v8356_v63, %v8322_v4  ;;  %v1732_v34 = vmul.f32 %v8365_v17, %v8349_v23  ;;  %v2221_v63 = vmul.f32 %v7552_v28, %v8349_v23  ;;  %v2222_v19 = vmul.f32 %v7552_v28, %v8351_v14 }
 0x29d   : > { %11053 = vst [vmem:[#allocation233_spill] sm:$0xff] %v8365_v17  ;;  %v1666_v1 = vadd.f32 %v1634_v25, %v7998_v26  ;;  %v1569_v11 = vadd.f32 %v1537_v50, %v1471_v35  ;;  %v2155_v25 = vadd.f32 %v2123_v10, %v2057_v9  ;;  %v2416_v44 = vmul.f32 %v7833_v47, %v8324_v43 }
 0x29e   : > { %v1862_v57 = vadd.f32 %v1830_v59, %v11054_v0  ;;  %v8385_v0 = vpop.eup %4821  ;;  %v11056_v59 = vld [vmem:[#allocation24_spill] sm:$0xff]  ;;  %v2611_v20 = vmul.f32 %v8253_v22, %v8326_v31  ;;  %v2612_v28 = vmul.f32 %v8253_v22, %v8340_v51  ;;  %v2710_v47 = vmul.f32 %v8038_v6, %v8351_v14 }
 0x29f   : > { %v1764_v7 = vadd.f32 %v1732_v34, %v1666_v1  ;;  %v2350_v54 = vadd.f32 %v2318_v45, %v11056_v59  ;;  %v1667_v2 = vadd.f32 %v1635_v48, %v1569_v11  ;;  %v2253_v1 = vadd.f32 %v2221_v63, %v2155_v25  ;;  %v11058_v45 = vld [vmem:[#allocation7_spill] sm:$0xff]  ;;  %v11059_v59 = vld [vmem:[#allocation44_spill] sm:$0xff] }
 0x2a0   : > { %v1960_v26 = vadd.f32 %v1928_v13, %v1862_v57  ;;  %v2643_v10 = vadd.f32 %v2611_v20, %v8016_v58  ;;  %v2709_v13 = vmul.f32 %v8038_v6, %v8349_v23  ;;  %v2904_v58 = vmul.f32 %v8116_v29, %v8324_v43  ;;  %v11063_v25 = vld [vmem:[#allocation87_spill] sm:$0xff] }
 0x2a1   : > { %v1863_v24 = vadd.f32 %v11057_v15, %v1764_v7  ;;  %v2448_v57 = vadd.f32 %v2416_v44, %v2350_v54  ;;  %v1765_v34 = vadd.f32 %v1733_v18, %v1667_v2  ;;  %v2351_v22 = vadd.f32 %v11059_v59, %v2253_v1  ;;  %v11060_v54 = vld [vmem:[#allocation73_spill] sm:$0xff]  ;;  %v11064_v44 = vld [vmem:[#allocation46_spill] sm:$0xff] }
 0x2a2   : > { %v2058_v35 = vadd.f32 %v2026_v12, %v1960_v26  ;;  %v2741_v11 = vadd.f32 %v2709_v13, %v2643_v10  ;;  %v2806_v15 = vmul.f32 %v8100_v42, %v8322_v4  ;;  %v11061_v12 = vld [vmem:[#allocation29_spill] sm:$0xff]  ;;  %v11067_v13 = vld [vmem:[#allocation80_spill] sm:$0xff]  ;;  %vm875_vm15 = vweird.f32 %v8385_v0 }
 0x2a3   : > { %v1961_v9 = vadd.f32 %v11058_v45, %v1863_v24  ;;  %v2546_v48 = vadd.f32 %v2514_v56, %v2448_v57  ;;  %v1864_v20 = vadd.f32 %v11060_v54, %v1765_v34  ;;  %v11062_v26 = vld [vmem:[#allocation45_spill] sm:$0xff]  ;;  %v3099_v56 = vmul.f32 %v11014_v60, %v8326_v31  ;;  %v11066_v57 = vld [vmem:[#allocation76_spill] sm:$0xff]  ;;  %v11068_v34 = vld [vmem:[#allocation30_spill] sm:$0xff] }
 0x2a4   : > { %v2156_v50 = vadd.f32 %v2124_v30, %v2058_v35  ;;  %v2449_v18 = vadd.f32 %v11062_v26, %v2351_v22  ;;  %v2838_v30 = vadd.f32 %v2806_v15, %v11063_v25  ;;  %v2839_v24 = vadd.f32 %v11064_v44, %v2741_v11  ;;  %v11065_v35 = vld [vmem:[#allocation74_spill] sm:$0xff]  ;;  %vm8690_vm0 = vmor %vm874_vm14, %vm875_vm15 }
 0x2a5   : > { %v2059_v63 = vadd.f32 %v11061_v12, %v1961_v9  ;;  %v2644_v2 = vadd.f32 %v2612_v28, %v2546_v48  ;;  %v1962_v1 = vadd.f32 %v11065_v35, %v1864_v20  ;;  %v3100_v28 = vmul.f32 %v11014_v60, %v8340_v51  ;;  %v11070_v48 = vld [vmem:[#allocation70_spill] sm:$0xff]  ;;  %v11072_v12 = vld [vmem:[#allocation81_spill] sm:$0xff]  ;;  %v11078_v35 = vld [vmem:[#allocation71_spill] sm:$0xff] }
 0x2a6   : > { %v2254_v7 = vadd.f32 %v2222_v19, %v2156_v50  ;;  %v2547_v59 = vadd.f32 %v11068_v34, %v2449_v18  ;;  %v2936_v19 = vadd.f32 %v2904_v58, %v2838_v30  ;;  %v11069_v50 = vld [vmem:[#allocation48_spill] sm:$0xff]  ;;  %v11071_v15 = vld [vmem:[#allocation78_spill] sm:$0xff]  ;;  %v11075_v18 = vld [vmem:[#allocation31_spill] sm:$0xff]  ;;  %v3131_v58 = vadd.f32 %v3099_v56, %v8018_v37 }
 0x2a7   : > { %v2157_v10 = vadd.f32 %v11066_v57, %v2059_v63  ;;  %v2742_v9 = vadd.f32 %v2710_v47, %v2644_v2  ;;  %v2937_v22 = vadd.f32 %v11069_v50, %v2839_v24  ;;  %v2060_v11 = vadd.f32 %v11070_v48, %v1962_v1  ;;  %v11073_v20 = vld [vmem:[#allocation82_spill] sm:$0xff]  ;;  %v11076_v2 = vld [vmem:[#allocation77_spill] sm:$0xff]  ;;  %v11077_v24 = vld [vmem:[#allocation148_spill] sm:$0xff] }
 0x2a8   : > { %v2352_v45 = vadd.f32 %v11067_v13, %v2254_v7  ;;  %v2645_v25 = vadd.f32 %v11073_v20, %v2547_v59  ;;  %v11074_v63 = vld [vmem:[#allocation86_spill] sm:$0xff]  ;;  %v3034_v7 = vadd.f32 %v8330_v8, %v2936_v19  ;;  %v11079_v57 = vld [vmem:[#allocation84_spill] sm:$0xff]  ;;  %v11081_v59 = vld [vmem:[#allocation89_spill] sm:$0xff]  ;;  %v3197_v8 = vmul.f32 %v11019_v38, %v8349_v23 }
 0x2a9   : > { %v2255_v54 = vadd.f32 %v11071_v15, %v2157_v10  ;;  %v2840_v44 = vadd.f32 %v11074_v63, %v2742_v9  ;;  %v3035_v47 = vadd.f32 %v11075_v18, %v2937_v22  ;;  %v2158_v30 = vadd.f32 %v11076_v2, %v2060_v11  ;;  %v11080_v13 = vld [vmem:[#allocation88_spill] sm:$0xff]  ;;  %v11082_v9 = vld [vmem:[#allocation79_spill] sm:$0xff]  ;;  %v11085_v11 = vld [vmem:[#allocation154_spill] sm:$0xff] }
 0x2aa   : > { %v2450_v26 = vadd.f32 %v11072_v12, %v2352_v45  ;;  %v2743_v10 = vadd.f32 %v11079_v57, %v2645_v25  ;;  %v3132_v34 = vadd.f32 %v3100_v28, %v3034_v7  ;;  %v11083_v22 = vld [vmem:[#allocation36_spill] sm:$0xff]  ;;  %v11084_v56 = vld [vmem:[#allocation83_spill] sm:$0xff]  ;;  %v3229_v20 = vadd.f32 %v3197_v8, %v3131_v58  ;;  %v11089_v7 = vld [vmem:[#allocation101_spill] sm:$0xff] }
 0x2ab   : > { %v2353_v60 = vadd.f32 %v11077_v24, %v2255_v54  ;;  %v2938_v45 = vadd.f32 %v11080_v13, %v2840_v44  ;;  %v3133_v50 = vadd.f32 %v11081_v59, %v3035_v47  ;;  %v2256_v19 = vadd.f32 %v11082_v9, %v2158_v30  ;;  %v11086_v54 = vld [vmem:[#allocation72_spill] sm:$0xff]  ;;  %v11088_v63 = vld [vmem:[#allocation175_spill] sm:$0xff]  ;;  %v11090_v47 = vld [vmem:[#allocation85_spill] sm:$0xff] }
 0x2ac   : > { %v2548_v1 = vadd.f32 %v11078_v35, %v2450_v26  ;;  %v2841_v15 = vadd.f32 %v11085_v11, %v2743_v10  ;;  %v3198_v26 = vmul.f32 %v11019_v38, %v8351_v14  ;;  %v11087_v28 = vld [vmem:[#allocation92_spill] sm:$0xff]  ;;  %v11091_v30 = vld [vmem:[#allocation155_spill] sm:$0xff]  ;;  %v8452_v57 = vld [vmem:[%s10456_s3 + $0x14] ss:$0 sm:$0xff] }
 0x2ad   : > { %v2451_v37 = vadd.f32 %v11083_v22, %v2353_v60  ;;  %v3036_v12 = vadd.f32 %v11086_v54, %v2938_v45  ;;  %v3231_v25 = vadd.f32 %v11087_v28, %v3133_v50  ;;  %v2354_v44 = vadd.f32 %v11088_v63, %v2256_v19  ;;  %v11092_v60 = vld [vmem:[#allocation90_spill] sm:$0xff]  ;;  %v11093_v58 = vld [vmem:[#allocation49_spill] sm:$0xff]  ;;  %v11095_v59 = vld [vmem:[#allocation179_spill] sm:$0xff] }
 0x2ae   : > { %v2646_v48 = vadd.f32 %v11084_v56, %v2548_v1  ;;  %v2939_v24 = vadd.f32 %v11091_v30, %v2841_v15  ;;  %v3230_v1 = vadd.f32 %v3198_v26, %v3132_v34  ;;  %v3294_v38 = vmul.f32 %v8452_v57, %v8322_v4  ;;  %v11094_v13 = vld [vmem:[#allocation178_spill] sm:$0xff]  ;;  %v11096_v8 = vld [vmem:[#allocation184_spill] sm:$0xff]  ;;  %v11097_v19 = vld [vmem:[#allocation9_spill] sm:$0xff] }
 0x2af   : > { %v2549_v18 = vadd.f32 %v11089_v7, %v2451_v37  ;;  %v3134_v35 = vadd.f32 %v11092_v60, %v3036_v12  ;;  %v3327_v10 = vadd.f32 %v11093_v58, %v3229_v20  ;;  %v8458_v45 = vadd.f32 %v11094_v13, %v2354_v44  ;;  %v11098_v22 = vld [vmem:[#allocation93_spill] sm:$0xff]  ;;  %v11099_v56 = vld [vmem:[#allocation118_spill] sm:$0xff]  ;;  %v11101_v54 = vld [vmem:[#allocation59_spill] sm:$0xff] }
 0x2b0   : > { %v2744_v2 = vadd.f32 %v11090_v47, %v2646_v48  ;;  %v3037_v34 = vadd.f32 %v11097_v19, %v2939_v24  ;;  %v3326_v48 = vadd.f32 %v3294_v38, %v11099_v56  ;;  %v11100_v11 = vld [vmem:[#allocation94_spill] sm:$0xff]  ;;  %v3329_v4 = vadd.f32 %v11101_v54, %v3231_v25  ;;  %v11102_v12 = vld [vmem:[#allocation185_spill] sm:$0xff]  ;;  %v11103_v20 = vld [vmem:[#allocation187_spill] sm:$0xff] }
 0x2b1   : > { %v8461_v50 = vadd.f32 %v11095_v59, %v2549_v18  ;;  %v3232_v37 = vadd.f32 %v11098_v22, %v3134_v35  ;;  %v3328_v15 = vadd.f32 %v11100_v11, %v3230_v1  ;;  %v8474_v63 = vld [vmem:[%s10456_s3 + $0x15] ss:$0 sm:$0xff]  ;;  %v11104_v7 = vld [vmem:[#allocation50_spill] sm:$0xff]  ;;  %v11106_v30 = vld [vmem:[#allocation95_spill] sm:$0xff]  ;;  %v3587_v35 = vmul.f32 %v11026_v52, %v8326_v31 }
 0x2b2   : > { %v2842_v9 = vadd.f32 %v11096_v8, %v2744_v2  ;;  %v3135_v28 = vadd.f32 %v11103_v20, %v3037_v34  ;;  %v3392_v44 = vmul.f32 %v8474_v63, %v8324_v43  ;;  %v3425_v18 = vadd.f32 %v11104_v7, %v3327_v10  ;;  %v11105_v47 = vld [vmem:[#allocation193_spill] sm:$0xff]  ;;  %v11107_v60 = vld [vmem:[#allocation156_spill] sm:$0xff]  ;;  %v11109_v58 = vld [vmem:[#allocation190_spill] sm:$0xff] }
 0x2b3   : > { %v3330_v2 = vadd.f32 %v11105_v47, %v3232_v37  ;;  %v3426_v24 = vadd.f32 %v11106_v30, %v3328_v15  ;;  %v3427_v25 = vadd.f32 %v11107_v60, %v3329_v4  ;;  %v11108_v1 = vld [vmem:[#allocation176_spill] sm:$0xff]  ;;  %v11111_v19 = vld [vmem:[#allocation194_spill] sm:$0xff]  ;;  %v11112_v34 = vld [vmem:[#allocation75_spill] sm:$0xff]  ;;  %v3588_v56 = vmul.f32 %v11026_v52, %v8340_v51 }
 0x2b4   : > { %v2940_v26 = vadd.f32 %v11102_v12, %v2842_v9  ;;  %v3233_v13 = vadd.f32 %v11109_v58, %v3135_v28  ;;  %v3424_v59 = vadd.f32 %v3392_v44, %v3326_v48  ;;  %v11110_v8 = vld [vmem:[#allocation32_spill] sm:$0xff]  ;;  %v11113_v22 = vld [vmem:[#allocation146_spill] sm:$0xff]  ;;  %v11115_v4 = vld [vmem:[#allocation13_spill] sm:$0xff] }
 0x2b5   : > { %v3523_v9 = vadd.f32 %v11110_v8, %v3425_v18  ;;  %v3428_v43 = vadd.f32 %v11111_v19, %v3330_v2  ;;  %v3524_v10 = vadd.f32 %v11112_v34, %v3426_v24  ;;  %v3525_v37 = vadd.f32 %v11113_v22, %v3427_v25  ;;  %v11114_v11 = vld [vmem:[#allocation188_spill] sm:$0xff]  ;;  %v11116_v48 = vld [vmem:[#allocation177_spill] sm:$0xff]  ;;  %v11120_v2 = vld [vmem:[#allocation191_spill] sm:$0xff] }
 0x2b6   : > { %v3038_v38 = vadd.f32 %v11108_v1, %v2940_v26  ;;  %v3331_v31 = vadd.f32 %v8286_v46, %v3233_v13  ;;  %v3522_v54 = vadd.f32 %v8333_v55, %v3424_v59  ;;  %v3619_v12 = vadd.f32 %v3587_v35, %v11115_v4  ;;  %v11117_v20 = vld [vmem:[#allocation96_spill] sm:$0xff]  ;;  %v11118_v44 = vld [vmem:[#allocation97_spill] sm:$0xff]  ;;  %v11122_v35 = vld [vmem:[#allocation98_spill] sm:$0xff] }
 0x2b7   : > { %v3526_v26 = vadd.f32 %v11116_v48, %v3428_v43  ;;  %v3621_v28 = vadd.f32 %v11117_v20, %v3523_v9  ;;  %v3622_v7 = vadd.f32 %v11118_v44, %v3524_v10  ;;  %v11119_v18 = vld [vmem:[#allocation196_spill] sm:$0xff]  ;;  %v3685_v46 = vmul.f32 %v11029_v61, %v8349_v23  ;;  %v11121_v60 = vld [vmem:[#allocation197_spill] sm:$0xff]  ;;  %v11124_v9 = vld [vmem:[#allocation199_spill] sm:$0xff] }
 0x2b8   : > { %v3136_v15 = vadd.f32 %v11114_v11, %v3038_v38  ;;  %v3623_v47 = vadd.f32 %v11119_v18, %v3525_v37  ;;  %v3429_v51 = vadd.f32 %v8290_v36, %v3331_v31  ;;  %v3620_v24 = vadd.f32 %v3588_v56, %v3522_v54  ;;  %v11123_v38 = vld [vmem:[#allocation99_spill] sm:$0xff]  ;;  %v8509_v13 = vld [vmem:[#allocation2 + $0xcb] sm:$0xff] }
 0x2b9   : > { %v3624_v55 = vadd.f32 %v11121_v60, %v3526_v26  ;;  %v3686_v25 = vmul.f32 %v11029_v61, %v8351_v14  ;;  %v3719_v1 = vadd.f32 %v11122_v35, %v3621_v28  ;;  %v3720_v58 = vadd.f32 %v11123_v38, %v3622_v7  ;;  %v11125_v23 = vld [vmem:[#allocation200_spill] sm:$0xff]  ;;  %v8518_v14 = vld [vmem:[%s10457_s4] ss:$0 sm:$0xff] }
 0x2ba   : > { %v3234_v30 = vadd.f32 %v11120_v2, %v3136_v15  ;;  %v3527_v8 = vadd.f32 %v8275_v5, %v3429_v51  ;;  %v3717_v36 = vadd.f32 %v3685_v46, %v3619_v12  ;;  %v3721_v19 = vadd.f32 %v11124_v9, %v3623_v47  ;;  %11126 = vst [vmem:[#allocation22_spill] sm:$0xff] %v8518_v14  ;;  %v8534_v11 = vld [vmem:[#allocation2 + $0xcc] sm:$0xff]  ;;  %v11137_v9 = vld [vmem:[#allocation47_spill] sm:$0xff] }
 0x2bb   : > { %v3718_v43 = vadd.f32 %v3686_v25, %v3620_v24  ;;  %v3722_v34 = vadd.f32 %v11125_v23, %v3624_v55  ;;  %v8521_v10 = vadd.f32 %v8518_v14, %v3719_v1  ;;  %v8524_v22 = vadd.f32 %v8518_v14, %v3720_v58  ;;  %v8575_v24 = vld [vmem:[#allocation2 + $0x120] sm:$0xff] }
 0x2bc   : > { %v3332_v59 = vadd.f32 %v8304_v3, %v3234_v30  ;;  %v3625_v5 = vadd.f32 %v8314_v49, %v3527_v8  ;;  %v8529_v37 = vadd.f32 %v8518_v14, %v3717_v36  ;;  %v8532_v56 = vadd.f32 %v8518_v14, %v3721_v19  ;;  %11127 = vst [vmem:[#allocation153_spill] sm:$0xff] %v8575_v24  ;;  %v8600_v1 = vld [vmem:[#allocation2 + $0x121] sm:$0xff] }
 0x2bd   : > { %v3594_v15 = vmul.f32 %v11026_v52, %v8509_v13  ;;  %v8539_v31 = vadd.f32 %v8518_v14, %v3718_v43  ;;  %v8542_v54 = vadd.f32 %v8518_v14, %v3722_v34  ;;  %v4624_v48 = vmul.f32 -1.442695, %v8524_v22  ;;  %11133 = vst [vmem:[#allocation73_spill] sm:$0xff] %v8600_v1  ;;  %v8616_v43 = vld [vmem:[%s10456_s3 + $0x9] ss:$0 sm:$0xff] }
 0x2be   : > { %v3430_v3 = vadd.f32 %v8310_v16, %v3332_v59  ;;  %v4623_v16 = vmul.f32 -1.442695, %v8521_v10  ;;  %v3723_v4 = vadd.f32 %v8318_v40, %v3625_v5  ;;  %v4621_v12 = vmul.f32 -1.442695, %v8529_v37  ;;  %v11135_v59 = vld [vmem:[#allocation211_spill] sm:$0xff]  ;;  %11138 = vst [vmem:[#allocation87_spill] sm:$0xff] %v8616_v43 }
 0x2bf   : > { %v4622_v26 = vmul.f32 -1.442695, %v8539_v31  ;;  %v4625_v52 = vmul.f32 -1.442695, %v8532_v56  ;;  %v870_v20 = vmul.f32 %v8385_v0, %v8282_v62  ;;  %v3692_v28 = vmul.f32 %v11029_v61, %v8534_v11  ;;  %v11139_v34 = vld [vmem:[#allocation228_spill] sm:$0xff] }
 0x2c0   : > { %v3528_v49 = vadd.f32 %v8294_v39, %v3430_v3  ;;  %4823 = vpow2.f32 %v4623_v16  ;;  %v8556_v39 = vadd.f32 %v8518_v14, %v3723_v4  ;;  %v8560_v40 = vmul.f32 %v7965_v21, %v11045_v27 }
 0x2c1   : > { %4825 = vpow2.f32 %v4621_v12  ;;  %v1641_v7 = vmul.f32 %v8345_v33, %v8509_v13  ;;  %v4626_v18 = vmul.f32 -1.442695, %v8542_v54  ;;  %v8567_v47 = vmul.f32 %v8100_v42, %v11047_v32  ;;  %v8584_v32 = vld [vmem:[%s10456_s3 + $0x16] ss:$0 sm:$0xff] }
 0x2c2   : > { %v3626_v44 = vadd.f32 %v3594_v15, %v3528_v49  ;;  %4827 = vpow2.f32 %v4622_v26  ;;  %v8571_v61 = vmul.f32 %v8116_v29, %v11048_v53  ;;  %v4627_v27 = vmul.f32 -1.442695, %v8556_v39  ;;  %11129 = vst [vmem:[#allocation6_spill] sm:$0xff] %v8584_v32  ;;  %v11130_v53 = vld [vmem:[#allocation214_spill] sm:$0xff] }
 0x2c3   : > { %4829 = vpow2.f32 %v4624_v48  ;;  %v1673_v30 = vadd.f32 %v1641_v7, %v8298_v41  ;;  %v871_v51 = vsub.f32 1.0, %v870_v20  ;;  %v8579_v46 = vmul.f32 %v8575_v24, %v8452_v57  ;;  %v8593_v41 = vld [vmem:[%s10456_s3 + $0x8] ss:$0 sm:$0xff]  ;;  %v11141_v20 = vld [vmem:[#allocation203_spill] sm:$0xff] }
 0x2c4   : > { %v3724_v2 = vadd.f32 %v3692_v28, %v3626_v44  ;;  %4831 = vpow2.f32 %v4625_v52  ;;  %v8588_v60 = vmul.f32 %v8584_v32, %v11130_v53  ;;  %11132 = vst [vmem:[#allocation44_spill] sm:$0xff] %v8593_v41  ;;  %v2130_v55 = vmul.f32 %v8593_v41, %v8509_v13 }
 0x2c5   : > { %11128 = vst [vmem:[#allocation24_spill] sm:$0xff] %v8579_v46  ;;  %v8604_v38 = vmul.f32 %v8600_v1, %v8474_v63  ;;  %v1739_v58 = vmul.f32 %v8365_v17, %v8534_v11  ;;  %v8610_v8 = vmul.f32 %v11135_v59, %v7965_v21  ;;  %4833 = vpow2.f32 %v4626_v18 }
 0x2c6   : > { %11131 = vst [vmem:[#allocation7_spill] sm:$0xff] %v8588_v60  ;;  %v8598_v25 = vadd.f32 %v8518_v14, %v3724_v2  ;;  %v4824_v35 = vpop.eup %4823  ;;  %v2162_v19 = vadd.f32 %v2130_v55, %v11137_v9  ;;  %v2228_v23 = vmul.f32 %v8616_v43, %v8534_v11  ;;  %v2618_v3 = vmul.f32 %v11139_v34, %v8509_v13  ;;  %v11146_v55 = vld [vmem:[#allocation206_spill] sm:$0xff] }
 0x2c7   : > { %11134 = vst [vmem:[#allocation29_spill] sm:$0xff] %v8604_v38  ;;  %v4826_v36 = vpop.eup %4825  ;;  %v8623_v21 = vadd.f32 %v1739_v58, %v1673_v30  ;;  %4835 = vpow2.f32 %v4627_v27  ;;  %v872_v49 = vmul.f32 %v8385_v0, %v871_v51  ;;  %v8630_v12 = vmul.f32 %v8038_v6, %v8534_v11  ;;  %v11143_v6 = vld [vmem:[#allocation204_spill] sm:$0xff]  ;;  %v11144_v51 = vld [vmem:[#allocation145_spill] sm:$0xff] }
 0x2c8   : > { %11136 = vst [vmem:[#allocation45_spill] sm:$0xff] %v8610_v8  ;;  %v4628_v5 = vmul.f32 -1.442695, %v8598_v25  ;;  %v4828_v15 = vpop.eup %4827  ;;  %v8625_v16 = vadd.f32 1.0, %v4826_v36  ;;  %v8634_v26 = vadd.f32 1.0, %v4824_v35  ;;  %v8638_v28 = vmul.f32 %v11141_v20, %v8100_v42 }
 0x2c9   : > { %11140 = vst [vmem:[#allocation46_spill] sm:$0xff] %v8623_v21  ;;  %v4830_v4 = vpop.eup %4829  ;;  %v8632_v48 = vadd.f32 1.0, %v4828_v15  ;;  %v880_v7 = vand.u32 2147483648, %v8282_v62  ;;  %v8644_v18 = vadd.f32 %v2228_v23, %v2162_v19  ;;  %v8648_v2 = vmul.f32 %v11143_v6, %v8116_v29  ;;  %v8664_v29 = vld [vmem:[%s10456_s3 + $0x12] ss:$0 sm:$0xff] }
 0x2ca   : > { %4837 = vpow2.f32 %v4628_v5  ;;  %v4832_v52 = vpop.eup %4831  ;;  %v8640_v44 = vadd.f32 1.0, %v4830_v4  ;;  %v8654_v42 = vadd.f32 %v2618_v3, %v11144_v51  ;;  %v8657_v53 = vadd.f32 %v8385_v0, %v872_v49  ;;  %11145 = vst [vmem:[#allocation76_spill] sm:$0xff] %v8664_v29 }
 0x2cb   : > { %4839 = vrcp.f32 %v8625_v16  ;;  %11142 = vst [vmem:[#allocation74_spill] sm:$0xff] %v8644_v18  ;;  %v8650_v30 = vadd.f32 1.0, %v4832_v52  ;;  %v4834_v27 = vpop.eup %4833  ;;  %v8668_v35 = vmul.f32 %v8664_v29, %v11146_v55  ;;  %v8672_v58 = vmul.f32 %v8664_v29, %v8509_v13 }
 0x2cc   : > { %4841 = vrcp.f32 %v8632_v48  ;;  %v3952_v9 = vand.u32 2147483648, %v8625_v16  ;;  %v3967_v19 = vand.u32 2147483648, %v8632_v48  ;;  %v8679_v23 = vor.u32 1.1754944e-38, %v880_v7 }
 0x2cd   : > { %11147 = vst [vmem:[#allocation80_spill] sm:$0xff] %v8672_v58  ;;  %4843 = vrcp.f32 %v8634_v26  ;;  %v4836_v36 = vpop.eup %4835  ;;  %v8681_v5 = vadd.f32 1.0, %v4834_v27  ;;  %v3950_v15 = vand.u32 2147483647, %v8625_v16  ;;  %v3982_v13 = vand.u32 2147483648, %v8634_v26 }
 0x2ce   : > { %4845 = vrcp.f32 %v8640_v44  ;;  %vm3946_vm1 = vweird.f32 %v8625_v16  ;;  %v3965_v52 = vand.u32 2147483647, %v8632_v48  ;;  %v3980_v20 = vand.u32 2147483647, %v8634_v26 }
 0x2cf   : > { %4847 = vrcp.f32 %v8650_v30  ;;  %vm3961_vm2 = vweird.f32 %v8632_v48  ;;  %v3995_v51 = vand.u32 2147483647, %v8640_v44  ;;  %v3997_v55 = vand.u32 2147483648, %v8640_v44 }
 0x2d0   : > { %v4838_v3 = vpop.eup %4837  ;;  %v8710_v59 = vadd.f32 1.0, %v4836_v36  ;;  %v3953_v1 = vor.u32 1.1754944e-38, %v3952_v9  ;;  %v3968_v14 = vor.u32 1.1754944e-38, %v3967_v19  ;;  %vm3976_vm3 = vweird.f32 %v8634_v26 }
 0x2d1   : > { %v8694_v4 = vpop.eup %4839  ;;  %v8715_v60 = vadd.f32 1.0, %v4838_v3  ;;  %vm8717_vm4 = vcmp.eq.f32.partialorder %v3950_v15, 8.507059e+37  ;;  %v3983_v58 = vor.u32 1.1754944e-38, %v3982_v13  ;;  %vm3991_vm5 = vweird.f32 %v8640_v44 }
 0x2d2   : > { %v8703_v6 = vpop.eup %4841  ;;  %v3942_v27 = vmul.f32 %v8694_v4, %v8625_v16  ;;  %4849 = vrcp.f32 %v8681_v5  ;;  %vm3947_vm6 = vweird.f32 %v8694_v4  ;;  %vm8724_vm7 = vcmp.eq.f32.partialorder %v3965_v52, 8.507059e+37 }
 0x2d3   : > { %v3957_v24 = vmul.f32 %v8703_v6, %v8632_v48  ;;  %v4844_v7 = vpop.eup %4843  ;;  %vm4006_vm8 = vweird.f32 %v8650_v30  ;;  %v4010_v15 = vand.u32 2147483647, %v8650_v30  ;;  %vm8732_vm9 = vcmp.eq.f32.partialorder %v3980_v20, 8.507059e+37  ;;  %vm8751_vm12 = vmor %vm3946_vm1, %vm3947_vm6 }
 0x2d4   : > { %v3943_v38 = vsub.f32 1.0, %v3942_v27  ;;  %v4846_v36 = vpop.eup %4845  ;;  %v3972_v3 = vmul.f32 %v4844_v7, %v8634_v26  ;;  %vm8737_vm10 = vcmp.eq.f32.partialorder %v3995_v51, 8.507059e+37  ;;  %v3998_v52 = vor.u32 1.1754944e-38, %v3997_v55 }
 0x2d5   : > { %v3958_v9 = vsub.f32 1.0, %v3957_v24  ;;  %v4848_v27 = vpop.eup %4847  ;;  %v3987_v8 = vmul.f32 %v4846_v36, %v8640_v44  ;;  %vm3962_vm11 = vweird.f32 %v8703_v6  ;;  %v4012_v41 = vand.u32 2147483648, %v8650_v30 }
 0x2d6   : > { %v3944_v13 = vmul.f32 %v8694_v4, %v3943_v38  ;;  %v3973_v18 = vsub.f32 1.0, %v3972_v3  ;;  %v4002_v43 = vmul.f32 %v4848_v27, %v8650_v30  ;;  %4851 = vrcp.f32 %v8710_v59  ;;  %vm8761_vm14 = vmor %vm3961_vm2, %vm3962_vm11 }
 0x2d7   : > { %v3959_v34 = vmul.f32 %v8703_v6, %v3958_v9  ;;  %v3988_v20 = vsub.f32 1.0, %v3987_v8  ;;  %vm3977_vm13 = vweird.f32 %v4844_v7  ;;  %vm3992_vm15 = vweird.f32 %v4846_v36 }
 0x2d8   : > { %v3945_v38 = vadd.f32 %v8694_v4, %v3944_v13  ;;  %v3974_v9 = vmul.f32 %v4844_v7, %v3973_v18  ;;  %v4003_v3 = vsub.f32 1.0, %v4002_v43  ;;  %v4850_v21 = vpop.eup %4849  ;;  %vm8765_vm1 = vcmp.eq.f32.partialorder %v4010_v15, 8.507059e+37  ;;  %vm8780_vm2 = vmor %vm3976_vm3, %vm3977_vm13 }
 0x2d9   : > { %v3960_v55 = vadd.f32 %v8703_v6, %v3959_v34  ;;  %v3989_v16 = vmul.f32 %v4846_v36, %v3988_v20  ;;  %vm4007_vm6 = vweird.f32 %v4848_v27  ;;  %v4013_v20 = vor.u32 1.1754944e-38, %v4012_v41 }
 0x2da   : > { %v3949_v8 = vsel %vm8751_vm12, %v8694_v4, %v3945_v38  ;;  %v3975_v34 = vadd.f32 %v4844_v7, %v3974_v9  ;;  %v4004_v18 = vmul.f32 %v4848_v27, %v4003_v3  ;;  %v11164_v4 = vand.u32 2147483647, %v8282_v62  ;;  %vm4008_vm3 = vmor %vm4006_vm8, %vm4007_vm6 }
 0x2db   : > { %v3964_v43 = vsel %vm8761_vm14, %v8703_v6, %v3960_v55  ;;  %v3990_v38 = vadd.f32 %v4846_v36, %v3989_v16  ;;  %v4017_v51 = vmul.f32 %v4850_v21, %v8681_v5  ;;  %vm4021_vm11 = vweird.f32 %v8681_v5  ;;  %vm3993_vm14 = vmor %vm3991_vm5, %vm3992_vm15 }
 0x2dc   : > { %vm8774_vm12 = vcmp.eq.f32.partialorder %v11164_v4, 8.507059e+37  ;;  %v3954_v6 = vsel %vm8717_vm4, %v3953_v1, %v3949_v8  ;;  %v3979_v62 = vsel %vm8780_vm2, %v4844_v7, %v3975_v34  ;;  %v4005_v26 = vadd.f32 %v4848_v27, %v4004_v18  ;;  %v4852_v9 = vpop.eup %4851 }
 0x2dd   : > { %v4027_v55 = vand.u32 2147483648, %v8681_v5  ;;  %v3969_v41 = vsel %vm8724_vm7, %v3968_v14, %v3964_v43  ;;  %v3994_v3 = vsel %vm3993_vm14, %v4846_v36, %v3990_v38  ;;  %v4018_v46 = vsub.f32 1.0, %v4017_v51 }
 0x2de   : > { %4853 = vrcp.f32 %v8715_v60  ;;  %v3984_v1 = vsel %vm8732_vm9, %v3983_v58, %v3979_v62  ;;  %v3999_v44 = vsel %vm8737_vm10, %v3998_v52, %v3994_v3  ;;  %v4009_v7 = vsel %vm4008_vm3, %v4848_v27, %v4005_v26  ;;  %v8869_v3 = vld [vmem:[#allocation2 + $0x128] sm:$0xff] }
 0x2df   : > { %v4032_v8 = vmul.f32 %v4852_v9, %v8710_v59  ;;  %v4014_v14 = vsel %vm8765_vm1, %v4013_v20, %v4009_v7  ;;  %v4019_v36 = vmul.f32 %v4850_v21, %v4018_v46  ;;  %vm4022_vm4 = vweird.f32 %v4850_v21  ;;  %v8893_v7 = vld [vmem:[#allocation2 + $0x123] sm:$0xff] }
 0x2e0   : > { %v4025_v30 = vand.u32 2147483647, %v8681_v5  ;;  %v4028_v19 = vor.u32 1.1754944e-38, %v4027_v55  ;;  %v4042_v16 = vand.u32 2147483648, %v8710_v59  ;;  %v4393_v29 = vmul.f32 %v3954_v6, %v8529_v37  ;;  %vm4023_vm5 = vmor %vm4021_vm11, %vm4022_vm4  ;;  %v8859_v6 = vld [vmem:[#allocation2 + $0x12b] sm:$0xff]  ;;  %11176 = vst [vmem:[#allocation78_spill] sm:$0xff] %v8893_v7 }
 0x2e1   : > { %v4033_v13 = vsub.f32 1.0, %v4032_v8  ;;  %v4020_v58 = vadd.f32 %v4850_v21, %v4019_v36  ;;  %v4394_v27 = vmul.f32 %v3969_v41, %v8539_v31  ;;  %v4395_v24 = vmul.f32 %v3984_v1, %v8521_v10  ;;  %v8822_v31 = vld [vmem:[%s10456_s3 + $0x13] ss:$0 sm:$0xff]  ;;  %v5060_v10 = vld [vmem:[#allocation2 + $0xc4] sm:$0xff]  ;;  %11171 = vst [vmem:[#allocation30_spill] sm:$0xff] %v8859_v6  ;;  %v489_v41 = vpop.f32.mrf.mxu2 }
 0x2e2   : > { %v4396_v17 = vmul.f32 %v3999_v44, %v8524_v22  ;;  %vm4037_vm7 = vweird.f32 %v4852_v9  ;;  %v4040_v43 = vand.u32 2147483647, %v8710_v59  ;;  %v4397_v34 = vmul.f32 %v4014_v14, %v8532_v56  ;;  %4425 = vst [vmem:[%s7473_s22 + $0x10] sm:$0xff] %v4393_v29  ;;  %v11173_v55 = vld [vmem:[#allocation181_spill] sm:$0xff]  ;;  %v8882_v44 = vld [vmem:[%s5408_s19 + $0xa8] sm:$0xff] }
 0x2e3   : > { %v4034_v52 = vmul.f32 %v4852_v9, %v4033_v13  ;;  %v8825_v22 = vmul.f32 %v5060_v10, %v8822_v31  ;;  %v4024_v5 = vsel %vm4023_vm5, %v4850_v21, %v4020_v58  ;;  %vm4026_vm8 = vcmp.eq.f32.partialorder %v4025_v30, 8.507059e+37  ;;  %4426 = vst [vmem:[%s7473_s22 + $0x18] sm:$0xff] %v4394_v27  ;;  %v8875_v1 = vld [vmem:[#allocation2 + $0x129] sm:$0xff]  ;;  %v8914_v29 = vld [vmem:[%s10456_s3 + $0x18] ss:$0 sm:$0xff] }
 0x2e4   : > { %v8817_v37 = vpop.eup %4853  ;;  %v11169_v56 = vsel %vm8690_vm0, %v8385_v0, %v8657_v53  ;;  %v4029_v4 = vsel %vm4026_vm8, %v4028_v19, %v4024_v5  ;;  %vm4036_vm9 = vweird.f32 %v8710_v59  ;;  %4427 = vst [vmem:[%s7473_s22 + $0x20] sm:$0xff] %v4395_v24  ;;  %v8842_v21 = vmul.f32 %v8822_v31, %v8534_v11  ;;  %v8900_v14 = vld [vmem:[#allocation2 + $0x12c] sm:$0xff]  ;;  %v8916_v58 = vld [vmem:[#allocation2 + $0x124] sm:$0xff] }
 0x2e5   : > { %v882_v18 = vsel %vm8774_vm12, %v8679_v23, %v11169_v56  ;;  %v4035_v15 = vadd.f32 %v4852_v9, %v4034_v52  ;;  %v4047_v38 = vmul.f32 %v8817_v37, %v8715_v60  ;;  %vm4038_vm0 = vmor %vm4036_vm9, %vm4037_vm7  ;;  %v4043_v0 = vor.u32 1.1754944e-38, %v4042_v16  ;;  %4428 = vst [vmem:[%s7473_s22 + $0x28] sm:$0xff] %v4396_v17  ;;  %v11170_v23 = vld [vmem:[#allocation19_spill] sm:$0xff]  ;;  %v11178_v30 = vld [vmem:[#allocation180_spill] sm:$0xff] }
 0x2e6   : > { %v4398_v53 = vmul.f32 %v4029_v4, %v8542_v54  ;;  %v8848_v49 = vmul.f32 %v882_v18, %v11170_v23  ;;  %v8852_v59 = vadd.f32 %v8630_v12, %v8654_v42  ;;  %vm4041_vm10 = vcmp.eq.f32.partialorder %v4040_v43, 8.507059e+37  ;;  %4429 = vst [vmem:[%s7473_s22 + $0x30] sm:$0xff] %v4397_v34  ;;  %v11172_v42 = vld [vmem:[#allocation174_spill] sm:$0xff]  ;;  %v11184_v5 = vld [vmem:[#allocation17_spill] sm:$0xff]  ;;  %v8956_v23 = vld [vmem:[%s10456_s3 + $0x2] ss:$0 sm:$0xff] }
 0x2e7   : > { %v4039_v48 = vsel %vm4038_vm0, %v4852_v9, %v4035_v15  ;;  %v4048_v20 = vsub.f32 1.0, %v4047_v38  ;;  %vm4052_vm13 = vweird.f32 %v8817_v37  ;;  %v4055_v51 = vand.u32 2147483647, %v8715_v60  ;;  %11174 = vst [vmem:[#allocation48_spill] sm:$0xff] %v8882_v44  ;;  %v11183_v52 = vld [vmem:[#allocation182_spill] sm:$0xff]  ;;  %v5069_v18 = vld [vmem:[%s5408_s19 + $0x70] sm:$0xff] }
 0x2e8   : > { %v4044_v11 = vsel %vm4041_vm10, %v4043_v0, %v4039_v48  ;;  %v4057_v54 = vand.u32 2147483648, %v8715_v60  ;;  %4430 = vst [vmem:[%s7473_s22 + $0x38] sm:$0xff] %v4398_v53  ;;  %v2550_v26 = vadd.f32 %v11172_v42, %v8458_v45  ;;  %v2745_v9 = vadd.f32 %v11173_v55, %v8461_v50  ;;  %v8891_v50 = vld [vmem:[%s10456_s3 + $0x17] ss:$0 sm:$0xff]  ;;  %v8988_v42 = vld [vmem:[%s10456_s3 + $0x11] ss:$0 sm:$0xff] }
 0x2e9   : > { %v4049_v62 = vmul.f32 %v8817_v37, %v4048_v20  ;;  %v4399_v12 = vmul.f32 %v4044_v11, %v8556_v39  ;;  %1171 = vst [vmem:[%s5408_s19 + $0x78] sm:$0xff] %v8848_v49  ;;  %v8873_v46 = vmul.f32 %v8869_v3, %v8452_v57  ;;  %v8879_v39 = vmul.f32 %v8875_v1, %v8474_v63  ;;  %v8963_v20 = vld [vmem:[%s10456_s3 + $0x7] ss:$0 sm:$0xff] }
 0x2ea   : > { %v8886_v45 = vmul.f32 %v8882_v44, %v8584_v32  ;;  %11175 = vst [vmem:[#allocation70_spill] sm:$0xff] %v8891_v50  ;;  %v8897_v8 = vmul.f32 %v8893_v7, %v8891_v50  ;;  %vm4051_vm15 = vweird.f32 %v8715_v60  ;;  %v2648_v19 = vadd.f32 %v11178_v30, %v2550_v26  ;;  %v11215_v44 = vld [vmem:[#allocation111_spill] sm:$0xff] }
 0x2eb   : > { %1271 = vst [vmem:[#allocation2 + $0xe2] sm:$0xff] %v8848_v49  ;;  %v4050_v36 = vadd.f32 %v8817_v37, %v4049_v62  ;;  %v2843_v13 = vadd.f32 %v8567_v47, %v2745_v9  ;;  %v8909_v16 = vmul.f32 %v8891_v50, %v8859_v6  ;;  %v8920_v60 = vmul.f32 %v8916_v58, %v8914_v29  ;;  %vm4053_vm1 = vmor %vm4051_vm15, %vm4052_vm13  ;;  %v8927_v47 = vld [vmem:[%s10455_s2] ss:$0 sm:$0xff] }
 0x2ec   : > { %11177 = vst [vmem:[#allocation81_spill] sm:$0xff] %v8900_v14  ;;  %v4058_v27 = vor.u32 1.1754944e-38, %v4057_v54  ;;  %v8930_v24 = vadd.f32 %v8927_v47, %v489_v41  ;;  %vm4056_vm6 = vcmp.eq.f32.partialorder %v4055_v51, 8.507059e+37  ;;  %v2746_v43 = vadd.f32 %v11183_v52, %v2648_v19 }
 0x2ed   : > { %4431 = vst [vmem:[%s7473_s22 + $0x40] sm:$0xff] %v4399_v12  ;;  %v4054_v17 = vsel %vm4053_vm1, %v8817_v37, %v4050_v36  ;;  %v2941_v34 = vadd.f32 %v8571_v61, %v2843_v13  ;;  %v8937_v10 = vmul.f32 %v8914_v29, %v8900_v14  ;;  %v8941_v56 = vmul.f32 %v8452_v57, %v11184_v5  ;;  %v5070_v37 = vld [vmem:[#allocation2 + $0xd9] sm:$0xff]  ;;  %v9011_v36 = vld [vmem:[%s10456_s3 + $0x1] ss:$0 sm:$0xff]  ;;  %v11200_v14 = vld [vmem:[#allocation228_spill] sm:$0xff] }
 0x2ee   : > { %11179 = vst [vmem:[#allocation82_spill] sm:$0xff] %v8914_v29  ;;  %v8945_v4 = vmul.f32 %v5069_v18, %v8584_v32  ;;  %v4059_v15 = vsel %vm4056_vm6, %v4058_v27, %v4054_v17  ;;  %v8948_v38 = vmul.f32 %v5070_v37, %v8474_v63  ;;  %v2844_v0 = vadd.f32 %v8638_v28, %v2746_v43  ;;  %v11189_v27 = vld [vmem:[#allocation232_spill] sm:$0xff]  ;;  %v11190_v43 = vld [vmem:[#allocation233_spill] sm:$0xff]  ;;  %v11191_v18 = vld [vmem:[#allocation227_spill] sm:$0xff] }
 0x2ef   : > { %11180 = vst [vmem:[#allocation86_spill] sm:$0xff] %v8916_v58  ;;  %v4400_v61 = vmul.f32 %v4059_v15, %v8598_v25  ;;  %v3039_v53 = vadd.f32 %v8560_v40, %v2941_v34  ;;  %v1545_v48 = vmul.f32 %v8956_v23, %v8848_v49  ;;  %v2034_v25 = vmul.f32 %v8963_v20, %v8848_v49  ;;  %v8970_v40 = vld [vmem:[%s10456_s3 + $0xc] ss:$0 sm:$0xff]  ;;  %v11195_v58 = vld [vmem:[#allocation87_spill] sm:$0xff] }
 0x2f0   : > { %11181 = vst [vmem:[#allocation31_spill] sm:$0xff] %v8927_v47  ;;  %v2522_v28 = vmul.f32 %v8970_v40, %v8848_v49  ;;  %v8975_v11 = vmul.f32 -1.442695, %v8930_v24  ;;  %v2942_v12 = vadd.f32 %v8648_v2, %v2844_v0  ;;  %v8992_v26 = vmul.f32 %v8988_v42, %v8848_v49  ;;  %v9004_v2 = vld [vmem:[%s10456_s3] ss:$0 sm:$0xff]  ;;  %v11198_v47 = vld [vmem:[#allocation74_spill] sm:$0xff] }
 0x2f1   : > { %11182 = vst [vmem:[#allocation77_spill] sm:$0xff] %v8930_v24  ;;  %v8995_v55 = vadd.f32 %v8668_v35, %v3039_v53  ;;  %v8999_v9 = vmul.f32 %v8584_v32, %v8848_v49  ;;  %v11193_v53 = vld [vmem:[#allocation46_spill] sm:$0xff]  ;;  %v11214_v32 = vld [vmem:[#allocation11_spill] sm:$0xff] }
 0x2f2   : > { %11185 = vst [vmem:[#allocation148_spill] sm:$0xff] %v8956_v23  ;;  %v8978_v51 = vld [vmem:[#allocation2 + $0xe0] sm:$0xff]  ;;  %4855 = vpow2.f32 %v8975_v11  ;;  %v5083_v11 = vld [vmem:[#allocation2 + $0x16b] sm:$0xff] }
 0x2f3   : > { %11186 = vst [vmem:[#allocation71_spill] sm:$0xff] %v8963_v20  ;;  %v8980_v54 = vld [vmem:[#allocation2 + $0xe1] sm:$0xff]  ;;  %v1349_v41 = vmul.f32 %v9004_v2, %v8978_v51  ;;  %v1838_v17 = vmul.f32 %v11189_v27, %v8978_v51 }
 0x2f4   : > { %11187 = vst [vmem:[#allocation84_spill] sm:$0xff] %v8970_v40  ;;  %v8982_v62 = vld [vmem:[#allocation2 + $0xdb] sm:$0xff]  ;;  %v1447_v35 = vmul.f32 %v9011_v36, %v8980_v54  ;;  %v9015_v30 = vld [vmem:[#allocation2 + $0xe3] sm:$0xff]  ;;  %v1936_v15 = vmul.f32 %v11191_v18, %v8980_v54 }
 0x2f5   : > { %4432 = vst [vmem:[%s7473_s22 + $0x48] sm:$0xff] %v4400_v61  ;;  %v1642_v49 = vmul.f32 %v8345_v33, %v8982_v62  ;;  %v9019_v19 = vld [vmem:[#allocation2 + $0xdc] sm:$0xff]  ;;  %v9021_v13 = vld [vmem:[#allocation2 + $0xe4] sm:$0xff]  ;;  %v1643_v52 = vmul.f32 %v8345_v33, %v9015_v30  ;;  %v1870_v40 = vadd.f32 %v1838_v17, %v11193_v53  ;;  %v2619_v6 = vmul.f32 %v11200_v14, %v8982_v62 }
 0x2f6   : > { %11188 = vst [vmem:[#allocation88_spill] sm:$0xff] %v8988_v42  ;;  %v1740_v34 = vmul.f32 %v11190_v43, %v9019_v19  ;;  %v1741_v5 = vmul.f32 %v11190_v43, %v9021_v13  ;;  %v1479_v37 = vadd.f32 %v1447_v35, %v1349_v41  ;;  %v11192_v61 = vld [vmem:[#allocation16_spill] sm:$0xff]  ;;  %v2229_v7 = vmul.f32 %v11195_v58, %v9019_v19 }
 0x2f7   : > { %v1674_v0 = vadd.f32 %v1642_v49, %v11192_v61  ;;  %v11194_v20 = vld [vmem:[#allocation44_spill] sm:$0xff]  ;;  %v2230_v43 = vmul.f32 %v11195_v58, %v9021_v13  ;;  %v1968_v18 = vadd.f32 %v1936_v15, %v1870_v40  ;;  %v11201_v40 = vld [vmem:[#allocation51_spill] sm:$0xff] }
 0x2f8   : > { %v2131_v27 = vmul.f32 %v11194_v20, %v8982_v62  ;;  %v2132_v33 = vmul.f32 %v11194_v20, %v9015_v30  ;;  %v9046_v41 = vld [vmem:[%s10456_s3 + $0xa] ss:$0 sm:$0xff]  ;;  %v1577_v49 = vadd.f32 %v1545_v48, %v1479_v37  ;;  %v9055_v20 = vld [vmem:[%s10456_s3 + $0xb] ss:$0 sm:$0xff]  ;;  %v2620_v48 = vmul.f32 %v11200_v14, %v9015_v30 }
 0x2f9   : > { %11196 = vst [vmem:[#allocation89_spill] sm:$0xff] %v9046_v41  ;;  %v2326_v35 = vmul.f32 %v9046_v41, %v8978_v51  ;;  %v1772_v17 = vadd.f32 %v1740_v34, %v1674_v0  ;;  %v11197_v61 = vld [vmem:[#allocation112_spill] sm:$0xff]  ;;  %v2424_v58 = vmul.f32 %v9055_v20, %v8980_v54  ;;  %v2066_v37 = vadd.f32 %v2034_v25, %v1968_v18  ;;  %v11205_v25 = vld [vmem:[#allocation5_spill] sm:$0xff] }
 0x2fa   : > { %v2163_v53 = vadd.f32 %v2131_v27, %v11197_v61  ;;  %11199 = vst [vmem:[#allocation79_spill] sm:$0xff] %v9055_v20  ;;  %v1675_v34 = vadd.f32 %v1643_v52, %v1577_v49  ;;  %v11202_v27 = vld [vmem:[#allocation218_spill] sm:$0xff]  ;;  %v9068_v61 = vld [vmem:[%s10456_s3 + $0xe] ss:$0 sm:$0xff] }
 0x2fb   : > { %v2358_v24 = vadd.f32 %v2326_v35, %v11198_v47  ;;  %v1871_v15 = vadd.f32 %v11201_v40, %v1772_v17  ;;  %v2651_v35 = vadd.f32 %v2619_v6, %v11202_v27  ;;  %11203 = vst [vmem:[#allocation36_spill] sm:$0xff] %v9068_v61  ;;  %v2717_v20 = vmul.f32 %v9068_v61, %v9019_v19  ;;  %v11204_v52 = vld [vmem:[#allocation52_spill] sm:$0xff]  ;;  %v11211_v27 = vld [vmem:[#allocation55_spill] sm:$0xff] }
 0x2fc   : > { %v2261_v0 = vadd.f32 %v2229_v7, %v2163_v53  ;;  %v2718_v41 = vmul.f32 %v9068_v61, %v9021_v13  ;;  %v1773_v14 = vadd.f32 %v1741_v5, %v1675_v34  ;;  %v2164_v17 = vadd.f32 %v2132_v33, %v2066_v37  ;;  %v9079_v6 = vld [vmem:[%s10456_s3 + $0xf] ss:$0 sm:$0xff]  ;;  %v9086_v53 = vld [vmem:[%s10456_s3 + $0x10] ss:$0 sm:$0xff]  ;;  %v11208_v33 = vld [vmem:[#allocation106_spill] sm:$0xff] }
 0x2fd   : > { %v2456_v47 = vadd.f32 %v2424_v58, %v2358_v24  ;;  %v1969_v49 = vadd.f32 %v11204_v52, %v1871_v15  ;;  %v2749_v24 = vadd.f32 %v2717_v20, %v2651_v35  ;;  %11206 = vst [vmem:[#allocation83_spill] sm:$0xff] %v9079_v6  ;;  %v2814_v18 = vmul.f32 %v9079_v6, %v8978_v51  ;;  %v11210_v15 = vld [vmem:[#allocation53_spill] sm:$0xff]  ;;  %v11213_v61 = vld [vmem:[#allocation107_spill] sm:$0xff] }
 0x2fe   : > { %v2359_v7 = vadd.f32 %v11205_v25, %v2261_v0  ;;  %11207 = vst [vmem:[#allocation154_spill] sm:$0xff] %v9086_v53  ;;  %v2912_v5 = vmul.f32 %v9086_v53, %v8980_v54  ;;  %v1872_v34 = vadd.f32 %v11208_v33, %v1773_v14  ;;  %v2262_v40 = vadd.f32 %v2230_v43, %v2164_v17  ;;  %v11212_v52 = vld [vmem:[#allocation45_spill] sm:$0xff]  ;;  %v11216_v53 = vld [vmem:[#allocation34_spill] sm:$0xff]  ;;  %v11217_v43 = vld [vmem:[#allocation56_spill] sm:$0xff] }
 0x2ff   : > { %v2554_v58 = vadd.f32 %v2522_v28, %v2456_v47  ;;  %v11209_v28 = vld [vmem:[#allocation33_spill] sm:$0xff]  ;;  %v2846_v47 = vadd.f32 %v2814_v18, %v8852_v59  ;;  %v2847_v35 = vadd.f32 %v11211_v27, %v2749_v24  ;;  %v3040_v25 = vadd.f32 %v11212_v52, %v2942_v12  ;;  %v11219_v59 = vld [vmem:[#allocation100_spill] sm:$0xff]  ;;  %v11220_v24 = vld [vmem:[#allocation91_spill] sm:$0xff] }
 0x300   : > { %v2067_v20 = vadd.f32 %v11209_v28, %v1969_v49  ;;  %v2457_v37 = vadd.f32 %v11210_v15, %v2359_v7  ;;  %v1970_v6 = vadd.f32 %v11213_v61, %v1872_v34  ;;  %v2360_v42 = vadd.f32 %v11215_v44, %v2262_v40  ;;  %v11221_v12 = vld [vmem:[#allocation113_spill] sm:$0xff]  ;;  %v11222_v61 = vld [vmem:[#allocation12_spill] sm:$0xff] }
 0x301   : > { %v2652_v0 = vadd.f32 %v2620_v48, %v2554_v58  ;;  %v2944_v49 = vadd.f32 %v2912_v5, %v2846_v47  ;;  %v2945_v17 = vadd.f32 %v11217_v43, %v2847_v35  ;;  %v11218_v48 = vld [vmem:[#allocation76_spill] sm:$0xff]  ;;  %v11225_v40 = vld [vmem:[#allocation21_spill] sm:$0xff] }
 0x302   : > { %v2165_v23 = vadd.f32 %v11214_v32, %v2067_v20  ;;  %v2555_v14 = vadd.f32 %v11216_v53, %v2457_v37  ;;  %v3107_v7 = vmul.f32 %v11218_v48, %v8982_v62  ;;  %v2068_v58 = vadd.f32 %v11219_v59, %v1970_v6  ;;  %v11223_v32 = vld [vmem:[#allocation115_spill] sm:$0xff]  ;;  %v11224_v53 = vld [vmem:[#allocation37_spill] sm:$0xff]  ;;  %v11227_v6 = vld [vmem:[#allocation102_spill] sm:$0xff] }
 0x303   : > { %v2750_v33 = vadd.f32 %v2718_v41, %v2652_v0  ;;  %v2458_v28 = vadd.f32 %v11221_v12, %v2360_v42  ;;  %v3042_v44 = vadd.f32 %v8992_v26, %v2944_v49  ;;  %v3043_v41 = vadd.f32 %v11224_v53, %v2945_v17  ;;  %v11226_v37 = vld [vmem:[#allocation157_spill] sm:$0xff]  ;;  %v11229_v42 = vld [vmem:[#allocation116_spill] sm:$0xff]  ;;  %v11232_v49 = vld [vmem:[#allocation35_spill] sm:$0xff] }
 0x304   : > { %v2263_v18 = vadd.f32 %v11220_v24, %v2165_v23  ;;  %v2653_v34 = vadd.f32 %v11222_v61, %v2555_v14  ;;  %v3108_v5 = vmul.f32 %v11218_v48, %v9015_v30  ;;  %v2166_v15 = vadd.f32 %v11225_v40, %v2068_v58  ;;  %v11228_v23 = vld [vmem:[#allocation25_spill] sm:$0xff]  ;;  %v11230_v52 = vld [vmem:[#allocation80_spill] sm:$0xff]  ;;  %v11233_v59 = vld [vmem:[#allocation158_spill] sm:$0xff] }
 0x305   : > { %v2848_v20 = vadd.f32 %v11223_v32, %v2750_v33  ;;  %v2556_v47 = vadd.f32 %v11227_v6, %v2458_v28  ;;  %v3138_v14 = vadd.f32 %v11230_v52, %v3040_v25  ;;  %v11231_v33 = vld [vmem:[#allocation219_spill] sm:$0xff]  ;;  %v11234_v12 = vld [vmem:[#allocation40_spill] sm:$0xff]  ;;  %v3206_v25 = vmul.f32 %v8822_v31, %v9021_v13 }
 0x306   : > { %v2361_v0 = vadd.f32 %v11226_v37, %v2263_v18  ;;  %v2751_v27 = vadd.f32 %v11228_v23, %v2653_v34  ;;  %v3139_v43 = vadd.f32 %v3107_v7, %v11231_v33  ;;  %v3140_v26 = vadd.f32 %v3108_v5, %v3042_v44  ;;  %v11235_v58 = vld [vmem:[#allocation159_spill] sm:$0xff]  ;;  %v11237_v28 = vld [vmem:[#allocation20_spill] sm:$0xff]  ;;  %v11244_v33 = vld [vmem:[#allocation213_spill] sm:$0xff] }
 0x307   : > { %v2946_v35 = vadd.f32 %v11229_v42, %v2848_v20  ;;  %v2264_v17 = vadd.f32 %v11232_v49, %v2166_v15  ;;  %v2654_v61 = vadd.f32 %v11234_v12, %v2556_v47  ;;  %v11236_v18 = vld [vmem:[#allocation103_spill] sm:$0xff]  ;;  %v3141_v40 = vadd.f32 %v11237_v28, %v3043_v41  ;;  %v11238_v7 = vld [vmem:[#allocation208_spill] sm:$0xff]  ;;  %v11240_v15 = vld [vmem:[#allocation114_spill] sm:$0xff] }
 0x308   : > { %v2459_v24 = vadd.f32 %v11233_v59, %v2361_v0  ;;  %v2849_v32 = vadd.f32 %v11235_v58, %v2751_v27  ;;  %v3205_v34 = vmul.f32 %v8822_v31, %v9019_v19  ;;  %v11239_v44 = vld [vmem:[#allocation147_spill] sm:$0xff]  ;;  %v11241_v0 = vld [vmem:[#allocation160_spill] sm:$0xff]  ;;  %v11242_v47 = vld [vmem:[#allocation117_spill] sm:$0xff]  ;;  %v3235_v27 = vadd.f32 %v8825_v22, %v8995_v55 }
 0x309   : > { %v3044_v53 = vadd.f32 %v11236_v18, %v2946_v35  ;;  %v2362_v20 = vadd.f32 %v11238_v7, %v2264_v17  ;;  %v2752_v37 = vadd.f32 %v11240_v15, %v2654_v61  ;;  %v3236_v41 = vadd.f32 %v8842_v21, %v3138_v14  ;;  %v11243_v35 = vld [vmem:[#allocation210_spill] sm:$0xff]  ;;  %v11245_v17 = vld [vmem:[#allocation224_spill] sm:$0xff]  ;;  %v11249_v21 = vld [vmem:[#allocation225_spill] sm:$0xff] }
 0x30a   : > { %v2557_v5 = vadd.f32 %v11239_v44, %v2459_v24  ;;  %v2947_v6 = vadd.f32 %v11241_v0, %v2849_v32  ;;  %v3237_v42 = vadd.f32 %v3205_v34, %v3139_v43  ;;  %v11246_v24 = vld [vmem:[#allocation149_spill] sm:$0xff]  ;;  %v3238_v61 = vadd.f32 %v3206_v25, %v3140_v26  ;;  %v11247_v58 = vld [vmem:[#allocation8_spill] sm:$0xff]  ;;  %v11248_v18 = vld [vmem:[#allocation14_spill] sm:$0xff] }
 0x30b   : > { %v3142_v23 = vadd.f32 %v11242_v47, %v3044_v53  ;;  %v9138_v52 = vadd.f32 %v11243_v35, %v2362_v20  ;;  %v2850_v59 = vadd.f32 %v11245_v17, %v2752_v37  ;;  %v3239_v32 = vadd.f32 %v11247_v58, %v3141_v40  ;;  %v11250_v14 = vld [vmem:[#allocation133_spill] sm:$0xff]  ;;  %v11252_v44 = vld [vmem:[#allocation119_spill] sm:$0xff]  ;;  %v11254_v25 = vld [vmem:[#allocation144_spill] sm:$0xff] }
 0x30c   : > { %v9141_v49 = vadd.f32 %v11244_v33, %v2557_v5  ;;  %v3045_v12 = vadd.f32 %v11246_v24, %v2947_v6  ;;  %v3302_v22 = vmul.f32 %v8452_v57, %v8978_v51  ;;  %v3333_v28 = vadd.f32 %v8941_v56, %v3235_v27  ;;  %v11251_v34 = vld [vmem:[#allocation57_spill] sm:$0xff]  ;;  %v11255_v37 = vld [vmem:[#allocation202_spill] sm:$0xff]  ;;  %v11258_v27 = vld [vmem:[#allocation120_spill] sm:$0xff] }
 0x30d   : > { %v3240_v53 = vadd.f32 %v11248_v18, %v3142_v23  ;;  %v2948_v55 = vadd.f32 %v11249_v21, %v2850_v59  ;;  %v3335_v7 = vadd.f32 %v11251_v34, %v3237_v42  ;;  %v3336_v5 = vadd.f32 %v11252_v44, %v3238_v61  ;;  %v11253_v15 = vld [vmem:[#allocation161_spill] sm:$0xff]  ;;  %v11256_v6 = vld [vmem:[#allocation186_spill] sm:$0xff]  ;;  %v11261_v24 = vld [vmem:[#allocation207_spill] sm:$0xff] }
 0x30e   : > { %v3143_v43 = vadd.f32 %v11250_v14, %v3045_v12  ;;  %v3334_v20 = vadd.f32 %v3302_v22, %v3236_v41  ;;  %v3337_v26 = vadd.f32 %v11253_v15, %v3239_v32  ;;  %v3400_v51 = vmul.f32 %v8474_v63, %v8980_v54  ;;  %v11257_v35 = vld [vmem:[#allocation58_spill] sm:$0xff]  ;;  %v11259_v41 = vld [vmem:[#allocation163_spill] sm:$0xff]  ;;  %v11260_v17 = vld [vmem:[#allocation189_spill] sm:$0xff] }
 0x30f   : > { %v3338_v40 = vadd.f32 %v11254_v25, %v3240_v53  ;;  %v3046_v0 = vadd.f32 %v11255_v37, %v2948_v55  ;;  %v3431_v23 = vadd.f32 %v8948_v38, %v3333_v28  ;;  %v3433_v56 = vadd.f32 %v11257_v35, %v3335_v7  ;;  %v11262_v61 = vld [vmem:[#allocation24_spill] sm:$0xff]  ;;  %v11263_v53 = vld [vmem:[#allocation38_spill] sm:$0xff]  ;;  %v11266_v14 = vld [vmem:[#allocation109_spill] sm:$0xff] }
 0x310   : > { %v3241_v47 = vadd.f32 %v11256_v6, %v3143_v43  ;;  %v3434_v42 = vadd.f32 %v11258_v27, %v3336_v5  ;;  %v3435_v33 = vadd.f32 %v11259_v41, %v3337_v26  ;;  %v3432_v32 = vadd.f32 %v3400_v51, %v3334_v20  ;;  %v11264_v54 = vld [vmem:[#allocation104_spill] sm:$0xff]  ;;  %v11265_v38 = vld [vmem:[#allocation150_spill] sm:$0xff]  ;;  %v11268_v7 = vld [vmem:[#allocation29_spill] sm:$0xff] }
 0x311   : > { %v3436_v59 = vadd.f32 %v11260_v17, %v3338_v40  ;;  %v3144_v12 = vadd.f32 %v11261_v24, %v3046_v0  ;;  %v3529_v18 = vadd.f32 %v8945_v4, %v3431_v23  ;;  %v3531_v22 = vadd.f32 %v11263_v53, %v3433_v56  ;;  %v11267_v28 = vld [vmem:[#allocation212_spill] sm:$0xff]  ;;  %v11269_v20 = vld [vmem:[#allocation121_spill] sm:$0xff]  ;;  %v11270_v25 = vld [vmem:[#allocation122_spill] sm:$0xff] }
 0x312   : > { %v3339_v58 = vadd.f32 %v11262_v61, %v3241_v47  ;;  %v3532_v21 = vadd.f32 %v11264_v54, %v3434_v42  ;;  %v3533_v55 = vadd.f32 %v11265_v38, %v3435_v33  ;;  %v3530_v5 = vadd.f32 %v8999_v9, %v3432_v32  ;;  %v11271_v37 = vld [vmem:[#allocation216_spill] sm:$0xff]  ;;  %v11272_v47 = vld [vmem:[#allocation7_spill] sm:$0xff] }
 0x313   : > { %v3534_v43 = vadd.f32 %v11266_v14, %v3436_v59  ;;  %v3242_v34 = vadd.f32 %v11267_v28, %v3144_v12  ;;  %v3595_v15 = vmul.f32 %v8891_v50, %v8982_v62  ;;  %v3596_v4 = vmul.f32 %v8891_v50, %v9015_v30  ;;  %v11273_v35 = vld [vmem:[#allocation3_spill] sm:$0xff]  ;;  %v11275_v17 = vld [vmem:[#allocation124_spill] sm:$0xff] }
 0x314   : > { %v3437_v44 = vadd.f32 %v11268_v7, %v3339_v58  ;;  %v3629_v26 = vadd.f32 %v11269_v20, %v3531_v22  ;;  %v3630_v40 = vadd.f32 %v11270_v25, %v3532_v21  ;;  %v3631_v0 = vadd.f32 %v11271_v37, %v3533_v55  ;;  %v11274_v27 = vld [vmem:[#allocation123_spill] sm:$0xff]  ;;  %v11277_v58 = vld [vmem:[#allocation198_spill] sm:$0xff]  ;;  %v5085_v37 = vld [vmem:[#allocation2 + $0x16c] sm:$0xff] }
 0x315   : > { %v3340_v6 = vadd.f32 %v8873_v46, %v3242_v34  ;;  %v3627_v23 = vadd.f32 %v3595_v15, %v3529_v18  ;;  %v3632_v56 = vadd.f32 %v11273_v35, %v3534_v43  ;;  %v3628_v9 = vadd.f32 %v3596_v4, %v3530_v5  ;;  %v11276_v59 = vld [vmem:[#allocation195_spill] sm:$0xff]  ;;  %v11278_v18 = vld [vmem:[#allocation22_spill] sm:$0xff] }
 0x316   : > { %v3535_v51 = vadd.f32 %v11272_v47, %v3437_v44  ;;  %v3693_v62 = vmul.f32 %v8914_v29, %v9019_v19  ;;  %v3694_v30 = vmul.f32 %v8914_v29, %v9021_v13  ;;  %v3727_v42 = vadd.f32 %v11274_v27, %v3629_v26  ;;  %v5082_v44 = vld [vmem:[#allocation2 + $0x171] sm:$0xff] }
 0x317   : > { %v3438_v41 = vadd.f32 %v8879_v39, %v3340_v6  ;;  %v3728_v46 = vadd.f32 %v11275_v17, %v3630_v40  ;;  %v3729_v24 = vadd.f32 %v11276_v59, %v3631_v0  ;;  %v3730_v32 = vadd.f32 %v11277_v58, %v3632_v56  ;;  %v11279_v5 = vld [vmem:[#allocation154_spill] sm:$0xff]  ;;  %v11291_v17 = vld [vmem:[#allocation88_spill] sm:$0xff] }
 0x318   : > { %v3633_v33 = vadd.f32 %v8897_v8, %v3535_v51  ;;  %v3725_v12 = vadd.f32 %v3693_v62, %v3627_v23  ;;  %v3726_v61 = vadd.f32 %v3694_v30, %v3628_v9  ;;  %v9196_v53 = vadd.f32 %v11278_v18, %v3727_v42  ;;  %v5084_v26 = vld [vmem:[#allocation2 + $0x173] sm:$0xff]  ;;  %v11293_v59 = vld [vmem:[#allocation48_spill] sm:$0xff] }
 0x319   : > { %v3536_v19 = vadd.f32 %v8886_v45, %v3438_v41  ;;  %v9201_v22 = vadd.f32 %v11278_v18, %v3728_v46  ;;  %v9204_v39 = vadd.f32 %v11278_v18, %v3729_v24  ;;  %v9213_v21 = vadd.f32 %v11278_v18, %v3730_v32  ;;  %v5086_v6 = vld [vmem:[#allocation2 + $0x174] sm:$0xff]  ;;  %v11294_v24 = vld [vmem:[#allocation148_spill] sm:$0xff]  ;;  %v5089_v32 = vld [vmem:[%s5408_s19 + $0xe0] sm:$0xff] }
 0x31a   : > { %v3731_v13 = vadd.f32 %v8920_v60, %v3633_v33  ;;  %v9207_v8 = vadd.f32 %v11278_v18, %v3725_v12  ;;  %v9210_v54 = vadd.f32 %v11278_v18, %v3726_v61  ;;  %v4631_v38 = vmul.f32 -1.442695, %v9196_v53  ;;  %v5087_v51 = vld [vmem:[#allocation2 + $0x170] sm:$0xff]  ;;  %v5088_v33 = vld [vmem:[%s5408_s19 + $0xa0] sm:$0xff] }
 0x31b   : > { %v3634_v45 = vadd.f32 %v8909_v16, %v3536_v19  ;;  %v4632_v55 = vmul.f32 -1.442695, %v9201_v22  ;;  %v4633_v28 = vmul.f32 -1.442695, %v9204_v39  ;;  %v1355_v34 = vmul.f32 %v9004_v2, %v8869_v3  ;;  %v11296_v19 = vld [vmem:[#allocation6_spill] sm:$0xff] }
 0x31c   : > { %v9218_v60 = vadd.f32 %v11278_v18, %v3731_v13  ;;  %v4629_v14 = vmul.f32 -1.442695, %v9207_v8  ;;  %v4630_v43 = vmul.f32 -1.442695, %v9210_v54  ;;  %4857 = vpow2.f32 %v4631_v38 }
 0x31d   : > { %v1453_v16 = vmul.f32 %v9011_v36, %v8875_v1  ;;  %v3732_v7 = vadd.f32 %v8937_v10, %v3634_v45  ;;  %4859 = vpow2.f32 %v4632_v55  ;;  %v9231_v15 = vmul.f32 %v5082_v44, %v11279_v5  ;;  %v11298_v55 = vld [vmem:[#allocation153_spill] sm:$0xff] }
 0x31e   : > { %v9234_v4 = vmul.f32 %v5083_v11, %v11218_v48  ;;  %4861 = vpow2.f32 %v4629_v14  ;;  %v4634_v20 = vmul.f32 -1.442695, %v9213_v21  ;;  %v9238_v25 = vmul.f32 %v5084_v26, %v11218_v48  ;;  %v4856_v48 = vpop.eup %4855  ;;  %v11299_v14 = vld [vmem:[#allocation83_spill] sm:$0xff] }
 0x31f   : > { %11280 = vst [vmem:[#allocation72_spill] sm:$0xff] %v9231_v15  ;;  %v9241_v40 = vadd.f32 %v11278_v18, %v3732_v7  ;;  %4863 = vpow2.f32 %v4630_v43  ;;  %v4635_v10 = vmul.f32 -1.442695, %v9218_v60  ;;  %v9245_v0 = vmul.f32 %v5085_v37, %v8822_v31  ;;  %v11300_v7 = vld [vmem:[#allocation73_spill] sm:$0xff] }
 0x320   : > { %11281 = vst [vmem:[#allocation92_spill] sm:$0xff] %v9234_v4  ;;  %v9248_v47 = vmul.f32 %v5086_v6, %v8822_v31  ;;  %v9251_v23 = vmul.f32 %v5087_v51, %v8452_v57  ;;  %4865 = vpow2.f32 %v4633_v28  ;;  %v9254_v35 = vmul.f32 %v5082_v44, %v8474_v63 }
 0x321   : > { %11282 = vst [vmem:[#allocation175_spill] sm:$0xff] %v9238_v25  ;;  %v9257_v56 = vmul.f32 %v5083_v11, %v8891_v50  ;;  %v1485_v9 = vadd.f32 %v1453_v16, %v1355_v34  ;;  %v4636_v62 = vmul.f32 -1.442695, %v9241_v40  ;;  %v9261_v27 = vmul.f32 %v5084_v26, %v8891_v50  ;;  %v9305_v26 = vld [vmem:[%s10456_s3 + $0x14] ss:$0 sm:$0xff] }
 0x322   : > { %11283 = vst [vmem:[#allocation101_spill] sm:$0xff] %v9245_v0  ;;  %v4858_v30 = vpop.eup %4857  ;;  %v9264_v42 = vmul.f32 %v5085_v37, %v8914_v29  ;;  %v9267_v57 = vmul.f32 %v5086_v6, %v8914_v29  ;;  %4867 = vpow2.f32 %v4634_v20  ;;  %v9271_v46 = vmul.f32 %v5088_v33, %v11291_v17  ;;  %v9313_v6 = vld [vmem:[#allocation2 + $0x181] sm:$0xff]  ;;  %v11308_v33 = vld [vmem:[#allocation81_spill] sm:$0xff] }
 0x323   : > { %11284 = vst [vmem:[#allocation85_spill] sm:$0xff] %v9248_v47  ;;  %v4860_v41 = vpop.eup %4859  ;;  %v1551_v12 = vmul.f32 %v11294_v24, %v11293_v59  ;;  %4869 = vpow2.f32 %v4635_v10  ;;  %v9275_v61 = vadd.f32 1.0, %v4858_v30  ;;  %v9279_v18 = vmul.f32 %v5089_v32, %v11291_v17  ;;  %v9307_v10 = vld [vmem:[#allocation2 + $0x180] sm:$0xff] }
 0x324   : > { %11285 = vst [vmem:[#allocation155_spill] sm:$0xff] %v9251_v23  ;;  %v4862_v58 = vpop.eup %4861  ;;  %v9282_v13 = vmul.f32 %v5089_v32, %v11296_v19  ;;  %4871 = vpow2.f32 %v4636_v62  ;;  %v9284_v38 = vadd.f32 1.0, %v4860_v41  ;;  %v9288_v43 = vmul.f32 %v11299_v14, %v11298_v55  ;;  %v9330_v41 = vld [vmem:[%s10456_s3 + $0x4] ss:$0 sm:$0xff] }
 0x325   : > { %11286 = vst [vmem:[#allocation90_spill] sm:$0xff] %v9254_v35  ;;  %v4864_v45 = vpop.eup %4863  ;;  %v1583_v28 = vadd.f32 %v1551_v12, %v1485_v9  ;;  %v9290_v34 = vadd.f32 1.0, %v4862_v58  ;;  %4873 = vrcp.f32 %v9275_v61  ;;  %v9295_v44 = vmul.f32 %v11279_v5, %v11300_v7  ;;  %v11306_v9 = vld [vmem:[#allocation30_spill] sm:$0xff]  ;;  %v11311_v7 = vld [vmem:[#allocation87_spill] sm:$0xff] }
 0x326   : > { %11287 = vst [vmem:[#allocation49_spill] sm:$0xff] %v9257_v56  ;;  %v4866_v16 = vpop.eup %4865  ;;  %v9297_v11 = vadd.f32 1.0, %v4864_v45  ;;  %4875 = vrcp.f32 %v9284_v38  ;;  %v9300_v20 = vadd.f32 1.0, %v4856_v48  ;;  %v9311_v37 = vmul.f32 %v9307_v10, %v9305_v26  ;;  %v9322_v48 = vld [vmem:[%s10456_s3 + $0x3] ss:$0 sm:$0xff]  ;;  %v11310_v45 = vld [vmem:[#allocation44_spill] sm:$0xff] }
 0x327   : > { %11288 = vst [vmem:[#allocation178_spill] sm:$0xff] %v9261_v27  ;;  %v9317_v51 = vmul.f32 %v9313_v6, %v8474_v63  ;;  %v1649_v62 = vmul.f32 %v9322_v48, %v11306_v9  ;;  %4877 = vrcp.f32 %v9290_v34  ;;  %v9334_v63 = vmul.f32 %v9330_v41, %v11308_v33 }
 0x328   : > { %11289 = vst [vmem:[#allocation179_spill] sm:$0xff] %v9264_v42  ;;  %v4868_v30 = vpop.eup %4867  ;;  %v9338_v12 = vmul.f32 %v11291_v17, %v11293_v59  ;;  %v9340_v58 = vadd.f32 1.0, %v4866_v16  ;;  %4879 = vrcp.f32 %v9297_v11  ;;  %v9347_v55 = vmul.f32 %v11310_v45, %v11306_v9  ;;  %v9356_v59 = vld [vmem:[%s10456_s3 + $0xd] ss:$0 sm:$0xff] }
 0x329   : > { %11290 = vst [vmem:[#allocation184_spill] sm:$0xff] %v9267_v57  ;;  %v4870_v32 = vpop.eup %4869  ;;  %v9343_v19 = vadd.f32 %v1649_v62, %v1583_v28  ;;  %v9360_v16 = vmul.f32 %v9356_v59, %v11306_v9  ;;  %v4072_v28 = vand.u32 2147483648, %v9290_v34  ;;  %vm4096_vm12 = vweird.f32 %v9275_v61 }
 0x32a   : > { %11292 = vst [vmem:[#allocation9_spill] sm:$0xff] %v9271_v46  ;;  %v4102_v62 = vand.u32 2147483648, %v9275_v61  ;;  %4881 = vrcp.f32 %v9300_v20  ;;  %v4100_v57 = vand.u32 2147483647, %v9275_v61  ;;  %vm4111_vm2 = vweird.f32 %v9284_v38 }
 0x32b   : > { %11295 = vst [vmem:[#allocation93_spill] sm:$0xff] %v9279_v18  ;;  %v9351_v18 = vmul.f32 %v11311_v7, %v11308_v33  ;;  %v4070_v7 = vand.u32 2147483647, %v9290_v34  ;;  %v9374_v27 = vadd.f32 1.0, %v4868_v30  ;;  %vm4066_vm11 = vweird.f32 %v9290_v34 }
 0x32c   : > { %11297 = vst [vmem:[#allocation118_spill] sm:$0xff] %v9282_v13  ;;  %4883 = vrcp.f32 %v9340_v58  ;;  %vm4081_vm14 = vweird.f32 %v9297_v11  ;;  %v4073_v0 = vor.u32 1.1754944e-38, %v4072_v28  ;;  %v4103_v4 = vor.u32 1.1754944e-38, %v4102_v62 }
 0x32d   : > { %11301 = vst [vmem:[#allocation94_spill] sm:$0xff] %v9307_v10  ;;  %v4085_v10 = vand.u32 2147483647, %v9297_v11  ;;  %vm9389_vm3 = vcmp.eq.f32.partialorder %v4070_v7, 8.507059e+37  ;;  %vm9403_vm7 = vcmp.eq.f32.partialorder %v4100_v57, 8.507059e+37  ;;  %4885 = vrcp.f32 %v9374_v27 }
 0x32e   : > { %11302 = vst [vmem:[#allocation59_spill] sm:$0xff] %v9311_v37  ;;  %v4087_v37 = vand.u32 2147483648, %v9297_v11  ;;  %v4117_v7 = vand.u32 2147483648, %v9284_v38  ;;  %vm4126_vm15 = vweird.f32 %v9340_v58  ;;  %v4147_v15 = vand.u32 2147483648, %v9374_v27 }
 0x32f   : > { %11303 = vst [vmem:[#allocation185_spill] sm:$0xff] %v9313_v6  ;;  %v4872_v6 = vpop.eup %4871  ;;  %vm9394_vm4 = vcmp.eq.f32.partialorder %v4085_v10, 8.507059e+37 }
 0x330   : > { %11304 = vst [vmem:[#allocation187_spill] sm:$0xff] %v9317_v51  ;;  %v9366_v45 = vpop.eup %4873  ;;  %v9380_v51 = vadd.f32 1.0, %v4870_v32  ;;  %v9382_v47 = vadd.f32 1.0, %v4872_v6 }
 0x331   : > { %11305 = vst [vmem:[#allocation50_spill] sm:$0xff] %v9322_v48  ;;  %v9372_v42 = vpop.eup %4875  ;;  %v4092_v13 = vmul.f32 %v9366_v45, %v9275_v61  ;;  %vm4097_vm5 = vweird.f32 %v9366_v45  ;;  %v4132_v61 = vand.u32 2147483648, %v9340_v58 }
 0x332   : > { %11307 = vst [vmem:[#allocation193_spill] sm:$0xff] %v9330_v41  ;;  %v4878_v56 = vpop.eup %4877  ;;  %v4107_v30 = vmul.f32 %v9372_v42, %v9284_v38  ;;  %vm4112_vm8 = vweird.f32 %v9372_v42  ;;  %vm9414_vm10 = vmor %vm4096_vm12, %vm4097_vm5  ;;  %4887 = vrcp.f32 %v9380_v51 }
 0x333   : > { %11309 = vst [vmem:[#allocation95_spill] sm:$0xff] %v9338_v12  ;;  %v4880_v25 = vpop.eup %4879  ;;  %v4062_v35 = vmul.f32 %v4878_v56, %v9290_v34  ;;  %v4093_v23 = vsub.f32 1.0, %v4092_v13  ;;  %vm4067_vm9 = vweird.f32 %v4878_v56  ;;  %vm9422_vm13 = vmor %vm4111_vm2, %vm4112_vm8  ;;  %4889 = vrcp.f32 %v9382_v47 }
 0x334   : > { %11312 = vst [vmem:[#allocation156_spill] sm:$0xff] %v9356_v59  ;;  %v4077_v6 = vmul.f32 %v4880_v25, %v9297_v11  ;;  %v4108_v12 = vsub.f32 1.0, %v4107_v30  ;;  %v4115_v59 = vand.u32 2147483647, %v9284_v38  ;;  %v9399_v41 = vpop.eup %4881  ;;  %vm4082_vm0 = vweird.f32 %v4880_v25  ;;  %vm9431_vm1 = vmor %vm4066_vm11, %vm4067_vm9 }
 0x335   : > { %v4063_v48 = vsub.f32 1.0, %v4062_v35  ;;  %v4094_v28 = vmul.f32 %v9366_v45, %v4093_v23  ;;  %v4884_v30 = vpop.eup %4883  ;;  %v4088_v35 = vor.u32 1.1754944e-38, %v4087_v37  ;;  %v4130_v37 = vand.u32 2147483647, %v9340_v58  ;;  %vm4083_vm12 = vmor %vm4081_vm14, %vm4082_vm0 }
 0x336   : > { %v4078_v10 = vsub.f32 1.0, %v4077_v6  ;;  %v4109_v62 = vmul.f32 %v9372_v42, %v4108_v12  ;;  %v4122_v6 = vmul.f32 %v4884_v30, %v9340_v58  ;;  %vm9435_vm6 = vcmp.eq.f32.partialorder %v4115_v59, 8.507059e+37  ;;  %v4886_v24 = vpop.eup %4885  ;;  %v11330_v58 = vld [vmem:[#allocation36_spill] sm:$0xff] }
 0x337   : > { %v4064_v17 = vmul.f32 %v4878_v56, %v4063_v48  ;;  %v4095_v23 = vadd.f32 %v9366_v45, %v4094_v28  ;;  %v4118_v38 = vor.u32 1.1754944e-38, %v4117_v7  ;;  %vm4127_vm2 = vweird.f32 %v4884_v30 }
 0x338   : > { %v4079_v29 = vmul.f32 %v4880_v25, %v4078_v10  ;;  %v4110_v12 = vadd.f32 %v9372_v42, %v4109_v62  ;;  %v4123_v62 = vsub.f32 1.0, %v4122_v6  ;;  %v4137_v6 = vmul.f32 %v4886_v24, %v9374_v27  ;;  %vm4128_vm14 = vmor %vm4126_vm15, %vm4127_vm2 }
 0x339   : > { %v4065_v46 = vadd.f32 %v4878_v56, %v4064_v17  ;;  %v4099_v34 = vsel %vm9414_vm10, %v9366_v45, %v4095_v23  ;;  %vm9456_vm11 = vcmp.eq.f32.partialorder %v4130_v37, 8.507059e+37  ;;  %v4133_v45 = vor.u32 1.1754944e-38, %v4132_v61 }
 0x33a   : > { %v4080_v10 = vadd.f32 %v4880_v25, %v4079_v29  ;;  %v4114_v59 = vsel %vm9422_vm13, %v9372_v42, %v4110_v12  ;;  %v4124_v7 = vmul.f32 %v4884_v30, %v4123_v62  ;;  %v4138_v57 = vsub.f32 1.0, %v4137_v6  ;;  %v11329_v12 = vld [vmem:[#allocation164_spill] sm:$0xff] }
 0x33b   : > { %v4069_v50 = vsel %vm9431_vm1, %v4878_v56, %v4065_v46  ;;  %v4119_v42 = vsel %vm9435_vm6, %v4118_v38, %v4114_v59  ;;  %v9474_v48 = vadd.f32 %v9347_v55, %v11329_v12  ;;  %v9478_v37 = vmul.f32 %v11330_v58, %v11308_v33 }
 0x33c   : > { %v4084_v29 = vsel %vm4083_vm12, %v4880_v25, %v4080_v10  ;;  %v4074_v56 = vsel %vm9389_vm3, %v4073_v0, %v4069_v50  ;;  %v4104_v25 = vsel %vm9403_vm7, %v4103_v4, %v4099_v34  ;;  %v4125_v23 = vadd.f32 %v4884_v30, %v4124_v7 }
 0x33d   : > { %v4089_v46 = vsel %vm9394_vm4, %v4088_v35, %v4084_v29  ;;  %vm4142_vm3 = vweird.f32 %v4886_v24  ;;  %v4145_v50 = vand.u32 2147483647, %v9374_v27  ;;  %v4139_v32 = vmul.f32 %v4886_v24, %v4138_v57  ;;  %v4888_v35 = vpop.eup %4887 }
 0x33e   : > { %v4129_v0 = vsel %vm4128_vm14, %v4884_v30, %v4125_v23  ;;  %v4401_v4 = vmul.f32 %v4074_v56, %v9207_v8  ;;  %v4402_v13 = vmul.f32 %v4089_v46, %v9210_v54  ;;  %v4403_v30 = vmul.f32 %v4104_v25, %v9196_v53  ;;  %v4890_v38 = vpop.eup %4889 }
 0x33f   : > { %v4134_v61 = vsel %vm9456_vm11, %v4133_v45, %v4129_v0  ;;  %v4140_v28 = vadd.f32 %v4886_v24, %v4139_v32  ;;  %vm4141_vm4 = vweird.f32 %v9374_v27  ;;  %v4152_v8 = vmul.f32 %v4888_v35, %v9380_v51  ;;  %v513_v0 = vpop.f32.mrf.mxu3  ;;  %v9511_v32 = vld [vmem:[#allocation2 + $0x138] sm:$0xff] }
 0x340   : > { %v4404_v54 = vmul.f32 %v4119_v42, %v9201_v22  ;;  %4433 = vst [vmem:[%s7473_s22 + $0x50] sm:$0xff] %v4401_v4  ;;  %vm4143_vm5 = vmor %vm4141_vm4, %vm4142_vm3  ;;  %v4148_v55 = vor.u32 1.1754944e-38, %v4147_v15  ;;  %v4405_v10 = vmul.f32 %v4134_v61, %v9204_v39  ;;  %v990_v17 = vmul.f32 %v9399_v41, %v9300_v20  ;;  %v9517_v61 = vld [vmem:[#allocation2 + $0x139] sm:$0xff] }
 0x341   : > { %4434 = vst [vmem:[%s7473_s22 + $0x58] sm:$0xff] %v4402_v13  ;;  %v998_v53 = vand.u32 2147483647, %v9300_v20  ;;  %v4144_v27 = vsel %vm4143_vm5, %v4886_v24, %v4140_v28  ;;  %vm4146_vm7 = vcmp.eq.f32.partialorder %v4145_v50, 8.507059e+37  ;;  %v4153_v62 = vsub.f32 1.0, %v4152_v8 }
 0x342   : > { %v4162_v22 = vand.u32 2147483648, %v9380_v51  ;;  %4435 = vst [vmem:[%s7473_s22 + $0x60] sm:$0xff] %v4403_v30  ;;  %v4149_v34 = vsel %vm4146_vm7, %v4148_v55, %v4144_v27  ;;  %v4167_v29 = vmul.f32 %v4890_v38, %v9382_v47  ;;  %v991_v39 = vsub.f32 1.0, %v990_v17  ;;  %v11334_v17 = vld [vmem:[#allocation31_spill] sm:$0xff] }
 0x343   : > { %4436 = vst [vmem:[%s7473_s22 + $0x68] sm:$0xff] %v4404_v54  ;;  %v1000_v59 = vand.u32 2147483648, %v9300_v20  ;;  %v4154_v7 = vmul.f32 %v4888_v35, %v4153_v62  ;;  %vm4157_vm8 = vweird.f32 %v4888_v35  ;;  %v4160_v6 = vand.u32 2147483647, %v9380_v51  ;;  %v11332_v54 = vld [vmem:[#allocation201_spill] sm:$0xff] }
 0x344   : > { %v4406_v56 = vmul.f32 %v4149_v34, %v9213_v21  ;;  %4437 = vst [vmem:[%s7473_s22 + $0x70] sm:$0xff] %v4405_v10  ;;  %v4168_v24 = vsub.f32 1.0, %v4167_v29  ;;  %v992_v46 = vmul.f32 %v9399_v41, %v991_v39  ;;  %vm994_vm9 = vweird.f32 %v9300_v20  ;;  %v11333_v10 = vld [vmem:[#allocation217_spill] sm:$0xff]  ;;  %v11339_v39 = vld [vmem:[#allocation86_spill] sm:$0xff] }
 0x345   : > { %vm995_vm0 = vweird.f32 %v9399_v41  ;;  %v4155_v11 = vadd.f32 %v4888_v35, %v4154_v7  ;;  %vm4156_vm10 = vweird.f32 %v9380_v51  ;;  %v4163_v45 = vor.u32 1.1754944e-38, %v4162_v22 }
 0x346   : > { %v4177_v25 = vand.u32 2147483648, %v9382_v47  ;;  %4438 = vst [vmem:[%s7473_s22 + $0x78] sm:$0xff] %v4406_v56  ;;  %vm4158_vm13 = vmor %vm4156_vm10, %vm4157_vm8  ;;  %v4169_v23 = vmul.f32 %v4890_v38, %v4168_v24  ;;  %vm4172_vm15 = vweird.f32 %v4890_v38  ;;  %v4175_v21 = vand.u32 2147483647, %v9382_v47 }
 0x347   : > { %v993_v57 = vadd.f32 %v9399_v41, %v992_v46  ;;  %v4159_v42 = vsel %vm4158_vm13, %v4888_v35, %v4155_v11  ;;  %vm4161_vm1 = vcmp.eq.f32.partialorder %v4160_v6, 8.507059e+37  ;;  %vm996_vm6 = vmor %vm994_vm9, %vm995_vm0  ;;  %vm999_vm12 = vcmp.eq.f32.partialorder %v998_v53, 8.507059e+37  ;;  %v9572_v6 = vld [vmem:[#allocation2 + $0x18b] sm:$0xff] }
 0x348   : > { %v1001_v20 = vor.u32 1.1754944e-38, %v1000_v59  ;;  %v4164_v50 = vsel %vm4161_vm1, %v4163_v45, %v4159_v42  ;;  %v4170_v15 = vadd.f32 %v4890_v38, %v4169_v23  ;;  %vm4171_vm2 = vweird.f32 %v9382_v47  ;;  %v9582_v11 = vld [vmem:[#allocation2 + $0x188] sm:$0xff] }
 0x349   : > { %v997_v51 = vsel %vm996_vm6, %v9399_v41, %v993_v57  ;;  %v1356_v4 = vmul.f32 %v9511_v32, %v9004_v2  ;;  %vm4173_vm11 = vmor %vm4171_vm2, %vm4172_vm15  ;;  %v4178_v13 = vor.u32 1.1754944e-38, %v4177_v25  ;;  %v4407_v35 = vmul.f32 %v4164_v50, %v9218_v60  ;;  %v11331_v41 = vld [vmem:[#allocation77_spill] sm:$0xff]  ;;  %11342 = vst [vmem:[#allocation32_spill] sm:$0xff] %v9582_v11  ;;  %v9605_v25 = vld [vmem:[%s5408_s19 + $0xe8] sm:$0xff] }
 0x34a   : > { %v1002_v12 = vsel %vm999_vm12, %v1001_v20, %v997_v51  ;;  %v1454_v47 = vmul.f32 %v9517_v61, %v9011_v36  ;;  %v4174_v30 = vsel %vm4173_vm11, %v4890_v38, %v4170_v15  ;;  %vm4176_vm14 = vcmp.eq.f32.partialorder %v4175_v21, 8.507059e+37  ;;  %v11336_v38 = vld [vmem:[#allocation10_spill] sm:$0xff]  ;;  %v9593_v45 = vld [vmem:[#allocation2 + $0x189] sm:$0xff]  ;;  %11346 = vst [vmem:[#allocation188_spill] sm:$0xff] %v9605_v25 }
 0x34b   : > { %v9522_v28 = vmul.f32 %v1002_v12, %v11331_v41  ;;  %v4179_v8 = vsel %vm4176_vm14, %v4178_v13, %v4174_v30  ;;  %4439 = vst [vmem:[%s7473_s22 + $0x80] sm:$0xff] %v4407_v35  ;;  %v2558_v55 = vadd.f32 %v11332_v54, %v9138_v52  ;;  %v2753_v60 = vadd.f32 %v11333_v10, %v9141_v49  ;;  %v9548_v49 = vld [vmem:[%s10456_s3 + $0x12] ss:$0 sm:$0xff]  ;;  %v9611_v21 = vld [vmem:[#allocation2 + $0x183] sm:$0xff]  ;;  %v11348_v57 = vld [vmem:[#allocation70_spill] sm:$0xff] }
 0x34c   : > { %v9530_v53 = vadd.f32 %v11334_v17, %v513_v0  ;;  %v9534_v27 = vadd.f32 %v9334_v63, %v9343_v19  ;;  %v2658_v62 = vadd.f32 %v9360_v16, %v11336_v38  ;;  %v2820_v22 = vmul.f32 %v11299_v14, %v8869_v3  ;;  %v11337_v63 = vld [vmem:[#allocation78_spill] sm:$0xff]  ;;  %v11338_v16 = vld [vmem:[#allocation215_spill] sm:$0xff]  ;;  %11344 = vst [vmem:[#allocation75_spill] sm:$0xff] %v9593_v45  ;;  %v5105_v20 = vld [vmem:[%s5408_s19 + $0xb0] sm:$0xff] }
 0x34d   : > { %v4408_v34 = vmul.f32 %v4179_v8, %v9241_v40  ;;  %1179 = vst [vmem:[%s5408_s19 + $0xb8] sm:$0xff] %v9522_v28  ;;  %v2918_v52 = vmul.f32 %v11279_v5, %v8875_v1  ;;  %v3113_v19 = vmul.f32 %v9548_v49, %v11337_v63  ;;  %v2656_v29 = vadd.f32 %v11338_v16, %v2558_v55  ;;  %v11349_v50 = vld [vmem:[#allocation148_spill] sm:$0xff]  ;;  %v11350_v0 = vld [vmem:[#allocation9_spill] sm:$0xff]  ;;  %v11352_v12 = vld [vmem:[#allocation82_spill] sm:$0xff] }
 0x34e   : > { %11335 = vst [vmem:[#allocation176_spill] sm:$0xff] %v9530_v53  ;;  %v2851_v3 = vadd.f32 %v9288_v43, %v2753_v60  ;;  %v9557_v40 = vadd.f32 %v9351_v18, %v9474_v48  ;;  %v9561_v1 = vmul.f32 %v9548_v49, %v11306_v9  ;;  %v9565_v59 = vmul.f32 %v11339_v39, %v8822_v31  ;;  %v9574_v43 = vld [vmem:[#allocation2 + $0x18c] sm:$0xff]  ;;  %v11341_v48 = vld [vmem:[#allocation222_spill] sm:$0xff]  ;;  %v9624_v35 = vld [vmem:[#allocation2 + $0x184] sm:$0xff] }
 0x34f   : > { %1283 = vst [vmem:[#allocation2 + $0x142] sm:$0xff] %v9522_v28  ;;  %v9569_v7 = vmul.f32 %v8822_v31, %v11308_v33  ;;  %v1486_v18 = vadd.f32 %v1454_v47, %v1356_v4  ;;  %v2754_v56 = vadd.f32 %v11341_v48, %v2656_v29  ;;  %v4618_v24 = vmul.f32 -1.442695, %v9530_v53  ;;  %v9591_v33 = vld [vmem:[%s10456_s3 + $0x15] ss:$0 sm:$0xff]  ;;  %v11356_v39 = vld [vmem:[#allocation50_spill] sm:$0xff] }
 0x350   : > { %4440 = vst [vmem:[%s7473_s22 + $0x88] sm:$0xff] %v4408_v34  ;;  %v2949_v9 = vadd.f32 %v9295_v44, %v2851_v3  ;;  %v9580_v46 = vadd.f32 %v9478_v37, %v2658_v62  ;;  %v9586_v31 = vmul.f32 %v9582_v11, %v9305_v26  ;;  %v9597_v44 = vmul.f32 %v9593_v45, %v9591_v33  ;;  %v9602_v37 = vld [vmem:[%s10456_s3 + $0x16] ss:$0 sm:$0xff]  ;;  %v11353_v62 = vld [vmem:[#allocation71_spill] sm:$0xff]  ;;  %v11354_v34 = vld [vmem:[#allocation84_spill] sm:$0xff] }
 0x351   : > { %11340 = vst [vmem:[#allocation190_spill] sm:$0xff] %v9574_v43  ;;  %v9609_v23 = vmul.f32 %v9605_v25, %v9602_v37  ;;  %v9615_v42 = vmul.f32 %v9611_v21, %v11348_v57  ;;  %v1552_v15 = vmul.f32 %v5105_v20, %v11349_v50  ;;  %v2852_v51 = vadd.f32 %v2820_v22, %v2754_v56  ;;  %v11363_v25 = vld [vmem:[#allocation156_spill] sm:$0xff] }
 0x352   : > { %11343 = vst [vmem:[#allocation194_spill] sm:$0xff] %v9591_v33  ;;  %v3047_v4 = vadd.f32 %v11350_v0, %v2949_v9  ;;  %v9622_v13 = vmul.f32 %v11348_v57, %v9572_v6  ;;  %v9628_v47 = vmul.f32 %v9624_v35, %v11352_v12  ;;  %v9632_v30 = vmul.f32 %v11352_v12, %v9574_v43  ;;  %v5107_v9 = vld [vmem:[%s10456_s3 + $0x5] ss:$0 sm:$0xff]  ;;  %v9687_v12 = vld [vmem:[%s10456_s3 + $0x8] ss:$0 sm:$0xff]  ;;  %v11364_v43 = vld [vmem:[#allocation61_spill] sm:$0xff] }
 0x353   : > { %11345 = vst [vmem:[#allocation146_spill] sm:$0xff] %v9602_v37  ;;  %v9635_v41 = vmul.f32 %v5105_v20, %v9602_v37  ;;  %v1584_v8 = vadd.f32 %v1552_v15, %v1486_v18  ;;  %v9637_v54 = vadd.f32 %v2918_v52, %v2852_v51  ;;  %4891 = vpow2.f32 %v4618_v24  ;;  %v11355_v52 = vld [vmem:[#allocation88_spill] sm:$0xff] }
 0x354   : > { %11347 = vst [vmem:[#allocation13_spill] sm:$0xff] %v9611_v21  ;;  %v9639_v55 = vadd.f32 %v3113_v19, %v3047_v4  ;;  %v1553_v17 = vmul.f32 %v11349_v50, %v9522_v28  ;;  %v2042_v22 = vmul.f32 %v11353_v62, %v9522_v28  ;;  %v2530_v63 = vmul.f32 %v11354_v34, %v9522_v28  ;;  %v5108_v50 = vld [vmem:[%s10456_s3 + $0x6] ss:$0 sm:$0xff] }
 0x355   : > { %11351 = vst [vmem:[#allocation177_spill] sm:$0xff] %v9624_v35  ;;  %v9655_v19 = vmul.f32 %v11355_v52, %v9522_v28  ;;  %v9696_v52 = vld [vmem:[%s10456_s3 + $0x9] ss:$0 sm:$0xff]  ;;  %v11362_v35 = vld [vmem:[#allocation79_spill] sm:$0xff] }
 0x356   : > { %v9641_v10 = vld [vmem:[#allocation2 + $0x140] sm:$0xff]  ;;  %11358 = vst [vmem:[#allocation96_spill] sm:$0xff] %v9687_v12 }
 0x357   : > { %v9643_v60 = vld [vmem:[#allocation2 + $0x141] sm:$0xff]  ;;  %v1357_v16 = vmul.f32 %v9004_v2, %v9641_v10  ;;  %v1846_v24 = vmul.f32 %v5107_v9, %v9641_v10  ;;  %11359 = vst [vmem:[#allocation97_spill] sm:$0xff] %v9696_v52 }
 0x358   : > { %v9647_v38 = vld [vmem:[#allocation2 + $0x13b] sm:$0xff]  ;;  %v1455_v29 = vmul.f32 %v9011_v36, %v9643_v60  ;;  %v9661_v3 = vld [vmem:[#allocation2 + $0x143] sm:$0xff]  ;;  %v11357_v36 = vld [vmem:[#allocation193_spill] sm:$0xff]  ;;  %v1944_v15 = vmul.f32 %v5108_v50, %v9643_v60  ;;  %v2432_v21 = vmul.f32 %v11362_v35, %v9643_v60 }
 0x359   : > { %v1650_v18 = vmul.f32 %v11356_v39, %v9647_v38  ;;  %v9665_v48 = vld [vmem:[#allocation2 + $0x13c] sm:$0xff]  ;;  %v9667_v56 = vld [vmem:[#allocation2 + $0x144] sm:$0xff]  ;;  %v1651_v2 = vmul.f32 %v11356_v39, %v9661_v3  ;;  %v1878_v4 = vadd.f32 %v1846_v24, %v9534_v27  ;;  %v2139_v62 = vmul.f32 %v9687_v12, %v9647_v38  ;;  %v4892_v39 = vpop.eup %4891 }
 0x35a   : > { %v1748_v57 = vmul.f32 %v11357_v36, %v9665_v48  ;;  %v1749_v20 = vmul.f32 %v11357_v36, %v9667_v56  ;;  %v1487_v51 = vadd.f32 %v1455_v29, %v1357_v16  ;;  %v2140_v34 = vmul.f32 %v9687_v12, %v9661_v3  ;;  %v11360_v16 = vld [vmem:[#allocation89_spill] sm:$0xff]  ;;  %v11361_v36 = vld [vmem:[#allocation220_spill] sm:$0xff] }
 0x35b   : > { %v1682_v0 = vadd.f32 %v1650_v18, %v1584_v8  ;;  %v2237_v8 = vmul.f32 %v9696_v52, %v9665_v48  ;;  %v2238_v27 = vmul.f32 %v9696_v52, %v9667_v56  ;;  %v2334_v29 = vmul.f32 %v11360_v16, %v9641_v10 }
 0x35c   : > { %v1585_v18 = vadd.f32 %v1553_v17, %v1487_v51  ;;  %v1976_v24 = vadd.f32 %v1944_v15, %v1878_v4  ;;  %v2171_v50 = vadd.f32 %v2139_v62, %v11361_v36  ;;  %v2627_v45 = vmul.f32 %v11363_v25, %v9647_v38  ;;  %v11365_v15 = vld [vmem:[#allocation221_spill] sm:$0xff]  ;;  %v11366_v4 = vld [vmem:[#allocation62_spill] sm:$0xff]  ;;  %v11367_v36 = vld [vmem:[#allocation63_spill] sm:$0xff] }
 0x35d   : > { %v1780_v9 = vadd.f32 %v1748_v57, %v1682_v0  ;;  %v2366_v53 = vadd.f32 %v2334_v29, %v9557_v40  ;;  %v2628_v11 = vmul.f32 %v11363_v25, %v9661_v3  ;;  %v2725_v40 = vmul.f32 %v11330_v58, %v9665_v48 }
 0x35e   : > { %v1683_v52 = vadd.f32 %v1651_v2, %v1585_v18  ;;  %v2074_v12 = vadd.f32 %v2042_v22, %v1976_v24  ;;  %v2269_v17 = vadd.f32 %v2237_v8, %v2171_v50  ;;  %v2659_v51 = vadd.f32 %v2627_v45, %v11365_v15  ;;  %v11368_v45 = vld [vmem:[#allocation27_spill] sm:$0xff] }
 0x35f   : > { %v1879_v16 = vadd.f32 %v11364_v43, %v1780_v9  ;;  %v2464_v57 = vadd.f32 %v2432_v21, %v2366_v53  ;;  %v2726_v35 = vmul.f32 %v11330_v58, %v9667_v56  ;;  %v2822_v43 = vmul.f32 %v11299_v14, %v9641_v10  ;;  %v11369_v22 = vld [vmem:[#allocation39_spill] sm:$0xff]  ;;  %v11370_v58 = vld [vmem:[#allocation65_spill] sm:$0xff] }
 0x360   : > { %v1781_v0 = vadd.f32 %v1749_v20, %v1683_v52  ;;  %v2172_v29 = vadd.f32 %v2140_v34, %v2074_v12  ;;  %v2367_v25 = vadd.f32 %v11367_v36, %v2269_v17  ;;  %v2757_v18 = vadd.f32 %v2725_v40, %v2659_v51  ;;  %v11371_v34 = vld [vmem:[#allocation66_spill] sm:$0xff]  ;;  %v11374_v17 = vld [vmem:[#allocation125_spill] sm:$0xff]  ;;  %v11380_v36 = vld [vmem:[#allocation128_spill] sm:$0xff] }
 0x361   : > { %v1977_v62 = vadd.f32 %v11366_v4, %v1879_v16  ;;  %v2562_v2 = vadd.f32 %v2530_v63, %v2464_v57  ;;  %v2920_v53 = vmul.f32 %v11279_v5, %v9643_v60  ;;  %v2854_v12 = vadd.f32 %v2822_v43, %v9580_v46  ;;  %v11372_v63 = vld [vmem:[#allocation95_spill] sm:$0xff]  ;;  %v11373_v16 = vld [vmem:[#allocation28_spill] sm:$0xff]  ;;  %v11376_v51 = vld [vmem:[#allocation41_spill] sm:$0xff] }
 0x362   : > { %v1880_v21 = vadd.f32 %v11368_v45, %v1781_v0  ;;  %v2270_v9 = vadd.f32 %v2238_v27, %v2172_v29  ;;  %v2465_v20 = vadd.f32 %v11370_v58, %v2367_v25  ;;  %v2855_v24 = vadd.f32 %v11371_v34, %v2757_v18  ;;  %v11375_v5 = vld [vmem:[#allocation127_spill] sm:$0xff]  ;;  %v11379_v29 = vld [vmem:[#allocation126_spill] sm:$0xff]  ;;  %v11386_v34 = vld [vmem:[#allocation132_spill] sm:$0xff] }
 0x363   : > { %v2075_v8 = vadd.f32 %v11369_v22, %v1977_v62  ;;  %v2660_v52 = vadd.f32 %v2628_v11, %v2562_v2  ;;  %v3048_v50 = vadd.f32 %v11372_v63, %v9637_v54  ;;  %v2952_v27 = vadd.f32 %v2920_v53, %v2854_v12  ;;  %v11377_v4 = vld [vmem:[#allocation67_spill] sm:$0xff]  ;;  %v11378_v11 = vld [vmem:[#allocation105_spill] sm:$0xff]  ;;  %v11381_v18 = vld [vmem:[#allocation130_spill] sm:$0xff] }
 0x364   : > { %v1978_v14 = vadd.f32 %v11373_v16, %v1880_v21  ;;  %v2368_v15 = vadd.f32 %v11375_v5, %v2270_v9  ;;  %v2563_v40 = vadd.f32 %v11376_v51, %v2465_v20  ;;  %v2953_v25 = vadd.f32 %v11377_v4, %v2855_v24  ;;  %v11382_v21 = vld [vmem:[#allocation26_spill] sm:$0xff]  ;;  %v11384_v58 = vld [vmem:[#allocation167_spill] sm:$0xff] }
 0x365   : > { %v2173_v57 = vadd.f32 %v11374_v17, %v2075_v8  ;;  %v2758_v0 = vadd.f32 %v2726_v35, %v2660_v52  ;;  %v3115_v46 = vmul.f32 %v9548_v49, %v9647_v38  ;;  %v3309_v45 = vmul.f32 %v9511_v32, %v9305_v26  ;;  %v11383_v22 = vld [vmem:[#allocation42_spill] sm:$0xff]  ;;  %v11387_v63 = vld [vmem:[#allocation135_spill] sm:$0xff] }
 0x366   : > { %v9739_v62 = vadd.f32 %v11378_v11, %v1978_v14  ;;  %v2466_v2 = vadd.f32 %v11380_v36, %v2368_v15  ;;  %v2661_v43 = vadd.f32 %v11381_v18, %v2563_v40  ;;  %v3050_v53 = vadd.f32 %v9655_v19, %v2952_v27  ;;  %v11385_v52 = vld [vmem:[#allocation18_spill] sm:$0xff]  ;;  %v11388_v17 = vld [vmem:[#allocation223_spill] sm:$0xff]  ;;  %v11393_v11 = vld [vmem:[#allocation136_spill] sm:$0xff] }
 0x367   : > { %v2271_v54 = vadd.f32 %v11379_v29, %v2173_v57  ;;  %v2856_v35 = vadd.f32 %v11382_v21, %v2758_v0  ;;  %v3051_v8 = vadd.f32 %v11383_v22, %v2953_v25  ;;  %v3407_v9 = vmul.f32 %v9591_v33, %v9517_v61  ;;  %v11389_v57 = vld [vmem:[#allocation169_spill] sm:$0xff]  ;;  %v11390_v15 = vld [vmem:[#allocation131_spill] sm:$0xff]  ;;  %v11391_v61 = vld [vmem:[#allocation170_spill] sm:$0xff] }
 0x368   : > { %v2564_v12 = vadd.f32 %v11385_v52, %v2466_v2  ;;  %v2759_v24 = vadd.f32 %v11386_v34, %v2661_v43  ;;  %v3116_v32 = vmul.f32 %v9548_v49, %v9661_v3  ;;  %v3146_v14 = vadd.f32 %v9561_v1, %v3048_v50  ;;  %v11392_v27 = vld [vmem:[#allocation15_spill] sm:$0xff]  ;;  %v11394_v50 = vld [vmem:[#allocation60_spill] sm:$0xff]  ;;  %v11395_v36 = vld [vmem:[#allocation134_spill] sm:$0xff] }
 0x369   : > { %v2369_v20 = vadd.f32 %v11384_v58, %v2271_v54  ;;  %v2954_v16 = vadd.f32 %v11387_v63, %v2856_v35  ;;  %v3147_v19 = vadd.f32 %v3115_v46, %v11388_v17  ;;  %v9762_v0 = vadd.f32 1.0, %v4892_v39  ;;  %v9769_v54 = vld [vmem:[%s10456_s3 + $0x13] ss:$0 sm:$0xff]  ;;  %v11396_v39 = vld [vmem:[#allocation171_spill] sm:$0xff]  ;;  %v11399_v52 = vld [vmem:[#allocation166_spill] sm:$0xff] }
 0x36a   : > { %v2662_v51 = vadd.f32 %v11390_v15, %v2564_v12  ;;  %v2857_v40 = vadd.f32 %v11391_v61, %v2759_v24  ;;  %v3148_v25 = vadd.f32 %v3116_v32, %v3050_v53  ;;  %v3149_v29 = vadd.f32 %v11393_v11, %v3051_v8  ;;  %v11397_v21 = vld [vmem:[#allocation137_spill] sm:$0xff]  ;;  %v11398_v58 = vld [vmem:[#allocation231_spill] sm:$0xff]  ;;  %v11400_v63 = vld [vmem:[#allocation138_spill] sm:$0xff] }
 0x36b   : > { %v2467_v5 = vadd.f32 %v11389_v57, %v2369_v20  ;;  %v3052_v4 = vadd.f32 %v11392_v27, %v2954_v16  ;;  %v3213_v1 = vmul.f32 %v9769_v54, %v9665_v48  ;;  %v3214_v43 = vmul.f32 %v9769_v54, %v9667_v56  ;;  %v11401_v32 = vld [vmem:[#allocation139_spill] sm:$0xff]  ;;  %v11408_v11 = vld [vmem:[#allocation205_spill] sm:$0xff] }
 0x36c   : > { %v2760_v2 = vadd.f32 %v11395_v36, %v2662_v51  ;;  %v2955_v18 = vadd.f32 %v11396_v39, %v2857_v40  ;;  %v3243_v53 = vadd.f32 %v9565_v59, %v9639_v55  ;;  %v3244_v22 = vadd.f32 %v9569_v7, %v3146_v14  ;;  %v11402_v55 = vld [vmem:[#allocation72_spill] sm:$0xff]  ;;  %v11405_v61 = vld [vmem:[#allocation23_spill] sm:$0xff] }
 0x36d   : > { %v9774_v46 = vadd.f32 %v11394_v50, %v2467_v5  ;;  %v3150_v35 = vadd.f32 %v11397_v21, %v3052_v4  ;;  %v3245_v8 = vadd.f32 %v3213_v1, %v3147_v19  ;;  %v3506_v34 = vmul.f32 %v9602_v37, %v9522_v28  ;;  %v11403_v14 = vld [vmem:[#allocation92_spill] sm:$0xff]  ;;  %v11407_v4 = vld [vmem:[#allocation155_spill] sm:$0xff]  ;;  %v11409_v1 = vld [vmem:[#allocation101_spill] sm:$0xff] }
 0x36e   : > { %v2858_v20 = vadd.f32 %v11398_v58, %v2760_v2  ;;  %v3053_v12 = vadd.f32 %v11399_v52, %v2955_v18  ;;  %4893 = vrcp.f32 %v9762_v0  ;;  %v3246_v24 = vadd.f32 %v3214_v43, %v3148_v25  ;;  %v11404_v5 = vld [vmem:[#allocation68_spill] sm:$0xff]  ;;  %v11410_v2 = vld [vmem:[#allocation69_spill] sm:$0xff] }
 0x36f   : > { %v3247_v16 = vadd.f32 %v11400_v63, %v3149_v29  ;;  %v3248_v17 = vadd.f32 %v11401_v32, %v3150_v35  ;;  %v3310_v59 = vmul.f32 %v9305_v26, %v9641_v10  ;;  %v3341_v57 = vadd.f32 %v3309_v45, %v3243_v53  ;;  %v11406_v40 = vld [vmem:[#allocation172_spill] sm:$0xff]  ;;  %v11412_v43 = vld [vmem:[#allocation173_spill] sm:$0xff]  ;;  %v11413_v35 = vld [vmem:[#allocation90_spill] sm:$0xff] }
 0x370   : > { %v2956_v7 = vadd.f32 %v11402_v55, %v2858_v20  ;;  %v3151_v19 = vadd.f32 %v11403_v14, %v3053_v12  ;;  %v3343_v15 = vadd.f32 %v11404_v5, %v3245_v8  ;;  %v3344_v28 = vadd.f32 %v11405_v61, %v3246_v24  ;;  %v11411_v45 = vld [vmem:[#allocation4_spill] sm:$0xff]  ;;  %v11414_v8 = vld [vmem:[#allocation175_spill] sm:$0xff] }
 0x371   : > { %v3342_v51 = vadd.f32 %v3310_v59, %v3244_v22  ;;  %v3345_v27 = vadd.f32 %v11406_v40, %v3247_v16  ;;  %v3346_v25 = vadd.f32 %v11407_v4, %v3248_v17  ;;  %v3408_v10 = vmul.f32 %v9591_v33, %v9643_v60  ;;  %v11415_v20 = vld [vmem:[#allocation59_spill] sm:$0xff]  ;;  %v11418_v32 = vld [vmem:[#allocation168_spill] sm:$0xff]  ;;  %v11419_v59 = vld [vmem:[#allocation209_spill] sm:$0xff] }
 0x372   : > { %v3054_v29 = vadd.f32 %v11408_v11, %v2956_v7  ;;  %v3249_v50 = vadd.f32 %v11409_v1, %v3151_v19  ;;  %v3439_v36 = vadd.f32 %v3407_v9, %v3341_v57  ;;  %v3441_v39 = vadd.f32 %v11410_v2, %v3343_v15  ;;  %v11416_v63 = vld [vmem:[#allocation43_spill] sm:$0xff]  ;;  %v11417_v9 = vld [vmem:[#allocation108_spill] sm:$0xff]  ;;  %v11420_v7 = vld [vmem:[#allocation85_spill] sm:$0xff] }
 0x373   : > { %v3442_v18 = vadd.f32 %v11411_v45, %v3344_v28  ;;  %v3443_v21 = vadd.f32 %v11412_v43, %v3345_v27  ;;  %v3444_v53 = vadd.f32 %v11413_v35, %v3346_v25  ;;  %v3440_v12 = vadd.f32 %v3408_v10, %v3342_v51  ;;  %v11421_v19 = vld [vmem:[#allocation187_spill] sm:$0xff]  ;;  %v9821_v15 = vld [vmem:[%s10456_s3 + $0x17] ss:$0 sm:$0xff]  ;;  %v11423_v61 = vld [vmem:[#allocation140_spill] sm:$0xff] }
 0x374   : > { %v9807_v22 = vpop.eup %4893  ;;  %v3152_v58 = vadd.f32 %v11414_v8, %v3054_v29  ;;  %v3347_v52 = vadd.f32 %v11415_v20, %v3249_v50  ;;  %v3537_v24 = vadd.f32 %v9635_v41, %v3439_v36  ;;  %v3539_v60 = vadd.f32 %v11416_v63, %v3441_v39  ;;  %11422 = vst [vmem:[#allocation196_spill] sm:$0xff] %v9821_v15  ;;  %v11424_v40 = vld [vmem:[#allocation141_spill] sm:$0xff]  ;;  %v11427_v50 = vld [vmem:[#allocation178_spill] sm:$0xff]  ;;  %v11430_v43 = vld [vmem:[#allocation143_spill] sm:$0xff] }
 0x375   : > { %v3540_v16 = vadd.f32 %v11417_v9, %v3442_v18  ;;  %v3541_v17 = vadd.f32 %v11418_v32, %v3443_v21  ;;  %v3542_v55 = vadd.f32 %v11419_v59, %v3444_v53  ;;  %v3538_v5 = vadd.f32 %v3506_v34, %v3440_v12  ;;  %v11425_v4 = vld [vmem:[#allocation49_spill] sm:$0xff]  ;;  %v11426_v34 = vld [vmem:[#allocation118_spill] sm:$0xff]  ;;  %v11431_v35 = vld [vmem:[#allocation179_spill] sm:$0xff] }
 0x376   : > { %v3250_v14 = vadd.f32 %v11420_v7, %v3152_v58  ;;  %v3445_v57 = vadd.f32 %v11421_v19, %v3347_v52  ;;  %v3603_v41 = vmul.f32 %v9821_v15, %v9647_v38  ;;  %v3604_v51 = vmul.f32 %v9821_v15, %v9661_v3  ;;  %v9836_v38 = vld [vmem:[%s10456_s3 + $0x18] ss:$0 sm:$0xff]  ;;  %v11432_v20 = vld [vmem:[#allocation184_spill] sm:$0xff] }
 0x377   : > { %v3637_v28 = vadd.f32 %v11423_v61, %v3539_v60  ;;  %v3638_v27 = vadd.f32 %v11424_v40, %v3540_v16  ;;  %v3639_v25 = vadd.f32 %v11425_v4, %v3541_v17  ;;  %v3640_v10 = vadd.f32 %v11427_v50, %v3542_v55  ;;  %11428 = vst [vmem:[#allocation191_spill] sm:$0xff] %v9836_v38  ;;  %v11429_v39 = vld [vmem:[#allocation142_spill] sm:$0xff]  ;;  %v9887_v19 = vld [vmem:[%s10456_s3 + $0xf] ss:$0 sm:$0xff]  ;;  %v9919_v50 = vld [vmem:[%s10456_s3 + $0xe] ss:$0 sm:$0xff] }
 0x378   : > { %v3348_v11 = vadd.f32 %v9586_v31, %v3250_v14  ;;  %v3543_v29 = vadd.f32 %v11426_v34, %v3445_v57  ;;  %v3635_v1 = vadd.f32 %v3603_v41, %v3537_v24  ;;  %v3636_v36 = vadd.f32 %v3604_v51, %v3538_v5  ;;  %v9896_v57 = vld [vmem:[%s10456_s3 + $0x10] ss:$0 sm:$0xff]  ;;  %v11437_v61 = vld [vmem:[#allocation96_spill] sm:$0xff]  ;;  %v11438_v4 = vld [vmem:[#allocation190_spill] sm:$0xff]  ;;  %11441 = vst [vmem:[#allocation98_spill] sm:$0xff] %v9919_v50 }
 0x379   : > { %v3701_v3 = vmul.f32 %v9836_v38, %v9665_v48  ;;  %v3702_v2 = vmul.f32 %v9836_v38, %v9667_v56  ;;  %v3735_v45 = vadd.f32 %v11429_v39, %v3637_v28  ;;  %v3736_v21 = vadd.f32 %v11430_v43, %v3638_v27  ;;  %v9851_v48 = vld [vmem:[%s10457_s4] ss:$0 sm:$0xff]  ;;  %v11436_v5 = vld [vmem:[#allocation185_spill] sm:$0xff] }
 0x37a   : > { %v3446_v31 = vadd.f32 %v9597_v44, %v3348_v11  ;;  %v3641_v18 = vadd.f32 %v9615_v42, %v3543_v29  ;;  %v3737_v53 = vadd.f32 %v11431_v35, %v3639_v25  ;;  %v3738_v52 = vadd.f32 %v11432_v20, %v3640_v10  ;;  %11433 = vst [vmem:[#allocation197_spill] sm:$0xff] %v9851_v48  ;;  %v11439_v25 = vld [vmem:[#allocation97_spill] sm:$0xff] }
 0x37b   : > { %v3733_v8 = vadd.f32 %v3701_v3, %v3635_v1  ;;  %v3734_v58 = vadd.f32 %v3702_v2, %v3636_v36  ;;  %v9854_v56 = vadd.f32 %v9851_v48, %v3735_v45  ;;  %v9859_v12 = vadd.f32 %v9851_v48, %v3736_v21  ;;  %v11442_v36 = vld [vmem:[#allocation64_spill] sm:$0xff]  ;;  %v11443_v2 = vld [vmem:[#allocation183_spill] sm:$0xff]  ;;  %v11447_v20 = vld [vmem:[#allocation13_spill] sm:$0xff] }
 0x37c   : > { %v3544_v44 = vadd.f32 %v9609_v23, %v3446_v31  ;;  %v3739_v42 = vadd.f32 %v9628_v47, %v3641_v18  ;;  %v9862_v24 = vadd.f32 %v9851_v48, %v3737_v53  ;;  %v9871_v9 = vadd.f32 %v9851_v48, %v3738_v52  ;;  %v11434_v23 = vld [vmem:[#allocation54_spill] sm:$0xff]  ;;  %v11444_v45 = vld [vmem:[#allocation32_spill] sm:$0xff]  ;;  %v11445_v18 = vld [vmem:[#allocation75_spill] sm:$0xff] }
 0x37d   : > { %v9865_v63 = vadd.f32 %v9851_v48, %v3733_v8  ;;  %v9868_v60 = vadd.f32 %v9851_v48, %v3734_v58  ;;  %v4639_v16 = vmul.f32 -1.442695, %v9854_v56  ;;  %v2174_v47 = vadd.f32 %v11434_v23, %v9739_v62  ;;  %v11435_v62 = vld [vmem:[#allocation94_spill] sm:$0xff]  ;;  %v9937_v53 = vld [vmem:[%s10456_s3 + $0x11] ss:$0 sm:$0xff]  ;;  %v11446_v8 = vld [vmem:[#allocation188_spill] sm:$0xff] }
 0x37e   : > { %v3642_v32 = vadd.f32 %v9622_v13, %v3544_v44  ;;  %v9878_v17 = vadd.f32 %v9851_v48, %v3739_v42  ;;  %v4640_v59 = vmul.f32 -1.442695, %v9859_v12  ;;  %v4641_v14 = vmul.f32 -1.442695, %v9862_v24 }
 0x37f   : > { %v4637_v55 = vmul.f32 -1.442695, %v9865_v63  ;;  %v4638_v7 = vmul.f32 -1.442695, %v9868_v60  ;;  %4895 = vpow2.f32 %v4639_v16  ;;  %v9891_v13 = vmul.f32 %v9887_v19, %v11435_v62  ;;  %v11448_v16 = vld [vmem:[#allocation192_spill] sm:$0xff] }
 0x380   : > { %v9900_v41 = vmul.f32 %v9896_v57, %v11436_v5  ;;  %v3740_v51 = vadd.f32 %v9632_v30, %v3642_v32  ;;  %4897 = vpow2.f32 %v4640_v59  ;;  %v2146_v28 = vmul.f32 %v11437_v61, %v9572_v6  ;;  %v11440_v30 = vld [vmem:[#allocation156_spill] sm:$0xff] }
 0x381   : > { %4899 = vpow2.f32 %v4637_v55  ;;  %v4642_v40 = vmul.f32 -1.442695, %v9871_v9  ;;  %v1110_v27 = vmul.f32 %v9807_v22, %v9762_v0  ;;  %v2244_v11 = vmul.f32 %v11439_v25, %v11438_v4  ;;  %v11449_v55 = vld [vmem:[#allocation177_spill] sm:$0xff] }
 0x382   : > { %v9911_v34 = vadd.f32 %v9851_v48, %v3740_v51  ;;  %4901 = vpow2.f32 %v4638_v7  ;;  %v4643_v29 = vmul.f32 -1.442695, %v9878_v17  ;;  %v2634_v1 = vmul.f32 %v11440_v30, %v9572_v6  ;;  %v5119_v30 = vld [vmem:[#allocation2 + $0x198] sm:$0xff] }
 0x383   : > { %v2732_v10 = vmul.f32 %v9919_v50, %v11438_v4  ;;  %v2272_v3 = vadd.f32 %v11442_v36, %v2174_v47  ;;  %4903 = vpow2.f32 %v4641_v14  ;;  %v2178_v39 = vadd.f32 %v2146_v28, %v11443_v2  ;;  %v11450_v14 = vld [vmem:[#allocation151_spill] sm:$0xff]  ;;  %v5121_v2 = vld [vmem:[%s5408_s19 + $0xf0] sm:$0xff] }
 0x384   : > { %v9927_v31 = vmul.f32 %v9887_v19, %v11444_v45  ;;  %v9931_v43 = vmul.f32 %v9896_v57, %v11445_v18  ;;  %v4644_v21 = vmul.f32 -1.442695, %v9911_v34  ;;  %v9941_v58 = vmul.f32 %v9937_v53, %v11446_v8  ;;  %v11457_v45 = vld [vmem:[#allocation152_spill] sm:$0xff] }
 0x385   : > { %v4896_v35 = vpop.eup %4895  ;;  %v9945_v52 = vmul.f32 %v11447_v20, %v9548_v49  ;;  %4905 = vpow2.f32 %v4642_v40  ;;  %v1111_v44 = vsub.f32 1.0, %v1110_v27  ;;  %v2666_v23 = vadd.f32 %v2634_v1, %v11448_v16 }
 0x386   : > { %v4898_v42 = vpop.eup %4897  ;;  %v9950_v47 = vmul.f32 %v9548_v49, %v9572_v6  ;;  %4907 = vpow2.f32 %v4643_v29  ;;  %v9952_v32 = vadd.f32 1.0, %v4896_v35  ;;  %v9956_v7 = vmul.f32 %v9769_v54, %v11449_v55 }
 0x387   : > { %v4900_v59 = vpop.eup %4899  ;;  %v2370_v62 = vadd.f32 %v11450_v14, %v2272_v3  ;;  %4909 = vpow2.f32 %v4644_v21  ;;  %v9959_v5 = vadd.f32 1.0, %v4898_v42  ;;  %v9961_v61 = vadd.f32 %v2244_v11, %v2178_v39  ;;  %v11458_v21 = vld [vmem:[#allocation229_spill] sm:$0xff] }
 0x388   : > { %v4902_v51 = vpop.eup %4901  ;;  %v9965_v6 = vmul.f32 %v9769_v54, %v11438_v4  ;;  %v9967_v28 = vadd.f32 1.0, %v4900_v59  ;;  %4911 = vrcp.f32 %v9952_v32  ;;  %v1112_v25 = vmul.f32 %v9807_v22, %v1111_v44  ;;  %v5120_v4 = vld [vmem:[#allocation2 + $0x199] sm:$0xff] }
 0x389   : > { %11451 = vst [vmem:[#allocation99_spill] sm:$0xff] %v9961_v61  ;;  %v4904_v40 = vpop.eup %4903  ;;  %v9970_v27 = vadd.f32 1.0, %v4902_v51  ;;  %4913 = vrcp.f32 %v9959_v5  ;;  %v1120_v29 = vand.u32 2147483648, %v9762_v0  ;;  %v9975_v11 = vadd.f32 %v2732_v10, %v2666_v23 }
 0x38a   : > { %11452 = vst [vmem:[#allocation199_spill] sm:$0xff] %v9965_v6  ;;  %v9978_v1 = vmul.f32 %v5119_v30, %v9305_v26  ;;  %v9981_v36 = vmul.f32 %v5120_v4, %v9591_v33  ;;  %4915 = vrcp.f32 %v9967_v28  ;;  %v9986_v39 = vmul.f32 %v5121_v2, %v9602_v37 }
 0x38b   : > { %11453 = vst [vmem:[#allocation200_spill] sm:$0xff] %v9975_v11  ;;  %v4906_v3 = vpop.eup %4905  ;;  %v9989_v18 = vadd.f32 %v11457_v45, %v2370_v62  ;;  %v9991_v10 = vadd.f32 1.0, %v4904_v40  ;;  %4917 = vrcp.f32 %v9970_v27  ;;  %v9996_v35 = vadd.f32 %v11458_v21, %v9774_v46 }
 0x38c   : > { %11454 = vst [vmem:[#allocation214_spill] sm:$0xff] %v9978_v1  ;;  %v4908_v26 = vpop.eup %4907  ;;  %v4192_v8 = vand.u32 2147483648, %v9967_v28  ;;  %v4222_v20 = vand.u32 2147483648, %v9952_v32  ;;  %v1118_v44 = vand.u32 2147483647, %v9762_v0  ;;  %v4207_v16 = vand.u32 2147483648, %v9970_v27 }
 0x38d   : > { %11455 = vst [vmem:[#allocation211_spill] sm:$0xff] %v9981_v36  ;;  %v4910_v42 = vpop.eup %4909  ;;  %vm4216_vm3 = vweird.f32 %v9952_v32  ;;  %v10004_v23 = vadd.f32 %v9807_v22, %v1112_v25  ;;  %v10006_v59 = vor.u32 1.1754944e-38, %v1120_v29  ;;  %v4190_v46 = vand.u32 2147483647, %v9967_v28 }
 0x38e   : > { %11456 = vst [vmem:[#allocation47_spill] sm:$0xff] %v9986_v39  ;;  %v10008_v55 = vpop.eup %4911  ;;  %v4205_v14 = vand.u32 2147483647, %v9970_v27  ;;  %v4220_v62 = vand.u32 2147483647, %v9952_v32  ;;  %vm4231_vm4 = vweird.f32 %v9959_v5  ;;  %v10016_v40 = vadd.f32 1.0, %v4906_v3 }
 0x38f   : > { %v10014_v51 = vpop.eup %4913  ;;  %v10018_v30 = vadd.f32 1.0, %v4908_v26  ;;  %vm4186_vm5 = vweird.f32 %v9967_v28  ;;  %v4212_v25 = vmul.f32 %v10008_v55, %v9952_v32  ;;  %4919 = vrcp.f32 %v9991_v10 }
 0x390   : > { %v4916_v29 = vpop.eup %4915  ;;  %v10024_v4 = vadd.f32 1.0, %v4910_v42  ;;  %v4193_v2 = vor.u32 1.1754944e-38, %v4192_v8  ;;  %vm4201_vm7 = vweird.f32 %v9970_v27  ;;  %v4223_v45 = vor.u32 1.1754944e-38, %v4222_v20 }
 0x391   : > { %v4227_v3 = vmul.f32 %v10014_v51, %v9959_v5  ;;  %v4918_v21 = vpop.eup %4917  ;;  %v4182_v26 = vmul.f32 %v4916_v29, %v9967_v28  ;;  %v4208_v48 = vor.u32 1.1754944e-38, %v4207_v16  ;;  %v4213_v38 = vsub.f32 1.0, %v4212_v25 }
 0x392   : > { %v4235_v15 = vand.u32 2147483647, %v9959_v5  ;;  %vm10031_vm8 = vcmp.eq.f32.partialorder %v4190_v46, 8.507059e+37  ;;  %v4197_v42 = vmul.f32 %v4918_v21, %v9970_v27  ;;  %vm10036_vm9 = vcmp.eq.f32.partialorder %v4205_v14, 8.507059e+37 }
 0x393   : > { %vm4217_vm0 = vweird.f32 %v10008_v55  ;;  %v4228_v20 = vsub.f32 1.0, %v4227_v3  ;;  %v4237_v36 = vand.u32 2147483648, %v9959_v5  ;;  %v4183_v6 = vsub.f32 1.0, %v4182_v26 }
 0x394   : > { %v4214_v16 = vmul.f32 %v10008_v55, %v4213_v38  ;;  %vm10043_vm10 = vcmp.eq.f32.partialorder %v4220_v62, 8.507059e+37  ;;  %v4250_v46 = vand.u32 2147483647, %v9991_v10  ;;  %4921 = vrcp.f32 %v10016_v40  ;;  %vm10063_vm14 = vmor %vm4216_vm3, %vm4217_vm0 }
 0x395   : > { %v4198_v14 = vsub.f32 1.0, %v4197_v42  ;;  %v4229_v3 = vmul.f32 %v10014_v51, %v4228_v20  ;;  %vm4232_vm1 = vweird.f32 %v10014_v51  ;;  %vm4246_vm6 = vweird.f32 %v9991_v10  ;;  %v4920_v38 = vpop.eup %4919 }
 0x396   : > { %v4184_v62 = vmul.f32 %v4916_v29, %v4183_v6  ;;  %vm4187_vm12 = vweird.f32 %v4916_v29  ;;  %v4215_v26 = vadd.f32 %v10008_v55, %v4214_v16  ;;  %vm10055_vm2 = vcmp.eq.f32.partialorder %v4235_v15, 8.507059e+37  ;;  %vm10071_vm13 = vmor %vm4231_vm4, %vm4232_vm1 }
 0x397   : > { %v4199_v61 = vmul.f32 %v4918_v21, %v4198_v14  ;;  %vm4202_vm11 = vweird.f32 %v4918_v21  ;;  %v4230_v20 = vadd.f32 %v10014_v51, %v4229_v3  ;;  %v4242_v6 = vmul.f32 %v4920_v38, %v9991_v10  ;;  %vm10086_vm0 = vmor %vm4186_vm5, %vm4187_vm12  ;;  %v11483_v14 = vld [vmem:[#allocation110_spill] sm:$0xff] }
 0x398   : > { %v4185_v1 = vadd.f32 %v4916_v29, %v4184_v62  ;;  %v4238_v16 = vor.u32 1.1754944e-38, %v4237_v36  ;;  %vm10075_vm15 = vcmp.eq.f32.partialorder %v4250_v46, 8.507059e+37  ;;  %v4252_v32 = vand.u32 2147483648, %v9991_v10  ;;  %vm4203_vm4 = vmor %vm4201_vm7, %vm4202_vm11  ;;  %v10205_v10 = vld [vmem:[#allocation2 + $0x1ba] sm:$0xff] }
 0x399   : > { %vm10080_vm3 = vcmp.eq.f32.partialorder %v1118_v44, 8.507059e+37  ;;  %v4200_v5 = vadd.f32 %v4918_v21, %v4199_v61  ;;  %v4243_v62 = vsub.f32 1.0, %v4242_v6  ;;  %v4265_v36 = vand.u32 2147483647, %v10016_v40 }
 0x39a   : > { %v4267_v46 = vand.u32 2147483648, %v10016_v40  ;;  %v4922_v37 = vpop.eup %4921  ;;  %v4189_v33 = vsel %vm10086_vm0, %v4916_v29, %v4185_v1  ;;  %v4219_v28 = vsel %vm10063_vm14, %v10008_v55, %v4215_v26  ;;  %vm4247_vm5 = vweird.f32 %v4920_v38 }
 0x39b   : > { %4923 = vrcp.f32 %v10018_v30  ;;  %v4204_v61 = vsel %vm4203_vm4, %v4918_v21, %v4200_v5  ;;  %v4234_v44 = vsel %vm10071_vm13, %v10014_v51, %v4230_v20  ;;  %v4244_v6 = vmul.f32 %v4920_v38, %v4243_v62 }
 0x39c   : > { %v4257_v3 = vmul.f32 %v4922_v37, %v10016_v40  ;;  %v4194_v1 = vsel %vm10031_vm8, %v4193_v2, %v4189_v33  ;;  %v4209_v27 = vsel %vm10036_vm9, %v4208_v48, %v4204_v61  ;;  %v4253_v29 = vor.u32 1.1754944e-38, %v4252_v32  ;;  %vm4248_vm8 = vmor %vm4246_vm6, %vm4247_vm5  ;;  %v11486_v61 = vld [vmem:[#allocation162_spill] sm:$0xff] }
 0x39d   : > { %vm4261_vm7 = vweird.f32 %v10016_v40  ;;  %v4224_v55 = vsel %vm10043_vm10, %v4223_v45, %v4219_v28  ;;  %v4245_v21 = vadd.f32 %v4920_v38, %v4244_v6  ;;  %4925 = vrcp.f32 %v10024_v4 }
 0x39e   : > { %v4258_v26 = vsub.f32 1.0, %v4257_v3  ;;  %v4239_v51 = vsel %vm10055_vm2, %v4238_v16, %v4234_v44  ;;  %vm4262_vm13 = vweird.f32 %v4922_v37  ;;  %vm10118_vm1 = vcmp.eq.f32.partialorder %v4265_v36, 8.507059e+37 }
 0x39f   : > { %v4268_v48 = vor.u32 1.1754944e-38, %v4267_v46  ;;  %v4249_v39 = vsel %vm4248_vm8, %v4920_v38, %v4245_v21  ;;  %vm4276_vm9 = vweird.f32 %v10018_v30  ;;  %v4409_v45 = vmul.f32 %v4194_v1, %v9865_v63 }
 0x3a0   : > { %v4259_v2 = vmul.f32 %v4922_v37, %v4258_v26  ;;  %v4410_v11 = vmul.f32 %v4209_v27, %v9868_v60  ;;  %vm11479_vm10 = vweird.f32 %v9807_v22  ;;  %vm11480_vm6 = vweird.f32 %v9762_v0 }
 0x3a1   : > { %vm10129_vm12 = vmor %vm11480_vm6, %vm11479_vm10  ;;  %v4924_v8 = vpop.eup %4923  ;;  %v4254_v25 = vsel %vm10075_vm15, %v4253_v29, %v4249_v39  ;;  %v4280_v38 = vand.u32 2147483647, %v10018_v30  ;;  %v4282_v42 = vand.u32 2147483648, %v10018_v30  ;;  %v4411_v63 = vmul.f32 %v4224_v55, %v9854_v56  ;;  %4441 = vst [vmem:[%s7473_s22 + $0x90] sm:$0xff] %v4409_v45  ;;  %v2895_v55 = vld [vmem:[#allocation2 + $0x1b1] sm:$0xff] }
 0x3a2   : > { %v4260_v60 = vadd.f32 %v4922_v37, %v4259_v2  ;;  %v4272_v20 = vmul.f32 %v4924_v8, %v10018_v30  ;;  %v4295_v0 = vand.u32 2147483647, %v10024_v4  ;;  %v4412_v15 = vmul.f32 %v4239_v51, %v9859_v12  ;;  %vm4263_vm15 = vmor %vm4261_vm7, %vm4262_vm13  ;;  %4442 = vst [vmem:[%s7473_s22 + $0x98] sm:$0xff] %v4410_v11  ;;  %v11484_v12 = vld [vmem:[#allocation230_spill] sm:$0xff] }
 0x3a3   : > { %v4413_v16 = vmul.f32 %v4254_v25, %v9862_v24  ;;  %v1117_v56 = vsel %vm10129_vm12, %v9807_v22, %v10004_v23  ;;  %v2566_v32 = vadd.f32 %v11483_v14, %v9989_v18  ;;  %v2761_v5 = vadd.f32 %v11484_v12, %v9996_v35  ;;  %v4926_v62 = vpop.eup %4925  ;;  %4443 = vst [vmem:[%s7473_s22 + $0xa0] sm:$0xff] %v4411_v63  ;;  %v11485_v35 = vld [vmem:[#allocation176_spill] sm:$0xff]  ;;  %v2993_v11 = vld [vmem:[#allocation2 + $0x1b2] sm:$0xff] }
 0x3a4   : > { %v4264_v36 = vsel %vm4263_vm15, %v4922_v37, %v4260_v60  ;;  %v4273_v40 = vsub.f32 1.0, %v4272_v20  ;;  %v4297_v46 = vand.u32 2147483648, %v10024_v4  ;;  %v1122_v24 = vsel %vm10080_vm3, %v10006_v59, %v1117_v56  ;;  %4444 = vst [vmem:[%s7473_s22 + $0xa8] sm:$0xff] %v4412_v15  ;;  %v11494_v25 = vld [vmem:[#allocation93_spill] sm:$0xff] }
 0x3a5   : > { %v4269_v22 = vsel %vm10118_vm1, %v4268_v48, %v4264_v36  ;;  %vm4277_vm2 = vweird.f32 %v4924_v8  ;;  %v4287_v18 = vmul.f32 %v4926_v62, %v10024_v4  ;;  %v10165_v23 = vmul.f32 %v1122_v24, %v11485_v35  ;;  %4445 = vst [vmem:[%s7473_s22 + $0xb0] sm:$0xff] %v4413_v16  ;;  %v5122_v48 = vld [vmem:[#allocation2] sm:$0xff]  ;;  %v10228_v14 = vld [vmem:[#allocation2 + $0x1b4] sm:$0xff] }
 0x3a6   : > { %v4274_v37 = vmul.f32 %v4924_v8, %v4273_v40  ;;  %v4414_v28 = vmul.f32 %v4269_v22, %v9871_v9  ;;  %v2664_v44 = vadd.f32 %v11486_v61, %v2566_v32  ;;  %v2859_v50 = vadd.f32 %v9891_v13, %v2761_v5  ;;  %v11491_v9 = vld [vmem:[#allocation165_spill] sm:$0xff]  ;;  %v2896_v13 = vld [vmem:[#allocation2 + $0x1b9] sm:$0xff]  ;;  %vm10188_vm0 = vmor %vm4276_vm9, %vm4277_vm2 }
 0x3a7   : > { %vm10171_vm11 = vcmp.eq.f32.partialorder %v4280_v38, 8.507059e+37  ;;  %v4283_v6 = vor.u32 1.1754944e-38, %v4282_v42  ;;  %v4288_v3 = vsub.f32 1.0, %v4287_v18  ;;  %vm4291_vm14 = vweird.f32 %v10024_v4  ;;  %1187 = vst [vmem:[%s5408_s19 + $0xf8] sm:$0xff] %v10165_v23  ;;  %v10208_v42 = vld [vmem:[#allocation2 + $0x1b3] sm:$0xff]  ;;  %v10230_v32 = vld [vmem:[#allocation2 + $0x1bc] sm:$0xff] }
 0x3a8   : > { %v4275_v1 = vadd.f32 %v4924_v8, %v4274_v37  ;;  %vm10178_vm3 = vcmp.eq.f32.partialorder %v4295_v0, 8.507059e+37  ;;  %4446 = vst [vmem:[%s7473_s22 + $0xb8] sm:$0xff] %v4414_v28  ;;  %v2762_v29 = vadd.f32 %v11491_v9, %v2664_v44  ;;  %v2957_v21 = vadd.f32 %v9900_v41, %v2859_v50  ;;  %v5123_v41 = vld [vmem:[%s10456_s3 + $0xc] ss:$0 sm:$0xff]  ;;  %v10218_v0 = vld [vmem:[#allocation2 + $0x1bb] sm:$0xff] }
 0x3a9   : > { %v4289_v51 = vmul.f32 %v4926_v62, %v4288_v3  ;;  %vm4292_vm4 = vweird.f32 %v4926_v62  ;;  %v4298_v33 = vor.u32 1.1754944e-38, %v4297_v46  ;;  %1295 = vst [vmem:[#allocation2 + $0x1a2] sm:$0xff] %v10165_v23  ;;  %v10194_v39 = vmul.f32 %v5122_v48, %v9887_v19  ;;  %v5125_v50 = vld [vmem:[%s10456_s3 + $0xa] ss:$0 sm:$0xff]  ;;  %v5126_v3 = vld [vmem:[%s10456_s3 + $0xd] ss:$0 sm:$0xff] }
 0x3aa   : > { %v4279_v2 = vsel %vm10188_vm0, %v4924_v8, %v4275_v1  ;;  %v10202_v30 = vmul.f32 %v5123_v41, %v10165_v23  ;;  %v2860_v45 = vadd.f32 %v9927_v31, %v2762_v29  ;;  %v3055_v38 = vadd.f32 %v11494_v25, %v2957_v21  ;;  %vm4293_vm5 = vmor %vm4291_vm14, %vm4292_vm4  ;;  %v11496_v9 = vld [vmem:[#allocation146_spill] sm:$0xff] }
 0x3ab   : > { %v4284_v63 = vsel %vm10171_vm11, %v4283_v6, %v4279_v2  ;;  %v4290_v8 = vadd.f32 %v4926_v62, %v4289_v51  ;;  %v10213_v60 = vmul.f32 %v9896_v57, %v2895_v55  ;;  %v10216_v20 = vmul.f32 %v9896_v57, %v2896_v13  ;;  %v11497_v21 = vld [vmem:[#allocation98_spill] sm:$0xff]  ;;  %v11499_v2 = vld [vmem:[#allocation99_spill] sm:$0xff] }
 0x3ac   : > { %v4415_v31 = vmul.f32 %v4284_v63, %v9878_v17  ;;  %v2958_v15 = vadd.f32 %v9931_v43, %v2860_v45  ;;  %v3026_v16 = vmul.f32 %v9937_v53, %v10165_v23  ;;  %v3153_v56 = vadd.f32 %v9945_v52, %v3055_v38  ;;  %v3385_v43 = vld [vmem:[#allocation2 + $0x1c9] sm:$0xff]  ;;  %v11500_v45 = vld [vmem:[#allocation226_spill] sm:$0xff] }
 0x3ad   : > { %v4294_v12 = vsel %vm4293_vm5, %v4926_v62, %v4290_v8  ;;  %v10233_v5 = vmul.f32 %v9937_v53, %v2993_v11  ;;  %v10237_v4 = vmul.f32 %v9937_v53, %v10205_v10  ;;  %v10241_v17 = vmul.f32 %v9548_v49, %v10208_v42 }
 0x3ae   : > { %v4299_v52 = vsel %vm10178_vm3, %v4298_v33, %v4294_v12  ;;  %4447 = vst [vmem:[%s7473_s22 + $0xc0] sm:$0xff] %v4415_v31  ;;  %v3056_v36 = vadd.f32 %v9941_v58, %v2958_v15  ;;  %v10249_v62 = vmul.f32 %v9548_v49, %v10218_v0  ;;  %v3251_v40 = vadd.f32 %v9956_v7, %v3153_v56  ;;  %v5124_v58 = vld [vmem:[%s10456_s3 + $0x14] ss:$0 sm:$0xff]  ;;  %v11498_v33 = vld [vmem:[#allocation214_spill] sm:$0xff]  ;;  %v11502_v15 = vld [vmem:[#allocation199_spill] sm:$0xff] }
 0x3af   : > { %v4416_v53 = vmul.f32 %v4299_v52, %v9911_v34  ;;  %v10255_v46 = vmul.f32 %v9769_v54, %v10228_v14  ;;  %v10259_v24 = vmul.f32 %v9769_v54, %v10230_v32  ;;  %v10264_v22 = vmul.f32 %v5124_v58, %v5122_v48  ;;  %v11495_v34 = vld [vmem:[#allocation194_spill] sm:$0xff] }
 0x3b0   : > { %v2308_v18 = vld [vmem:[#allocation2 + $0x1a0] sm:$0xff]  ;;  %v3154_v7 = vadd.f32 %v9950_v47, %v3056_v36  ;;  %v3417_v28 = vmul.f32 %v11495_v34, %v2895_v55  ;;  %v10269_v61 = vmul.f32 %v11495_v34, %v2896_v13  ;;  %v10272_v44 = vmul.f32 %v11495_v34, %v3385_v43  ;;  %v5127_v55 = vld [vmem:[%s10456_s3 + $0xb] ss:$0 sm:$0xff]  ;;  %v11503_v36 = vld [vmem:[#allocation129_spill] sm:$0xff] }
 0x3b1   : > { %v2406_v35 = vld [vmem:[#allocation2 + $0x1a1] sm:$0xff]  ;;  %4448 = vst [vmem:[%s7473_s22 + $0xc8] sm:$0xff] %v4416_v53  ;;  %v2342_v59 = vmul.f32 %v5125_v50, %v2308_v18  ;;  %v2830_v27 = vmul.f32 %v9887_v19, %v2308_v18  ;;  %v3514_v29 = vmul.f32 %v11496_v9, %v10165_v23  ;;  %v3349_v48 = vadd.f32 %v11498_v33, %v3251_v40 }
 0x3b2   : > { %v2601_v37 = vld [vmem:[#allocation2 + $0x19b] sm:$0xff]  ;;  %v2602_v6 = vld [vmem:[#allocation2 + $0x1a3] sm:$0xff]  ;;  %v2440_v13 = vmul.f32 %v5127_v55, %v2406_v35  ;;  %v2928_v51 = vmul.f32 %v9896_v57, %v2406_v35  ;;  %v3252_v56 = vadd.f32 %v11502_v15, %v3154_v7  ;;  %v3515_v12 = vmul.f32 %v11496_v9, %v2993_v11 }
 0x3b3   : > { %v2635_v47 = vmul.f32 %v5126_v3, %v2601_v37  ;;  %v2699_v1 = vld [vmem:[#allocation2 + $0x19c] sm:$0xff]  ;;  %v2374_v41 = vadd.f32 %v2342_v59, %v11499_v2  ;;  %v2700_v38 = vld [vmem:[#allocation2 + $0x1a4] sm:$0xff]  ;;  %v3123_v23 = vmul.f32 %v9548_v49, %v2601_v37  ;;  %v2636_v8 = vmul.f32 %v5126_v3, %v2602_v6 }
 0x3b4   : > { %v2733_v26 = vmul.f32 %v11497_v21, %v2699_v1  ;;  %v11501_v19 = vld [vmem:[#allocation200_spill] sm:$0xff]  ;;  %v3221_v31 = vmul.f32 %v9769_v54, %v2699_v1  ;;  %v2734_v53 = vmul.f32 %v11497_v21, %v2700_v38  ;;  %v3124_v50 = vmul.f32 %v9548_v49, %v2602_v6 }
 0x3b5   : > { %v2667_v25 = vadd.f32 %v2635_v47, %v11500_v45  ;;  %v2862_v63 = vadd.f32 %v2830_v27, %v11501_v19  ;;  %v2472_v43 = vadd.f32 %v2440_v13, %v2374_v41  ;;  %v3155_v40 = vadd.f32 %v3123_v23, %v11503_v36  ;;  %v11504_v47 = vld [vmem:[#allocation211_spill] sm:$0xff] }
 0x3b6   : > { %v3318_v59 = vmul.f32 %v5124_v58, %v2308_v18  ;;  %v3447_v27 = vadd.f32 %v11504_v47, %v3349_v48  ;;  %v3222_v11 = vmul.f32 %v9769_v54, %v2700_v38  ;;  %v11506_v48 = vld [vmem:[#allocation196_spill] sm:$0xff]  ;;  %v3484_v47 = vld [vmem:[#allocation2 + $0x1d2] sm:$0xff] }
 0x3b7   : > { %v2765_v57 = vadd.f32 %v2733_v26, %v2667_v25  ;;  %v2960_v52 = vadd.f32 %v2928_v51, %v2862_v63  ;;  %v2570_v3 = vadd.f32 %v10202_v30, %v2472_v43  ;;  %v3253_v7 = vadd.f32 %v3221_v31, %v3155_v40  ;;  %v11505_v51 = vld [vmem:[#allocation47_spill] sm:$0xff]  ;;  %v3483_v31 = vld [vmem:[#allocation2 + $0x1ca] sm:$0xff] }
 0x3b8   : > { %v3350_v13 = vadd.f32 %v3318_v59, %v3252_v56  ;;  %v3416_v26 = vmul.f32 %v11495_v34, %v2406_v35  ;;  %v3545_v2 = vadd.f32 %v11505_v51, %v3447_v27  ;;  %v3516_v30 = vmul.f32 %v11496_v9, %v10205_v10  ;;  %v11507_v56 = vld [vmem:[#allocation191_spill] sm:$0xff]  ;;  %v3581_v43 = vld [vmem:[#allocation2 + $0x1cb] sm:$0xff]  ;;  %v5129_v51 = vld [vmem:[%s10456_s3 + $0x16] ss:$0 sm:$0xff] }
 0x3b9   : > { %v2863_v55 = vadd.f32 %v10194_v39, %v2765_v57  ;;  %v3058_v33 = vadd.f32 %v3026_v16, %v2960_v52  ;;  %v2668_v41 = vadd.f32 %v2636_v8, %v2570_v3  ;;  %v3351_v58 = vadd.f32 %v10264_v22, %v3253_v7  ;;  %v5128_v3 = vld [vmem:[%s10456_s3 + $0x15] ss:$0 sm:$0xff] }
 0x3ba   : > { %v3448_v18 = vadd.f32 %v3416_v26, %v3350_v13  ;;  %v3611_v16 = vmul.f32 %v11506_v48, %v2601_v37  ;;  %v3613_v54 = vmul.f32 %v11506_v48, %v10208_v42  ;;  %v3614_v63 = vmul.f32 %v11506_v48, %v10218_v0 }
 0x3bb   : > { %v2961_v21 = vadd.f32 %v10213_v60, %v2863_v55  ;;  %v3156_v49 = vadd.f32 %v3124_v50, %v3058_v33  ;;  %v2766_v45 = vadd.f32 %v2734_v53, %v2668_v41  ;;  %v3449_v25 = vadd.f32 %v3417_v28, %v3351_v58  ;;  %v3582_v41 = vld [vmem:[#allocation2 + $0x1d3] sm:$0xff] }
 0x3bc   : > { %v3546_v19 = vadd.f32 %v3514_v29, %v3448_v18  ;;  %v3612_v60 = vmul.f32 %v11506_v48, %v2602_v6  ;;  %v3643_v23 = vadd.f32 %v3611_v16, %v3545_v2  ;;  %v3710_v28 = vmul.f32 %v11507_v56, %v2700_v38  ;;  %v3680_v18 = vld [vmem:[#allocation2 + $0x1d4] sm:$0xff] }
 0x3bd   : > { %v3059_v35 = vadd.f32 %v10233_v5, %v2961_v21  ;;  %v3254_v34 = vadd.f32 %v3222_v11, %v3156_v49  ;;  %v2864_v8 = vadd.f32 %v10194_v39, %v2766_v45  ;;  %v3547_v42 = vadd.f32 %v3515_v12, %v3449_v25 }
 0x3be   : > { %v3644_v15 = vadd.f32 %v3612_v60, %v3546_v19  ;;  %v3709_v5 = vmul.f32 %v11507_v56, %v2699_v1  ;;  %v3711_v6 = vmul.f32 %v11507_v56, %v10228_v14  ;;  %v3517_v57 = vmul.f32 %v11496_v9, %v3483_v31  ;;  %v3386_v14 = vld [vmem:[#allocation2 + $0x1d1] sm:$0xff] }
 0x3bf   : > { %v3157_v10 = vadd.f32 %v10241_v17, %v3059_v35  ;;  %v3352_v37 = vadd.f32 %v10264_v22, %v3254_v34  ;;  %v2962_v29 = vadd.f32 %v10216_v20, %v2864_v8  ;;  %v3645_v17 = vadd.f32 %v3613_v54, %v3547_v42  ;;  %v3679_v20 = vld [vmem:[#allocation2 + $0x1cc] sm:$0xff] }
 0x3c0   : > { %v3712_v12 = vmul.f32 %v11507_v56, %v10230_v32  ;;  %v3741_v52 = vadd.f32 %v3709_v5, %v3643_v23  ;;  %v3742_v1 = vadd.f32 %v3710_v28, %v3644_v15  ;;  %v3420_v55 = vmul.f32 %v5128_v3, %v3386_v14 }
 0x3c1   : > { %v3255_v0 = vadd.f32 %v10255_v46, %v3157_v10  ;;  %v3450_v39 = vadd.f32 %v10269_v61, %v3352_v37  ;;  %v3060_v38 = vadd.f32 %v10237_v4, %v2962_v29  ;;  %v3743_v53 = vadd.f32 %v3711_v6, %v3645_v17  ;;  %v11508_v61 = vld [vmem:[#allocation197_spill] sm:$0xff] }
 0x3c2   : > { %v3615_v46 = vmul.f32 %v11506_v48, %v3581_v43  ;;  %v10334_v50 = vadd.f32 %v11508_v61, %v3741_v52  ;;  %v10337_v9 = vadd.f32 %v11508_v61, %v3742_v1  ;;  %v3713_v33 = vmul.f32 %v11507_v56, %v3679_v20 }
 0x3c3   : > { %v3353_v36 = vadd.f32 %v10264_v22, %v3255_v0  ;;  %v3548_v40 = vadd.f32 %v3516_v30, %v3450_v39  ;;  %v3158_v32 = vadd.f32 %v10249_v62, %v3060_v38  ;;  %v10342_v27 = vadd.f32 %v11508_v61, %v3743_v53 }
 0x3c4   : > { %v4645_v7 = vmul.f32 -1.442695, %v10334_v50  ;;  %v4646_v11 = vmul.f32 -1.442695, %v10337_v9  ;;  %v3518_v2 = vmul.f32 %v5129_v51, %v3484_v47  ;;  %v3616_v30 = vmul.f32 %v11506_v48, %v3582_v41 }
 0x3c5   : > { %v3451_v59 = vadd.f32 %v10272_v44, %v3353_v36  ;;  %v3646_v4 = vadd.f32 %v3614_v63, %v3548_v40  ;;  %v3256_v62 = vadd.f32 %v10259_v24, %v3158_v32  ;;  %v4647_v26 = vmul.f32 -1.442695, %v10342_v27 }
 0x3c6   : > { %4927 = vpow2.f32 %v4645_v7  ;;  %v3714_v35 = vmul.f32 %v11507_v56, %v3680_v18 }
 0x3c7   : > { %v3549_v13 = vadd.f32 %v3517_v57, %v3451_v59  ;;  %v3744_v44 = vadd.f32 %v3712_v12, %v3646_v4  ;;  %v3354_v21 = vadd.f32 %v10264_v22, %v3256_v62  ;;  %4929 = vpow2.f32 %v4646_v11 }
 0x3c8   : > { %4931 = vpow2.f32 %v4647_v26 }
 0x3c9   : > { %v3647_v49 = vadd.f32 %v3615_v46, %v3549_v13  ;;  %v10357_v58 = vadd.f32 %v11508_v61, %v3744_v44  ;;  %v3452_v24 = vadd.f32 %v3420_v55, %v3354_v21 }
 0x3cb   : > { %v3745_v16 = vadd.f32 %v3713_v33, %v3647_v49  ;;  %v4648_v54 = vmul.f32 -1.442695, %v10357_v58  ;;  %v3550_v45 = vadd.f32 %v3518_v2, %v3452_v24 }
 0x3cc   : > { %v4928_v22 = vpop.eup %4927 }
 0x3cd   : > { %v10363_v34 = vadd.f32 %v11508_v61, %v3745_v16  ;;  %4933 = vpow2.f32 %v4648_v54  ;;  %v4930_v25 = vpop.eup %4929  ;;  %v3648_v19 = vadd.f32 %v3616_v30, %v3550_v45  ;;  %v3905_v63 = vadd.f32 1.0, %v4928_v22 }
 0x3ce   : > { %v4932_v23 = vpop.eup %4931  ;;  %v10366_v8 = vadd.f32 1.0, %v4930_v25 }
 0x3cf   : > { %v4649_v60 = vmul.f32 -1.442695, %v10363_v34  ;;  %v3746_v48 = vadd.f32 %v3714_v35, %v3648_v19  ;;  %v10368_v10 = vadd.f32 1.0, %v4932_v23  ;;  %v4310_v56 = vand.u32 2147483647, %v3905_v63 }
 0x3d0   : > { %v4312_v5 = vand.u32 2147483648, %v3905_v63  ;;  %v4325_v28 = vand.u32 2147483647, %v10366_v8  ;;  %v4327_v6 = vand.u32 2147483648, %v10366_v8  ;;  %vm4306_vm7 = vweird.f32 %v3905_v63 }
 0x3d1   : > { %4935 = vpow2.f32 %v4649_v60  ;;  %v10371_v31 = vadd.f32 %v11508_v61, %v3746_v48  ;;  %v4340_v43 = vand.u32 2147483647, %v10368_v10  ;;  %vm10384_vm8 = vcmp.eq.f32.partialorder %v4310_v56, 8.507059e+37 }
 0x3d2   : > { %4937 = vrcp.f32 %v3905_v63  ;;  %v4313_v52 = vor.u32 1.1754944e-38, %v4312_v5  ;;  %vm4321_vm13 = vweird.f32 %v10366_v8  ;;  %vm10390_vm1 = vcmp.eq.f32.partialorder %v4325_v28, 8.507059e+37 }
 0x3d3   : > { %v4934_v37 = vpop.eup %4933  ;;  %4939 = vrcp.f32 %v10366_v8  ;;  %v4650_v15 = vmul.f32 -1.442695, %v10371_v31  ;;  %v4328_v14 = vor.u32 1.1754944e-38, %v4327_v6  ;;  %v4342_v40 = vand.u32 2147483648, %v10368_v10 }
 0x3d4   : > { %v10374_v42 = vadd.f32 1.0, %v4934_v37  ;;  %4941 = vrcp.f32 %v10368_v10  ;;  %vm4336_vm9 = vweird.f32 %v10368_v10  ;;  %vm10399_vm6 = vcmp.eq.f32.partialorder %v4340_v43, 8.507059e+37 }
 0x3d5   : > { %v4343_v62 = vor.u32 1.1754944e-38, %v4342_v40 }
 0x3d6   : > { %4943 = vrcp.f32 %v10374_v42  ;;  %vm4351_vm10 = vweird.f32 %v10374_v42  ;;  %v4355_v59 = vand.u32 2147483647, %v10374_v42  ;;  %v4357_v47 = vand.u32 2147483648, %v10374_v42 }
 0x3d7   : > { %v4936_v29 = vpop.eup %4935  ;;  %4945 = vpow2.f32 %v4650_v15 }
 0x3d8   : > { %v4938_v0 = vpop.eup %4937  ;;  %v10381_v39 = vadd.f32 1.0, %v4936_v29  ;;  %vm10409_vm3 = vcmp.eq.f32.partialorder %v4355_v59, 8.507059e+37  ;;  %v4358_v54 = vor.u32 1.1754944e-38, %v4357_v47 }
 0x3d9   : > { %v4940_v17 = vpop.eup %4939  ;;  %v4302_v57 = vmul.f32 %v4938_v0, %v3905_v63  ;;  %vm4307_vm12 = vweird.f32 %v4938_v0 }
 0x3da   : > { %v4942_v1 = vpop.eup %4941  ;;  %v4317_v38 = vmul.f32 %v4940_v17, %v10366_v8  ;;  %4947 = vrcp.f32 %v10381_v39  ;;  %vm4322_vm15 = vweird.f32 %v4940_v17  ;;  %vm4308_vm11 = vmor %vm4306_vm7, %vm4307_vm12  ;;  %v4370_v45 = vand.u32 2147483647, %v10381_v39 }
 0x3db   : > { %v4303_v20 = vsub.f32 1.0, %v4302_v57  ;;  %v4332_v53 = vmul.f32 %v4942_v1, %v10368_v10  ;;  %vm4337_vm2 = vweird.f32 %v4942_v1  ;;  %vm4323_vm0 = vmor %vm4321_vm13, %vm4322_vm15  ;;  %v4372_v63 = vand.u32 2147483648, %v10381_v39 }
 0x3dc   : > { %v4944_v46 = vpop.eup %4943  ;;  %v4318_v61 = vsub.f32 1.0, %v4317_v38  ;;  %vm4338_vm4 = vmor %vm4336_vm9, %vm4337_vm2 }
 0x3dd   : > { %v4946_v4 = vpop.eup %4945  ;;  %v4304_v3 = vmul.f32 %v4938_v0, %v4303_v20  ;;  %v4333_v55 = vsub.f32 1.0, %v4332_v53  ;;  %v4347_v33 = vmul.f32 %v4944_v46, %v10374_v42  ;;  %vm4352_vm14 = vweird.f32 %v4944_v46 }
 0x3de   : > { %v10406_v7 = vadd.f32 1.0, %v4946_v4  ;;  %v4319_v11 = vmul.f32 %v4940_v17, %v4318_v61  ;;  %vm4353_vm5 = vmor %vm4351_vm10, %vm4352_vm14 }
 0x3df   : > { %v4305_v13 = vadd.f32 %v4938_v0, %v4304_v3  ;;  %v4334_v44 = vmul.f32 %v4942_v1, %v4333_v55  ;;  %v4348_v26 = vsub.f32 1.0, %v4347_v33 }
 0x3e0   : > { %v4948_v51 = vpop.eup %4947  ;;  %v4320_v2 = vadd.f32 %v4940_v17, %v4319_v11  ;;  %4949 = vrcp.f32 %v10406_v7  ;;  %v4387_v29 = vand.u32 2147483648, %v10406_v7  ;;  %vm4381_vm10 = vweird.f32 %v10406_v7 }
 0x3e1   : > { %v4309_v21 = vsel %vm4308_vm11, %v4938_v0, %v4305_v13  ;;  %v4335_v49 = vadd.f32 %v4942_v1, %v4334_v44  ;;  %v4349_v18 = vmul.f32 %v4944_v46, %v4348_v26  ;;  %v4362_v24 = vmul.f32 %v4948_v51, %v10381_v39 }
 0x3e2   : > { %v4314_v30 = vsel %vm10384_vm8, %v4313_v52, %v4309_v21  ;;  %v4324_v16 = vsel %vm4323_vm0, %v4940_v17, %v4320_v2  ;;  %vm4367_vm7 = vweird.f32 %v4948_v51  ;;  %vm4366_vm8 = vweird.f32 %v10381_v39 }
 0x3e3   : > { %v4329_v35 = vsel %vm10390_vm1, %v4328_v14, %v4324_v16  ;;  %v4339_v22 = vsel %vm4338_vm4, %v4942_v1, %v4335_v49  ;;  %v4350_v25 = vadd.f32 %v4944_v46, %v4349_v18  ;;  %v4363_v19 = vsub.f32 1.0, %v4362_v24  ;;  %vm4368_vm13 = vmor %vm4366_vm8, %vm4367_vm7 }
 0x3e4   : > { %v4344_v60 = vsel %vm10399_vm6, %v4343_v62, %v4339_v22  ;;  %v4417_v23 = vmul.f32 %v4314_v30, %v10334_v50  ;;  %v4418_v8 = vmul.f32 %v4329_v35, %v10337_v9  ;;  %v4373_v9 = vor.u32 1.1754944e-38, %v4372_v63 }
 0x3e5   : > { %v4354_v48 = vsel %vm4353_vm5, %v4944_v46, %v4350_v25  ;;  %v4364_v10 = vmul.f32 %v4948_v51, %v4363_v19  ;;  %v4419_v37 = vmul.f32 %v4344_v60, %v10342_v27  ;;  %vm4371_vm1 = vcmp.eq.f32.partialorder %v4370_v45, 8.507059e+37 }
 0x3e6   : > { %v4950_v15 = vpop.eup %4949  ;;  %v4359_v56 = vsel %vm10409_vm3, %v4358_v54, %v4354_v48  ;;  %4449 = vst [vmem:[%s7473_s22 + $0xd0] sm:$0xff] %v4417_v23  ;;  %v4385_v39 = vand.u32 2147483647, %v10406_v7  ;;  %v4388_v17 = vor.u32 1.1754944e-38, %v4387_v29 }
 0x3e7   : > { %v4365_v42 = vadd.f32 %v4948_v51, %v4364_v10  ;;  %v4377_v5 = vmul.f32 %v4950_v15, %v10406_v7  ;;  %v4420_v50 = vmul.f32 %v4359_v56, %v10357_v58  ;;  %4450 = vst [vmem:[%s7473_s22 + $0xd8] sm:$0xff] %v4418_v8  ;;  %vm4382_vm9 = vweird.f32 %v4950_v15 }
 0x3e8   : > { %4451 = vst [vmem:[%s7473_s22 + $0xe0] sm:$0xff] %v4419_v37  ;;  %vm4383_vm6 = vmor %vm4381_vm10, %vm4382_vm9  ;;  %vm4386_vm12 = vcmp.eq.f32.partialorder %v4385_v39, 8.507059e+37 }
 0x3e9   : > { %v4369_v28 = vsel %vm4368_vm13, %v4948_v51, %v4365_v42  ;;  %v4378_v27 = vsub.f32 1.0, %v4377_v5  ;;  %4452 = vst [vmem:[%s7473_s22 + $0xe8] sm:$0xff] %v4420_v50 }
 0x3ea   : > { %v4374_v6 = vsel %vm4371_vm1, %v4373_v9, %v4369_v28 }
 0x3eb   : > { %v4379_v0 = vmul.f32 %v4950_v15, %v4378_v27  ;;  %v4421_v43 = vmul.f32 %v4374_v6, %v10363_v34 }
 0x3ed   : > { %v4380_v58 = vadd.f32 %v4950_v15, %v4379_v0  ;;  %4453 = vst [vmem:[%s7473_s22 + $0xf0] sm:$0xff] %v4421_v43 }
 0x3ef   : > { %v4384_v57 = vsel %vm4383_vm6, %v4950_v15, %v4380_v58 }
 0x3f0   : > { %v4389_v12 = vsel %vm4386_vm12, %v4388_v17, %v4384_v57 }
 0x3f1   : > { %v4422_v52 = vmul.f32 %v4389_v12, %v10371_v31 }
 0x3f3   : > { %4454 = vst [vmem:[%s7473_s22 + $0xf8] sm:$0xff] %v4422_v52 }
 0x3f4 PF: > { %s17_s21 = sadd.s32 1, %s5136_s21  }
 0x3f5   : > { %p14_p4 = scmp.ge.s32.totalorder %s17_s21, 4  }
 0x3f7   :  { %16 = sbr.rel (!%p14_p4) target bundleno = 1 (0x1), region = 99 }

</bundles_post_ra>
